<compile_context>
chip_gen: v5e
topology: v5e:2x2
jax: 0.10.0
libtpu: 0.0.40
codegen_flags: <defaults>
</compile_context>

<pallas_src>
import jax
import jax.numpy as jnp
from jax.experimental import pallas as pl
from jax.experimental.pallas import tpu as pltpu

NEG_INF = -1e30  # additive mask value for non-edges / cross-graph pairs


# ----------------------------------------------------------------------------
# Fused Pallas kernel: full GAT forward for the whole (flattened) batch.
# ----------------------------------------------------------------------------
def gat_fused_kernel(x_ref, mask_ref, w1_ref, attbd_ref, rep_ref, w2_ref,
                     pvec_ref, out_ref):
    # x_ref    : [B*N, Fin]            node features, batch flattened (bf16)
    # mask_ref : [B*N, B*N]            additive mask: 0 for edge j->i within a graph
    #                                  (self loops included), -1e30 otherwise (f32)
    # w1_ref   : [Fin, 2*H*C1]         conv1 [lin_l | lin_r], head-major columns (bf16)
    # attbd_ref: [H*C1, H]             conv1 attention vectors, block-diagonal (f32)
    # rep_ref  : [H, H*C1]             0/1 head->channel replication matrix (bf16)
    # w2_ref   : [H*C1, 2*C2]          conv2 [lin_l | lin_r] (bf16)
    # pvec_ref : [1, 3*H*C1 + 4*C2]    packed: bl1|br1 | b1 | bl2|br2 | att2 | b2 (f32)
    # out_ref  : [B, C2]               node-0 embedding per graph
    f32, bf16 = jnp.float32, jnp.bfloat16
    BN = x_ref.shape[0]
    HC1, H = attbd_ref.shape
    B, C2 = out_ref.shape
    N = BN // B

    pv = pvec_ref[...]
    bias1 = pv[:, :2 * HC1]                                # conv1 lin_l|lin_r biases
    b1 = pv[:, 2 * HC1:3 * HC1]                            # conv1 output bias
    bias2 = pv[:, 3 * HC1:3 * HC1 + 2 * C2]                # conv2 lin_l|lin_r biases
    att2 = pv[:, 3 * HC1 + 2 * C2:3 * HC1 + 3 * C2]        # conv2 attention vector
    b2 = pv[:, 3 * HC1 + 3 * C2:3 * HC1 + 4 * C2]          # conv2 output bias
    mask = mask_ref[...]                                   # [BN, BN]

    # --- conv1: lin_l | lin_r fused into a single bf16 MXU matmul (f32 acc). ---
    xproj = jnp.dot(x_ref[...], w1_ref[...], preferred_element_type=f32) + bias1
    xl1 = xproj[:, :HC1]                                   # source side (lin_l, x_j)
    xr1 = xproj[:, HC1:]                                   # target side (lin_r, x_i)

    # --- GATv2 scores, all H heads at once:
    #     e[i, j, h] = att1[h] . leaky_relu(xl1[j, hC1:] + xr1[i, hC1:], 0.2)
    s = xl1[None, :, :] + xr1[:, None, :]                  # [BN_i, BN_j, H*C1]
    s = jnp.maximum(s, 0.2 * s)                            # leaky_relu, no select
    e = jnp.dot(s.reshape(BN * BN, HC1), attbd_ref[...],   # block-diag attention
                preferred_element_type=f32).reshape(BN, BN, H)
    e = e + mask[:, :, None]                               # mask non-edges / cross-graph

    # softmax over incoming neighbors j (self loops keep every row finite)
    e = e - jnp.max(e, axis=1, keepdims=True)
    p = jnp.exp(e)
    alpha = p * pl.reciprocal(jnp.sum(p, axis=1, keepdims=True), approx=True)

    # --- aggregation: hidden[i, h*C1+c] = sum_j alpha[i,j,h] * xl1[j, h*C1+c].
    # alpha is replicated across each head's C1 channels with one tiny 0/1 matmul
    # (avoids per-head lane slicing and H separate MXU launches).
    a_rep = jnp.dot(alpha.reshape(BN * BN, H).astype(bf16), rep_ref[...],
                    preferred_element_type=f32).reshape(BN, BN, HC1)
    hidden = jnp.sum(a_rep * xl1[None, :, :], axis=1) + b1  # [BN, H*C1]
    # ELU; exp(x)-1 (not expm1) keeps guaranteed Mosaic lowering, delta ~1e-7.
    act = jnp.where(hidden > 0, hidden, jnp.exp(hidden) - 1.0)

    # --- conv2: lin_l | lin_r fused into a single bf16 matmul. ---
    z = jnp.dot(act.astype(bf16), w2_ref[...], preferred_element_type=f32) + bias2
    xl2 = z[:, :C2]                                        # [BN, C2]  every source j
    xr2_0 = z.reshape(B, N, 2 * C2)[:, 0, C2:]             # [B, C2]   target node 0 only
    mask0 = mask.reshape(B, N, BN)[:, 0, :]                # [B, BN]   mask rows of node 0

    # conv2 attention + aggregation for target node 0 of each graph only.
    s2 = xl2[None, :, :] + xr2_0[:, None, :]               # [B, BN_j, C2]
    s2 = jnp.maximum(s2, 0.2 * s2)
    e2 = jnp.sum(s2 * att2[None, :, :], axis=-1) + mask0   # [B, BN_j]
    e2 = e2 - jnp.max(e2, axis=-1, keepdims=True)
    p2 = jnp.exp(e2)
    alpha2 = p2 * pl.reciprocal(jnp.sum(p2, axis=-1, keepdims=True), approx=True)

    out = jnp.dot(alpha2.astype(bf16), xl2.astype(bf16),
                  preferred_element_type=f32) + b2          # [B, C2]
    out_ref[...] = out.astype(out_ref.dtype)


# ----------------------------------------------------------------------------
# Wrapper: parameter re-layout / packing + single grid-less pallas_call.
# ----------------------------------------------------------------------------
def gat_forward(x, adj, params):
    """Inference-mode GAT forward; returns node-0 embeddings [B, out_channels]."""
    B, N, Fin = x.shape
    H, _, C1 = params["w1_l"].shape
    HC1 = H * C1
    C2 = params["w2_l"].shape[-1]
    BN = B * N
    f32, bf16 = jnp.float32, jnp.bfloat16

    # conv1 [lin_l | lin_r] folded head-major: column h*C1 + c <-> (head h, channel c)
    w1l = params["w1_l"].transpose(1, 0, 2).reshape(Fin, HC1)
    w1r = params["w1_r"].transpose(1, 0, 2).reshape(Fin, HC1)
    w1cat = jnp.concatenate([w1l, w1r], axis=1).astype(bf16)          # [Fin, 2*H*C1]

    # conv2 [lin_l | lin_r]
    w2cat = jnp.concatenate([params["w2_l"][0], params["w2_r"][0]],
                            axis=1).astype(bf16)                      # [H*C1, 2*C2]

    # Block-diagonal conv1 attention: attbd[h*C1+c, g] = att1[h, c] * (g == h).
    att1 = params["att1"].astype(f32)                                 # [H, C1]
    attbd = (jnp.eye(H, dtype=f32)[:, None, :] * att1[:, :, None]).reshape(HC1, H)

    # Head -> per-channel replication matrix: rep[h, g*C1+c] = (g == h).
    rep = (jnp.eye(H, dtype=f32)[:, :, None]
           * jnp.ones((H, 1, C1), f32)).reshape(H, HC1).astype(bf16)  # [H, H*C1]

    # All small bias / attention parameters packed into one lane vector.
    pvec = jnp.concatenate([
        params["b1_ll"].reshape(HC1), params["b1_lr"].reshape(HC1),   # conv1 lin biases
        params["b1"].reshape(HC1),                                    # conv1 out bias
        params["b2_ll"].reshape(C2), params["b2_lr"].reshape(C2),     # conv2 lin biases
        params["att2"].reshape(C2),                                   # conv2 attention
        params["b2"].reshape(C2),                                     # conv2 out bias
    ]).astype(f32).reshape(1, 3 * HC1 + 4 * C2)

    # Block-diagonal additive softmax mask over the flattened batch:
    #   0 for edge j->i within the same graph (self loops included), -1e30 otherwise.
    mask1 = jnp.where(adj > 0, 0.0, NEG_INF).astype(f32)              # [N, N]
    same_graph = jnp.eye(B, dtype=f32)[:, None, :, None]              # [B,1,B,1]
    bigmask = jnp.where(same_graph > 0, mask1[None, :, None, :],
                        NEG_INF).reshape(BN, BN).astype(f32)

    x2d = x.reshape(BN, Fin).astype(bf16)

    vmem = pl.BlockSpec(memory_space=pltpu.MemorySpace.VMEM)
    out = pl.pallas_call(
        gat_fused_kernel,
        out_shape=jax.ShapeDtypeStruct((B, C2), f32),
        in_specs=[vmem] * 7,       # whole (tiny) arrays resident in VMEM, no grid
        out_specs=vmem,
    )(x2d, bigmask, w1cat, attbd, rep, w2cat, pvec)
    return out                                                        # [B, C2]


# ----------------------------------------------------------------------------
# Pure-JAX reference (same math, no Pallas) for a correctness check.
# ----------------------------------------------------------------------------
def gatv2_layer_ref(x, wl, wr, bl, br, att, bias, adj, *, concat):
    xl = jnp.einsum("bnf,hfc->bhnc", x, wl) + bl[None, :, None, :]
    xr = jnp.einsum("bnf,hfc->bhnc", x, wr) + br[None, :, None, :]
    s = xl[:, :, None, :, :] + xr[:, :, :, None, :]   # [B,H,i,j,C]
    s = jnp.where(s > 0, s, 0.2 * s)
    e = jnp.einsum("bhijc,hc->bhij", s, att)
    e = jnp.where(adj[None, None] > 0, e, NEG_INF)
    alpha = jax.nn.softmax(e, axis=-1)
    out = jnp.einsum("bhij,bhjc->bhic", alpha, xl)    # [B,H,N,C]
    out = jnp.transpose(out, (0, 2, 1, 3))
    B, N, H, C = out.shape
    out = out.reshape(B, N, H * C) if concat else out.mean(axis=2)
    return out + bias


def gat_forward_ref(x, adj, params):
    h = gatv2_layer_ref(x, params["w1_l"], params["w1_r"], params["b1_ll"],
                        params["b1_lr"], params["att1"], params["b1"], adj,
                        concat=True)
    h = jnp.where(h > 0, h, jnp.expm1(h))             # F.elu
    h = gatv2_layer_ref(h, params["w2_l"], params["w2_r"], params["b2_ll"],
                        params["b2_lr"], params["att2"], params["b2"], adj,
                        concat=False)
    return h[:, 0, :]


# ----------------------------------------------------------------------------
# Deterministic parameter init + example inputs.
# ----------------------------------------------------------------------------
def glorot(key, shape):
    fan_in, fan_out = shape[-2], shape[-1]
    lim = jnp.sqrt(6.0 / (fan_in + fan_out))
    return jax.random.uniform(key, shape, jnp.float32, -lim, lim)


if __name__ == "__main__":
    B, N, E = 2, 16, 48                    # batch of graphs, nodes, edges
    in_channels, hidden_channels, out_channels, heads = 8, 8, 8, 4

    key = jax.random.PRNGKey(0)
    keys = jax.random.split(key, 16)

    # Node features [B, N, in_channels]
    x = jax.random.normal(keys[0], (B, N, in_channels), jnp.float32)

    # Deterministic random edge_index [2, E]; shared across the batch.
    src = jax.random.randint(keys[1], (E,), 0, N)
    dst = jax.random.randint(keys[2], (E,), 0, N)
    adj = jnp.zeros((N, N), jnp.float32).at[dst, src].set(1.0)
    adj = jnp.maximum(adj, jnp.eye(N, dtype=jnp.float32))      # add self loops

    # conv1: GATv2Conv(in_channels, hidden_channels, heads=heads, concat=True)
    # conv2: GATv2Conv(hidden_channels*heads, out_channels, heads=1, concat=False)
    params = {
        "w1_l": glorot(keys[3], (heads, in_channels, hidden_channels)),
        "w1_r": glorot(keys[4], (heads, in_channels, hidden_channels)),
        "att1": glorot(keys[5], (heads, hidden_channels)),
        "b1_ll": 0.1 * jax.random.normal(keys[9], (heads, hidden_channels), jnp.float32),
        "b1_lr": 0.1 * jax.random.normal(keys[10], (heads, hidden_channels), jnp.float32),
        "b1": 0.1 * jax.random.normal(keys[11], (heads * hidden_channels,), jnp.float32),
        "w2_l": glorot(keys[6], (1, hidden_channels * heads, out_channels)),
        "w2_r": glorot(keys[7], (1, hidden_channels * heads, out_channels)),
        "att2": glorot(keys[8], (1, out_channels)),
        "b2_ll": 0.1 * jax.random.normal(keys[12], (1, out_channels), jnp.float32),
        "b2_lr": 0.1 * jax.random.normal(keys[13], (1, out_channels), jnp.float32),
        "b2": 0.1 * jax.random.normal(keys[14], (out_channels,), jnp.float32),
    }

    out = jax.block_until_ready(gat_forward(x, adj, params))
    ref = jax.block_until_ready(gat_forward_ref(x, adj, params))

    assert out.shape == (B, out_channels), out.shape
    # Tolerance accounts for bf16 MXU operands (f32 accumulation) on the
    # projection / aggregation / output matmuls plus approx-reciprocal softmax
    # normalization; the f32 reference is exact.
    err = jnp.max(jnp.abs(out - ref))
    assert jnp.allclose(out, ref, rtol=5e-2, atol=5e-2), (err, out, ref)
    print("KERNEL_OK")
</pallas_src>

<mosaic_0001>
module attributes {stable_mosaic.version = 11 : i64} {
  func.func @gat_fused_kernel(%arg0: memref<32x8xbf16, #tpu.memory_space<vmem>>, %arg1: memref<32x32xf32, #tpu.memory_space<vmem>>, %arg2: memref<8x64xbf16, #tpu.memory_space<vmem>>, %arg3: memref<32x4xf32, #tpu.memory_space<vmem>>, %arg4: memref<4x32xbf16, #tpu.memory_space<vmem>>, %arg5: memref<32x16xbf16, #tpu.memory_space<vmem>>, %arg6: memref<1x128xf32, #tpu.memory_space<vmem>>, %arg7: memref<2x8xf32, #tpu.memory_space<vmem>>) attributes {dimension_semantics = [], scalar_prefetch = 0 : i64, scratch_operands = 0 : i64, tpu.core_type = #tpu.core_type<tc>} {
    %c0 = arith.constant 0 : index
    %c0_0 = arith.constant 0 : index
    %0 = vector.load %arg6[%c0, %c0_0] : memref<1x128xf32, #tpu.memory_space<vmem>>, vector<1x128xf32>
    %1 = vector.extract_strided_slice %0 {offsets = [0, 0], sizes = [1, 64], strides = [1, 1]} : vector<1x128xf32> to vector<1x64xf32>
    %2 = vector.extract_strided_slice %0 {offsets = [0, 64], sizes = [1, 32], strides = [1, 1]} : vector<1x128xf32> to vector<1x32xf32>
    %3 = vector.extract_strided_slice %0 {offsets = [0, 96], sizes = [1, 16], strides = [1, 1]} : vector<1x128xf32> to vector<1x16xf32>
    %4 = vector.extract_strided_slice %0 {offsets = [0, 112], sizes = [1, 8], strides = [1, 1]} : vector<1x128xf32> to vector<1x8xf32>
    %5 = vector.extract_strided_slice %0 {offsets = [0, 120], sizes = [1, 8], strides = [1, 1]} : vector<1x128xf32> to vector<1x8xf32>
    %c0_1 = arith.constant 0 : index
    %c0_2 = arith.constant 0 : index
    %6 = vector.load %arg1[%c0_1, %c0_2] : memref<32x32xf32, #tpu.memory_space<vmem>>, vector<32x32xf32>
    %c0_3 = arith.constant 0 : index
    %c0_4 = arith.constant 0 : index
    %7 = vector.load %arg0[%c0_3, %c0_4] : memref<32x8xbf16, #tpu.memory_space<vmem>>, vector<32x8xbf16>
    %c0_5 = arith.constant 0 : index
    %c0_6 = arith.constant 0 : index
    %8 = vector.load %arg2[%c0_5, %c0_6] : memref<8x64xbf16, #tpu.memory_space<vmem>>, vector<8x64xbf16>
    %cst = arith.constant dense<0.000000e+00> : vector<32x64xf32>
    %9 = tpu.matmul %7, %8, %cst {dimension_numbers = #tpu.dot_dimension_numbers<[1], [0], [0], [1], [0, 0, 1, 1], [], []>} : vector<32x8xbf16>, vector<8x64xbf16>, vector<32x64xf32> -> vector<32x64xf32>
    %10 = vector.broadcast %1 : vector<1x64xf32> to vector<32x64xf32>
    %11 = arith.addf %9, %10 : vector<32x64xf32>
    %12 = vector.extract_strided_slice %11 {offsets = [0, 0], sizes = [32, 32], strides = [1, 1]} : vector<32x64xf32> to vector<32x32xf32>
    %13 = vector.extract_strided_slice %11 {offsets = [0, 32], sizes = [32, 32], strides = [1, 1]} : vector<32x64xf32> to vector<32x32xf32>
    %14 = vector.shape_cast %12 : vector<32x32xf32> to vector<1x32x32xf32>
    %15 = vector.shape_cast %13 : vector<32x32xf32> to vector<32x1x32xf32>
    %16 = vector.broadcast %14 : vector<1x32x32xf32> to vector<32x32x32xf32>
    %17 = vector.broadcast %15 : vector<32x1x32xf32> to vector<32x32x32xf32>
    %18 = arith.addf %16, %17 : vector<32x32x32xf32>
    %cst_7 = arith.constant 2.000000e-01 : f32
    %19 = vector.broadcast %cst_7 : f32 to vector<32x32x32xf32>
    %20 = arith.mulf %19, %18 : vector<32x32x32xf32>
    %21 = arith.maximumf %18, %20 : vector<32x32x32xf32>
    %22 = vector.shape_cast %21 : vector<32x32x32xf32> to vector<1024x32xf32>
    %c0_8 = arith.constant 0 : index
    %c0_9 = arith.constant 0 : index
    %23 = vector.load %arg3[%c0_8, %c0_9] : memref<32x4xf32, #tpu.memory_space<vmem>>, vector<32x4xf32>
    %cst_10 = arith.constant dense<0.000000e+00> : vector<1024x4xf32>
    %24 = tpu.matmul %22, %23, %cst_10 {dimension_numbers = #tpu.dot_dimension_numbers<[1], [0], [0], [1], [0, 0, 1, 1], [], []>} : vector<1024x32xf32>, vector<32x4xf32>, vector<1024x4xf32> -> vector<1024x4xf32>
    %25 = vector.shape_cast %24 : vector<1024x4xf32> to vector<32x32x4xf32>
    %26 = vector.shape_cast %6 : vector<32x32xf32> to vector<32x32x1xf32>
    %27 = vector.broadcast %26 : vector<32x32x1xf32> to vector<32x32x4xf32>
    %28 = arith.addf %25, %27 : vector<32x32x4xf32>
    %cst_11 = arith.constant dense<0xFF800000> : vector<32x4xf32>
    %29 = vector.multi_reduction <maximumf>, %28, %cst_11 [1] : vector<32x32x4xf32> to vector<32x4xf32>
    %30 = vector.shape_cast %29 : vector<32x4xf32> to vector<32x1x4xf32>
    %31 = vector.broadcast %30 : vector<32x1x4xf32> to vector<32x32x4xf32>
    %32 = arith.subf %28, %31 : vector<32x32x4xf32>
    %33 = math.exp %32 : vector<32x32x4xf32>
    %cst_12 = arith.constant dense<0.000000e+00> : vector<32x4xf32>
    %34 = vector.multi_reduction <add>, %33, %cst_12 [1] : vector<32x32x4xf32> to vector<32x4xf32>
    %35 = vector.shape_cast %34 : vector<32x4xf32> to vector<32x1x4xf32>
    %36 = tpu.reciprocal %35 {approx = true} : vector<32x1x4xf32> -> vector<32x1x4xf32>
    %37 = vector.broadcast %36 : vector<32x1x4xf32> to vector<32x32x4xf32>
    %38 = arith.mulf %33, %37 : vector<32x32x4xf32>
    %39 = vector.shape_cast %38 : vector<32x32x4xf32> to vector<1024x4xf32>
    %40 = arith.truncf %39 : vector<1024x4xf32> to vector<1024x4xbf16>
    %c0_13 = arith.constant 0 : index
    %c0_14 = arith.constant 0 : index
    %41 = vector.load %arg4[%c0_13, %c0_14] : memref<4x32xbf16, #tpu.memory_space<vmem>>, vector<4x32xbf16>
    %cst_15 = arith.constant dense<0.000000e+00> : vector<1024x32xf32>
    %42 = tpu.matmul %40, %41, %cst_15 {dimension_numbers = #tpu.dot_dimension_numbers<[1], [0], [0], [1], [0, 0, 1, 1], [], []>} : vector<1024x4xbf16>, vector<4x32xbf16>, vector<1024x32xf32> -> vector<1024x32xf32>
    %43 = vector.shape_cast %42 : vector<1024x32xf32> to vector<32x32x32xf32>
    %44 = vector.shape_cast %12 : vector<32x32xf32> to vector<1x32x32xf32>
    %45 = vector.broadcast %44 : vector<1x32x32xf32> to vector<32x32x32xf32>
    %46 = arith.mulf %43, %45 : vector<32x32x32xf32>
    %cst_16 = arith.constant dense<0.000000e+00> : vector<32x32xf32>
    %47 = vector.multi_reduction <add>, %46, %cst_16 [1] : vector<32x32x32xf32> to vector<32x32xf32>
    %48 = vector.broadcast %2 : vector<1x32xf32> to vector<32x32xf32>
    %49 = arith.addf %47, %48 : vector<32x32xf32>
    %cst_17 = arith.constant 0.000000e+00 : f32
    %50 = vector.broadcast %cst_17 : f32 to vector<32x32xf32>
    %51 = arith.cmpf ogt, %49, %50 : vector<32x32xf32>
    %52 = math.exp %49 : vector<32x32xf32>
    %cst_18 = arith.constant 1.000000e+00 : f32
    %53 = vector.broadcast %cst_18 : f32 to vector<32x32xf32>
    %54 = arith.subf %52, %53 : vector<32x32xf32>
    %55 = arith.select %51, %49, %54 : vector<32x32xi1>, vector<32x32xf32>
    %56 = arith.truncf %55 : vector<32x32xf32> to vector<32x32xbf16>
    %c0_19 = arith.constant 0 : index
    %c0_20 = arith.constant 0 : index
    %57 = vector.load %arg5[%c0_19, %c0_20] : memref<32x16xbf16, #tpu.memory_space<vmem>>, vector<32x16xbf16>
    %cst_21 = arith.constant dense<0.000000e+00> : vector<32x16xf32>
    %58 = tpu.matmul %56, %57, %cst_21 {dimension_numbers = #tpu.dot_dimension_numbers<[1], [0], [0], [1], [0, 0, 1, 1], [], []>} : vector<32x32xbf16>, vector<32x16xbf16>, vector<32x16xf32> -> vector<32x16xf32>
    %59 = vector.broadcast %3 : vector<1x16xf32> to vector<32x16xf32>
    %60 = arith.addf %58, %59 : vector<32x16xf32>
    %61 = vector.extract_strided_slice %60 {offsets = [0, 0], sizes = [32, 8], strides = [1, 1]} : vector<32x16xf32> to vector<32x8xf32>
    %62 = vector.shape_cast %60 : vector<32x16xf32> to vector<2x16x16xf32>
    %63 = vector.extract_strided_slice %62 {offsets = [0, 0, 8], sizes = [2, 1, 8], strides = [1, 1, 1]} : vector<2x16x16xf32> to vector<2x1x8xf32>
    %64 = vector.shape_cast %63 : vector<2x1x8xf32> to vector<2x8xf32>
    %65 = vector.shape_cast %6 : vector<32x32xf32> to vector<2x16x32xf32>
    %66 = vector.extract_strided_slice %65 {offsets = [0, 0, 0], sizes = [2, 1, 32], strides = [1, 1, 1]} : vector<2x16x32xf32> to vector<2x1x32xf32>
    %67 = vector.shape_cast %66 : vector<2x1x32xf32> to vector<2x32xf32>
    %68 = vector.shape_cast %61 : vector<32x8xf32> to vector<1x32x8xf32>
    %69 = vector.shape_cast %64 : vector<2x8xf32> to vector<2x1x8xf32>
    %70 = vector.broadcast %68 : vector<1x32x8xf32> to vector<2x32x8xf32>
    %71 = vector.broadcast %69 : vector<2x1x8xf32> to vector<2x32x8xf32>
    %72 = arith.addf %70, %71 : vector<2x32x8xf32>
    %cst_22 = arith.constant 2.000000e-01 : f32
    %73 = vector.broadcast %cst_22 : f32 to vector<2x32x8xf32>
    %74 = arith.mulf %73, %72 : vector<2x32x8xf32>
    %75 = arith.maximumf %72, %74 : vector<2x32x8xf32>
    %76 = vector.shape_cast %4 : vector<1x8xf32> to vector<1x1x8xf32>
    %77 = vector.broadcast %76 : vector<1x1x8xf32> to vector<2x32x8xf32>
    %78 = arith.mulf %75, %77 : vector<2x32x8xf32>
    %cst_23 = arith.constant dense<0.000000e+00> : vector<2x32xf32>
    %79 = vector.multi_reduction <add>, %78, %cst_23 [2] : vector<2x32x8xf32> to vector<2x32xf32>
    %80 = arith.addf %79, %67 : vector<2x32xf32>
    %cst_24 = arith.constant dense<0xFF800000> : vector<2xf32>
    %81 = vector.multi_reduction <maximumf>, %80, %cst_24 [1] : vector<2x32xf32> to vector<2xf32>
    %82 = vector.shape_cast %81 : vector<2xf32> to vector<2x1xf32>
    %83 = vector.broadcast %82 : vector<2x1xf32> to vector<2x32xf32>
    %84 = arith.subf %80, %83 : vector<2x32xf32>
    %85 = math.exp %84 : vector<2x32xf32>
    %cst_25 = arith.constant dense<0.000000e+00> : vector<2xf32>
    %86 = vector.multi_reduction <add>, %85, %cst_25 [1] : vector<2x32xf32> to vector<2xf32>
    %87 = vector.shape_cast %86 : vector<2xf32> to vector<2x1xf32>
    %88 = tpu.reciprocal %87 {approx = true} : vector<2x1xf32> -> vector<2x1xf32>
    %89 = vector.broadcast %88 : vector<2x1xf32> to vector<2x32xf32>
    %90 = arith.mulf %85, %89 : vector<2x32xf32>
    %91 = arith.truncf %90 : vector<2x32xf32> to vector<2x32xbf16>
    %92 = arith.truncf %61 : vector<32x8xf32> to vector<32x8xbf16>
    %cst_26 = arith.constant dense<0.000000e+00> : vector<2x8xf32>
    %93 = tpu.matmul %91, %92, %cst_26 {dimension_numbers = #tpu.dot_dimension_numbers<[1], [0], [0], [1], [0, 0, 1, 1], [], []>} : vector<2x32xbf16>, vector<32x8xbf16>, vector<2x8xf32> -> vector<2x8xf32>
    %94 = vector.broadcast %5 : vector<1x8xf32> to vector<2x8xf32>
    %95 = arith.addf %93, %94 : vector<2x8xf32>
    %c0_27 = arith.constant 0 : index
    %c0_28 = arith.constant 0 : index
    %96 = vector.load %arg7[%c0_27, %c0_28] : memref<2x8xf32, #tpu.memory_space<vmem>>, vector<2x8xf32>
    tpu.vector_store %arg7[%c0_27, %c0_28], %95 {strides = array<i32>} : memref<2x8xf32, #tpu.memory_space<vmem>>, vector<2x8xf32>,
    return
  }
}

</mosaic_0001>

<bundles_post_ra>
// kernel: tpu_custom_call.1
= control target key start
LH: loop header
LB: loop body
LE: loop exit
PB: predicated region body
PF: predicated region fallthrough
CT: control target
= control target key end

     0   :  { %vm58_vm0 = vcmask 1043456   ;;  %vm51_vm1 = vcmask 64512   ;;  %s10094_s0 = inlined_call_operand.vmem [shape: bf16[32,8], index: 0, kind: input, shape index: {}]   ;;  %s10095_s1 = inlined_call_operand.vmem [shape: f32[32,32], index: 1, kind: input, shape index: {}]   ;;  %s10096_s2 = inlined_call_operand.vmem [shape: bf16[8,64], index: 2, kind: input, shape index: {}]   ;;  %s10097_s3 = inlined_call_operand.vmem [shape: f32[32,4], index: 3, kind: input, shape index: {}]   ;;  %s10098_s4 = inlined_call_operand.vmem [shape: bf16[4,32], index: 4, kind: input, shape index: {}]   ;;  %s10099_s5 = inlined_call_operand.vmem [shape: bf16[32,16], index: 5, kind: input, shape index: {}]   ;;  %s10100_s6 = inlined_call_operand.vmem [shape: f32[1,128], index: 6, kind: input, shape index: {}]   ;;  %s10101_s7 = inlined_call_operand.hbm [shape: f32[2,8], index: 7, kind: output, shape index: {}]  }
   0x1   :  { %v37_v0 = vld [vmem:[%s10096_s2] sm:$0xf] }
   0x2   :  { %v60_v1 = vsel %vm58_vm0, %v37_v0, 0  ;;  %v5885_v2 = vld [vmem:[%s10094_s0] sm:$0xff] }
   0x3   :  { %69 = vmatpush.bf16.msra.mxu0 %v60_v1 }
   0x4   :  { %12 = vsyncpa [#allocation3], 0  ;;  %v5886_v3 = vld [vmem:[%s10094_s0 + $0x8] sm:$0xff]  ;;  %v6519_v4 = vld [vmem:[%s10100_s6] ss:$0 sm:$0xff]  ;;  %s6457_s2 = smov 96   ;;  %v10102_v18 = vlaneseq }
   0x5   :  { %v6583_v50 = vld [vmem:[%s10095_s1 + $0x8] sm:$0xff]  ;;  %v6595_v57 = vld [vmem:[%s10095_s1 + $0x10] sm:$0xff]  ;;  %v6611_v61 = vld [vmem:[%s10095_s1] sm:$0xff]  ;;  %vm629_vm2 = vcmask 261120   ;;  %vm2343_vm3 = vcmask 31744   ;;  %vm3977_vm4 = vcmask 1041408  }
   0x6   :  { %5648 = vmatmul.msk.bf16.vlgmr.msra.gmra.mxu0 %vm51_vm1, %v5885_v2  ;;  %v6538_v21 = vshrl.u32 %v10102_v18, 7  ;;  %v1790_v52 = vperm.slane %v6583_v50, 7  ;;  %v6600_v58 = vperm.slane %v6595_v57, 0  ;;  %v6614_v62 = vperm.slane %v6611_v61, 0  ;;  %v628_v63 = vld [vmem:[%s10097_s3 + $0x18] sm:$0xff]  ;;  %v627_v0 = vld [vmem:[%s10097_s3 + $0x10] sm:$0xff] }
   0x7   :  { %1026 = vmatpush.msra.mxu1 %v628_v63  ;;  %5889 = vmatpush.msra.mxu3 %v628_v63  ;;  %v626_v1 = vld [vmem:[%s10097_s3 + $0x8] sm:$0xff]  ;;  %v625_v2 = vld [vmem:[%s10097_s3] sm:$0xff]  ;;  %s6458_s0 = smov 64   ;;  %vm5150_vm8 = vcmask 1041409   ;;  %vm5153_vm9 = vcmask 1042434   ;;  %s6459_s14 = smov 32  }
   0x8   :  { %5902 = vset.pattern.permute.xlu2 %v6538_v21  ;;  %v6546_v24 = vadd.s32 8, %v6538_v21  ;;  %v6558_v34 = vadd.s32 24, %v6538_v21  ;;  %v6590_v55 = vadd.s32 16, %v6538_v21  ;;  %10174 = vst [vmem:[#allocation6_spill] sm:$0xff] %v6600_v58  ;;  %s6460_s15 = smov 16   ;;  %s6461_s16 = smov 120  }
   0x9   :  { %10175 = vst [vmem:[#allocation7_spill] sm:$0xff] %v6614_v62  ;;  %1027 = vmatpush.msra.mxu1 %v627_v0  ;;  %5890 = vmatpush.msra.mxu3 %v627_v0  ;;  %v6718_v0 = vperm.slane %v6611_v61, 3  ;;  %s6463_s19 = smov 8   ;;  %s5631_s22 = sshll.u32 %s10101_s7, 4  ;;  %s5632_s22 = int_to_ptr.hbm [resolvable:$true] %s5631_s22 }
   0xa   :  { %5903 = vset.pattern.permute.xlu0 %v6546_v24  ;;  %10173 = vst [vmem:[#allocation5_spill] sm:$0xff] %v6558_v34  ;;  %5905 = vset.pattern.permute.xlu1 %v6558_v34 }
   0xb   :  { %1028 = vmatpush.msra.mxu1 %v626_v1  ;;  %5891 = vmatpush.msra.mxu3 %v626_v1 }
   0xd   :  { %1029 = vmatpush.msra.mxu1 %v625_v2  ;;  %5892 = vmatpush.msra.mxu3 %v625_v2 }
  0x16   :  { %5649 = vmatmul.msk.bf16.gmra.mxu0 %vm51_vm1, %v5886_v3  ;;  %v1840_v3 = vperm.slane %v6595_v57, 1 }
  0x83   :  { %v71_v5 = vpop.f32.mrf.mxu0 }
  0x84   :  { %v6522_v6 = vadd.f32 %v6519_v4, %v71_v5  ;;  %v6638_v5 = vperm.slane %v6611_v61, 1 }
  0x86   :  { %v113_v7 = vperm.slane %v6522_v6, 0  ;;  %v88_v8 = vrot.slane %v6522_v6, 4  ;;  %v86_v9 = vrot.slane %v6522_v6, 2  ;;  %v85_v12 = vrot.slane %v6522_v6, 1 }
  0x87   :  { %v89_v13 = vrot.slane %v6522_v6, 5  ;;  %v87_v14 = vrot.slane %v6522_v6, 3  ;;  %v90_v20 = vrot.slane %v6522_v6, 6  ;;  %v91_v23 = vrot.slane %v6522_v6, 7 }
  0x88   :  { %145 = vrot.lane.b32.xlu0 %v113_v7, %s6457_s2  ;;  %v117_v10 = vperm.slane %v88_v8, 0  ;;  %v115_v11 = vperm.slane %v86_v9, 0  ;;  %v114_v15 = vperm.slane %v85_v12, 0 }
  0x89   :  { %v118_v16 = vperm.slane %v89_v13, 0  ;;  %v116_v17 = vperm.slane %v87_v14, 0  ;;  %v119_v25 = vperm.slane %v90_v20, 0  ;;  %v120_v27 = vperm.slane %v91_v23, 0 }
  0x8a   :  { %153 = vrot.lane.b32.xlu2 %v117_v10, %s6457_s2  ;;  %149 = vrot.lane.b32.xlu1 %v115_v11, %s6457_s2 }
  0x8b   :  { %v73_v19 = vpop.f32.mrf.mxu0 }
  0x8c   :  { %v6541_v22 = vadd.f32 %v6519_v4, %v73_v19 }
  0x8e   :  { %v121_v26 = vperm.slane %v6541_v22, 0  ;;  %v92_v28 = vrot.slane %v6541_v22, 1  ;;  %v94_v29 = vrot.slane %v6541_v22, 3  ;;  %v93_v30 = vrot.slane %v6541_v22, 2 }
  0x8f   :  { %v95_v35 = vrot.slane %v6541_v22, 4  ;;  %v97_v37 = vrot.slane %v6541_v22, 6  ;;  %v96_v38 = vrot.slane %v6541_v22, 5  ;;  %v98_v43 = vrot.slane %v6541_v22, 7 }
  0x90   :  { %147 = vrot.lane.b32.xlu0 %v114_v15, %s6457_s2  ;;  %v122_v31 = vperm.slane %v92_v28, 0  ;;  %v124_v32 = vperm.slane %v94_v29, 0  ;;  %v123_v33 = vperm.slane %v93_v30, 0 }
  0x91   :  { %v125_v39 = vperm.slane %v95_v35, 0  ;;  %v127_v41 = vperm.slane %v97_v37, 0  ;;  %v126_v42 = vperm.slane %v96_v38, 0  ;;  %v128_v45 = vperm.slane %v98_v43, 0 }
  0x92   :  { %155 = vrot.lane.b32.xlu2 %v118_v16, %s6457_s2  ;;  %151 = vrot.lane.b32.xlu1 %v116_v17, %s6457_s2  ;;  %v6660_v16 = vperm.slane %v6595_v57, 2 }
  0x93   :  { %v76_v36 = vpop.f32.mrf.mxu0 }
  0x94   :  { %v6567_v40 = vadd.f32 %v6519_v4, %v76_v36  ;;  %v6684_v36 = vperm.slane %v6611_v61, 2 }
  0x96   :  { %v99_v44 = vrot.slane %v6567_v40, 1  ;;  %v129_v47 = vperm.slane %v6567_v40, 0  ;;  %v100_v48 = vrot.slane %v6567_v40, 2  ;;  %v101_v49 = vrot.slane %v6567_v40, 3 }
  0x97   :  { %v102_v54 = vrot.slane %v6567_v40, 4  ;;  %v103_v59 = vrot.slane %v6567_v40, 5  ;;  %v104_v28 = vrot.slane %v6567_v40, 6  ;;  %v105_v2 = vrot.slane %v6567_v40, 7 }
  0x98   :  { %157 = vrot.lane.b32.xlu0 %v119_v25, %s6457_s2  ;;  %v130_v46 = vperm.slane %v99_v44, 0  ;;  %v131_v51 = vperm.slane %v100_v48, 0  ;;  %v132_v53 = vperm.slane %v101_v49, 0 }
  0x99   :  { %v133_v56 = vperm.slane %v102_v54, 0  ;;  %v134_v60 = vperm.slane %v103_v59, 0 }
  0x9a   :  { %161 = vrot.lane.b32.xlu2 %v121_v26, %s6457_s2  ;;  %159 = vrot.lane.b32.xlu1 %v120_v27, %s6457_s2 }
  0x9b   :  { %v78_v25 = vpop.f32.mrf.mxu0 }
  0x9c   :  { %v6672_v29 = vadd.f32 %v6519_v4, %v78_v25 }
  0xa0   :  { %163 = vrot.lane.b32.xlu0 %v122_v31, %s6457_s2  ;;  %v135_v31 = vperm.slane %v104_v28, 0 }
  0xa2   :  { %167 = vrot.lane.b32.xlu2 %v124_v32, %s6457_s2  ;;  %165 = vrot.lane.b32.xlu1 %v123_v33, %s6457_s2 }
  0xa8   :  { %169 = vrot.lane.b32.xlu0 %v125_v39, %s6457_s2 }
  0xaa   :  { %173 = vrot.lane.b32.xlu2 %v127_v41, %s6457_s2  ;;  %171 = vrot.lane.b32.xlu1 %v126_v42, %s6457_s2  ;;  %v6693_v42 = vperm.slane %v6595_v57, 3 }
  0xb0   :  { %175 = vrot.lane.b32.xlu0 %v128_v45, %s6457_s2 }
  0xb2   :  { %179 = vrot.lane.b32.xlu2 %v130_v46, %s6457_s2  ;;  %177 = vrot.lane.b32.xlu1 %v129_v47, %s6457_s2 }
  0xb8   :  { %181 = vrot.lane.b32.xlu0 %v131_v51, %s6457_s2 }
  0xba   :  { %1795 = vperm.xlu2 %5902, %v1790_v52   ;;  %183 = vrot.lane.b32.xlu1 %v132_v53, %s6457_s2 }
  0xc0   :  { %1801 = vperm.xlu0 %5903, %v1790_v52  }
  0xc2   :  { %5904 = vset.pattern.permute.xlu2 %v6590_v55  ;;  %185 = vrot.lane.b32.xlu1 %v133_v56, %s6457_s2 }
  0xc8   :  { %1826 = vperm.xlu0 %5903, %v6600_v58  }
  0xca   :  { %1807 = vperm.xlu2 %5904, %v1790_v52   ;;  %1813 = vperm.xlu1 %5905, %v1790_v52  }
  0xd0   :  { %5908 = vset.pattern.permute.xlu0 %v6558_v34 }
  0xd2   :  { %5906 = vset.pattern.permute.xlu2 %v6538_v21  ;;  %5909 = vset.pattern.permute.xlu1 %v6538_v21 }
  0xd3   :  { %187 = vrot.lane.b32.xlu1 %v134_v60, %s6457_s2 }
  0xd8   :  { %1838 = vperm.xlu0 %5908, %v6600_v58  }
  0xda   :  { %1820 = vperm.xlu2 %5906, %v6600_v58  }
  0xdb   :  { %1420 = vperm.xlu1 %5909, %v6614_v62  }
  0xe0   :  { %5913 = vset.pattern.permute.xlu0 %v6538_v21 }
  0xe2   :  { %5907 = vset.pattern.permute.xlu2 %v6590_v55 }
  0xe3   :  { %5911 = vset.pattern.permute.xlu1 %v6590_v55 }
  0xe4   :  { %v6643_v7 = vpop.permute.xlu2 %153 }
  0xe8   :  { %1845 = vperm.xlu0 %5913, %v1840_v3  }
  0xea   :  { %1832 = vperm.xlu2 %5907, %v6600_v58  }
  0xeb   :  { %1432 = vperm.xlu1 %5911, %v6614_v62  }
  0xec   :  { %v6650_v12 = vpop.permute.xlu2 %155 }
  0xf0   :  { %1445 = vperm.xlu0 %5913, %v6638_v5  }
  0xf2   :  { %5910 = vset.pattern.permute.xlu2 %v6546_v24 }
  0xf3   :  { %5914 = vset.pattern.permute.xlu1 %v6546_v24 }
  0xf4   :  { %v6664_v23 = vpop.permute.xlu2 %161 }
  0xf8   :  { %5918 = vset.pattern.permute.xlu0 %v6558_v34 }
  0xfa   :  { %v146_v8 = vpop.permute.xlu0 %145  ;;  %1426 = vperm.xlu2 %5910, %v6614_v62  }
  0xfb   :  { %1851 = vperm.xlu1 %5914, %v1840_v3   ;;  %v241_v9 = vadd.f32 %v146_v8, %v6522_v6  ;;  %v242_v14 = vadd.f32 %v146_v8, %v6541_v22  ;;  %v243_v20 = vadd.f32 %v146_v8, %v6567_v40  ;;  %v244_v32 = vadd.f32 %v146_v8, %v6672_v29 }
  0xfc   :  { %v6648_v10 = vpop.permute.xlu1 %149  ;;  %v6678_v33 = vpop.permute.xlu2 %167 }
  0xfd   :  { %v369_v11 = vmul.f32 0.2, %v241_v9  ;;  %v370_v17 = vmul.f32 0.2, %v242_v14  ;;  %v371_v27 = vmul.f32 0.2, %v243_v20  ;;  %v249_v28 = vadd.f32 %v6648_v10, %v6522_v6 }
  0xfe   :  { %10176 = vst [vmem:[#allocation8_spill] sm:$0xff] %v6678_v33  ;;  %v372_v4 = vmul.f32 0.2, %v244_v32 }
  0xff   :  { %v497_v13 = vmax.f32 %v241_v9, %v369_v11  ;;  %v498_v19 = vmax.f32 %v242_v14, %v370_v17  ;;  %v499_v30 = vmax.f32 %v243_v20, %v371_v27  ;;  %v106_v17 = vrot.slane %v6672_v29, 1 }
 0x100   :  { %1463 = vperm.xlu0 %5918, %v6638_v5   ;;  %v500_v38 = vmax.f32 %v244_v32, %v372_v4  ;;  %v377_v32 = vmul.f32 0.2, %v249_v28 }
 0x101   :  { %5650 = vmatmul.msk.f32.vlgmr.msra.gmra.mxu1 %vm629_vm2, %v497_v13  ;;  %v138_v25 = vperm.slane %v106_v17, 0 }
 0x102   :  { %5912 = vset.pattern.permute.xlu2 %v6558_v34  ;;  %v148_v37 = vpop.permute.xlu0 %147 }
 0x103   :  { %5915 = vset.pattern.permute.xlu1 %v6590_v55  ;;  %v245_v39 = vadd.f32 %v148_v37, %v6522_v6  ;;  %v246_v47 = vadd.f32 %v148_v37, %v6541_v22  ;;  %v247_v56 = vadd.f32 %v148_v37, %v6567_v40  ;;  %v248_v9 = vadd.f32 %v148_v37, %v6672_v29 }
 0x104   :  { %v6657_v15 = vpop.permute.xlu1 %151  ;;  %v6695_v44 = vpop.permute.xlu2 %173  ;;  %v6743_v37 = vperm.slane %v6611_v61, 4 }
 0x105   :  { %v373_v43 = vmul.f32 0.2, %v245_v39  ;;  %10179 = vst [vmem:[#allocation11_spill] sm:$0xff] %v6695_v44  ;;  %v374_v49 = vmul.f32 0.2, %v246_v47 }
 0x106   :  { %v375_v1 = vmul.f32 0.2, %v247_v56 }
 0x107   :  { %v501_v46 = vmax.f32 %v245_v39, %v373_v43  ;;  %v502_v53 = vmax.f32 %v246_v47, %v374_v49  ;;  %v505_v39 = vmax.f32 %v249_v28, %v377_v32  ;;  %v250_v43 = vadd.f32 %v6648_v10, %v6541_v22 }
 0x108   :  { %1888 = vperm.xlu0 %5918, %v6660_v16   ;;  %v503_v8 = vmax.f32 %v247_v56, %v375_v1  ;;  %v251_v56 = vadd.f32 %v6648_v10, %v6567_v40  ;;  %v6762_v1 = vperm.slane %v6595_v57, 5 }
 0x109   :  { %5651 = vmatmul.msk.f32.gmra.mxu1 %vm629_vm2, %v498_v19  ;;  %v376_v19 = vmul.f32 0.2, %v248_v9  ;;  %v378_v49 = vmul.f32 0.2, %v250_v43 }
 0x10a   :  { %1438 = vperm.xlu2 %5912, %v6614_v62   ;;  %v6697_v45 = vpop.permute.xlu0 %157 }
 0x10b   :  { %1857 = vperm.xlu1 %5915, %v1840_v3   ;;  %v504_v27 = vmax.f32 %v248_v9, %v376_v19 }
 0x10c   :  { %v6668_v26 = vpop.permute.xlu1 %159  ;;  %v180_v52 = vpop.permute.xlu2 %179 }
 0x10d   :  { %v309_v63 = vadd.f32 %v180_v52, %v6522_v6  ;;  %v310_v13 = vadd.f32 %v180_v52, %v6541_v22  ;;  %v312_v47 = vadd.f32 %v180_v52, %v6672_v29  ;;  %v7106_v33 = vadd.f32 %v6668_v26, %v6541_v22 }
 0x10f   :  { %v438_v20 = vmul.f32 0.2, %v310_v13 }
 0x110   :  { %5923 = vset.pattern.permute.xlu0 %v6590_v55 }
 0x111   :  { %5652 = vmatmul.msk.f32.gmra.mxu1 %vm629_vm2, %v499_v30  ;;  %v566_v30 = vmax.f32 %v310_v13, %v438_v20 }
 0x112   :  { %189 = vrot.lane.b32.xlu2 %v135_v31, %s6457_s2  ;;  %v6710_v59 = vpop.permute.xlu0 %163  ;;  %v311_v31 = vadd.f32 %v180_v52, %v6567_v40 }
 0x113   :  { %5916 = vset.pattern.permute.xlu1 %v6546_v24 }
 0x114   :  { %v6681_v35 = vpop.permute.xlu1 %165 }
 0x115   :  { %10177 = vst [vmem:[#allocation9_spill] sm:$0xff] %v6681_v35 }
 0x118   :  { %1482 = vperm.xlu0 %5923, %v6684_v36  }
 0x119   :  { %5653 = vmatmul.msk.f32.gmra.mxu1 %vm629_vm2, %v500_v38  ;;  %v439_v38 = vmul.f32 0.2, %v311_v31 }
 0x11a   :  { %1863 = vperm.xlu2 %5912, %v1840_v3   ;;  %v437_v3 = vmul.f32 0.2, %v309_v63  ;;  %v6726_v14 = vpop.permute.xlu0 %169 }
 0x11b   :  { %1451 = vperm.xlu1 %5916, %v6638_v5   ;;  %10181 = vst [vmem:[#allocation13_spill] sm:$0xff] %v6726_v14 }
 0x11c   :  { %v6690_v41 = vpop.permute.xlu1 %171  ;;  %v565_v11 = vmax.f32 %v309_v63, %v437_v3  ;;  %v379_v63 = vmul.f32 0.2, %v251_v56 }
 0x11d   :  { %10178 = vst [vmem:[#allocation10_spill] sm:$0xff] %v6690_v41 }
 0x11e   :  { %v507_v3 = vmax.f32 %v251_v56, %v379_v63 }
 0x120   :  { %1907 = vperm.xlu0 %5923, %v6693_v42  }
 0x121   :  { %5654 = vmatmul.msk.f32.gmra.mxu1 %vm629_vm2, %v501_v46  ;;  %v567_v46 = vmax.f32 %v311_v31, %v439_v38  ;;  %v254_v31 = vadd.f32 %v6657_v15, %v6541_v22  ;;  %v6789_v38 = vpop.permute.xlu2 %1795 }
 0x122   :  { %5917 = vset.pattern.permute.xlu2 %v6590_v55  ;;  %v6740_v4 = vpop.permute.xlu0 %175  ;;  %10183 = vst [vmem:[#allocation15_spill] sm:$0xff] %v6789_v38 }
 0x123   :  { %5919 = vset.pattern.permute.xlu1 %v6538_v21  ;;  %10182 = vst [vmem:[#allocation14_spill] sm:$0xff] %v6740_v4 }
 0x124   :  { %v6704_v48 = vpop.permute.xlu1 %177 }
 0x125   :  { %10180 = vst [vmem:[#allocation12_spill] sm:$0xff] %v6704_v48  ;;  %v308_v51 = vadd.f32 %v6704_v48, %v6672_v29 }
 0x127   :  { %v436_v54 = vmul.f32 0.2, %v308_v51 }
 0x128   :  { %5928 = vset.pattern.permute.xlu0 %v6546_v24 }
 0x129   :  { %5655 = vmatmul.msk.f32.gmra.mxu1 %vm629_vm2, %v502_v53  ;;  %v564_v60 = vmax.f32 %v308_v51, %v436_v54  ;;  %v440_v51 = vmul.f32 0.2, %v312_v47  ;;  %v506_v54 = vmax.f32 %v250_v43, %v378_v49  ;;  %v6796_v43 = vperm.slane %v6595_v57, 6  ;;  %v6808_v56 = vpop.permute.xlu2 %1807 }
 0x12a   :  { %1457 = vperm.xlu2 %5917, %v6638_v5   ;;  %v136_v5 = vperm.slane %v105_v2, 0  ;;  %v182_v53 = vpop.permute.xlu0 %181  ;;  %10184 = vst [vmem:[#allocation16_spill] sm:$0xff] %v6808_v56 }
 0x12b   :  { %1870 = vperm.xlu1 %5919, %v6660_v16   ;;  %5717 = vmatmul.msk.f32.vlgmr.msra.gmra.mxu3 %vm629_vm2, %v564_v60  ;;  %v313_v60 = vadd.f32 %v182_v53, %v6522_v6  ;;  %v568_v52 = vmax.f32 %v312_v47, %v440_v51  ;;  %v314_v9 = vadd.f32 %v182_v53, %v6541_v22 }
 0x12c   :  { %v315_v19 = vadd.f32 %v182_v53, %v6567_v40  ;;  %v316_v32 = vadd.f32 %v182_v53, %v6672_v29  ;;  %v255_v51 = vadd.f32 %v6657_v15, %v6567_v40 }
 0x12d   :  { %v441_v2 = vmul.f32 0.2, %v313_v60  ;;  %v442_v13 = vmul.f32 0.2, %v314_v9 }
 0x12e   :  { %v443_v28 = vmul.f32 0.2, %v315_v19 }
 0x12f   :  { %v570_v20 = vmax.f32 %v314_v9, %v442_v13 }
 0x130   :  { %1501 = vperm.xlu0 %5928, %v6718_v0  }
 0x131   :  { %5656 = vmatmul.msk.f32.gmra.mxu1 %vm629_vm2, %v503_v8  ;;  %v252_v8 = vadd.f32 %v6648_v10, %v6672_v29  ;;  %v253_v10 = vadd.f32 %v6657_v15, %v6522_v6 }
 0x132   :  { %5920 = vset.pattern.permute.xlu2 %v6546_v24 }
 0x133   :  { %191 = vrot.lane.b32.xlu1 %v136_v5, %s6457_s2  ;;  %5718 = vmatmul.msk.f32.gmra.mxu3 %vm629_vm2, %v565_v11  ;;  %v380_v5 = vmul.f32 0.2, %v252_v8  ;;  %v6773_v11 = vperm.slane %v6611_v61, 5 }
 0x134   :  { %v6826_v13 = vpop.permute.xlu2 %1820 }
 0x135   :  { %v508_v17 = vmax.f32 %v252_v8, %v380_v5  ;;  %v256_v8 = vadd.f32 %v6657_v15, %v6672_v29  ;;  %10186 = vst [vmem:[#allocation18_spill] sm:$0xff] %v6826_v13 }
 0x137   :  { %v384_v5 = vmul.f32 0.2, %v256_v8 }
 0x138   :  { %5935 = vset.pattern.permute.xlu0 %v6538_v21 }
 0x139   :  { %195 = vrot.lane.b32.xlu0 %v138_v25, %s6457_s2  ;;  %5657 = vmatmul.msk.f32.gmra.mxu1 %vm629_vm2, %v504_v27  ;;  %v381_v25 = vmul.f32 0.2, %v253_v10  ;;  %v6783_v27 = vpop.permute.xlu1 %183 }
 0x13a   :  { %1876 = vperm.xlu2 %5920, %v6660_v16  }
 0x13b   :  { %1470 = vperm.xlu1 %5919, %v6684_v36   ;;  %5719 = vmatmul.msk.f32.gmra.mxu3 %vm629_vm2, %v566_v30  ;;  %v509_v30 = vmax.f32 %v253_v10, %v381_v25  ;;  %v257_v10 = vadd.f32 %v6643_v7, %v6522_v6 }
 0x141   :  { %1520 = vperm.xlu0 %5935, %v6743_v37   ;;  %5658 = vmatmul.msk.f32.gmra.mxu1 %vm629_vm2, %v505_v39  ;;  %v382_v39 = vmul.f32 0.2, %v254_v31  ;;  %v6798_v47 = vpop.permute.xlu1 %185 }
 0x142   :  { %5921 = vset.pattern.permute.xlu2 %v6590_v55 }
 0x143   :  { %5924 = vset.pattern.permute.xlu1 %v6558_v34  ;;  %5720 = vmatmul.msk.f32.gmra.mxu3 %vm629_vm2, %v567_v46  ;;  %v444_v46 = vmul.f32 0.2, %v316_v32  ;;  %v510_v49 = vmax.f32 %v254_v31, %v382_v39  ;;  %v258_v39 = vadd.f32 %v6643_v7, %v6541_v22 }
 0x145   :  { %v572_v53 = vmax.f32 %v316_v32, %v444_v46  ;;  %v6839_v32 = vpop.permute.xlu2 %1832 }
 0x146   :  { %10187 = vst [vmem:[#allocation19_spill] sm:$0xff] %v6839_v32 }
 0x149   :  { %5940 = vset.pattern.permute.xlu0 %v6546_v24  ;;  %5659 = vmatmul.msk.f32.gmra.mxu1 %vm629_vm2, %v506_v54  ;;  %v317_v54 = vadd.f32 %v6783_v27, %v6522_v6  ;;  %v6818_v9 = vpop.permute.xlu1 %1813 }
 0x14a   :  { %1882 = vperm.xlu2 %5921, %v6660_v16   ;;  %v569_v16 = vmax.f32 %v313_v60, %v441_v2  ;;  %v383_v60 = vmul.f32 0.2, %v255_v51  ;;  %10185 = vst [vmem:[#allocation17_spill] sm:$0xff] %v6818_v9 }
 0x14b   :  { %1488 = vperm.xlu1 %5924, %v6684_v36   ;;  %5721 = vmatmul.msk.f32.gmra.mxu3 %vm629_vm2, %v568_v52  ;;  %v6812_v52 = vperm.slane %v6611_v61, 6  ;;  %v445_v63 = vmul.f32 0.2, %v317_v54 }
 0x14c   :  { %v511_v2 = vmax.f32 %v255_v51, %v383_v60  ;;  %v6849_v51 = vpop.permute.xlu0 %1801  ;;  %v6853_v60 = vperm.slane %v6595_v57, 7 }
 0x14d   :  { %10188 = vst [vmem:[#allocation20_spill] sm:$0xff] %v6849_v51 }
 0x14e   :  { %10189 = vst [vmem:[#allocation21_spill] sm:$0xff] %v6853_v60 }
 0x151   :  { %1951 = vperm.xlu0 %5940, %v6762_v1   ;;  %5660 = vmatmul.msk.f32.gmra.mxu1 %vm629_vm2, %v507_v3  ;;  %v137_v3 = vperm.slane %v6672_v29, 0  ;;  %v6836_v25 = vpop.permute.xlu1 %187 }
 0x152   :  { %5922 = vset.pattern.permute.xlu2 %v6546_v24 }
 0x153   :  { %5926 = vset.pattern.permute.xlu1 %v6546_v24  ;;  %5722 = vmatmul.msk.f32.gmra.mxu3 %vm629_vm2, %v569_v16  ;;  %v318_v16 = vadd.f32 %v6783_v27, %v6541_v22 }
 0x155   :  { %v446_v15 = vmul.f32 0.2, %v318_v16 }
 0x159   :  { %1551 = vperm.xlu0 %5940, %v6773_v11   ;;  %5661 = vmatmul.msk.f32.gmra.mxu1 %vm629_vm2, %v508_v17  ;;  %v512_v17 = vmax.f32 %v256_v8, %v384_v5  ;;  %v321_v5 = vadd.f32 %v6798_v47, %v6522_v6 }
 0x15a   :  { %1476 = vperm.xlu2 %5922, %v6684_v36   ;;  %v571_v36 = vmax.f32 %v315_v19, %v443_v28  ;;  %v574_v19 = vmax.f32 %v318_v16, %v446_v15  ;;  %v385_v28 = vmul.f32 0.2, %v257_v10  ;;  %v6867_v15 = vpop.permute.xlu0 %1826 }
 0x15b   :  { %1901 = vperm.xlu1 %5926, %v6693_v42   ;;  %5723 = vmatmul.msk.f32.gmra.mxu3 %vm629_vm2, %v570_v20  ;;  %v319_v20 = vadd.f32 %v6783_v27, %v6567_v40  ;;  %10190 = vst [vmem:[#allocation22_spill] sm:$0xff] %v6867_v15 }
 0x161   :  { %5945 = vset.pattern.permute.xlu0 %v6538_v21  ;;  %5662 = vmatmul.msk.f32.gmra.mxu1 %vm629_vm2, %v509_v30  ;;  %v447_v30 = vmul.f32 0.2, %v319_v20 }
 0x162   :  { %5925 = vset.pattern.permute.xlu2 %v6538_v21 }
 0x163   :  { %5927 = vset.pattern.permute.xlu1 %v6558_v34  ;;  %5724 = vmatmul.msk.f32.gmra.mxu3 %vm629_vm2, %v571_v36  ;;  %v513_v36 = vmax.f32 %v257_v10, %v385_v28  ;;  %v575_v46 = vmax.f32 %v319_v20, %v447_v30  ;;  %v449_v10 = vmul.f32 0.2, %v321_v5  ;;  %v322_v30 = vadd.f32 %v6798_v47, %v6541_v22 }
 0x169   :  { %1970 = vperm.xlu0 %5945, %v6796_v43   ;;  %5663 = vmatmul.msk.f32.gmra.mxu1 %vm629_vm2, %v510_v49  ;;  %v320_v49 = vadd.f32 %v6783_v27, %v6672_v29  ;;  %v259_v27 = vadd.f32 %v6643_v7, %v6567_v40 }
 0x16a   :  { %1895 = vperm.xlu2 %5925, %v6693_v42  }
 0x16b   :  { %1913 = vperm.xlu1 %5927, %v6693_v42   ;;  %5725 = vmatmul.msk.f32.gmra.mxu3 %vm629_vm2, %v572_v53  ;;  %v573_v42 = vmax.f32 %v317_v54, %v445_v63  ;;  %v1421_v53 = vpop.permute.xlu1 %1420  ;;  %v386_v54 = vmul.f32 0.2, %v258_v39  ;;  %v448_v63 = vmul.f32 0.2, %v320_v49 }
 0x16d   :  { %v514_v8 = vmax.f32 %v258_v39, %v386_v54  ;;  %v576_v16 = vmax.f32 %v320_v49, %v448_v63 }
 0x171   :  { %1570 = vperm.xlu0 %5945, %v6812_v52   ;;  %5664 = vmatmul.msk.f32.gmra.mxu1 %vm629_vm2, %v511_v2 }
 0x172   :  { %193 = vrot.lane.b32.xlu2 %v137_v3, %s6457_s2  ;;  %v6856_v3 = vperm.slane %v6595_v57, 4  ;;  %v387_v57 = vmul.f32 0.2, %v259_v27 }
 0x173   :  { %5929 = vset.pattern.permute.xlu1 %v6590_v55  ;;  %5726 = vmatmul.msk.f32.gmra.mxu3 %vm629_vm2, %v573_v42  ;;  %v1427_v42 = vpop.permute.xlu2 %1426 }
 0x174   :  { %v515_v28 = vmax.f32 %v259_v27, %v387_v57 }
 0x179   :  { %5950 = vset.pattern.permute.xlu0 %v6558_v34  ;;  %5665 = vmatmul.msk.f32.gmra.mxu1 %vm629_vm2, %v512_v17  ;;  %v1433_v17 = vpop.permute.xlu1 %1432 }
 0x17a   :  { %1495 = vperm.xlu2 %5925, %v6718_v0  }
 0x17b   :  { %1507 = vperm.xlu1 %5929, %v6718_v0   ;;  %5727 = vmatmul.msk.f32.gmra.mxu3 %vm629_vm2, %v574_v19  ;;  %v1439_v49 = vpop.permute.xlu2 %1438 }
 0x17e   :  { %v1031_v31 = vpop.f32.mrf.mxu1 }
 0x181   :  { %1588 = vperm.xlu0 %5950, %v6812_v52   ;;  %5666 = vmatmul.msk.f32.gmra.mxu1 %vm629_vm2, %v513_v36  ;;  %v6876_v36 = vadd.f32 %v1421_v53, %v1031_v31  ;;  %v6887_v31 = vperm.slane %v6611_v61, 7 }
 0x182   :  { %5930 = vset.pattern.permute.xlu2 %v6558_v34 }
 0x183   :  { %5931 = vset.pattern.permute.xlu1 %v6538_v21  ;;  %5728 = vmatmul.msk.f32.gmra.mxu3 %vm629_vm2, %v575_v46  ;;  %v577_v46 = vmax.f32 %v321_v5, %v449_v10  ;;  %10191 = vst [vmem:[#allocation23_spill] sm:$0xff] %v6887_v31  ;;  %v2344_v53 = vsel %vm2343_vm3, %v6876_v36, -inf }
 0x186   :  { %v1034_v2 = vpop.f32.mrf.mxu1 }
 0x187   :  { %v6869_v20 = vadd.f32 %v1427_v42, %v1034_v2  ;;  %v450_v2 = vmul.f32 0.2, %v322_v30  ;;  %v6893_v42 = vpop.permute.xlu0 %1838 }
 0x188   :  { %10192 = vst [vmem:[#allocation24_spill] sm:$0xff] %v6893_v42 }
 0x189   :  { %2013 = vperm.xlu0 %5950, %v6853_v60   ;;  %5667 = vmatmul.msk.f32.gmra.mxu1 %vm629_vm2, %v514_v8 }
 0x18a   :  { %1513 = vperm.xlu2 %5930, %v6718_v0   ;;  %v260_v0 = vadd.f32 %v6643_v7, %v6672_v29  ;;  %v2345_v7 = vsel %vm2343_vm3, %v6869_v20, -inf }
 0x18b   :  { %1920 = vperm.xlu1 %5931, %v6856_v3   ;;  %5729 = vmatmul.msk.f32.gmra.mxu3 %vm629_vm2, %v576_v16  ;;  %v2346_v8 = vmax.f32 %v2344_v53, %v2345_v7  ;;  %v6895_v16 = vpop.permute.xlu1 %1851  ;;  %v6912_v53 = vpop.permute.xlu2 %189 }
 0x18c   :  { %v388_v54 = vmul.f32 0.2, %v260_v0 }
 0x18e   :  { %v1037_v19 = vpop.f32.mrf.mxu1  ;;  %v516_v57 = vmax.f32 %v260_v0, %v388_v54  ;;  %v323_v0 = vadd.f32 %v6798_v47, %v6567_v40 }
 0x18f   :  { %v6878_v39 = vadd.f32 %v1433_v17, %v1037_v19  ;;  %v261_v17 = vadd.f32 %v6650_v12, %v6522_v6  ;;  %v578_v19 = vmax.f32 %v322_v30, %v450_v2 }
 0x191   :  { %5955 = vset.pattern.permute.xlu0 %v6590_v55  ;;  %5668 = vmatmul.msk.f32.gmra.mxu1 %vm629_vm2, %v515_v28  ;;  %v2347_v63 = vsel %vm2343_vm3, %v6878_v39, -inf  ;;  %v32_v28 = vld [vmem:[%s10095_s1 + $0x18] sm:$0xff] }
 0x192   :  { %5932 = vset.pattern.permute.xlu2 %v6546_v24  ;;  %v2348_v61 = vmax.f32 %v2346_v8, %v2347_v63  ;;  %v6910_v54 = vperm.slane %v32_v28, 0  ;;  %v451_v63 = vmul.f32 0.2, %v323_v0  ;;  %v324_v28 = vadd.f32 %v6798_v47, %v6672_v29 }
 0x193   :  { %5933 = vset.pattern.permute.xlu1 %v6590_v55  ;;  %5730 = vmatmul.msk.f32.gmra.mxu3 %vm629_vm2, %v577_v46 }
 0x194   :  { %10193 = vst [vmem:[#allocation25_spill] sm:$0xff] %v6910_v54  ;;  %v452_v18 = vmul.f32 0.2, %v324_v28 }
 0x196   :  { %v1040_v27 = vpop.f32.mrf.mxu1 }
 0x197   :  { %v2218_v5 = vadd.f32 %v1439_v49, %v1040_v27  ;;  %v389_v49 = vmul.f32 0.2, %v261_v17  ;;  %v262_v27 = vadd.f32 %v6650_v12, %v6541_v22 }
 0x199   :  { %1607 = vperm.xlu0 %5955, %v6887_v31   ;;  %v2349_v10 = vsel %vm2343_vm3, %v2218_v5, -inf  ;;  %5669 = vmatmul.msk.f32.gmra.mxu1 %vm629_vm2, %v516_v57  ;;  %v517_v8 = vmax.f32 %v261_v17, %v389_v49  ;;  %v390_v17 = vmul.f32 0.2, %v262_v27 }
 0x19a   :  { %1926 = vperm.xlu2 %5932, %v6856_v3   ;;  %v2350_v46 = vmax.f32 %v2348_v61, %v2349_v10  ;;  %v6917_v61 = vpop.permute.xlu0 %1845  ;;  %v6919_v10 = vpop.permute.xlu1 %1857 }
 0x19b   :  { %1932 = vperm.xlu1 %5933, %v6856_v3   ;;  %5731 = vmatmul.msk.f32.gmra.mxu3 %vm629_vm2, %v578_v19  ;;  %v579_v19 = vmax.f32 %v323_v0, %v451_v63  ;;  %v518_v32 = vmax.f32 %v262_v27, %v390_v17  ;;  %v325_v27 = vadd.f32 %v6836_v25, %v6522_v6 }
 0x19c   :  { %v2351_v7 = vrot.slane %v2350_v46, 4 }
 0x19e   :  { %v2352_v30 = vmax.f32 %v2350_v46, %v2351_v7  ;;  %v1043_v2 = vpop.f32.mrf.mxu1  ;;  %v6927_v7 = vpop.permute.xlu2 %1863 }
 0x1a0   :  { %v2353_v57 = vrot.slane %v2352_v30, 2 }
 0x1a1   :  { %2032 = vperm.xlu0 %5955, %v6910_v54   ;;  %5670 = vmatmul.msk.f32.gmra.mxu1 %vm629_vm2, %v517_v8  ;;  %v263_v8 = vadd.f32 %v6650_v12, %v6567_v40 }
 0x1a2   :  { %5934 = vset.pattern.permute.xlu2 %v6558_v34  ;;  %v2354_v46 = vmax.f32 %v2352_v30, %v2353_v57  ;;  %v580_v57 = vmax.f32 %v324_v28, %v452_v18  ;;  %v453_v18 = vmul.f32 0.2, %v325_v27 }
 0x1a3   :  { %5936 = vset.pattern.permute.xlu1 %v6546_v24  ;;  %5732 = vmatmul.msk.f32.gmra.mxu3 %vm629_vm2, %v579_v19 }
 0x1a4   :  { %v2355_v49 = vrot.slane %v2354_v46, 1 }
 0x1a6   :  { %v2356_v58 = vmax.f32 %v2354_v46, %v2355_v49  ;;  %v1046_v62 = vpop.f32.mrf.mxu1 }
 0x1a8   :  { %v2760_v0 = vsub.f32 %v6876_v36, %v2356_v58  ;;  %v2761_v47 = vsub.f32 %v6869_v20, %v2356_v58  ;;  %v2762_v63 = vsub.f32 %v6878_v39, %v2356_v58  ;;  %v2763_v30 = vsub.f32 %v2218_v5, %v2356_v58  ;;  %v1446_v36 = vpop.permute.xlu0 %1445  ;;  %v1452_v20 = vpop.permute.xlu1 %1451 }
 0x1a9   :  { %5960 = vset.pattern.permute.xlu0 %v6546_v24  ;;  %5671 = vmatmul.msk.f32.gmra.mxu1 %vm629_vm2, %v518_v32  ;;  %v391_v58 = vmul.f32 0.2, %v263_v8  ;;  %v6942_v32 = vperm.slane %v6583_v50, 0  ;;  %v1458_v5 = vpop.permute.xlu2 %1457  ;;  %v6946_v28 = vadd.f32 %v1452_v20, %v1046_v62  ;;  %v326_v50 = vadd.f32 %v6836_v25, %v6541_v22  ;;  %v3784_v62 = vld [vmem:[%s10098_s4] sm:$0x3] }
 0x1aa   :  { %1938 = vperm.xlu2 %5934, %v6856_v3   ;;  %v2888_v19 = vmul.f32 1.442695, %v2760_v0  ;;  %v2890_v46 = vmul.f32 1.442695, %v2761_v47  ;;  %v2892_v17 = vmul.f32 1.442695, %v2762_v63  ;;  %v264_v47 = vadd.f32 %v6650_v12, %v6672_v29 }
 0x1ab   :  { %1526 = vperm.xlu1 %5936, %v6743_v37   ;;  %v2894_v49 = vmul.f32 1.442695, %v2763_v30  ;;  %5733 = vmatmul.msk.f32.gmra.mxu3 %vm629_vm2, %v580_v57  ;;  %10194 = vst [vmem:[#allocation26_spill] sm:$0xff] %v6942_v32  ;;  %v519_v0 = vmax.f32 %v263_v8, %v391_v58  ;;  %v6953_v63 = vadd.f32 %v1446_v36, %v1043_v2  ;;  %v111_v8 = vrot.slane %v6672_v29, 6 }
 0x1ac   :  { %6022 = vpow2.f32 %v2888_v19  ;;  %v581_v57 = vmax.f32 %v325_v27, %v453_v18  ;;  %v3979_v2 = vsel %vm3977_vm4, %v3784_v62, 0  ;;  %v2358_v27 = vsel %vm2343_vm3, %v6946_v28, -inf }
 0x1ad   :  { %6024 = vpow2.f32 %v2890_v46  ;;  %3988 = vmatpush.bf16.msrb.mxu0 %v3979_v2  ;;  %5893 = vmatpush.bf16.msra.mxu2 %v3979_v2  ;;  %v143_v2 = vperm.slane %v111_v8, 0 }
 0x1ae   :  { %6026 = vpow2.f32 %v2892_v17  ;;  %v1049_v3 = vpop.f32.mrf.mxu1  ;;  %v6944_v39 = vpop.f32.mrf.mxu3  ;;  %v392_v17 = vmul.f32 0.2, %v264_v47 }
 0x1af   :  { %10195 = vst [vmem:[#allocation27_spill] sm:$0xff] %v6944_v39  ;;  %6028 = vpow2.f32 %v2894_v49  ;;  %v6955_v30 = vadd.f32 %v1458_v5, %v1049_v3  ;;  %v2357_v5 = vsel %vm2343_vm3, %v6953_v63, -inf  ;;  %v265_v39 = vadd.f32 %v6697_v45, %v6522_v6 }
 0x1b0   :  { %v1464_v58 = vpop.permute.xlu0 %1463  ;;  %v6979_v3 = vpop.permute.xlu1 %1870  ;;  %v2359_v15 = vmax.f32 %v2357_v5, %v2358_v27  ;;  %v520_v9 = vmax.f32 %v264_v47, %v392_v17 }
 0x1b1   :  { %1626 = vperm.xlu0 %5960, %v6942_v32   ;;  %5672 = vmatmul.msk.f32.gmra.mxu1 %vm629_vm2, %v519_v0  ;;  %v2360_v0 = vsel %vm2343_vm3, %v6955_v30, -inf  ;;  %v6994_v48 = vpop.permute.xlu2 %1876 }
 0x1b2   :  { %5937 = vset.pattern.permute.xlu2 %v6590_v55  ;;  %v6962_v12 = vpop.eup %6022  ;;  %v2361_v38 = vmax.f32 %v2359_v15, %v2360_v0 }
 0x1b3   :  { %5938 = vset.pattern.permute.xlu1 %v6558_v34  ;;  %v6966_v19 = vpop.eup %6024  ;;  %v3144_v46 = vsel %vm2343_vm3, %v6962_v12, 0.0  ;;  %5734 = vmatmul.msk.f32.gmra.mxu3 %vm629_vm2, %v581_v57  ;;  %v454_v57 = vmul.f32 0.2, %v326_v50 }
 0x1b4   :  { %v6973_v36 = vpop.eup %6026  ;;  %v3145_v20 = vsel %vm2343_vm3, %v6966_v19, 0.0 }
 0x1b5   :  { %v6977_v49 = vpop.eup %6028  ;;  %v3146_v18 = vadd.f32 %v3145_v20, %v3144_v46  ;;  %v3147_v62 = vsel %vm2343_vm3, %v6973_v36, 0.0  ;;  %v582_v8 = vmax.f32 %v326_v50, %v454_v57 }
 0x1b6   :  { %v1052_v13 = vpop.f32.mrf.mxu1  ;;  %v1235_v42 = vpop.f32.mrf.mxu3  ;;  %v3149_v56 = vsel %vm2343_vm3, %v6977_v49, 0.0 }
 0x1b7   :  { %v3148_v46 = vadd.f32 %v3147_v62, %v3146_v18  ;;  %v6989_v20 = vadd.f32 %v1464_v58, %v1052_v13  ;;  %v327_v13 = vadd.f32 %v6836_v25, %v6567_v40  ;;  %v107_v58 = vrot.slane %v6672_v29, 2 }
 0x1b8   :  { %v7013_v62 = vpop.permute.xlu1 %191 }
 0x1b9   :  { %205 = vrot.lane.b32.xlu0 %v143_v2, %s6457_s2  ;;  %v3150_v51 = vadd.f32 %v3149_v56, %v3148_v46  ;;  %v2362_v27 = vsel %vm2343_vm3, %v6989_v20, -inf  ;;  %5673 = vmatmul.msk.f32.gmra.mxu1 %vm629_vm2, %v520_v9  ;;  %v393_v56 = vmul.f32 0.2, %v265_v39  ;;  %v7007_v9 = vadd.f32 %v6917_v61, %v1235_v42 }
 0x1ba   :  { %1532 = vperm.xlu2 %5937, %v6743_v37   ;;  %v2363_v47 = vmax.f32 %v2361_v38, %v2362_v27  ;;  %5967 = vset.pattern.permute.xlu0 %v6538_v21  ;;  %v455_v50 = vmul.f32 0.2, %v327_v13  ;;  %v328_v42 = vadd.f32 %v6836_v25, %v6672_v29 }
 0x1bb   :  { %1538 = vperm.xlu1 %5938, %v6743_v37   ;;  %v3151_v15 = vrot.slane %v3150_v51, 4  ;;  %5735 = vmatmul.msk.f32.gmra.mxu3 %vm629_vm2, %v582_v8  ;;  %v266_v37 = vadd.f32 %v6697_v45, %v6541_v22  ;;  %v521_v46 = vmax.f32 %v265_v39, %v393_v56  ;;  %v2565_v8 = vsel %vm2343_vm3, %v7007_v9, -inf  ;;  %v7027_v56 = vpop.permute.xlu2 %1882 }
 0x1bc   :  { %v2364_v17 = vrot.slane %v2363_v47, 4 }
 0x1bd   :  { %v3152_v18 = vadd.f32 %v3151_v15, %v3150_v51  ;;  %v139_v51 = vperm.slane %v107_v58, 0  ;;  %v583_v15 = vmax.f32 %v327_v13, %v455_v50  ;;  %v394_v25 = vmul.f32 0.2, %v266_v37 }
 0x1be   :  { %v2365_v5 = vmax.f32 %v2363_v47, %v2364_v17  ;;  %v1238_v0 = vpop.f32.mrf.mxu3  ;;  %v7009_v57 = vpop.f32.mrf.mxu1  ;;  %v267_v13 = vadd.f32 %v6697_v45, %v6567_v40 }
 0x1bf   :  { %v3153_v38 = vrot.slane %v3152_v18, 2  ;;  %v7016_v2 = vadd.f32 %v6895_v16, %v1238_v0 }
 0x1c0   :  { %v2366_v27 = vrot.slane %v2365_v5, 2  ;;  %v1471_v50 = vpop.permute.xlu1 %1470 }
 0x1c1   :  { %v3154_v61 = vadd.f32 %v3153_v38, %v3152_v18  ;;  %v2566_v47 = vsel %vm2343_vm3, %v7016_v2, -inf  ;;  %5674 = vmatmul.msk.f32.gmra.mxu1 %vm629_vm2, %v521_v46  ;;  %v7030_v18 = vpop.permute.xlu0 %1888  ;;  %v456_v38 = vmul.f32 0.2, %v328_v42 }
 0x1c2   :  { %5939 = vset.pattern.permute.xlu2 %v6538_v21  ;;  %v2367_v16 = vmax.f32 %v2365_v5, %v2366_v27  ;;  %v2567_v17 = vmax.f32 %v2565_v8, %v2566_v47  ;;  %v522_v27 = vmax.f32 %v266_v37, %v394_v25 }
 0x1c3   :  { %197 = vrot.lane.b32.xlu1 %v139_v51, %s6457_s2  ;;  %v3155_v39 = vrot.slane %v3154_v61, 1  ;;  %5736 = vmatmul.msk.f32.gmra.mxu3 %vm629_vm2, %v583_v15 }
 0x1c4   :  { %v2368_v58 = vrot.slane %v2367_v16, 1 }
 0x1c5   :  { %v3156_v0 = vadd.f32 %v3155_v39, %v3154_v61  ;;  %v1477_v39 = vpop.permute.xlu2 %1476 }
 0x1c6   :  { %v2369_v4 = vmax.f32 %v2367_v16, %v2368_v58  ;;  %v1058_v46 = vpop.f32.mrf.mxu1  ;;  %v1241_v44 = vpop.f32.mrf.mxu3  ;;  %v584_v16 = vmax.f32 %v328_v42, %v456_v38  ;;  %v268_v42 = vadd.f32 %v6697_v45, %v6672_v29  ;;  %v330_v45 = vadd.f32 %v6912_v53, %v6541_v22 }
 0x1c7   :  { %6030 = vrcp.f32 %v3156_v0  ;;  %v7035_v5 = vadd.f32 %v6919_v10, %v1241_v44  ;;  %v329_v44 = vadd.f32 %v6912_v53, %v6522_v6 }
 0x1c8   :  { %v2764_v51 = vsub.f32 %v6953_v63, %v2369_v4  ;;  %v2765_v8 = vsub.f32 %v6946_v28, %v2369_v4  ;;  %v2766_v47 = vsub.f32 %v6955_v30, %v2369_v4  ;;  %v2767_v61 = vsub.f32 %v6989_v20, %v2369_v4 }
 0x1c9   :  { %v2568_v15 = vsel %vm2343_vm3, %v7035_v5, -inf  ;;  %5675 = vmatmul.msk.f32.gmra.mxu1 %vm629_vm2, %v522_v27  ;;  %v395_v4 = vmul.f32 0.2, %v267_v13  ;;  %v457_v25 = vmul.f32 0.2, %v329_v44  ;;  %v7057_v27 = vadd.f32 %v1477_v39, %v1058_v46 }
 0x1ca   :  { %1945 = vperm.xlu2 %5939, %v6762_v1   ;;  %v2896_v10 = vmul.f32 1.442695, %v2764_v51  ;;  %v2898_v37 = vmul.f32 1.442695, %v2765_v8  ;;  %v2900_v63 = vmul.f32 1.442695, %v2766_v47  ;;  %v2569_v30 = vmax.f32 %v2567_v17, %v2568_v15  ;;  %v1489_v47 = vpop.permute.xlu1 %1488 }
 0x1cb   :  { %1963 = vperm.xlu1 %5938, %v6762_v1   ;;  %v2902_v28 = vmul.f32 1.442695, %v2767_v61  ;;  %5737 = vmatmul.msk.f32.gmra.mxu3 %vm629_vm2, %v584_v16  ;;  %v523_v8 = vmax.f32 %v267_v13, %v395_v4  ;;  %v1483_v61 = vpop.permute.xlu0 %1482  ;;  %v7065_v16 = vadd.f32 %v1471_v50, %v7009_v57  ;;  %v2371_v50 = vsel %vm2343_vm3, %v7057_v27, -inf }
 0x1cc   :  { %6032 = vpow2.f32 %v2896_v10 }
 0x1cd   :  { %v7049_v20 = vpop.eup %6030  ;;  %6034 = vpow2.f32 %v2898_v37  ;;  %v396_v37 = vmul.f32 0.2, %v268_v42  ;;  %v2370_v39 = vsel %vm2343_vm3, %v7065_v16, -inf }
 0x1ce   :  { %6036 = vpow2.f32 %v2900_v63  ;;  %v1061_v58 = vpop.f32.mrf.mxu1  ;;  %v1244_v0 = vpop.f32.mrf.mxu3  ;;  %v3592_v38 = vmul.f32 %v7049_v20, %v6962_v12  ;;  %v3593_v17 = vmul.f32 %v7049_v20, %v6966_v19 }
 0x1cf   :  { %6038 = vpow2.f32 %v2902_v28  ;;  %v7060_v51 = vadd.f32 %v6927_v7, %v1244_v0  ;;  %v7067_v12 = vadd.f32 %v1483_v61, %v1061_v58  ;;  %v585_v7 = vmax.f32 %v329_v44, %v457_v25 }
 0x1d0   :  { %v3720_v15 = vpack.c.bf16 %v3593_v17, %v3592_v38  ;;  %v458_v58 = vmul.f32 0.2, %v330_v45  ;;  %v269_v0 = vadd.f32 %v6668_v26, %v6522_v6  ;;  %v2372_v17 = vmax.f32 %v2370_v39, %v2371_v50 }
 0x1d1   :  { %v2570_v19 = vsel %vm2343_vm3, %v7060_v51, -inf  ;;  %5676 = vmatmul.msk.f32.gmra.mxu1 %vm629_vm2, %v523_v8  ;;  %v2373_v25 = vsel %vm2343_vm3, %v7067_v12, -inf }
 0x1d2   :  { %5941 = vset.pattern.permute.xlu2 %v6590_v55  ;;  %v7073_v46 = vpop.eup %6032  ;;  %v2571_v13 = vmax.f32 %v2569_v30, %v2570_v19  ;;  %5778 = vmatmul.msk.bf16.vlgmr.msrb.gmra.mxu0 %vm2343_vm3, %v3720_v15  ;;  %v2374_v14 = vmax.f32 %v2372_v17, %v2373_v25  ;;  %v397_v39 = vmul.f32 0.2, %v269_v0 }
 0x1d3   :  { %5943 = vset.pattern.permute.xlu1 %v6590_v55  ;;  %v7077_v10 = vpop.eup %6034  ;;  %v3157_v57 = vsel %vm2343_vm3, %v7073_v46, 0.0  ;;  %5738 = vmatmul.msk.f32.gmra.mxu3 %vm629_vm2, %v585_v7 }
 0x1d4   :  { %v7084_v63 = vpop.eup %6036  ;;  %v3158_v44 = vsel %vm2343_vm3, %v7077_v10, 0.0  ;;  %v2572_v28 = vrot.slane %v2571_v13, 4 }
 0x1d5   :  { %v7088_v30 = vpop.eup %6038  ;;  %v3159_v4 = vadd.f32 %v3158_v44, %v3157_v57  ;;  %v3160_v38 = vsel %vm2343_vm3, %v7084_v63, 0.0  ;;  %v524_v57 = vmax.f32 %v268_v42, %v396_v37  ;;  %v331_v44 = vadd.f32 %v6912_v53, %v6567_v40  ;;  %v7114_v37 = vpop.permute.xlu2 %1895 }
 0x1d6   :  { %v2573_v8 = vmax.f32 %v2571_v13, %v2572_v28  ;;  %v1064_v61 = vpop.f32.mrf.mxu1  ;;  %v1247_v15 = vpop.f32.mrf.mxu3  ;;  %v3162_v41 = vsel %vm2343_vm3, %v7088_v30, 0.0  ;;  %v586_v42 = vmax.f32 %v330_v45, %v458_v58 }
 0x1d7   :  { %v3161_v19 = vadd.f32 %v3160_v38, %v3159_v4  ;;  %v7098_v7 = vadd.f32 %v1489_v47, %v1064_v61  ;;  %v7112_v47 = vpop.permute.xlu1 %1901  ;;  %v3595_v38 = vmul.f32 %v7049_v20, %v6977_v49  ;;  %v7123_v61 = vadd.f32 %v6979_v3, %v1247_v15 }
 0x1d8   :  { %v2574_v32 = vrot.slane %v2573_v8, 2 }
 0x1d9   :  { %v3163_v50 = vadd.f32 %v3162_v41, %v3161_v19  ;;  %v2375_v13 = vsel %vm2343_vm3, %v7098_v7, -inf  ;;  %5677 = vmatmul.msk.f32.gmra.mxu1 %vm629_vm2, %v524_v57  ;;  %v3594_v41 = vmul.f32 %v7049_v20, %v6973_v36 }
 0x1da   :  { %1957 = vperm.xlu2 %5941, %v6762_v1   ;;  %v2575_v28 = vmax.f32 %v2573_v8, %v2574_v32  ;;  %v2376_v4 = vmax.f32 %v2374_v14, %v2375_v13  ;;  %v459_v1 = vmul.f32 0.2, %v331_v44  ;;  %v398_v14 = vmul.f32 0.2, %v7106_v33 }
 0x1db   :  { %1557 = vperm.xlu1 %5943, %v6773_v11   ;;  %v3164_v25 = vrot.slane %v3163_v50, 4  ;;  %5739 = vmatmul.msk.f32.gmra.mxu3 %vm629_vm2, %v586_v42  ;;  %v7128_v32 = vadd.f32 %v6912_v53, %v6672_v29  ;;  %v525_v13 = vmax.f32 %v269_v0, %v397_v39 }
 0x1dc   :  { %v2576_v45 = vrot.slane %v2575_v28, 1  ;;  %v2377_v58 = vrot.slane %v2376_v4, 4  ;;  %v587_v42 = vmax.f32 %v331_v44, %v459_v1 }
 0x1dd   :  { %v3165_v17 = vadd.f32 %v3164_v25, %v3163_v50  ;;  %v3721_v50 = vpack.c.bf16 %v3595_v38, %v3594_v41  ;;  %v7156_v1 = vpop.permute.xlu2 %193 }
 0x1de   :  { %v2577_v8 = vmax.f32 %v2575_v28, %v2576_v45  ;;  %v2378_v19 = vmax.f32 %v2376_v4, %v2377_v58  ;;  %v7130_v57 = vpop.f32.mrf.mxu1  ;;  %v1250_v36 = vpop.f32.mrf.mxu3  ;;  %v2578_v45 = vsel %vm2343_vm3, %v7123_v61, -inf }
 0x1df   :  { %v3166_v49 = vrot.slane %v3165_v17, 2  ;;  %v7133_v20 = vadd.f32 %v6994_v48, %v1250_v36  ;;  %v7154_v38 = vpop.permute.xlu1 %1913 }
 0x1e0   :  { %v2828_v3 = vsub.f32 %v7007_v9, %v2577_v8  ;;  %v2829_v15 = vsub.f32 %v7016_v2, %v2577_v8  ;;  %v2830_v25 = vsub.f32 %v7035_v5, %v2577_v8  ;;  %v2831_v53 = vsub.f32 %v7060_v51, %v2577_v8  ;;  %v7151_v51 = vpop.permute.xlu0 %1907 }
 0x1e1   :  { %v3167_v28 = vadd.f32 %v3166_v49, %v3165_v17  ;;  %v2379_v4 = vrot.slane %v2378_v19, 2  ;;  %v2579_v0 = vsel %vm2343_vm3, %v7133_v20, -inf  ;;  %5678 = vmatmul.msk.f32.gmra.mxu1 %vm629_vm2, %v525_v13  ;;  %v7149_v5 = vadd.f32 %v6668_v26, %v6567_v40 }
 0x1e2   :  { %5942 = vset.pattern.permute.xlu2 %v6538_v21  ;;  %v3024_v48 = vmul.f32 1.442695, %v2828_v3  ;;  %v3026_v9 = vmul.f32 1.442695, %v2829_v15  ;;  %v3028_v44 = vmul.f32 1.442695, %v2830_v25  ;;  %v2580_v2 = vmax.f32 %v2578_v45, %v2579_v0  ;;  %5779 = vmatmul.msk.bf16.gmra.mxu0 %vm2343_vm3, %v3721_v50 }
 0x1e3   :  { %5946 = vset.pattern.permute.xlu1 %v6546_v24  ;;  %v3168_v39 = vrot.slane %v3167_v28, 1  ;;  %v2380_v41 = vmax.f32 %v2378_v19, %v2379_v4  ;;  %5740 = vmatmul.msk.f32.gmra.mxu3 %vm629_vm2, %v587_v42  ;;  %v3030_v58 = vmul.f32 1.442695, %v2831_v53  ;;  %v460_v17 = vmul.f32 0.2, %v7128_v32 }
 0x1e4   :  { %6040 = vpow2.f32 %v3024_v48  ;;  %v526_v50 = vmax.f32 %v7106_v33, %v398_v14  ;;  %v399_v3 = vmul.f32 0.2, %v7149_v5  ;;  %v333_v15 = vadd.f32 %v7013_v62, %v6522_v6 }
 0x1e5   :  { %v3169_v8 = vadd.f32 %v3168_v39, %v3167_v28  ;;  %6042 = vpow2.f32 %v3026_v9  ;;  %v2381_v36 = vrot.slane %v2380_v41, 1  ;;  %v588_v25 = vmax.f32 %v7128_v32, %v460_v17 }
 0x1e6   :  { %6044 = vpow2.f32 %v3028_v44  ;;  %v1070_v13 = vpop.f32.mrf.mxu1  ;;  %v1253_v49 = vpop.f32.mrf.mxu3  ;;  %v7176_v14 = vadd.f32 %v6668_v26, %v6672_v29  ;;  %v527_v32 = vmax.f32 %v7149_v5, %v399_v3  ;;  %v7196_v17 = vadd.f32 %v7013_v62, %v6541_v22 }
 0x1e7   :  { %6046 = vrcp.f32 %v3169_v8  ;;  %v2382_v19 = vmax.f32 %v2380_v41, %v2381_v36  ;;  %v7161_v42 = vadd.f32 %v7027_v56, %v1253_v49  ;;  %v1496_v44 = vpop.permute.xlu2 %1495  ;;  %v461_v5 = vmul.f32 0.2, %v333_v15 }
 0x1e8   :  { %6048 = vpow2.f32 %v3030_v58  ;;  %v1502_v58 = vpop.permute.xlu0 %1501 }
 0x1e9   :  { %v2768_v53 = vsub.f32 %v7065_v16, %v2382_v19  ;;  %v2769_v28 = vsub.f32 %v7057_v27, %v2382_v19  ;;  %v2770_v4 = vsub.f32 %v7067_v12, %v2382_v19  ;;  %v2771_v33 = vsub.f32 %v7098_v7, %v2382_v19  ;;  %5679 = vmatmul.msk.f32.gmra.mxu1 %vm629_vm2, %v526_v50 }
 0x1ea   :  { %v7172_v56 = vpop.eup %6040  ;;  %v2581_v45 = vsel %vm2343_vm3, %v7161_v42, -inf  ;;  %1545 = vperm.xlu2 %5942, %v6773_v11  }
 0x1eb   :  { %1976 = vperm.xlu1 %5946, %v6796_v43   ;;  %v7182_v27 = vpop.eup %6042  ;;  %v3365_v16 = vsel %vm2343_vm3, %v7172_v56, 0.0  ;;  %v2904_v12 = vmul.f32 1.442695, %v2768_v53  ;;  %v2906_v7 = vmul.f32 1.442695, %v2769_v28  ;;  %5741 = vmatmul.msk.f32.gmra.mxu3 %vm629_vm2, %v588_v25  ;;  %v2582_v39 = vmax.f32 %v2580_v2, %v2581_v45 }
 0x1ec   :  { %v7188_v26 = vpop.eup %6044  ;;  %v3366_v0 = vsel %vm2343_vm3, %v7182_v27, 0.0  ;;  %v2908_v48 = vmul.f32 1.442695, %v2770_v4  ;;  %v2910_v9 = vmul.f32 1.442695, %v2771_v33  ;;  %v7207_v28 = vadd.f32 %v1496_v44, %v7130_v57 }
 0x1ed   :  { %v7192_v41 = vpop.eup %6046  ;;  %v3367_v8 = vadd.f32 %v3366_v0, %v3365_v16  ;;  %6050 = vpow2.f32 %v2904_v12  ;;  %v1508_v36 = vpop.permute.xlu1 %1507  ;;  %v3368_v50 = vsel %vm2343_vm3, %v7188_v26, 0.0  ;;  %v7209_v4 = vadd.f32 %v1502_v58, %v1070_v13 }
 0x1ee   :  { %v7198_v49 = vpop.eup %6048  ;;  %6052 = vpow2.f32 %v2906_v7  ;;  %v1073_v19 = vpop.f32.mrf.mxu1  ;;  %v3596_v2 = vmul.f32 %v7192_v41, %v7073_v46  ;;  %v3597_v25 = vmul.f32 %v7192_v41, %v7077_v10  ;;  %v589_v10 = vmax.f32 %v333_v15, %v461_v5 }
 0x1ef   :  { %v1256_v3 = vpop.f32.mrf.mxu3  ;;  %v3369_v53 = vadd.f32 %v3368_v50, %v3367_v8  ;;  %6054 = vpow2.f32 %v2908_v48  ;;  %v3370_v33 = vsel %vm2343_vm3, %v7198_v49, 0.0  ;;  %v7216_v46 = vadd.f32 %v1508_v36, %v1073_v19  ;;  %v1514_v8 = vpop.permute.xlu2 %1513 }
 0x1f0   :  { %6056 = vpow2.f32 %v2910_v9  ;;  %v7214_v45 = vadd.f32 %v7030_v18, %v1256_v3  ;;  %v3722_v16 = vpack.c.bf16 %v3597_v25, %v3596_v2  ;;  %v400_v13 = vmul.f32 0.2, %v7176_v14 }
 0x1f1   :  { %v3371_v12 = vadd.f32 %v3370_v33, %v3369_v53  ;;  %5680 = vmatmul.msk.f32.gmra.mxu1 %vm629_vm2, %v527_v32  ;;  %v2384_v0 = vsel %vm2343_vm3, %v7209_v4, -inf  ;;  %v108_v15 = vrot.slane %v6672_v29, 3  ;;  %v7235_v9 = vadd.f32 %v6664_v23, %v6522_v6 }
 0x1f2   :  { %v2583_v57 = vsel %vm2343_vm3, %v7214_v45, -inf  ;;  %5780 = vmatmul.msk.bf16.gmra.mxu0 %vm2343_vm3, %v3722_v16  ;;  %5944 = vset.pattern.permute.xlu2 %v6558_v34  ;;  %v2383_v58 = vsel %vm2343_vm3, %v7207_v28, -inf  ;;  %v2386_v19 = vsel %vm2343_vm3, %v7216_v46, -inf  ;;  %v7252_v25 = vadd.f32 %v7013_v62, %v6567_v40 }
 0x1f3   :  { %v7224_v7 = vpop.eup %6050  ;;  %v3372_v18 = vrot.slane %v3371_v12, 4  ;;  %v2584_v48 = vmax.f32 %v2582_v39, %v2583_v57  ;;  %5947 = vset.pattern.permute.xlu1 %v6590_v55  ;;  %5742 = vmatmul.msk.f32.gmra.mxu3 %vm629_vm2, %v589_v10  ;;  %v462_v39 = vmul.f32 0.2, %v7196_v17  ;;  %v2385_v33 = vmax.f32 %v2383_v58, %v2384_v0 }
 0x1f4   :  { %v7231_v32 = vpop.eup %6052  ;;  %v3170_v44 = vsel %vm2343_vm3, %v7224_v7, 0.0  ;;  %v528_v57 = vmax.f32 %v7176_v14, %v400_v13  ;;  %v7261_v34 = vadd.f32 %v6664_v23, %v6541_v22 }
 0x1f5   :  { %v7242_v36 = vpop.eup %6054  ;;  %v3373_v5 = vadd.f32 %v3372_v18, %v3371_v12  ;;  %v3171_v50 = vsel %vm2343_vm3, %v7231_v32, 0.0  ;;  %v2585_v3 = vrot.slane %v2584_v48, 4  ;;  %v2387_v60 = vmax.f32 %v2385_v33, %v2386_v19 }
 0x1f6   :  { %v7248_v2 = vpop.eup %6056  ;;  %v3172_v53 = vadd.f32 %v3171_v50, %v3170_v44  ;;  %v1076_v16 = vpop.f32.mrf.mxu1  ;;  %v3173_v18 = vsel %vm2343_vm3, %v7242_v36, 0.0  ;;  %v590_v44 = vmax.f32 %v7196_v17, %v462_v39  ;;  %v401_v50 = vmul.f32 0.2, %v7235_v9 }
 0x1f7   :  { %v1259_v10 = vpop.f32.mrf.mxu3  ;;  %v3374_v12 = vrot.slane %v3373_v5, 2  ;;  %v2586_v54 = vmax.f32 %v2584_v48, %v2585_v3  ;;  %v7257_v35 = vadd.f32 %v1514_v8, %v1076_v16  ;;  %v3175_v58 = vsel %vm2343_vm3, %v7248_v2, 0.0 }
 0x1f8   :  { %v3174_v31 = vadd.f32 %v3173_v18, %v3172_v53  ;;  %v140_v3 = vperm.slane %v108_v15, 0  ;;  %v7273_v17 = vadd.f32 %v7013_v62, %v6672_v29  ;;  %v463_v19 = vmul.f32 0.2, %v7252_v25 }
 0x1f9   :  { %v3375_v0 = vadd.f32 %v3374_v12, %v3373_v5  ;;  %v2587_v14 = vrot.slane %v2586_v54, 2  ;;  %v2388_v13 = vsel %vm2343_vm3, %v7257_v35, -inf  ;;  %5681 = vmatmul.msk.f32.gmra.mxu1 %vm629_vm2, %v528_v57  ;;  %v7284_v62 = vadd.f32 %v6664_v23, %v6567_v40 }
 0x1fa   :  { %v3176_v48 = vadd.f32 %v3175_v58, %v3174_v31  ;;  %v2389_v8 = vmax.f32 %v2387_v60, %v2388_v13  ;;  %1563 = vperm.xlu2 %5944, %v6773_v11   ;;  %v3598_v11 = vmul.f32 %v7192_v41, %v7084_v63  ;;  %v3599_v60 = vmul.f32 %v7192_v41, %v7088_v30 }
 0x1fb   :  { %v3376_v39 = vrot.slane %v3375_v0, 1  ;;  %v2588_v5 = vmax.f32 %v2586_v54, %v2587_v14  ;;  %1982 = vperm.xlu1 %5947, %v6796_v43   ;;  %5743 = vmatmul.msk.f32.gmra.mxu3 %vm629_vm2, %v590_v44  ;;  %v402_v33 = vmul.f32 0.2, %v7261_v34  ;;  %v7288_v12 = vadd.f32 %v7114_v37, %v1259_v10 }
 0x1fc   :  { %v3177_v53 = vrot.slane %v3176_v48, 4  ;;  %v2390_v31 = vrot.slane %v2389_v8, 4  ;;  %v529_v63 = vmax.f32 %v7235_v9, %v401_v50  ;;  %v3723_v13 = vpack.c.bf16 %v3599_v60, %v3598_v11 }
 0x1fd   :  { %v3377_v15 = vadd.f32 %v3376_v39, %v3375_v0  ;;  %v2589_v54 = vrot.slane %v2588_v5, 1  ;;  %v591_v0 = vmax.f32 %v7252_v25, %v463_v19  ;;  %v2591_v25 = vsel %vm2343_vm3, %v7288_v12, -inf }
 0x1fe   :  { %v3178_v16 = vadd.f32 %v3177_v53, %v3176_v48  ;;  %v2391_v57 = vmax.f32 %v2389_v8, %v2390_v31  ;;  %v7290_v18 = vpop.f32.mrf.mxu1  ;;  %v464_v48 = vmul.f32 0.2, %v7273_v17  ;;  %v530_v53 = vmax.f32 %v7261_v34, %v402_v33 }
 0x1ff   :  { %v1262_v44 = vpop.f32.mrf.mxu3  ;;  %6058 = vrcp.f32 %v3377_v15  ;;  %v2590_v30 = vmax.f32 %v2588_v5, %v2589_v54  ;;  %v403_v31 = vmul.f32 0.2, %v7284_v62  ;;  %v7315_v60 = vadd.f32 %v7156_v1, %v6522_v6 }
 0x200   :  { %v7294_v41 = vadd.f32 %v7112_v47, %v1262_v44  ;;  %v3179_v58 = vrot.slane %v3178_v16, 2  ;;  %v2392_v14 = vrot.slane %v2391_v57, 2  ;;  %v592_v15 = vmax.f32 %v7273_v17, %v464_v48 }
 0x201   :  { %v2832_v37 = vsub.f32 %v7123_v61, %v2590_v30  ;;  %v2833_v10 = vsub.f32 %v7133_v20, %v2590_v30  ;;  %v2834_v8 = vsub.f32 %v7161_v42, %v2590_v30  ;;  %v2835_v9 = vsub.f32 %v7214_v45, %v2590_v30  ;;  %5682 = vmatmul.msk.f32.gmra.mxu1 %vm629_vm2, %v529_v63 }
 0x202   :  { %v3180_v50 = vadd.f32 %v3179_v58, %v3178_v16  ;;  %v2393_v47 = vmax.f32 %v2391_v57, %v2392_v14  ;;  %v2592_v39 = vsel %vm2343_vm3, %v7294_v41, -inf  ;;  %5781 = vmatmul.msk.bf16.gmra.mxu0 %vm2343_vm3, %v3723_v13  ;;  %199 = vrot.lane.b32.xlu2 %v140_v3, %s6457_s2 }
 0x203   :  { %v3032_v61 = vmul.f32 1.442695, %v2832_v37  ;;  %v3034_v20 = vmul.f32 1.442695, %v2833_v10  ;;  %v3036_v5 = vmul.f32 1.442695, %v2834_v8  ;;  %v2593_v42 = vmax.f32 %v2591_v25, %v2592_v39  ;;  %5948 = vset.pattern.permute.xlu1 %v6546_v24  ;;  %5744 = vmatmul.msk.f32.gmra.mxu3 %vm629_vm2, %v591_v0 }
 0x204   :  { %v3181_v45 = vrot.slane %v3180_v50, 1  ;;  %v2394_v19 = vrot.slane %v2393_v47, 1  ;;  %v3038_v3 = vmul.f32 1.442695, %v2835_v9  ;;  %v7355_v10 = vadd.f32 %v6664_v23, %v6672_v29 }
 0x205   :  { %v6059_v11 = vpop.eup %6058  ;;  %6060 = vpow2.f32 %v3032_v61 }
 0x206   :  { %v3182_v54 = vadd.f32 %v3181_v45, %v3180_v50  ;;  %6062 = vpow2.f32 %v3034_v20  ;;  %v2395_v16 = vmax.f32 %v2393_v47, %v2394_v19  ;;  %v7318_v57 = vpop.f32.mrf.mxu1  ;;  %v7321_v63 = vmul.f32 %v6059_v11, %v7172_v56 }
 0x207   :  { %v1265_v44 = vpop.f32.mrf.mxu3  ;;  %6064 = vpow2.f32 %v3036_v5  ;;  %v7327_v33 = vmul.f32 %v6059_v11, %v7182_v27  ;;  %v7330_v30 = vmul.f32 %v6059_v11, %v7188_v26  ;;  %v531_v50 = vmax.f32 %v7284_v62, %v403_v31 }
 0x208   :  { %10196 = vst [vmem:[#allocation28_spill] sm:$0xff] %v7321_v63  ;;  %v7324_v34 = vadd.f32 %v7151_v51, %v1265_v44  ;;  %6066 = vrcp.f32 %v3182_v54  ;;  %v2772_v17 = vsub.f32 %v7207_v28, %v2395_v16  ;;  %v2773_v0 = vsub.f32 %v7209_v4, %v2395_v16 }
 0x209   :  { %10197 = vst [vmem:[#allocation29_spill] sm:$0xff] %v7327_v33  ;;  %v2774_v58 = vsub.f32 %v7216_v46, %v2395_v16  ;;  %6068 = vpow2.f32 %v3038_v3  ;;  %v2775_v56 = vsub.f32 %v7257_v35, %v2395_v16  ;;  %5683 = vmatmul.msk.f32.gmra.mxu1 %vm629_vm2, %v530_v53  ;;  %v7346_v35 = vpop.permute.xlu1 %1920  ;;  %v7349_v46 = vmul.f32 %v6059_v11, %v7198_v49 }
 0x20a   :  { %10198 = vst [vmem:[#allocation30_spill] sm:$0xff] %v7330_v30  ;;  %v2594_v51 = vsel %vm2343_vm3, %v7324_v34, -inf  ;;  %v2912_v26 = vmul.f32 1.442695, %v2772_v17  ;;  %v2914_v14 = vmul.f32 1.442695, %v2773_v0  ;;  %1988 = vperm.xlu2 %5944, %v6796_v43   ;;  %v1927_v0 = vpop.permute.xlu2 %1926 }
 0x20b   :  { %v2916_v13 = vmul.f32 1.442695, %v2774_v58  ;;  %v2595_v48 = vmax.f32 %v2593_v42, %v2594_v51  ;;  %v7342_v28 = vpop.eup %6060  ;;  %v2918_v4 = vmul.f32 1.442695, %v2775_v56  ;;  %1576 = vperm.xlu1 %5948, %v6812_v52   ;;  %5745 = vmatmul.msk.f32.gmra.mxu3 %vm629_vm2, %v592_v15  ;;  %10199 = vst [vmem:[#allocation31_spill] sm:$0xff] %v7349_v46 }
 0x20c   :  { %v7351_v37 = vpop.eup %6062  ;;  %v3378_v43 = vsel %vm2343_vm3, %v7342_v28, 0.0  ;;  %6070 = vpow2.f32 %v2912_v26  ;;  %v465_v20 = vmul.f32 0.2, %v7315_v60  ;;  %v404_v58 = vmul.f32 0.2, %v7355_v10 }
 0x20d   :  { %v7359_v8 = vpop.eup %6064  ;;  %v3379_v9 = vsel %vm2343_vm3, %v7351_v37, 0.0  ;;  %6072 = vpow2.f32 %v2914_v14 }
 0x20e   :  { %v7366_v47 = vpop.eup %6066  ;;  %v3380_v25 = vadd.f32 %v3379_v9, %v3378_v43  ;;  %v3381_v23 = vsel %vm2343_vm3, %v7359_v8, 0.0  ;;  %6074 = vpow2.f32 %v2916_v13  ;;  %v7370_v39 = vpop.f32.mrf.mxu1  ;;  %v593_v16 = vmax.f32 %v7315_v60, %v465_v20 }
 0x20f   :  { %v1268_v61 = vpop.f32.mrf.mxu3  ;;  %v7373_v5 = vpop.eup %6068  ;;  %6076 = vpow2.f32 %v2918_v4  ;;  %v3600_v42 = vmul.f32 %v7366_v47, %v7224_v7  ;;  %v3601_v45 = vmul.f32 %v7366_v47, %v7231_v32  ;;  %v338_v32 = vadd.f32 %v7156_v1, %v6541_v22 }
 0x210   :  { %v7376_v62 = vadd.f32 %v7154_v38, %v1268_v61  ;;  %v3382_v19 = vadd.f32 %v3381_v23, %v3380_v25  ;;  %v3383_v53 = vsel %vm2343_vm3, %v7373_v5, 0.0  ;;  %v7390_v38 = vld [vmem:[%s10095_s1 + $0x8] sm:$0xff]  ;;  %v277_v13 = vadd.f32 %v6710_v59, %v6522_v6 }
 0x211   :  { %5684 = vmatmul.msk.f32.gmra.mxu1 %vm629_vm2, %v531_v50  ;;  %v3724_v11 = vpack.c.bf16 %v3601_v45, %v3600_v42  ;;  %v7393_v7 = vperm.slane %v7390_v38, 1  ;;  %v7418_v4 = vpop.permute.xlu1 %1932  ;;  %v466_v61 = vmul.f32 0.2, %v338_v32  ;;  %v7426_v20 = vadd.f32 %v7156_v1, %v6567_v40 }
 0x212   :  { %v2596_v31 = vsel %vm2343_vm3, %v7376_v62, -inf  ;;  %v7395_v3 = vpop.eup %6070  ;;  %v3384_v15 = vadd.f32 %v3383_v53, %v3382_v19  ;;  %5949 = vset.pattern.permute.xlu2 %v6590_v55  ;;  %v532_v45 = vmax.f32 %v7355_v10, %v404_v58  ;;  %v405_v10 = vmul.f32 0.2, %v277_v13 }
 0x213   :  { %v2597_v54 = vmax.f32 %v2595_v48, %v2596_v31  ;;  %v7401_v44 = vpop.eup %6072  ;;  %v3183_v17 = vsel %vm2343_vm3, %v7395_v3, 0.0  ;;  %5782 = vmatmul.msk.bf16.gmra.mxu0 %vm2343_vm3, %v3724_v11  ;;  %5951 = vset.pattern.permute.xlu1 %v6538_v21  ;;  %v109_v11 = vrot.slane %v6672_v29, 4 }
 0x214   :  { %v7408_v56 = vpop.eup %6074  ;;  %v3385_v51 = vrot.slane %v3384_v15, 4  ;;  %v3184_v26 = vsel %vm2343_vm3, %v7401_v44, 0.0  ;;  %5746 = vmatmul.msk.f32.gmra.mxu3 %vm629_vm2, %v593_v16  ;;  %1645 = vperm.xlu0 %5967, %v7393_v7  }
 0x215   :  { %v2598_v14 = vrot.slane %v2597_v54, 4  ;;  %v7414_v60 = vpop.eup %6076  ;;  %v3185_v48 = vadd.f32 %v3184_v26, %v3183_v17  ;;  %v3186_v9 = vsel %vm2343_vm3, %v7408_v56, 0.0  ;;  %v10200_v26 = vld [vmem:[#allocation21_spill] sm:$0xff] }
 0x216   :  { %v3386_v43 = vadd.f32 %v3385_v51, %v3384_v15  ;;  %v7422_v25 = vpop.f32.mrf.mxu1  ;;  %v3188_v53 = vsel %vm2343_vm3, %v7414_v60, 0.0  ;;  %v7434_v15 = vadd.f32 %v6710_v59, %v6541_v22  ;;  %v594_v51 = vmax.f32 %v338_v32, %v466_v61 }
 0x217   :  { %v2599_v50 = vmax.f32 %v2597_v54, %v2598_v14  ;;  %v1271_v23 = vpop.f32.mrf.mxu3  ;;  %v3187_v42 = vadd.f32 %v3186_v9, %v3185_v48  ;;  %v3602_v14 = vmul.f32 %v7366_v47, %v7242_v36  ;;  %v3603_v48 = vmul.f32 %v7366_v47, %v7248_v2  ;;  %v7452_v36 = vpop.permute.xlu2 %1938 }
 0x218   :  { %v3387_v19 = vrot.slane %v3386_v43, 2  ;;  %v467_v9 = vmul.f32 0.2, %v7426_v20  ;;  %v7450_v32 = vadd.f32 %v6710_v59, %v6567_v40  ;;  %v7455_v2 = vadd.f32 %v7346_v35, %v1271_v23 }
 0x219   :  { %v2600_v31 = vrot.slane %v2599_v50, 2  ;;  %v3189_v54 = vadd.f32 %v3188_v53, %v3187_v42  ;;  %5685 = vmatmul.msk.f32.gmra.mxu1 %vm629_vm2, %v532_v45  ;;  %v7444_v42 = vpop.permute.xlu0 %195  ;;  %v406_v47 = vmul.f32 0.2, %v7434_v15  ;;  %v7460_v61 = vadd.f32 %v7156_v1, %v6672_v29 }
 0x21a   :  { %v3388_v16 = vadd.f32 %v3387_v19, %v3386_v43  ;;  %1582 = vperm.xlu2 %5949, %v6812_v52   ;;  %v141_v52 = vperm.slane %v109_v11, 0 }
 0x21b   :  { %v2601_v17 = vmax.f32 %v2599_v50, %v2600_v31  ;;  %v3190_v58 = vrot.slane %v3189_v54, 4  ;;  %1995 = vperm.xlu1 %5951, %v10200_v26  }
 0x21c   :  { %v3389_v45 = vrot.slane %v3388_v16, 1  ;;  %5747 = vmatmul.msk.f32.gmra.mxu3 %vm629_vm2, %v594_v51  ;;  %5972 = vset.pattern.permute.xlu0 %v6546_v24  ;;  %v533_v51 = vmax.f32 %v277_v13, %v405_v10  ;;  %v2604_v13 = vsel %vm2343_vm3, %v7455_v2, -inf }
 0x21d   :  { %v2602_v43 = vrot.slane %v2601_v17, 1  ;;  %v3191_v50 = vadd.f32 %v3190_v58, %v3189_v54  ;;  %v3725_v54 = vpack.c.bf16 %v3603_v48, %v3602_v14  ;;  %v595_v58 = vmax.f32 %v7426_v20, %v467_v9  ;;  %v1527_v30 = vpop.permute.xlu1 %1526 }
 0x21e   :  { %v3390_v19 = vadd.f32 %v3389_v45, %v3388_v16  ;;  %v7462_v31 = vpop.f32.mrf.mxu1  ;;  %v468_v45 = vmul.f32 0.2, %v7460_v61 }
 0x21f   :  { %v2603_v53 = vmax.f32 %v2601_v17, %v2602_v43  ;;  %v1274_v11 = vpop.f32.mrf.mxu3  ;;  %v3192_v49 = vrot.slane %v3191_v50, 2 }
 0x220   :  { %v7464_v27 = vadd.f32 %v1927_v0, %v1274_v11  ;;  %6078 = vrcp.f32 %v3390_v19  ;;  %v1533_v19 = vpop.permute.xlu2 %1532 }
 0x221   :  { %v2836_v35 = vsub.f32 %v7288_v12, %v2603_v53  ;;  %v2837_v23 = vsub.f32 %v7294_v41, %v2603_v53  ;;  %v2838_v1 = vsub.f32 %v7324_v34, %v2603_v53  ;;  %v3193_v16 = vadd.f32 %v3192_v49, %v3191_v50  ;;  %5686 = vmatmul.msk.f32.gmra.mxu1 %vm629_vm2, %v533_v51  ;;  %v1521_v49 = vpop.permute.xlu0 %1520 }
 0x222   :  { %v2839_v17 = vsub.f32 %v7376_v62, %v2603_v53  ;;  %v2605_v0 = vsel %vm2343_vm3, %v7464_v27, -inf  ;;  %5952 = vset.pattern.permute.xlu2 %v6546_v24  ;;  %v7478_v34 = vadd.f32 %v1527_v30, %v7318_v57  ;;  %v7484_v9 = vadd.f32 %v1521_v49, %v7290_v18 }
 0x223   :  { %v3040_v20 = vmul.f32 1.442695, %v2836_v35  ;;  %v3042_v10 = vmul.f32 1.442695, %v2837_v23  ;;  %v3044_v14 = vmul.f32 1.442695, %v2838_v1  ;;  %v2606_v12 = vmax.f32 %v2604_v13, %v2605_v0  ;;  %5783 = vmatmul.msk.bf16.gmra.mxu0 %vm2343_vm3, %v3725_v54  ;;  %201 = vrot.lane.b32.xlu1 %v141_v52, %s6457_s2 }
 0x224   :  { %v3194_v41 = vrot.slane %v3193_v16, 1  ;;  %v3046_v62 = vmul.f32 1.442695, %v2839_v17  ;;  %5748 = vmatmul.msk.f32.gmra.mxu3 %vm629_vm2, %v595_v58  ;;  %v534_v50 = vmax.f32 %v7434_v15, %v406_v47  ;;  %v407_v52 = vmul.f32 0.2, %v7450_v32  ;;  %v10205_v17 = vld [vmem:[#allocation23_spill] sm:$0xff] }
 0x225   :  { %6080 = vpow2.f32 %v3040_v20  ;;  %v2397_v53 = vsel %vm2343_vm3, %v7478_v34, -inf  ;;  %v341_v47 = vadd.f32 %v7444_v42, %v6522_v6 }
 0x226   :  { %v3195_v48 = vadd.f32 %v3194_v41, %v3193_v16  ;;  %6082 = vpow2.f32 %v3042_v10  ;;  %v6079_v43 = vpop.eup %6078  ;;  %v7487_v57 = vpop.f32.mrf.mxu1  ;;  %v280_v10 = vadd.f32 %v6710_v59, %v6672_v29  ;;  %v535_v41 = vmax.f32 %v7450_v32, %v407_v52 }
 0x227   :  { %6084 = vpow2.f32 %v3044_v14  ;;  %v1277_v30 = vpop.f32.mrf.mxu3  ;;  %v7497_v11 = vmul.f32 %v6079_v43, %v7342_v28  ;;  %v7500_v51 = vmul.f32 %v6079_v43, %v7351_v37  ;;  %v7503_v54 = vmul.f32 %v6079_v43, %v7359_v8 }
 0x228   :  { %6086 = vrcp.f32 %v3195_v48  ;;  %v7494_v18 = vadd.f32 %v7418_v4, %v1277_v30  ;;  %v7506_v15 = vmul.f32 %v6079_v43, %v7373_v5  ;;  %v2396_v4 = vsel %vm2343_vm3, %v7484_v9, -inf }
 0x229   :  { %10201 = vst [vmem:[#allocation21_spill] sm:$0xff] %v7497_v11  ;;  %6088 = vpow2.f32 %v3046_v62  ;;  %5687 = vmatmul.msk.f32.gmra.mxu1 %vm629_vm2, %v534_v50  ;;  %v596_v37 = vmax.f32 %v7460_v61, %v468_v45  ;;  %v7519_v8 = vadd.f32 %v1533_v19, %v7370_v39  ;;  %v2398_v61 = vmax.f32 %v2396_v4, %v2397_v53 }
 0x22a   :  { %10202 = vst [vmem:[#allocation32_spill] sm:$0xff] %v7500_v51  ;;  %v2607_v28 = vsel %vm2343_vm3, %v7494_v18, -inf  ;;  %2001 = vperm.xlu2 %5952, %v10200_v26   ;;  %v469_v14 = vmul.f32 0.2, %v341_v47  ;;  %v342_v53 = vadd.f32 %v7444_v42, %v6541_v22 }
 0x22b   :  { %10203 = vst [vmem:[#allocation33_spill] sm:$0xff] %v7503_v54  ;;  %v7516_v58 = vpop.eup %6080  ;;  %v2608_v5 = vmax.f32 %v2606_v12, %v2607_v28  ;;  %1595 = vperm.xlu1 %5951, %v10205_v17   ;;  %v2399_v48 = vsel %vm2343_vm3, %v7519_v8, -inf  ;;  %v7582_v54 = vperm.slane %v7390_v38, 2 }
 0x22c   :  { %10204 = vst [vmem:[#allocation34_spill] sm:$0xff] %v7506_v15  ;;  %v7526_v1 = vpop.eup %6082  ;;  %v3391_v16 = vsel %vm2343_vm3, %v7516_v58, 0.0  ;;  %5749 = vmatmul.msk.f32.gmra.mxu3 %vm629_vm2, %v596_v37  ;;  %v2400_v19 = vmax.f32 %v2398_v61, %v2399_v48  ;;  %v408_v48 = vmul.f32 0.2, %v280_v10  ;;  %v343_v15 = vadd.f32 %v7444_v42, %v6567_v40 }
 0x22d   :  { %v7531_v13 = vpop.eup %6084  ;;  %v3392_v39 = vsel %vm2343_vm3, %v7526_v1, 0.0  ;;  %v1539_v0 = vpop.permute.xlu1 %1538 }
 0x22e   :  { %v6087_v20 = vpop.eup %6086  ;;  %v3393_v12 = vadd.f32 %v3392_v39, %v3391_v16  ;;  %v3394_v62 = vsel %vm2343_vm3, %v7531_v13, 0.0  ;;  %v7546_v45 = vadd.f32 %v1539_v0, %v7422_v25  ;;  %v7548_v43 = vpop.f32.mrf.mxu1  ;;  %v597_v39 = vmax.f32 %v341_v47, %v469_v14 }
 0x22f   :  { %v7539_v49 = vpop.eup %6088  ;;  %v1280_v30 = vpop.f32.mrf.mxu3  ;;  %v3604_v59 = vmul.f32 %v6087_v20, %v7395_v3  ;;  %v3605_v52 = vmul.f32 %v6087_v20, %v7401_v44  ;;  %v7564_v3 = vld [vmem:[%s10095_s1 + $0x18] sm:$0xff] }
 0x230   :  { %v3395_v50 = vadd.f32 %v3394_v62, %v3393_v12  ;;  %v7552_v32 = vadd.f32 %v7452_v36, %v1280_v30  ;;  %v3396_v4 = vsel %vm2343_vm3, %v7539_v49, 0.0  ;;  %v2401_v25 = vsel %vm2343_vm3, %v7546_v45, -inf  ;;  %v10206_v62 = vld [vmem:[#allocation5_spill] sm:$0xff] }
 0x231   :  { %v7567_v28 = vperm.slane %v7564_v3, 2  ;;  %v2402_v37 = vmax.f32 %v2400_v19, %v2401_v25  ;;  %5688 = vmatmul.msk.f32.gmra.mxu1 %vm629_vm2, %v535_v41  ;;  %v3726_v16 = vpack.c.bf16 %v3605_v52, %v3604_v59  ;;  %v10207_v30 = vld [vmem:[#allocation9_spill] sm:$0xff]  ;;  %v470_v41 = vmul.f32 0.2, %v342_v53  ;;  %v1946_v52 = vpop.permute.xlu2 %1945 }
 0x232   :  { %v3397_v36 = vadd.f32 %v3396_v4, %v3395_v50  ;;  %v2609_v44 = vsel %vm2343_vm3, %v7552_v32, -inf  ;;  %5953 = vset.pattern.permute.xlu2 %v6590_v55  ;;  %v281_v50 = vadd.f32 %v10207_v30, %v6522_v6 }
 0x233   :  { %v2610_v61 = vmax.f32 %v2608_v5, %v2609_v44  ;;  %2076 = vperm.xlu0 %5972, %v7567_v28   ;;  %v2403_v12 = vrot.slane %v2402_v37, 4  ;;  %5784 = vmatmul.msk.bf16.gmra.mxu0 %vm2343_vm3, %v3726_v16  ;;  %v536_v16 = vmax.f32 %v280_v10, %v408_v48  ;;  %v3606_v10 = vmul.f32 %v6087_v20, %v7408_v56 }
 0x234   :  { %v3398_v0 = vrot.slane %v3397_v36, 4  ;;  %5956 = vset.pattern.permute.xlu1 %v10206_v62  ;;  %5750 = vmatmul.msk.f32.gmra.mxu3 %vm629_vm2, %v597_v39  ;;  %v409_v35 = vmul.f32 0.2, %v281_v50 }
 0x235   :  { %v2611_v19 = vrot.slane %v2610_v61, 4  ;;  %v2404_v59 = vmax.f32 %v2402_v37, %v2403_v12 }
 0x236   :  { %v3399_v5 = vadd.f32 %v3398_v0, %v3397_v36  ;;  %v7579_v14 = vpop.f32.mrf.mxu1  ;;  %v598_v36 = vmax.f32 %v342_v53, %v470_v41  ;;  %v3607_v0 = vmul.f32 %v6087_v20, %v7414_v60  ;;  %v537_v60 = vmax.f32 %v281_v50, %v409_v35 }
 0x237   :  { %v2612_v47 = vmax.f32 %v2610_v61, %v2611_v19  ;;  %v1283_v4 = vpop.f32.mrf.mxu3  ;;  %v2405_v44 = vrot.slane %v2404_v59, 2  ;;  %v7587_v61 = vpop.permute.xlu1 %197  ;;  %v7596_v19 = vadd.f32 %v10207_v30, %v6541_v22  ;;  %v471_v20 = vmul.f32 0.2, %v343_v15 }
 0x238   :  { %v3400_v25 = vrot.slane %v3399_v5, 2 }
 0x239   :  { %v2613_v23 = vrot.slane %v2612_v47, 2  ;;  %v2406_v11 = vmax.f32 %v2404_v59, %v2405_v44  ;;  %5689 = vmatmul.msk.f32.gmra.mxu1 %vm629_vm2, %v536_v16 }
 0x23a   :  { %v3401_v39 = vadd.f32 %v3400_v25, %v3399_v5  ;;  %2007 = vperm.xlu2 %5953, %v10200_v26   ;;  %v7601_v26 = vadd.f32 %v7444_v42, %v6672_v29  ;;  %v7603_v5 = vadd.f32 %v1946_v52, %v1283_v4  ;;  %v3727_v25 = vpack.c.bf16 %v3607_v0, %v3606_v10  ;;  %v1958_v52 = vpop.permute.xlu2 %1957 }
 0x23b   :  { %v2614_v37 = vmax.f32 %v2612_v47, %v2613_v23  ;;  %1676 = vperm.xlu0 %5972, %v7582_v54   ;;  %v2407_v48 = vrot.slane %v2406_v11, 1 }
 0x23c   :  { %v3402_v12 = vrot.slane %v3401_v39, 1  ;;  %1613 = vperm.xlu1 %5956, %v10205_v17   ;;  %5751 = vmatmul.msk.f32.gmra.mxu3 %vm629_vm2, %v598_v36  ;;  %v472_v0 = vmul.f32 0.2, %v7601_v26 }
 0x23d   :  { %v2615_v53 = vrot.slane %v2614_v37, 1  ;;  %v2408_v23 = vmax.f32 %v2406_v11, %v2407_v48 }
 0x23e   :  { %v3403_v56 = vadd.f32 %v3402_v12, %v3401_v39  ;;  %v7605_v59 = vpop.f32.mrf.mxu1 }
 0x23f   :  { %v2616_v41 = vmax.f32 %v2614_v37, %v2615_v53  ;;  %v1286_v47 = vpop.f32.mrf.mxu3  ;;  %v2776_v44 = vsub.f32 %v7484_v9, %v2408_v23  ;;  %v2777_v16 = vsub.f32 %v7478_v34, %v2408_v23  ;;  %v2778_v36 = vsub.f32 %v7519_v8, %v2408_v23  ;;  %v1952_v9 = vpop.permute.xlu0 %1951 }
 0x240   :  { %6090 = vrcp.f32 %v3403_v56  ;;  %v2779_v42 = vsub.f32 %v7546_v45, %v2408_v23  ;;  %v7618_v34 = vadd.f32 %v10207_v30, %v6567_v40  ;;  %v7624_v45 = vadd.f32 %v1952_v9, %v1286_v47 }
 0x241   :  { %v2840_v11 = vsub.f32 %v7455_v2, %v2616_v41  ;;  %v2841_v35 = vsub.f32 %v7464_v27, %v2616_v41  ;;  %v2842_v50 = vsub.f32 %v7494_v18, %v2616_v41  ;;  %v2920_v4 = vmul.f32 1.442695, %v2776_v44  ;;  %5690 = vmatmul.msk.f32.gmra.mxu1 %vm629_vm2, %v537_v60  ;;  %v7621_v27 = vpop.permute.xlu1 %1963 }
 0x242   :  { %v2922_v39 = vmul.f32 1.442695, %v2777_v16  ;;  %v2924_v37 = vmul.f32 1.442695, %v2778_v36  ;;  %v2843_v10 = vsub.f32 %v7552_v32, %v2616_v41  ;;  %v2926_v8 = vmul.f32 1.442695, %v2779_v42  ;;  %5954 = vset.pattern.permute.xlu2 %v6546_v24 }
 0x243   :  { %v599_v2 = vmax.f32 %v343_v15, %v471_v20  ;;  %5977 = vset.pattern.permute.xlu0 %v6538_v21  ;;  %6092 = vpow2.f32 %v2920_v4  ;;  %v3048_v18 = vmul.f32 1.442695, %v2840_v11  ;;  %5785 = vmatmul.msk.bf16.gmra.mxu0 %vm2343_vm3, %v3727_v25  ;;  %v410_v32 = vmul.f32 0.2, %v7596_v19 }
 0x244   :  { %5958 = vset.pattern.permute.xlu1 %v6546_v24  ;;  %6094 = vpow2.f32 %v2922_v39  ;;  %v3050_v12 = vmul.f32 1.442695, %v2841_v35  ;;  %v2617_v15 = vsel %vm2343_vm3, %v7603_v5, -inf  ;;  %v3052_v53 = vmul.f32 1.442695, %v2842_v50  ;;  %v1546_v39 = vpop.permute.xlu2 %1545 }
 0x245   :  { %5752 = vmatmul.msk.f32.gmra.mxu3 %vm629_vm2, %v599_v2  ;;  %6096 = vpow2.f32 %v2924_v37  ;;  %v3054_v56 = vmul.f32 1.442695, %v2843_v10  ;;  %v2618_v23 = vsel %vm2343_vm3, %v7624_v45, -inf  ;;  %v538_v16 = vmax.f32 %v7596_v19, %v410_v32 }
 0x246   :  { %v6091_v48 = vpop.eup %6090  ;;  %6098 = vpow2.f32 %v2926_v8  ;;  %v2619_v60 = vmax.f32 %v2617_v15, %v2618_v23  ;;  %v7635_v20 = vpop.f32.mrf.mxu1  ;;  %v411_v42 = vmul.f32 0.2, %v7618_v34  ;;  %v7651_v11 = vperm.slane %v7564_v3, 3 }
 0x247   :  { %v1289_v41 = vpop.f32.mrf.mxu3  ;;  %v7638_v47 = vmul.f32 %v6091_v48, %v7516_v58  ;;  %v7641_v25 = vmul.f32 %v6091_v48, %v7526_v1  ;;  %6100 = vpow2.f32 %v3048_v18  ;;  %v7647_v36 = vmul.f32 %v6091_v48, %v7531_v13 }
 0x248   :  { %v7643_v44 = vadd.f32 %v1958_v52, %v1289_v41  ;;  %6102 = vpow2.f32 %v3050_v12  ;;  %10211 = vst [vmem:[#allocation36_spill] sm:$0xff] %v7651_v11  ;;  %v600_v13 = vmax.f32 %v7601_v26, %v472_v0  ;;  %v7662_v19 = vmul.f32 %v6091_v48, %v7539_v49  ;;  %v10213_v26 = vld [vmem:[#allocation25_spill] sm:$0xff]  ;;  %v1552_v0 = vpop.permute.xlu0 %1551 }
 0x249   :  { %10208 = vst [vmem:[#allocation23_spill] sm:$0xff] %v7638_v47  ;;  %v7655_v35 = vpop.eup %6092  ;;  %6104 = vpow2.f32 %v3052_v53  ;;  %5691 = vmatmul.msk.f32.gmra.mxu1 %vm629_vm2, %v538_v16  ;;  %v345_v4 = vadd.f32 %v7587_v61, %v6522_v6  ;;  %v7689_v15 = vadd.f32 %v1546_v39, %v7462_v31  ;;  %v539_v48 = vmax.f32 %v7618_v34, %v411_v42 }
 0x24a   :  { %10209 = vst [vmem:[#allocation9_spill] sm:$0xff] %v7641_v25  ;;  %v2620_v1 = vsel %vm2343_vm3, %v7643_v44, -inf  ;;  %v7664_v50 = vpop.eup %6094  ;;  %v3196_v52 = vsel %vm2343_vm3, %v7655_v35, 0.0  ;;  %6106 = vpow2.f32 %v3054_v56  ;;  %1601 = vperm.xlu2 %5954, %v10205_v17   ;;  %v284_v17 = vadd.f32 %v10207_v30, %v6672_v29 }
 0x24b   :  { %10210 = vst [vmem:[#allocation35_spill] sm:$0xff] %v7647_v36  ;;  %v2621_v37 = vmax.f32 %v2619_v60, %v2620_v1  ;;  %2095 = vperm.xlu0 %5977, %v7651_v11   ;;  %v7672_v10 = vpop.eup %6096  ;;  %v3197_v49 = vsel %vm2343_vm3, %v7664_v50, 0.0  ;;  %v7695_v56 = vadd.f32 %v1552_v0, %v7487_v57  ;;  %v473_v16 = vmul.f32 0.2, %v345_v4 }
 0x24c   :  { %10212 = vst [vmem:[#allocation37_spill] sm:$0xff] %v7662_v19  ;;  %2026 = vperm.xlu1 %5958, %v10213_v26   ;;  %v7679_v8 = vpop.eup %6098  ;;  %v3198_v2 = vadd.f32 %v3197_v49, %v3196_v52  ;;  %v3199_v12 = vsel %vm2343_vm3, %v7672_v10, 0.0  ;;  %v346_v0 = vadd.f32 %v7587_v61, %v6541_v22 }
 0x24d   :  { %5753 = vmatmul.msk.f32.gmra.mxu3 %vm629_vm2, %v600_v13  ;;  %v1558_v18 = vpop.permute.xlu1 %1557  ;;  %v7682_v32 = vpop.eup %6100  ;;  %v3201_v31 = vsel %vm2343_vm3, %v7679_v8, 0.0 }
 0x24e   :  { %v7692_v53 = vpop.eup %6102  ;;  %v3200_v23 = vadd.f32 %v3199_v12, %v3198_v2  ;;  %v3404_v60 = vsel %vm2343_vm3, %v7682_v32, 0.0  ;;  %v7699_v41 = vpop.f32.mrf.mxu1  ;;  %v7708_v42 = vadd.f32 %v1558_v18, %v7548_v43  ;;  %v2409_v12 = vsel %vm2343_vm3, %v7689_v15, -inf }
 0x24f   :  { %v1292_v30 = vpop.f32.mrf.mxu3  ;;  %v7701_v1 = vpop.eup %6104  ;;  %v3405_v34 = vsel %vm2343_vm3, %v7692_v53, 0.0 }
 0x250   :  { %v7711_v57 = vadd.f32 %v7621_v27, %v1292_v30  ;;  %v7713_v13 = vpop.f32.mrf.mxu0  ;;  %v7715_v52 = vpop.eup %6106  ;;  %v3202_v39 = vadd.f32 %v3201_v31, %v3200_v23  ;;  %v3406_v49 = vadd.f32 %v3405_v34, %v3404_v60  ;;  %v3407_v2 = vsel %vm2343_vm3, %v7701_v1, 0.0 }
 0x251   :  { %5692 = vmatmul.msk.f32.gmra.mxu1 %vm629_vm2, %v539_v48  ;;  %v601_v23 = vmax.f32 %v345_v4, %v473_v16  ;;  %v2410_v60 = vsel %vm2343_vm3, %v7695_v56, -inf  ;;  %v3409_v31 = vsel %vm2343_vm3, %v7715_v52, 0.0  ;;  %v2412_v34 = vsel %vm2343_vm3, %v7708_v42, -inf }
 0x252   :  { %v2622_v43 = vsel %vm2343_vm3, %v7711_v57, -inf  ;;  %v3203_v27 = vrot.slane %v3202_v39, 4  ;;  %v3408_v18 = vadd.f32 %v3407_v2, %v3406_v49  ;;  %5957 = vset.pattern.permute.xlu2 %v6538_v21  ;;  %v412_v48 = vmul.f32 0.2, %v284_v17 }
 0x253   :  { %v2623_v30 = vmax.f32 %v2621_v37, %v2622_v43  ;;  %5982 = vset.pattern.permute.xlu0 %v6546_v24  ;;  %v2411_v37 = vmax.f32 %v2409_v12, %v2410_v60  ;;  %v474_v43 = vmul.f32 0.2, %v346_v0  ;;  %v7747_v12 = vadd.f32 %v7587_v61, %v6567_v40 }
 0x254   :  { %5959 = vset.pattern.permute.xlu1 %v10206_v62  ;;  %v3204_v9 = vadd.f32 %v3203_v27, %v3202_v39  ;;  %v3410_v49 = vadd.f32 %v3409_v31, %v3408_v18  ;;  %v1564_v4 = vpop.permute.xlu2 %1563  ;;  %v10214_v39 = vld [vmem:[#allocation8_spill] sm:$0xff] }
 0x255   :  { %v2624_v2 = vrot.slane %v2623_v30, 4  ;;  %5754 = vmatmul.msk.f32.gmra.mxu3 %vm629_vm2, %v601_v23  ;;  %v7737_v16 = vadd.f32 %v1564_v4, %v7579_v14  ;;  %v2413_v19 = vmax.f32 %v2411_v37, %v2412_v34  ;;  %v285_v27 = vadd.f32 %v10214_v39, %v6522_v6 }
 0x256   :  { %v3205_v58 = vrot.slane %v3204_v9, 2  ;;  %v3411_v36 = vrot.slane %v3410_v49, 4  ;;  %v7739_v25 = vpop.f32.mrf.mxu1  ;;  %v540_v23 = vmax.f32 %v284_v17, %v412_v48  ;;  %v7753_v37 = vadd.f32 %v10214_v39, %v6541_v22 }
 0x257   :  { %v2625_v47 = vmax.f32 %v2623_v30, %v2624_v2  ;;  %v7741_v51 = vpop.f32.mrf.mxu3  ;;  %v2414_v14 = vsel %vm2343_vm3, %v7737_v16, -inf  ;;  %v602_v2 = vmax.f32 %v346_v0, %v474_v43  ;;  %v110_v4 = vrot.slane %v6672_v29, 5 }
 0x258   :  { %v3992_v18 = vpop.f32.mrf.mxu0  ;;  %v3206_v60 = vadd.f32 %v3205_v58, %v3204_v9  ;;  %v3412_v31 = vadd.f32 %v3411_v36, %v3410_v49  ;;  %v2415_v30 = vmax.f32 %v2413_v19, %v2414_v14  ;;  %v413_v36 = vmul.f32 0.2, %v285_v27 }
 0x259   :  { %v2626_v34 = vrot.slane %v2625_v47, 2  ;;  %5693 = vmatmul.msk.f32.gmra.mxu1 %vm629_vm2, %v540_v23  ;;  %v4311_v58 = vmul.f32 %v3992_v18, %v6541_v22  ;;  %v475_v19 = vmul.f32 0.2, %v7747_v12  ;;  %v7762_v9 = vperm.slane %v7390_v38, 3 }
 0x25a   :  { %v3207_v46 = vrot.slane %v3206_v60, 1  ;;  %v3413_v63 = vrot.slane %v3412_v31, 2  ;;  %v2416_v11 = vrot.slane %v2415_v30, 4  ;;  %2020 = vperm.xlu2 %5957, %v10213_v26   ;;  %v4310_v43 = vmul.f32 %v7713_v13, %v6522_v6 }
 0x25b   :  { %v2627_v33 = vmax.f32 %v2625_v47, %v2626_v34  ;;  %10215 = vst [vmem:[#allocation25_spill] sm:$0xff] %v7762_v9  ;;  %v7767_v47 = vadd.f32 %v10214_v39, %v6567_v40  ;;  %v7772_v14 = vmul.f32 0.2, %v7753_v37  ;;  %1701 = vperm.xlu0 %5982, %v7762_v9   ;;  %v7779_v23 = vadd.f32 %v7587_v61, %v6672_v29 }
 0x25c   :  { %2038 = vperm.xlu1 %5959, %v10213_v26   ;;  %v3208_v17 = vadd.f32 %v3207_v46, %v3206_v60  ;;  %v3414_v0 = vadd.f32 %v3413_v63, %v3412_v31  ;;  %v2417_v49 = vmax.f32 %v2415_v30, %v2416_v11  ;;  %v142_v26 = vperm.slane %v110_v4, 0 }
 0x25d   :  { %v2628_v48 = vrot.slane %v2627_v33, 1  ;;  %5755 = vmatmul.msk.f32.gmra.mxu3 %vm629_vm2, %v602_v2  ;;  %v4439_v60 = vsel %vm629_vm2, %v4311_v58, 0.0  ;;  %v541_v31 = vmax.f32 %v285_v27, %v413_v36  ;;  %v603_v34 = vmax.f32 %v7747_v12, %v475_v19  ;;  %v1977_v19 = vpop.permute.xlu1 %1976 }
 0x25e   :  { %6108 = vrcp.f32 %v3208_v17  ;;  %v3415_v46 = vrot.slane %v3414_v0, 1  ;;  %v2418_v38 = vrot.slane %v2417_v49, 2  ;;  %v7775_v11 = vpop.f32.mrf.mxu1 }
 0x25f   :  { %v2629_v63 = vmax.f32 %v2627_v33, %v2628_v48  ;;  %v1298_v18 = vpop.f32.mrf.mxu3  ;;  %v4438_v48 = vsel %vm629_vm2, %v4310_v43, 0.0 }
 0x260   :  { %v3995_v13 = vpop.f32.mrf.mxu0  ;;  %v3416_v30 = vadd.f32 %v3415_v46, %v3414_v0  ;;  %v2419_v9 = vmax.f32 %v2417_v49, %v2418_v38  ;;  %v4440_v12 = vadd.f32 %v4439_v60, %v4438_v48  ;;  %v7799_v49 = vmul.f32 0.2, %v7767_v47 }
 0x261   :  { %v2844_v2 = vsub.f32 %v7603_v5, %v2629_v63  ;;  %v2845_v4 = vsub.f32 %v7624_v45, %v2629_v63  ;;  %v2846_v33 = vsub.f32 %v7643_v44, %v2629_v63  ;;  %v2847_v17 = vsub.f32 %v7711_v57, %v2629_v63  ;;  %5694 = vmatmul.msk.f32.gmra.mxu1 %vm629_vm2, %v541_v31 }
 0x262   :  { %v4312_v61 = vmul.f32 %v3995_v13, %v6567_v40  ;;  %203 = vrot.lane.b32.xlu2 %v142_v26, %s6457_s2  ;;  %6110 = vrcp.f32 %v3416_v30  ;;  %v2420_v45 = vrot.slane %v2419_v9, 1  ;;  %v7801_v26 = vpop.permute.xlu2 %199  ;;  %v542_v63 = vmax.f32 %v7753_v37, %v7772_v14 }
 0x263   :  { %v3056_v58 = vmul.f32 1.442695, %v2844_v2  ;;  %v3058_v27 = vmul.f32 1.442695, %v2845_v4  ;;  %v3060_v36 = vmul.f32 1.442695, %v2846_v33  ;;  %5987 = vset.pattern.permute.xlu0 %v6590_v55  ;;  %v7808_v38 = vadd.f32 %v1977_v19, %v1298_v18 }
 0x264   :  { %v3062_v5 = vmul.f32 1.442695, %v2847_v17  ;;  %v4441_v44 = vsel %vm629_vm2, %v4312_v61, 0.0  ;;  %5961 = vset.pattern.permute.xlu1 %v6590_v55  ;;  %v7793_v57 = vpop.eup %6108  ;;  %v2421_v43 = vmax.f32 %v2419_v9, %v2420_v45  ;;  %v476_v9 = vmul.f32 0.2, %v7779_v23 }
 0x265   :  { %6112 = vpow2.f32 %v3056_v58  ;;  %v7795_v0 = vadd.f32 %v4441_v44, %v4440_v12  ;;  %5756 = vmatmul.msk.f32.gmra.mxu3 %vm629_vm2, %v603_v34  ;;  %v3608_v46 = vmul.f32 %v7793_v57, %v7655_v35  ;;  %v3609_v31 = vmul.f32 %v7793_v57, %v7664_v50  ;;  %v1971_v34 = vpop.permute.xlu0 %1970 }
 0x266   :  { %6114 = vpow2.f32 %v3058_v27  ;;  %v7810_v60 = vpop.f32.mrf.mxu1  ;;  %v2780_v35 = vsub.f32 %v7689_v15, %v2421_v43  ;;  %v2781_v30 = vsub.f32 %v7695_v56, %v2421_v43  ;;  %v2782_v37 = vsub.f32 %v7708_v42, %v2421_v43 }
 0x267   :  { %10216 = vst [vmem:[#allocation8_spill] sm:$0xff] %v7795_v0  ;;  %6116 = vpow2.f32 %v3060_v36  ;;  %v1301_v13 = vpop.f32.mrf.mxu3  ;;  %v2783_v18 = vsub.f32 %v7737_v16, %v2421_v43  ;;  %v7822_v2 = vadd.f32 %v1971_v34, %v7741_v51  ;;  %v3728_v4 = vpack.c.bf16 %v3609_v31, %v3608_v46  ;;  %v10217_v51 = vld [vmem:[#allocation26_spill] sm:$0xff] }
 0x268   :  { %6118 = vpow2.f32 %v3062_v5  ;;  %v7818_v14 = vpop.f32.mrf.mxu0  ;;  %v6111_v33 = vpop.eup %6110  ;;  %v2928_v50 = vmul.f32 1.442695, %v2780_v35  ;;  %v2930_v17 = vmul.f32 1.442695, %v2781_v30  ;;  %v2932_v48 = vmul.f32 1.442695, %v2782_v37 }
 0x269   :  { %v7826_v61 = vadd.f32 %v7801_v26, %v6522_v6  ;;  %5695 = vmatmul.msk.f32.gmra.mxu1 %vm629_vm2, %v542_v63  ;;  %v7833_v56 = vadd.f32 %v10214_v39, %v6672_v29  ;;  %v2934_v42 = vmul.f32 1.442695, %v2783_v18  ;;  %5786 = vmatmul.msk.bf16.gmra.mxu0 %vm2343_vm3, %v3728_v4  ;;  %v604_v16 = vmax.f32 %v7779_v23, %v476_v9 }
 0x26a   :  { %1620 = vperm.xlu2 %5957, %v10217_v51   ;;  %6120 = vpow2.f32 %v2928_v50  ;;  %v2631_v36 = vsel %vm2343_vm3, %v7808_v38, -inf  ;;  %v543_v39 = vmax.f32 %v7767_v47, %v7799_v49  ;;  %v7853_v23 = vmul.f32 %v6111_v33, %v7682_v32  ;;  %v1989_v43 = vpop.permute.xlu2 %1988 }
 0x26b   :  { %v7829_v15 = vpop.eup %6112  ;;  %6122 = vpow2.f32 %v2930_v17  ;;  %v7856_v45 = vmul.f32 %v6111_v33, %v7692_v53  ;;  %v2630_v47 = vsel %vm2343_vm3, %v7822_v2, -inf  ;;  %v477_v49 = vmul.f32 0.2, %v7826_v61 }
 0x26c   :  { %v7838_v58 = vpop.eup %6114  ;;  %v3417_v27 = vsel %vm2343_vm3, %v7829_v15, 0.0  ;;  %1632 = vperm.xlu1 %5961, %v10217_v51   ;;  %10218 = vst [vmem:[#allocation26_spill] sm:$0xff] %v7853_v23  ;;  %6124 = vpow2.f32 %v2932_v48  ;;  %v2632_v35 = vmax.f32 %v2630_v47, %v2631_v36  ;;  %v416_v18 = vmul.f32 0.2, %v7833_v56 }
 0x26d   :  { %v7847_v12 = vpop.eup %6116  ;;  %v3418_v5 = vsel %vm2343_vm3, %v7838_v58, 0.0  ;;  %5757 = vmatmul.msk.f32.gmra.mxu3 %vm629_vm2, %v604_v16  ;;  %10219 = vst [vmem:[#allocation38_spill] sm:$0xff] %v7856_v45  ;;  %v1983_v46 = vpop.permute.xlu1 %1982  ;;  %6126 = vpow2.f32 %v2934_v42  ;;  %v7879_v50 = vmul.f32 %v6111_v33, %v7701_v1  ;;  %v7882_v17 = vmul.f32 %v6111_v33, %v7715_v52  ;;  %v10222_v42 = vld [vmem:[#allocation13_spill] sm:$0xff] }
 0x26e   :  { %v7858_v44 = vpop.eup %6118  ;;  %v3419_v19 = vadd.f32 %v3418_v5, %v3417_v27  ;;  %v3420_v63 = vsel %vm2343_vm3, %v7847_v12, 0.0  ;;  %v7865_v32 = vadd.f32 %v1983_v46, %v1301_v13  ;;  %v7867_v31 = vpop.f32.mrf.mxu1  ;;  %v7888_v16 = vadd.f32 %v10222_v42, %v6522_v6 }
 0x26f   :  { %v1304_v53 = vpop.f32.mrf.mxu3  ;;  %v3422_v4 = vsel %vm2343_vm3, %v7858_v44, 0.0  ;;  %10220 = vst [vmem:[#allocation39_spill] sm:$0xff] %v7879_v50  ;;  %v350_v36 = vadd.f32 %v7801_v26, %v6541_v22  ;;  %v1571_v1 = vpop.permute.xlu0 %1570  ;;  %v605_v47 = vmax.f32 %v7826_v61, %v477_v49  ;;  %v3610_v61 = vmul.f32 %v7793_v57, %v7672_v10 }
 0x270   :  { %v3421_v34 = vadd.f32 %v3420_v63, %v3419_v19  ;;  %v7871_v30 = vadd.f32 %v1989_v43, %v1304_v53  ;;  %v4000_v37 = vpop.f32.mrf.mxu0  ;;  %v2633_v13 = vsel %vm2343_vm3, %v7865_v32, -inf  ;;  %10221 = vst [vmem:[#allocation40_spill] sm:$0xff] %v7882_v17  ;;  %v7884_v48 = vpop.eup %6120  ;;  %v3611_v49 = vmul.f32 %v7793_v57, %v7679_v8 }
 0x271   :  { %v2634_v5 = vmax.f32 %v2632_v35, %v2633_v13  ;;  %5696 = vmatmul.msk.f32.gmra.mxu1 %vm629_vm2, %v543_v39  ;;  %v7893_v19 = vpop.eup %6122  ;;  %v3209_v52 = vsel %vm2343_vm3, %v7884_v48, 0.0 }
 0x272   :  { %v3423_v27 = vadd.f32 %v3422_v4, %v3421_v34  ;;  %v2635_v33 = vsel %vm2343_vm3, %v7871_v30, -inf  ;;  %5962 = vset.pattern.permute.xlu2 %v10206_v62  ;;  %v7903_v46 = vpop.eup %6124  ;;  %v3210_v39 = vsel %vm2343_vm3, %v7893_v19, 0.0  ;;  %v3729_v17 = vpack.c.bf16 %v3611_v49, %v3610_v61 }
 0x273   :  { %v2636_v53 = vmax.f32 %v2634_v5, %v2635_v33  ;;  %v7908_v34 = vpop.eup %6126  ;;  %v3211_v35 = vadd.f32 %v3210_v39, %v3209_v52  ;;  %v3212_v13 = vsel %vm2343_vm3, %v7903_v46, 0.0  ;;  %v544_v5 = vmax.f32 %v7833_v56, %v416_v18 }
 0x274   :  { %v3424_v63 = vrot.slane %v3423_v27, 4  ;;  %5963 = vset.pattern.permute.xlu1 %v6538_v21  ;;  %v7920_v33 = vadd.f32 %v10222_v42, %v6541_v22  ;;  %v417_v52 = vmul.f32 0.2, %v7888_v16  ;;  %v478_v39 = vmul.f32 0.2, %v350_v36 }
 0x275   :  { %5758 = vmatmul.msk.f32.gmra.mxu3 %vm629_vm2, %v605_v47  ;;  %v2637_v43 = vrot.slane %v2636_v53, 4  ;;  %v3213_v47 = vadd.f32 %v3212_v13, %v3211_v35  ;;  %v3214_v57 = vsel %vm2343_vm3, %v7908_v34, 0.0  ;;  %v7930_v56 = vperm.slane %v7564_v3, 1 }
 0x276   :  { %v3425_v4 = vadd.f32 %v3424_v63, %v3423_v27  ;;  %v7923_v9 = vpop.f32.mrf.mxu1  ;;  %v7933_v18 = vadd.f32 %v1571_v1, %v7605_v59  ;;  %v7936_v35 = vperm.slane %v7564_v3, 4  ;;  %v606_v59 = vmax.f32 %v350_v36, %v478_v39 }
 0x277   :  { %v7925_v10 = vpop.f32.mrf.mxu3  ;;  %v2638_v27 = vmax.f32 %v2636_v53, %v2637_v43  ;;  %v3215_v50 = vadd.f32 %v3214_v57, %v3213_v47  ;;  %v351_v43 = vadd.f32 %v7801_v26, %v6567_v40  ;;  %v4314_v3 = vmul.f32 %v4000_v37, %v6522_v6  ;;  %v1589_v49 = vpop.permute.xlu0 %1588 }
 0x278   :  { %v3426_v8 = vrot.slane %v3425_v4, 2  ;;  %v4002_v63 = vpop.f32.mrf.mxu0  ;;  %2132 = vperm.xlu0 %5987, %v7936_v35   ;;  %v7948_v61 = vmul.f32 0.2, %v7920_v33  ;;  %v7955_v37 = vadd.f32 %v1589_v49, %v7739_v25  ;;  %v7960_v57 = vadd.f32 %v7801_v26, %v6672_v29 }
 0x279   :  { %v2639_v23 = vrot.slane %v2638_v27, 2  ;;  %v4315_v45 = vmul.f32 %v4002_v63, %v6541_v22  ;;  %5697 = vmatmul.msk.f32.gmra.mxu1 %vm629_vm2, %v544_v5  ;;  %v3216_v0 = vrot.slane %v3215_v50, 4  ;;  %5787 = vmatmul.msk.bf16.gmra.mxu0 %vm2343_vm3, %v3729_v17  ;;  %v1583_v17 = vpop.permute.xlu2 %1582  ;;  %v4451_v25 = vsel %vm629_vm2, %v4314_v3, 0.0 }
 0x27a   :  { %v3427_v13 = vadd.f32 %v3426_v8, %v3425_v4  ;;  %1638 = vperm.xlu2 %5962, %v10217_v51   ;;  %v2422_v4 = vsel %vm2343_vm3, %v7933_v18, -inf  ;;  %v545_v51 = vmax.f32 %v7888_v16, %v417_v52  ;;  %v7969_v63 = vadd.f32 %v1583_v17, %v7699_v41 }
 0x27b   :  { %v2640_v53 = vmax.f32 %v2638_v27, %v2639_v23  ;;  %v3217_v5 = vadd.f32 %v3216_v0, %v3215_v50  ;;  %v4452_v47 = vsel %vm629_vm2, %v4315_v45, 0.0  ;;  %v479_v27 = vmul.f32 0.2, %v351_v43 }
 0x27c   :  { %v3428_v1 = vrot.slane %v3427_v13, 1  ;;  %2045 = vperm.xlu1 %5963, %v7930_v56  }
 0x27d   :  { %5759 = vmatmul.msk.f32.gmra.mxu3 %vm629_vm2, %v606_v59  ;;  %v2641_v36 = vrot.slane %v2640_v53, 1  ;;  %v1577_v39 = vpop.permute.xlu1 %1576  ;;  %v3218_v8 = vrot.slane %v3217_v5, 2  ;;  %v4453_v59 = vadd.f32 %v4452_v47, %v4451_v25  ;;  %v607_v17 = vmax.f32 %v351_v43, %v479_v27 }
 0x27e   :  { %v3429_v23 = vadd.f32 %v3428_v1, %v3427_v13  ;;  %v7963_v0 = vadd.f32 %v1577_v39, %v7635_v20  ;;  %v7965_v50 = vpop.f32.mrf.mxu1  ;;  %v2427_v43 = vsel %vm2343_vm3, %v7955_v37, -inf }
 0x27f   :  { %v1310_v16 = vpop.f32.mrf.mxu3  ;;  %v2642_v52 = vmax.f32 %v2640_v53, %v2641_v36  ;;  %v3219_v13 = vadd.f32 %v3218_v8, %v3217_v5 }
 0x280   :  { %6128 = vrcp.f32 %v3429_v23  ;;  %v4005_v45 = vpop.f32.mrf.mxu0  ;;  %v2423_v26 = vsel %vm2343_vm3, %v7963_v0, -inf  ;;  %5992 = vset.pattern.permute.xlu0 %v10206_v62 }
 0x281   :  { %v4316_v1 = vmul.f32 %v4005_v45, %v6567_v40  ;;  %v2848_v20 = vsub.f32 %v7822_v2, %v2642_v52  ;;  %v2849_v49 = vsub.f32 %v7808_v38, %v2642_v52  ;;  %v2850_v23 = vsub.f32 %v7865_v32, %v2642_v52  ;;  %5698 = vmatmul.msk.f32.gmra.mxu1 %vm629_vm2, %v545_v51 }
 0x282   :  { %v2851_v53 = vsub.f32 %v7871_v30, %v2642_v52  ;;  %v3220_v41 = vrot.slane %v3219_v13, 1  ;;  %v2424_v3 = vmax.f32 %v2422_v4, %v2423_v26  ;;  %5964 = vset.pattern.permute.xlu2 %v6546_v24  ;;  %v2425_v2 = vsel %vm2343_vm3, %v7969_v63, -inf }
 0x283   :  { %v4454_v5 = vsel %vm629_vm2, %v4316_v1, 0.0  ;;  %v3064_v36 = vmul.f32 1.442695, %v2848_v20  ;;  %v3066_v47 = vmul.f32 1.442695, %v2849_v49  ;;  %v546_v26 = vmax.f32 %v7920_v33, %v7948_v61 }
 0x284   :  { %v7983_v39 = vadd.f32 %v4454_v5, %v4453_v59  ;;  %5965 = vset.pattern.permute.xlu1 %v6590_v55  ;;  %v3221_v38 = vadd.f32 %v3220_v41, %v3219_v13  ;;  %v3068_v32 = vmul.f32 1.442695, %v2850_v23  ;;  %v2426_v30 = vmax.f32 %v2424_v3, %v2425_v2  ;;  %v2002_v49 = vpop.permute.xlu2 %2001 }
 0x285   :  { %5760 = vmatmul.msk.f32.gmra.mxu3 %vm629_vm2, %v607_v17  ;;  %v480_v51 = vmul.f32 0.2, %v7960_v57  ;;  %6130 = vpow2.f32 %v3064_v36  ;;  %v3070_v8 = vmul.f32 1.442695, %v2851_v53  ;;  %v291_v13 = vadd.f32 %v10222_v42, %v6567_v40 }
 0x286   :  { %10223 = vst [vmem:[#allocation13_spill] sm:$0xff] %v7983_v39  ;;  %v6129_v4 = vpop.eup %6128  ;;  %6132 = vrcp.f32 %v3221_v38  ;;  %v2428_v27 = vmax.f32 %v2426_v30, %v2427_v43  ;;  %v7991_v52 = vpop.f32.mrf.mxu1  ;;  %v8026_v5 = vadd.f32 %v2002_v49, %v1310_v16 }
 0x287   :  { %v7994_v25 = vmul.f32 %v6129_v4, %v7829_v15  ;;  %v7997_v45 = vmul.f32 %v6129_v4, %v7838_v58  ;;  %6134 = vpow2.f32 %v3066_v47  ;;  %v8006_v1 = vmul.f32 %v6129_v4, %v7847_v12  ;;  %v1313_v15 = vpop.f32.mrf.mxu3  ;;  %v8011_v58 = vld [vmem:[%s10095_s1 + $0x8] sm:$0xff] }
 0x288   :  { %v8001_v59 = vpop.f32.mrf.mxu0  ;;  %6136 = vpow2.f32 %v3068_v32  ;;  %v2429_v20 = vrot.slane %v2428_v27, 4  ;;  %v8014_v23 = vperm.slane %v8011_v58, 4  ;;  %v8020_v12 = vmul.f32 %v6129_v4, %v7858_v44 }
 0x289   :  { %10224 = vst [vmem:[#allocation41_spill] sm:$0xff] %v7994_v25  ;;  %6138 = vpow2.f32 %v3070_v8  ;;  %5699 = vmatmul.msk.f32.gmra.mxu1 %vm629_vm2, %v546_v26  ;;  %v608_v53 = vmax.f32 %v7960_v57, %v480_v51  ;;  %v419_v3 = vmul.f32 0.2, %v291_v13 }
 0x28a   :  { %10225 = vst [vmem:[#allocation42_spill] sm:$0xff] %v7997_v45  ;;  %v2430_v61 = vmax.f32 %v2428_v27, %v2429_v20  ;;  %2051 = vperm.xlu2 %5964, %v7930_v56   ;;  %1738 = vperm.xlu0 %5992, %v8014_v23   ;;  %v292_v27 = vadd.f32 %v10222_v42, %v6672_v29 }
 0x28b   :  { %10226 = vst [vmem:[#allocation43_spill] sm:$0xff] %v8006_v1  ;;  %v8024_v41 = vpop.eup %6130  ;;  %v547_v26 = vmax.f32 %v291_v13, %v419_v3 }
 0x28c   :  { %10227 = vst [vmem:[#allocation44_spill] sm:$0xff] %v8020_v12  ;;  %2057 = vperm.xlu1 %5965, %v7930_v56   ;;  %v8032_v36 = vpop.eup %6132  ;;  %v3430_v44 = vsel %vm2343_vm3, %v8024_v41, 0.0  ;;  %v2431_v47 = vrot.slane %v2430_v61, 2  ;;  %v420_v13 = vmul.f32 0.2, %v292_v27 }
 0x28d   :  { %5761 = vmatmul.msk.f32.gmra.mxu3 %vm629_vm2, %v608_v53  ;;  %v8037_v57 = vpop.eup %6134  ;;  %v1996_v2 = vpop.permute.xlu1 %1995  ;;  %v3612_v16 = vmul.f32 %v8032_v36, %v7884_v48  ;;  %v3613_v38 = vmul.f32 %v8032_v36, %v7893_v19  ;;  %v2644_v19 = vsel %vm2343_vm3, %v8026_v5, -inf }
 0x28e   :  { %v8043_v32 = vpop.eup %6136  ;;  %v3431_v30 = vsel %vm2343_vm3, %v8037_v57, 0.0  ;;  %v2432_v4 = vmax.f32 %v2430_v61, %v2431_v47  ;;  %v8048_v43 = vadd.f32 %v1996_v2, %v7925_v10  ;;  %v8050_v51 = vpop.f32.mrf.mxu1  ;;  %v548_v12 = vmax.f32 %v292_v27, %v420_v13 }
 0x28f   :  { %v8052_v8 = vpop.eup %6138  ;;  %v3432_v48 = vadd.f32 %v3431_v30, %v3430_v44  ;;  %v3433_v20 = vsel %vm2343_vm3, %v8043_v32, 0.0  ;;  %v3730_v53 = vpack.c.bf16 %v3613_v38, %v3612_v16  ;;  %v1316_v30 = vpop.f32.mrf.mxu3 }
 0x290   :  { %v2433_v49 = vrot.slane %v2432_v4, 1  ;;  %v2643_v10 = vsel %vm2343_vm3, %v8048_v43, -inf  ;;  %v4010_v61 = vpop.f32.mrf.mxu0  ;;  %v3435_v42 = vsel %vm2343_vm3, %v8052_v8, 0.0  ;;  %v2014_v16 = vpop.permute.xlu0 %2013 }
 0x291   :  { %v3434_v47 = vadd.f32 %v3433_v20, %v3432_v48  ;;  %v2645_v2 = vmax.f32 %v2643_v10, %v2644_v19  ;;  %5700 = vmatmul.msk.f32.gmra.mxu1 %vm629_vm2, %v547_v26  ;;  %5788 = vmatmul.msk.bf16.gmra.mxu0 %vm2343_vm3, %v3730_v53  ;;  %v10228_v20 = vld [vmem:[#allocation10_spill] sm:$0xff]  ;;  %v8077_v53 = vadd.f32 %v2014_v16, %v1316_v30 }
 0x292   :  { %v2434_v44 = vmax.f32 %v2432_v4, %v2433_v49  ;;  %5966 = vset.pattern.permute.xlu2 %v10206_v62  ;;  %5997 = vset.pattern.permute.xlu0 %v6538_v21  ;;  %v8075_v49 = vadd.f32 %v10228_v20, %v6522_v6  ;;  %v4318_v13 = vmul.f32 %v4010_v61, %v6522_v6 }
 0x293   :  { %v3436_v3 = vadd.f32 %v3435_v42, %v3434_v47 }
 0x294   :  { %5968 = vset.pattern.permute.xlu1 %v6546_v24  ;;  %v2784_v38 = vsub.f32 %v7933_v18, %v2434_v44  ;;  %v2785_v48 = vsub.f32 %v7963_v0, %v2434_v44  ;;  %v2786_v19 = vsub.f32 %v7969_v63, %v2434_v44  ;;  %v2787_v4 = vsub.f32 %v7955_v37, %v2434_v44  ;;  %v2008_v26 = vpop.permute.xlu2 %2007 }
 0x295   :  { %v3437_v10 = vrot.slane %v3436_v3, 4  ;;  %v8079_v47 = vadd.f32 %v2008_v26, %v1313_v15  ;;  %v8081_v42 = vpop.permute.xlu1 %201  ;;  %v8104_v26 = vperm.slane %v8011_v58, 5 }
 0x296   :  { %v2936_v17 = vmul.f32 1.442695, %v2784_v38  ;;  %v2938_v18 = vmul.f32 1.442695, %v2785_v48  ;;  %v2940_v33 = vmul.f32 1.442695, %v2786_v19  ;;  %v353_v0 = vadd.f32 %v8081_v42, %v6522_v6  ;;  %v8085_v63 = vpop.f32.mrf.mxu1 }
 0x297   :  { %v3438_v37 = vadd.f32 %v3437_v10, %v3436_v3  ;;  %v2942_v44 = vmul.f32 1.442695, %v2787_v4  ;;  %v2646_v1 = vsel %vm2343_vm3, %v8079_v47, -inf  ;;  %v2648_v38 = vsel %vm2343_vm3, %v8077_v53, -inf }
 0x298   :  { %6140 = vpow2.f32 %v2936_v17  ;;  %v2647_v30 = vmax.f32 %v2645_v2, %v2646_v1  ;;  %v4012_v15 = vpop.f32.mrf.mxu0  ;;  %v481_v48 = vmul.f32 0.2, %v353_v0  ;;  %v421_v3 = vmul.f32 0.2, %v8075_v49 }
 0x299   :  { %v3439_v16 = vrot.slane %v3438_v37, 2  ;;  %6142 = vpow2.f32 %v2938_v18  ;;  %5701 = vmatmul.msk.f32.gmra.mxu1 %vm629_vm2, %v548_v12  ;;  %v4319_v17 = vmul.f32 %v4012_v15, %v6541_v22  ;;  %v3614_v1 = vmul.f32 %v8032_v36, %v7903_v46 }
 0x29a   :  { %6144 = vpow2.f32 %v2940_v33  ;;  %v2649_v19 = vmax.f32 %v2647_v30, %v2648_v38  ;;  %2063 = vperm.xlu2 %5966, %v7930_v56   ;;  %v354_v2 = vadd.f32 %v8081_v42, %v6541_v22  ;;  %v609_v12 = vmax.f32 %v353_v0, %v481_v48  ;;  %1745 = vperm.xlu0 %5997, %v8104_v26  }
 0x29b   :  { %v3440_v4 = vadd.f32 %v3439_v16, %v3438_v37  ;;  %6146 = vpow2.f32 %v2942_v44  ;;  %v3615_v33 = vmul.f32 %v8032_v36, %v7908_v34  ;;  %v8110_v18 = vadd.f32 %v10228_v20, %v6541_v22 }
 0x29c   :  { %1651 = vperm.xlu1 %5968, %v7393_v7   ;;  %v2650_v27 = vrot.slane %v2649_v19, 4  ;;  %v8114_v46 = vadd.f32 %v10228_v20, %v6567_v40  ;;  %5762 = vmatmul.msk.f32.gmra.mxu3 %vm629_vm2, %v609_v12  ;;  %v4465_v44 = vsel %vm629_vm2, %v4319_v17, 0.0  ;;  %v549_v30 = vmax.f32 %v8075_v49, %v421_v3 }
 0x29d   :  { %v3441_v56 = vrot.slane %v3440_v4, 1  ;;  %v482_v48 = vmul.f32 0.2, %v354_v2  ;;  %v3731_v12 = vpack.c.bf16 %v3615_v33, %v3614_v1  ;;  %v4464_v17 = vsel %vm629_vm2, %v4318_v13, 0.0 }
 0x29e   :  { %v8106_v10 = vpop.eup %6140  ;;  %v2651_v0 = vmax.f32 %v2649_v19, %v2650_v27  ;;  %v8117_v34 = vpop.f32.mrf.mxu1  ;;  %v4466_v45 = vadd.f32 %v4465_v44, %v4464_v17  ;;  %v422_v1 = vmul.f32 0.2, %v8110_v18  ;;  %v423_v17 = vmul.f32 0.2, %v8114_v46 }
 0x29f   :  { %v8119_v36 = vpop.eup %6142  ;;  %v3442_v61 = vadd.f32 %v3441_v56, %v3440_v4  ;;  %v3222_v37 = vsel %vm2343_vm3, %v8106_v10, 0.0  ;;  %v1596_v19 = vpop.permute.xlu1 %1595 }
 0x2a0   :  { %v8126_v15 = vpop.eup %6144  ;;  %v3223_v16 = vsel %vm2343_vm3, %v8119_v36, 0.0  ;;  %v2652_v38 = vrot.slane %v2651_v0, 2  ;;  %v4015_v27 = vpop.f32.mrf.mxu0  ;;  %v8143_v13 = vadd.f32 %v1596_v19, %v7775_v11  ;;  %v550_v19 = vmax.f32 %v8110_v18, %v422_v1 }
 0x2a1   :  { %v8130_v4 = vpop.eup %6146  ;;  %6148 = vrcp.f32 %v3442_v61  ;;  %v3224_v56 = vadd.f32 %v3223_v16, %v3222_v37  ;;  %v4320_v49 = vmul.f32 %v4015_v27, %v6567_v40  ;;  %5702 = vmatmul.msk.f32.gmra.mxu1 %vm629_vm2, %v549_v30  ;;  %v3225_v3 = vsel %vm2343_vm3, %v8126_v15, 0.0  ;;  %5789 = vmatmul.msk.bf16.gmra.mxu0 %vm2343_vm3, %v3731_v12 }
 0x2a2   :  { %v2653_v25 = vmax.f32 %v2651_v0, %v2652_v38  ;;  %5969 = vset.pattern.permute.xlu2 %v6590_v55  ;;  %v355_v61 = vadd.f32 %v8081_v42, %v6567_v40  ;;  %v3227_v0 = vsel %vm2343_vm3, %v8130_v4, 0.0  ;;  %v610_v16 = vmax.f32 %v354_v2, %v482_v48  ;;  %6002 = vset.pattern.permute.xlu0 %v6546_v24 }
 0x2a3   :  { %v3226_v33 = vadd.f32 %v3225_v3, %v3224_v56  ;;  %v4467_v37 = vsel %vm629_vm2, %v4320_v49, 0.0 }
 0x2a4   :  { %5970 = vset.pattern.permute.xlu1 %v10206_v62  ;;  %v2654_v44 = vrot.slane %v2653_v25, 1  ;;  %v8149_v30 = vadd.f32 %v4467_v37, %v4466_v45  ;;  %v1602_v38 = vpop.permute.xlu2 %1601  ;;  %5763 = vmatmul.msk.f32.gmra.mxu3 %vm629_vm2, %v610_v16  ;;  %v483_v39 = vmul.f32 0.2, %v355_v61  ;;  %v2435_v45 = vsel %vm2343_vm3, %v8143_v13, -inf }
 0x2a5   :  { %v3228_v27 = vadd.f32 %v3227_v0, %v3226_v33  ;;  %v8152_v12 = vadd.f32 %v1602_v38, %v7810_v60  ;;  %v1608_v60 = vpop.permute.xlu0 %1607  ;;  %v112_v16 = vrot.slane %v6672_v29, 7 }
 0x2a6   :  { %10229 = vst [vmem:[#allocation10_spill] sm:$0xff] %v8149_v30  ;;  %v2655_v56 = vmax.f32 %v2653_v25, %v2654_v44  ;;  %v8155_v11 = vpop.f32.mrf.mxu1  ;;  %v8171_v37 = vadd.f32 %v1608_v60, %v7867_v31 }
 0x2a7   :  { %v6149_v49 = vpop.eup %6148  ;;  %v3229_v3 = vrot.slane %v3228_v27, 4  ;;  %v2436_v2 = vsel %vm2343_vm3, %v8152_v12, -inf }
 0x2a8   :  { %v2852_v25 = vsub.f32 %v8048_v43, %v2655_v56  ;;  %v2853_v48 = vsub.f32 %v8026_v5, %v2655_v56  ;;  %v2854_v18 = vsub.f32 %v8079_v47, %v2655_v56  ;;  %v2855_v1 = vsub.f32 %v8077_v53, %v2655_v56  ;;  %v8168_v33 = vpop.f32.mrf.mxu0 }
 0x2a9   :  { %v3230_v0 = vadd.f32 %v3229_v3, %v3228_v27  ;;  %v2437_v44 = vmax.f32 %v2435_v45, %v2436_v2  ;;  %5703 = vmatmul.msk.f32.gmra.mxu1 %vm629_vm2, %v550_v19  ;;  %v8177_v5 = vmul.f32 %v6149_v49, %v8024_v41  ;;  %v8181_v53 = vadd.f32 %v10228_v20, %v6672_v29 }
 0x2aa   :  { %v3072_v38 = vmul.f32 1.442695, %v2852_v25  ;;  %v3074_v30 = vmul.f32 1.442695, %v2853_v48  ;;  %v3076_v43 = vmul.f32 1.442695, %v2854_v18  ;;  %1657 = vperm.xlu2 %5969, %v7393_v7   ;;  %v551_v27 = vmax.f32 %v8114_v46, %v423_v17 }
 0x2ab   :  { %10230 = vst [vmem:[#allocation45_spill] sm:$0xff] %v8177_v5  ;;  %v3231_v31 = vrot.slane %v3230_v0, 2  ;;  %v3078_v47 = vmul.f32 1.442695, %v2855_v1  ;;  %v356_v56 = vadd.f32 %v8081_v42, %v6672_v29  ;;  %v611_v19 = vmax.f32 %v355_v61, %v483_v39 }
 0x2ac   :  { %1663 = vperm.xlu1 %5970, %v7393_v7   ;;  %6150 = vpow2.f32 %v3072_v38  ;;  %v8188_v3 = vmul.f32 %v6149_v49, %v8037_v57  ;;  %v8191_v20 = vmul.f32 %v6149_v49, %v8043_v32  ;;  %v8194_v2 = vmul.f32 %v6149_v49, %v8052_v8  ;;  %v1319_v32 = vpop.f32.mrf.mxu3 }
 0x2ad   :  { %v3232_v41 = vadd.f32 %v3231_v31, %v3230_v0  ;;  %6152 = vpow2.f32 %v3074_v30  ;;  %v2438_v7 = vsel %vm2343_vm3, %v8171_v37, -inf  ;;  %5764 = vmatmul.msk.f32.gmra.mxu3 %vm629_vm2, %v611_v19  ;;  %v484_v30 = vmul.f32 0.2, %v356_v56  ;;  %v2033_v5 = vpop.permute.xlu0 %2032 }
 0x2ae   :  { %10231 = vst [vmem:[#allocation46_spill] sm:$0xff] %v8188_v3  ;;  %v1614_v45 = vpop.permute.xlu1 %1613  ;;  %6154 = vpow2.f32 %v3076_v43  ;;  %v8202_v57 = vpop.f32.mrf.mxu1  ;;  %v2439_v61 = vmax.f32 %v2437_v44, %v2438_v7  ;;  %v144_v25 = vperm.slane %v112_v16, 0  ;;  %v424_v44 = vmul.f32 0.2, %v8181_v53 }
 0x2af   :  { %10232 = vst [vmem:[#allocation47_spill] sm:$0xff] %v8191_v20  ;;  %v8200_v39 = vadd.f32 %v1614_v45, %v7923_v9  ;;  %v3233_v46 = vrot.slane %v3232_v41, 1  ;;  %6156 = vpow2.f32 %v3078_v47  ;;  %v612_v43 = vmax.f32 %v356_v56, %v484_v30 }
 0x2b0   :  { %10233 = vst [vmem:[#allocation48_spill] sm:$0xff] %v8194_v2  ;;  %v4020_v49 = vpop.f32.mrf.mxu0 }
 0x2b1   :  { %v2440_v17 = vsel %vm2343_vm3, %v8200_v39, -inf  ;;  %v3234_v60 = vadd.f32 %v3233_v46, %v3232_v41  ;;  %5704 = vmatmul.msk.f32.gmra.mxu1 %vm629_vm2, %v551_v27  ;;  %v10234_v41 = vld [vmem:[#allocation11_spill] sm:$0xff] }
 0x2b2   :  { %v2441_v9 = vmax.f32 %v2439_v61, %v2440_v17  ;;  %v8211_v48 = vpop.eup %6150  ;;  %5971 = vset.pattern.permute.xlu2 %v6538_v21  ;;  %v297_v45 = vadd.f32 %v10234_v41, %v6522_v6 }
 0x2b3   :  { %v8214_v18 = vpop.eup %6152  ;;  %6158 = vrcp.f32 %v3234_v60  ;;  %v3443_v1 = vsel %vm2343_vm3, %v8211_v48, 0.0  ;;  %v552_v60 = vmax.f32 %v8181_v53, %v424_v44 }
 0x2b4   :  { %v2442_v0 = vrot.slane %v2441_v9, 4  ;;  %207 = vrot.lane.b32.xlu1 %v144_v25, %s6457_s2  ;;  %v8220_v38 = vpop.eup %6154  ;;  %v3444_v16 = vsel %vm2343_vm3, %v8214_v18, 0.0  ;;  %v2021_v31 = vpop.permute.xlu2 %2020 }
 0x2b5   :  { %v8224_v47 = vpop.eup %6156  ;;  %v3445_v27 = vadd.f32 %v3444_v16, %v3443_v1  ;;  %v3446_v7 = vsel %vm2343_vm3, %v8220_v38, 0.0  ;;  %5765 = vmatmul.msk.f32.gmra.mxu3 %vm629_vm2, %v612_v43 }
 0x2b6   :  { %v2443_v19 = vmax.f32 %v2441_v9, %v2442_v0  ;;  %v8231_v46 = vpop.f32.mrf.mxu1  ;;  %v3448_v56 = vsel %vm2343_vm3, %v8224_v47, 0.0  ;;  %v8240_v9 = vadd.f32 %v10234_v41, %v6541_v22  ;;  %v1322_v0 = vpop.f32.mrf.mxu3 }
 0x2b7   :  { %v3447_v61 = vadd.f32 %v3446_v7, %v3445_v27  ;;  %v4322_v27 = vmul.f32 %v4020_v49, %v6522_v6  ;;  %v425_v7 = vmul.f32 0.2, %v297_v45 }
 0x2b8   :  { %v2444_v17 = vrot.slane %v2443_v19, 2  ;;  %v4022_v30 = vpop.f32.mrf.mxu0 }
 0x2b9   :  { %v8236_v25 = vpop.eup %6158  ;;  %v3449_v1 = vadd.f32 %v3448_v56, %v3447_v61  ;;  %v4323_v43 = vmul.f32 %v4022_v30, %v6541_v22  ;;  %5705 = vmatmul.msk.f32.gmra.mxu1 %vm629_vm2, %v552_v60 }
 0x2ba   :  { %v2445_v16 = vmax.f32 %v2443_v19, %v2444_v17  ;;  %2070 = vperm.xlu2 %5971, %v7567_v28   ;;  %v3616_v53 = vmul.f32 %v8236_v25, %v8106_v10  ;;  %v3617_v44 = vmul.f32 %v8236_v25, %v8119_v36  ;;  %v8251_v19 = vadd.f32 %v2021_v31, %v1319_v32 }
 0x2bb   :  { %v3450_v8 = vrot.slane %v3449_v1, 4  ;;  %v4478_v56 = vsel %vm629_vm2, %v4323_v43, 0.0  ;;  %v4477_v36 = vsel %vm629_vm2, %v4322_v27, 0.0  ;;  %v553_v32 = vmax.f32 %v297_v45, %v425_v7 }
 0x2bc   :  { %v2446_v42 = vrot.slane %v2445_v16, 1  ;;  %2088 = vperm.xlu1 %5970, %v7567_v28   ;;  %v3732_v61 = vpack.c.bf16 %v3617_v44, %v3616_v53  ;;  %v8253_v17 = vpop.permute.xlu2 %203  ;;  %v426_v31 = vmul.f32 0.2, %v8240_v9  ;;  %v2656_v43 = vsel %vm2343_vm3, %v8251_v19, -inf }
 0x2bd   :  { %v3451_v60 = vadd.f32 %v3450_v8, %v3449_v1  ;;  %v357_v10 = vadd.f32 %v8253_v17, %v6522_v6  ;;  %v4479_v27 = vadd.f32 %v4478_v56, %v4477_v36 }
 0x2be   :  { %v2447_v49 = vmax.f32 %v2445_v16, %v2446_v42  ;;  %v2027_v30 = vpop.permute.xlu1 %2026  ;;  %5790 = vmatmul.msk.bf16.gmra.mxu0 %vm2343_vm3, %v3732_v61  ;;  %v8262_v2 = vpop.f32.mrf.mxu1 }
 0x2bf   :  { %v8260_v20 = vadd.f32 %v2027_v30, %v1322_v0  ;;  %v3452_v53 = vrot.slane %v3451_v60, 2  ;;  %v485_v0 = vmul.f32 0.2, %v357_v10  ;;  %v1325_v56 = vpop.f32.mrf.mxu3 }
 0x2c0   :  { %v2788_v42 = vsub.f32 %v8143_v13, %v2447_v49  ;;  %v2789_v8 = vsub.f32 %v8152_v12, %v2447_v49  ;;  %v2790_v1 = vsub.f32 %v8171_v37, %v2447_v49  ;;  %v2791_v16 = vsub.f32 %v8200_v39, %v2447_v49  ;;  %v4025_v44 = vpop.f32.mrf.mxu0 }
 0x2c1   :  { %v3453_v61 = vadd.f32 %v3452_v53, %v3451_v60  ;;  %5706 = vmatmul.msk.f32.gmra.mxu1 %vm629_vm2, %v553_v32  ;;  %v358_v12 = vadd.f32 %v8253_v17, %v6541_v22  ;;  %v2657_v37 = vsel %vm2343_vm3, %v8260_v20, -inf  ;;  %v4324_v39 = vmul.f32 %v4025_v44, %v6567_v40  ;;  %v8283_v53 = vld [vmem:[%s10095_s1 + $0x18] sm:$0xff] }
 0x2c2   :  { %v2944_v30 = vmul.f32 1.442695, %v2788_v42  ;;  %v2946_v45 = vmul.f32 1.442695, %v2789_v8  ;;  %v2948_v7 = vmul.f32 1.442695, %v2790_v1  ;;  %5973 = vset.pattern.permute.xlu2 %v6590_v55  ;;  %v2658_v60 = vmax.f32 %v2656_v43, %v2657_v37 }
 0x2c3   :  { %v2950_v13 = vmul.f32 1.442695, %v2791_v16  ;;  %v3454_v49 = vrot.slane %v3453_v61, 1  ;;  %v613_v36 = vmax.f32 %v357_v10, %v485_v0  ;;  %v4480_v32 = vsel %vm629_vm2, %v4324_v39, 0.0 }
 0x2c4   :  { %6160 = vpow2.f32 %v2944_v30  ;;  %5975 = vset.pattern.permute.xlu1 %v6590_v55  ;;  %v8286_v42 = vperm.slane %v8283_v53, 6  ;;  %v299_v8 = vadd.f32 %v10234_v41, %v6567_v40  ;;  %v8290_v16 = vadd.f32 %v4480_v32, %v4479_v27 }
 0x2c5   :  { %6162 = vpow2.f32 %v2946_v45  ;;  %v3455_v1 = vadd.f32 %v3454_v49, %v3453_v61  ;;  %5766 = vmatmul.msk.f32.gmra.mxu3 %vm629_vm2, %v613_v36  ;;  %v486_v43 = vmul.f32 0.2, %v358_v12  ;;  %v554_v0 = vmax.f32 %v8240_v9, %v426_v31  ;;  %v1627_v31 = vpop.permute.xlu0 %1626 }
 0x2c6   :  { %6164 = vpow2.f32 %v2948_v7  ;;  %10235 = vst [vmem:[#allocation11_spill] sm:$0xff] %v8290_v16  ;;  %v8293_v10 = vpop.f32.mrf.mxu1  ;;  %2176 = vperm.xlu0 %6002, %v8286_v42   ;;  %v8297_v44 = vadd.f32 %v2033_v5, %v1325_v56  ;;  %v3618_v30 = vmul.f32 %v8236_v25, %v8126_v15  ;;  %v3619_v27 = vmul.f32 %v8236_v25, %v8130_v4 }
 0x2c7   :  { %6166 = vpow2.f32 %v2950_v13  ;;  %v427_v45 = vmul.f32 0.2, %v299_v8  ;;  %v359_v5 = vadd.f32 %v8253_v17, %v6567_v40  ;;  %v614_v4 = vmax.f32 %v358_v12, %v486_v43  ;;  %v1328_v32 = vpop.f32.mrf.mxu3 }
 0x2c8   :  { %6168 = vrcp.f32 %v3455_v1  ;;  %v2659_v37 = vsel %vm2343_vm3, %v8297_v44, -inf  ;;  %v3733_v49 = vpack.c.bf16 %v3619_v27, %v3618_v30 }
 0x2c9   :  { %5707 = vmatmul.msk.f32.gmra.mxu1 %vm629_vm2, %v554_v0  ;;  %v2660_v12 = vmax.f32 %v2658_v60, %v2659_v37  ;;  %v555_v43 = vmax.f32 %v299_v8, %v427_v45  ;;  %v487_v3 = vmul.f32 0.2, %v359_v5 }
 0x2ca   :  { %v8303_v61 = vpop.eup %6160  ;;  %2082 = vperm.xlu2 %5973, %v7567_v28   ;;  %v300_v28 = vadd.f32 %v10234_v41, %v6672_v29 }
 0x2cb   :  { %v8306_v7 = vpop.eup %6162  ;;  %v3235_v13 = vsel %vm2343_vm3, %v8303_v61, 0.0 }
 0x2cc   :  { %v8313_v9 = vpop.eup %6164  ;;  %v3236_v15 = vsel %vm2343_vm3, %v8306_v7, 0.0  ;;  %1682 = vperm.xlu1 %5975, %v7582_v54  }
 0x2cd   :  { %v8318_v25 = vpop.eup %6166  ;;  %v3237_v39 = vadd.f32 %v3236_v15, %v3235_v13  ;;  %v3238_v36 = vsel %vm2343_vm3, %v8313_v9, 0.0  ;;  %5767 = vmatmul.msk.f32.gmra.mxu3 %vm629_vm2, %v614_v4 }
 0x2ce   :  { %v6169_v56 = vpop.eup %6168  ;;  %v2039_v1 = vpop.permute.xlu1 %2038  ;;  %5791 = vmatmul.msk.bf16.gmra.mxu0 %vm2343_vm3, %v3733_v49  ;;  %6007 = vset.pattern.permute.xlu0 %v6590_v55  ;;  %v3240_v27 = vsel %vm2343_vm3, %v8318_v25, 0.0  ;;  %v615_v49 = vmax.f32 %v359_v5, %v487_v3 }
 0x2cf   :  { %v3239_v0 = vadd.f32 %v3238_v36, %v3237_v39  ;;  %v8328_v16 = vadd.f32 %v2039_v1, %v1328_v32  ;;  %v8330_v30 = vpop.f32.mrf.mxu1  ;;  %v8334_v41 = vmul.f32 %v6169_v56, %v8211_v48  ;;  %v8339_v13 = vmul.f32 %v6169_v56, %v8214_v18  ;;  %v10240_v1 = vld [vmem:[#allocation14_spill] sm:$0xff] }
 0x2d0   :  { %v8342_v60 = vmul.f32 %v6169_v56, %v8220_v38  ;;  %v8345_v8 = vmul.f32 %v6169_v56, %v8224_v47  ;;  %v360_v38 = vadd.f32 %v8253_v17, %v6672_v29  ;;  %v1621_v47 = vpop.permute.xlu2 %1620  ;;  %v428_v56 = vmul.f32 0.2, %v300_v28 }
 0x2d1   :  { %10236 = vst [vmem:[#allocation49_spill] sm:$0xff] %v8334_v41  ;;  %v3241_v45 = vadd.f32 %v3240_v27, %v3239_v0  ;;  %v2661_v15 = vsel %vm2343_vm3, %v8328_v16, -inf  ;;  %5708 = vmatmul.msk.f32.gmra.mxu1 %vm629_vm2, %v555_v43  ;;  %v8359_v32 = vperm.slane %v8011_v58, 6  ;;  %v8364_v0 = vpop.permute.xlu0 %205  ;;  %v8370_v3 = vadd.f32 %v1621_v47, %v7965_v50 }
 0x2d2   :  { %10237 = vst [vmem:[#allocation50_spill] sm:$0xff] %v8339_v13  ;;  %v2662_v4 = vmax.f32 %v2660_v12, %v2661_v15  ;;  %5974 = vset.pattern.permute.xlu2 %v6538_v21  ;;  %v301_v12 = vadd.f32 %v10240_v1, %v6522_v6  ;;  %v488_v15 = vmul.f32 0.2, %v360_v38  ;;  %v556_v58 = vmax.f32 %v300_v28, %v428_v56  ;;  %v10241_v28 = vld [vmem:[#allocation36_spill] sm:$0xff] }
 0x2d3   :  { %10238 = vst [vmem:[#allocation51_spill] sm:$0xff] %v8342_v60  ;;  %v3242_v37 = vrot.slane %v3241_v45, 4  ;;  %v2448_v50 = vsel %vm2343_vm3, %v8370_v3, -inf  ;;  %v8387_v60 = vpop.f32.mrf.mxu3 }
 0x2d4   :  { %10239 = vst [vmem:[#allocation52_spill] sm:$0xff] %v8345_v8  ;;  %v2663_v39 = vrot.slane %v2662_v4, 4  ;;  %5978 = vset.pattern.permute.xlu1 %v6546_v24  ;;  %v616_v56 = vmax.f32 %v360_v38, %v488_v15  ;;  %v8398_v15 = vpop.f32.mrf.mxu0 }
 0x2d5   :  { %v3243_v36 = vadd.f32 %v3242_v37, %v3241_v45  ;;  %5768 = vmatmul.msk.f32.gmra.mxu3 %vm629_vm2, %v615_v49  ;;  %v429_v37 = vmul.f32 0.2, %v301_v12  ;;  %10242 = vst [vmem:[#allocation14_spill] sm:$0xff] %v8398_v15 }
 0x2d6   :  { %v2664_v43 = vmax.f32 %v2662_v4, %v2663_v39  ;;  %1782 = vperm.xlu0 %6007, %v8359_v32   ;;  %v361_v4 = vadd.f32 %v8364_v0, %v6522_v6  ;;  %v8375_v39 = vadd.f32 %v1627_v31, %v7991_v52 }
 0x2d7   :  { %v3244_v27 = vrot.slane %v3243_v36, 2  ;;  %v8366_v17 = vpop.f32.mrf.mxu1 }
 0x2d8   :  { %v2665_v5 = vrot.slane %v2664_v43, 2  ;;  %v1639_v48 = vpop.permute.xlu2 %1638  ;;  %v489_v52 = vmul.f32 0.2, %v361_v4  ;;  %v2449_v31 = vsel %vm2343_vm3, %v8375_v39, -inf }
 0x2d9   :  { %v3245_v45 = vadd.f32 %v3244_v27, %v3243_v36  ;;  %5709 = vmatmul.msk.f32.gmra.mxu1 %vm629_vm2, %v556_v58  ;;  %v302_v36 = vadd.f32 %v10240_v1, %v6541_v22  ;;  %v557_v58 = vmax.f32 %v301_v12, %v429_v37  ;;  %v2450_v8 = vmax.f32 %v2448_v50, %v2449_v31 }
 0x2da   :  { %v2666_v49 = vmax.f32 %v2664_v43, %v2665_v5  ;;  %1670 = vperm.xlu2 %5974, %v7582_v54   ;;  %v8390_v41 = vadd.f32 %v1639_v48, %v8085_v63 }
 0x2db   :  { %v3246_v18 = vrot.slane %v3245_v45, 1 }
 0x2dc   :  { %v2667_v47 = vrot.slane %v2666_v49, 1  ;;  %2101 = vperm.xlu1 %5978, %v10241_v28  }
 0x2dd   :  { %v3247_v27 = vadd.f32 %v3246_v18, %v3245_v45  ;;  %5769 = vmatmul.msk.f32.gmra.mxu3 %vm629_vm2, %v616_v56  ;;  %v430_v56 = vmul.f32 0.2, %v302_v36 }
 0x2de   :  { %v2668_v43 = vmax.f32 %v2666_v49, %v2667_v47  ;;  %v1633_v5 = vpop.permute.xlu1 %1632  ;;  %6012 = vset.pattern.permute.xlu0 %v10206_v62 }
 0x2df   :  { %6170 = vrcp.f32 %v3247_v27  ;;  %v8393_v38 = vadd.f32 %v1633_v5, %v8050_v51  ;;  %v8395_v18 = vpop.f32.mrf.mxu1 }
 0x2e0   :  { %v2856_v45 = vsub.f32 %v8251_v19, %v2668_v43  ;;  %v2857_v12 = vsub.f32 %v8260_v20, %v2668_v43  ;;  %v2858_v37 = vsub.f32 %v8297_v44, %v2668_v43  ;;  %v2859_v49 = vsub.f32 %v8328_v16, %v2668_v43 }
 0x2e1   :  { %v2451_v63 = vsel %vm2343_vm3, %v8393_v38, -inf  ;;  %5710 = vmatmul.msk.f32.gmra.mxu1 %vm629_vm2, %v557_v58  ;;  %v2453_v19 = vsel %vm2343_vm3, %v8390_v41, -inf  ;;  %v362_v20 = vadd.f32 %v8364_v0, %v6541_v22  ;;  %v617_v44 = vmax.f32 %v361_v4, %v489_v52 }
 0x2e2   :  { %v3080_v48 = vmul.f32 1.442695, %v2856_v45  ;;  %v3082_v51 = vmul.f32 1.442695, %v2857_v12  ;;  %v3084_v50 = vmul.f32 1.442695, %v2858_v37  ;;  %v2452_v47 = vmax.f32 %v2450_v8, %v2451_v63  ;;  %5976 = vset.pattern.permute.xlu2 %v10206_v62 }
 0x2e3   :  { %v3086_v27 = vmul.f32 1.442695, %v2859_v49  ;;  %v303_v8 = vadd.f32 %v10240_v1, %v6567_v40  ;;  %v490_v52 = vmul.f32 0.2, %v362_v20  ;;  %v558_v63 = vmax.f32 %v302_v36, %v430_v56 }
 0x2e4   :  { %6172 = vpow2.f32 %v3080_v48  ;;  %v2454_v16 = vmax.f32 %v2452_v47, %v2453_v19  ;;  %5980 = vset.pattern.permute.xlu1 %v10206_v62  ;;  %v1334_v48 = vpop.f32.mrf.mxu3  ;;  %v363_v56 = vadd.f32 %v8364_v0, %v6567_v40 }
 0x2e5   :  { %v6171_v31 = vpop.eup %6170  ;;  %6174 = vpow2.f32 %v3082_v51  ;;  %5770 = vmatmul.msk.f32.gmra.mxu3 %vm629_vm2, %v617_v44  ;;  %v618_v44 = vmax.f32 %v362_v20, %v490_v52 }
 0x2e6   :  { %6176 = vpow2.f32 %v3084_v50  ;;  %v2455_v43 = vrot.slane %v2454_v16, 4  ;;  %v3620_v5 = vmul.f32 %v6171_v31, %v8303_v61  ;;  %v3621_v45 = vmul.f32 %v6171_v31, %v8306_v7  ;;  %v4030_v49 = vpop.f32.mrf.mxu0 }
 0x2e7   :  { %6178 = vpow2.f32 %v3086_v27  ;;  %v8417_v58 = vpop.f32.mrf.mxu1  ;;  %v8421_v12 = vmul.f32 %v6171_v31, %v8313_v9  ;;  %v8424_v4 = vmul.f32 %v6171_v31, %v8318_v25  ;;  %v2052_v27 = vpop.permute.xlu2 %2051  ;;  %v431_v9 = vmul.f32 0.2, %v303_v8 }
 0x2e8   :  { %v2456_v37 = vmax.f32 %v2454_v16, %v2455_v43  ;;  %v3734_v51 = vpack.c.bf16 %v3621_v45, %v3620_v5  ;;  %v304_v43 = vadd.f32 %v10240_v1, %v6672_v29  ;;  %v8448_v45 = vadd.f32 %v2052_v27, %v1334_v48 }
 0x2e9   :  { %5711 = vmatmul.msk.f32.gmra.mxu1 %vm629_vm2, %v558_v63  ;;  %v491_v52 = vmul.f32 0.2, %v363_v56  ;;  %v559_v27 = vmax.f32 %v303_v8, %v431_v9  ;;  %v364_v8 = vadd.f32 %v8364_v0, %v6672_v29 }
 0x2ea   :  { %v8428_v50 = vpop.eup %6172  ;;  %v2457_v47 = vrot.slane %v2456_v37, 2  ;;  %5792 = vmatmul.msk.bf16.gmra.mxu0 %vm2343_vm3, %v3734_v51  ;;  %1688 = vperm.xlu2 %5976, %v7582_v54   ;;  %v8462_v13 = vsel %vm2343_vm3, %v8448_v45, -inf }
 0x2eb   :  { %v8431_v7 = vpop.eup %6174  ;;  %v3456_v25 = vsel %vm2343_vm3, %v8428_v50, 0.0 }
 0x2ec   :  { %v8437_v36 = vpop.eup %6176  ;;  %v3457_v19 = vsel %vm2343_vm3, %v8431_v7, 0.0  ;;  %v2458_v16 = vmax.f32 %v2456_v37, %v2457_v47  ;;  %2113 = vperm.xlu1 %5980, %v10241_v28  }
 0x2ed   :  { %v8444_v31 = vpop.eup %6178  ;;  %v3458_v5 = vadd.f32 %v3457_v19, %v3456_v25  ;;  %v3459_v54 = vsel %vm2343_vm3, %v8437_v36, 0.0  ;;  %5771 = vmatmul.msk.f32.gmra.mxu3 %vm629_vm2, %v618_v44  ;;  %v432_v25 = vmul.f32 0.2, %v304_v43 }
 0x2ee   :  { %v2459_v63 = vrot.slane %v2458_v16, 1  ;;  %v2046_v51 = vpop.permute.xlu1 %2045  ;;  %v3461_v1 = vsel %vm2343_vm3, %v8444_v31, 0.0  ;;  %v4032_v48 = vpop.f32.mrf.mxu0 }
 0x2ef   :  { %v3460_v61 = vadd.f32 %v3459_v54, %v3458_v5  ;;  %v8454_v37 = vadd.f32 %v2046_v51, %v8387_v60  ;;  %v8456_v20 = vpop.f32.mrf.mxu1  ;;  %v4327_v51 = vmul.f32 %v4032_v48, %v6541_v22 }
 0x2f0   :  { %v2460_v47 = vmax.f32 %v2458_v16, %v2459_v63 }
 0x2f1   :  { %v3462_v19 = vadd.f32 %v3461_v1, %v3460_v61  ;;  %v8466_v44 = vsel %vm2343_vm3, %v8454_v37, -inf  ;;  %5712 = vmatmul.msk.f32.gmra.mxu1 %vm629_vm2, %v559_v27  ;;  %v1337_v61 = vpop.f32.mrf.mxu3  ;;  %v4326_v27 = vmul.f32 %v4030_v49, %v6522_v6 }
 0x2f2   :  { %v2792_v60 = vsub.f32 %v8370_v3, %v2460_v47  ;;  %v2793_v5 = vsub.f32 %v8375_v39, %v2460_v47  ;;  %v2794_v54 = vsub.f32 %v8393_v38, %v2460_v47  ;;  %v2795_v16 = vsub.f32 %v8390_v41, %v2460_v47  ;;  %5979 = vset.pattern.permute.xlu2 %v6590_v55 }
 0x2f3   :  { %v3463_v9 = vrot.slane %v3462_v19, 4  ;;  %v2671_v63 = vmax.f32 %v8466_v44, %v8462_v13  ;;  %v619_v41 = vmax.f32 %v363_v56, %v491_v52  ;;  %v4491_v13 = vsel %vm629_vm2, %v4327_v51, 0.0  ;;  %v10243_v44 = vld [vmem:[#allocation12_spill] sm:$0xff] }
 0x2f4   :  { %v2952_v3 = vmul.f32 1.442695, %v2792_v60  ;;  %v2954_v39 = vmul.f32 1.442695, %v2793_v5  ;;  %v2956_v1 = vmul.f32 1.442695, %v2794_v54  ;;  %5983 = vset.pattern.permute.xlu1 %v6590_v55  ;;  %v305_v60 = vadd.f32 %v10243_v44, %v6522_v6 }
 0x2f5   :  { %v3464_v38 = vadd.f32 %v3463_v9, %v3462_v19  ;;  %v2958_v47 = vmul.f32 1.442695, %v2795_v16  ;;  %5772 = vmatmul.msk.f32.gmra.mxu3 %vm629_vm2, %v619_v41  ;;  %v492_v5 = vmul.f32 0.2, %v364_v8  ;;  %v560_v56 = vmax.f32 %v304_v43, %v432_v25  ;;  %v2064_v25 = vpop.permute.xlu2 %2063 }
 0x2f6   :  { %6180 = vpow2.f32 %v2952_v3  ;;  %v4035_v54 = vpop.f32.mrf.mxu0  ;;  %v4490_v49 = vsel %vm629_vm2, %v4326_v27, 0.0  ;;  %v10244_v3 = vpack.c.bf16 %v8424_v4, %v8421_v12 }
 0x2f7   :  { %v3465_v0 = vrot.slane %v3464_v38, 2  ;;  %6182 = vpow2.f32 %v2954_v39  ;;  %v8483_v48 = vpop.f32.mrf.mxu1  ;;  %v4328_v19 = vmul.f32 %v4035_v54, %v6567_v40  ;;  %v4492_v16 = vadd.f32 %v4491_v13, %v4490_v49 }
 0x2f8   :  { %6184 = vpow2.f32 %v2956_v1  ;;  %v10246_v1 = vld [vmem:[#allocation25_spill] sm:$0xff]  ;;  %v620_v41 = vmax.f32 %v364_v8, %v492_v5  ;;  %v306_v49 = vadd.f32 %v10243_v44, %v6541_v22 }
 0x2f9   :  { %v3466_v52 = vadd.f32 %v3465_v0, %v3464_v38  ;;  %6186 = vpow2.f32 %v2958_v47  ;;  %5713 = vmatmul.msk.f32.gmra.mxu1 %vm629_vm2, %v560_v56  ;;  %v4493_v51 = vsel %vm629_vm2, %v4328_v19, 0.0  ;;  %v433_v38 = vmul.f32 0.2, %v305_v60  ;;  %v1340_v0 = vpop.f32.mrf.mxu3 }
 0x2fa   :  { %5793 = vmatmul.msk.bf16.gmra.mxu0 %vm2343_vm3, %v10244_v3  ;;  %2107 = vperm.xlu2 %5979, %v10241_v28   ;;  %v8498_v39 = vadd.f32 %v4493_v51, %v4492_v16  ;;  %v8512_v5 = vadd.f32 %v2064_v25, %v1340_v0  ;;  %v434_v0 = vmul.f32 0.2, %v306_v49 }
 0x2fb   :  { %v3467_v9 = vrot.slane %v3466_v52, 1  ;;  %v561_v16 = vmax.f32 %v305_v60, %v433_v38 }
 0x2fc   :  { %v8496_v43 = vpop.eup %6180  ;;  %10245 = vst [vmem:[#allocation36_spill] sm:$0xff] %v8498_v39  ;;  %1707 = vperm.xlu1 %5983, %v10246_v1  }
 0x2fd   :  { %v8501_v47 = vpop.eup %6182  ;;  %v3468_v27 = vadd.f32 %v3467_v9, %v3466_v52  ;;  %v3248_v12 = vsel %vm2343_vm3, %v8496_v43, 0.0  ;;  %5773 = vmatmul.msk.f32.gmra.mxu3 %vm629_vm2, %v620_v41 }
 0x2fe   :  { %v8505_v4 = vpop.eup %6184  ;;  %v3249_v28 = vsel %vm2343_vm3, %v8501_v47, 0.0  ;;  %v2058_v13 = vpop.permute.xlu1 %2057 }
 0x2ff   :  { %v8510_v54 = vpop.eup %6186  ;;  %6188 = vrcp.f32 %v3468_v27  ;;  %v3250_v8 = vadd.f32 %v3249_v28, %v3248_v12  ;;  %v2317_v56 = vadd.f32 %v2058_v13, %v1337_v61  ;;  %v8514_v52 = vpop.f32.mrf.mxu1  ;;  %v3251_v19 = vsel %vm2343_vm3, %v8505_v4, 0.0 }
 0x300   :  { %v3253_v3 = vsel %vm2343_vm3, %v8510_v54, 0.0  ;;  %v2674_v61 = vsel %vm2343_vm3, %v8512_v5, -inf }
 0x301   :  { %v3252_v9 = vadd.f32 %v3251_v19, %v3250_v8  ;;  %v2672_v51 = vsel %vm2343_vm3, %v2317_v56, -inf  ;;  %5714 = vmatmul.msk.f32.gmra.mxu1 %vm629_vm2, %v561_v16  ;;  %v1343_v13 = vpop.f32.mrf.mxu3 }
 0x302   :  { %v2673_v41 = vmax.f32 %v2671_v63, %v2672_v51  ;;  %5981 = vset.pattern.permute.xlu2 %v6538_v21  ;;  %v307_v51 = vadd.f32 %v10243_v44, %v6567_v40 }
 0x303   :  { %v3254_v25 = vadd.f32 %v3253_v3, %v3252_v9 }
 0x304   :  { %v2675_v27 = vmax.f32 %v2673_v41, %v2674_v61  ;;  %5985 = vset.pattern.permute.xlu1 %v6538_v21  ;;  %v8544_v41 = vpop.f32.mrf.mxu0  ;;  %v435_v44 = vmul.f32 0.2, %v307_v51 }
 0x305   :  { %v6189_v60 = vpop.eup %6188  ;;  %v3255_v38 = vrot.slane %v3254_v25, 4  ;;  %10251 = vst [vmem:[#allocation55_spill] sm:$0xff] %v8544_v41 }
 0x306   :  { %v2676_v12 = vrot.slane %v2675_v27, 4  ;;  %v8529_v28 = vmul.f32 %v6189_v60, %v8428_v50  ;;  %v8534_v19 = vmul.f32 %v6189_v60, %v8431_v7  ;;  %v8537_v16 = vmul.f32 %v6189_v60, %v8437_v36  ;;  %v1646_v36 = vpop.permute.xlu0 %1645 }
 0x307   :  { %v3256_v63 = vadd.f32 %v3255_v38, %v3254_v25  ;;  %v8531_v8 = vpop.f32.mrf.mxu1  ;;  %v8540_v9 = vmul.f32 %v6189_v60, %v8444_v31  ;;  %v562_v50 = vmax.f32 %v306_v49, %v434_v0  ;;  %v1658_v49 = vpop.permute.xlu2 %1657  ;;  %v563_v7 = vmax.f32 %v307_v51, %v435_v44 }
 0x308   :  { %10247 = vst [vmem:[#allocation12_spill] sm:$0xff] %v8529_v28  ;;  %v2677_v3 = vmax.f32 %v2675_v27, %v2676_v12 }
 0x309   :  { %10248 = vst [vmem:[#allocation25_spill] sm:$0xff] %v8534_v19  ;;  %v3257_v61 = vrot.slane %v3256_v63, 2  ;;  %5715 = vmatmul.msk.f32.gmra.mxu1 %vm629_vm2, %v562_v50 }
 0x30a   :  { %10249 = vst [vmem:[#allocation53_spill] sm:$0xff] %v8537_v16  ;;  %v2678_v38 = vrot.slane %v2677_v3, 2  ;;  %1695 = vperm.xlu2 %5981, %v10246_v1   ;;  %v1346_v16 = vpop.f32.mrf.mxu3 }
 0x30b   :  { %10250 = vst [vmem:[#allocation54_spill] sm:$0xff] %v8540_v9  ;;  %v3258_v31 = vadd.f32 %v3257_v61, %v3256_v63 }
 0x30c   :  { %v2679_v60 = vmax.f32 %v2677_v3, %v2678_v38  ;;  %2120 = vperm.xlu1 %5985, %v7936_v35  }
 0x30d   :  { %v3259_v27 = vrot.slane %v3258_v31, 1 }
 0x30e   :  { %v2680_v0 = vrot.slane %v2679_v60, 1  ;;  %v4040_v28 = vpop.f32.mrf.mxu0  ;;  %v1652_v38 = vpop.permute.xlu1 %1651 }
 0x30f   :  { %v3260_v12 = vadd.f32 %v3259_v27, %v3258_v31  ;;  %v8553_v39 = vpop.f32.mrf.mxu1  ;;  %v2077_v9 = vpop.permute.xlu0 %2076 }
 0x310   :  { %v2681_v25 = vmax.f32 %v2679_v60, %v2680_v0  ;;  %v8560_v31 = vadd.f32 %v2077_v9, %v1346_v16 }
 0x311   :  { %6190 = vrcp.f32 %v3260_v12  ;;  %5716 = vmatmul.msk.f32.gmra.mxu1 %vm629_vm2, %v563_v7 }
 0x312   :  { %v2860_v50 = vsub.f32 %v8454_v37, %v2681_v25  ;;  %v2861_v63 = vsub.f32 %v8448_v45, %v2681_v25  ;;  %v2862_v61 = vsub.f32 %v2317_v56, %v2681_v25  ;;  %v2863_v3 = vsub.f32 %v8512_v5, %v2681_v25  ;;  %5984 = vset.pattern.permute.xlu2 %v10206_v62 }
 0x313   :  { %v8564_v37 = vadd.f32 %v1652_v38, %v8155_v11  ;;  %v8569_v25 = vadd.f32 %v1646_v36, %v8117_v34  ;;  %v2683_v9 = vsel %vm2343_vm3, %v8560_v31, -inf }
 0x314   :  { %v3088_v60 = vmul.f32 1.442695, %v2860_v50  ;;  %v3090_v27 = vmul.f32 1.442695, %v2861_v63  ;;  %v3092_v51 = vmul.f32 1.442695, %v2862_v61  ;;  %5988 = vset.pattern.permute.xlu1 %v10206_v62  ;;  %v2071_v45 = vpop.permute.xlu2 %2070  ;;  %v8588_v61 = vadd.f32 %v1658_v49, %v8202_v57 }
 0x315   :  { %v3094_v44 = vmul.f32 1.442695, %v2863_v3  ;;  %v8566_v5 = vadd.f32 %v2071_v45, %v1343_v13  ;;  %v2462_v13 = vsel %vm2343_vm3, %v8564_v37, -inf  ;;  %v2461_v63 = vsel %vm2343_vm3, %v8569_v25, -inf }
 0x316   :  { %6192 = vpow2.f32 %v3088_v60  ;;  %v4042_v11 = vpop.f32.mrf.mxu0  ;;  %v2463_v60 = vmax.f32 %v2461_v63, %v2462_v13  ;;  %v4330_v57 = vmul.f32 %v4040_v28, %v6522_v6  ;;  %v2464_v45 = vsel %vm2343_vm3, %v8588_v61, -inf }
 0x317   :  { %v6191_v56 = vpop.eup %6190  ;;  %6194 = vpow2.f32 %v3090_v27  ;;  %v8571_v16 = vpop.f32.mrf.mxu1  ;;  %v2682_v7 = vsel %vm2343_vm3, %v8566_v5, -inf }
 0x318   :  { %6196 = vpow2.f32 %v3092_v51  ;;  %v3624_v0 = vmul.f32 %v6191_v56, %v8496_v43  ;;  %v2684_v12 = vmax.f32 %v2682_v7, %v2683_v9  ;;  %v3625_v34 = vmul.f32 %v6191_v56, %v8501_v47 }
 0x319   :  { %6198 = vpow2.f32 %v3094_v44  ;;  %v8582_v36 = vmul.f32 %v6191_v56, %v8505_v4  ;;  %v3627_v50 = vmul.f32 %v6191_v56, %v8510_v54  ;;  %v4331_v43 = vmul.f32 %v4042_v11, %v6541_v22 }
 0x31a   :  { %v3736_v3 = vpack.c.bf16 %v3625_v34, %v3624_v0  ;;  %1713 = vperm.xlu2 %5984, %v10246_v1   ;;  %v2465_v11 = vmax.f32 %v2463_v60, %v2464_v45  ;;  %v4503_v34 = vsel %vm629_vm2, %v4330_v57, 0.0 }
 0x31b   :  { %v3737_v47 = vpack.c.bf16 %v3627_v50, %v8582_v36  ;;  %v4504_v56 = vsel %vm629_vm2, %v4331_v43, 0.0 }
 0x31c   :  { %v8592_v38 = vpop.eup %6192  ;;  %2138 = vperm.xlu1 %5988, %v7936_v35   ;;  %5794 = vmatmul.msk.bf16.gmra.mxu0 %vm2343_vm3, %v3736_v3  ;;  %v4505_v43 = vadd.f32 %v4504_v56, %v4503_v34 }
 0x31d   :  { %v8596_v4 = vpop.eup %6194  ;;  %v3469_v54 = vsel %vm2343_vm3, %v8592_v38, 0.0 }
 0x31e   :  { %v8602_v49 = vpop.eup %6196  ;;  %v3470_v1 = vsel %vm2343_vm3, %v8596_v4, 0.0  ;;  %v1664_v27 = vpop.permute.xlu1 %1663 }
 0x31f   :  { %v8606_v51 = vpop.eup %6198  ;;  %v3471_v44 = vadd.f32 %v3470_v1, %v3469_v54  ;;  %v2254_v9 = vadd.f32 %v1664_v27, %v8231_v46  ;;  %v8612_v7 = vpop.f32.mrf.mxu1  ;;  %v3472_v28 = vsel %vm2343_vm3, %v8602_v49, 0.0 }
 0x320   :  { %v4045_v0 = vpop.f32.mrf.mxu0  ;;  %v3474_v63 = vsel %vm2343_vm3, %v8606_v51, 0.0  ;;  %v1349_v1 = vpop.f32.mrf.mxu3 }
 0x321   :  { %v3473_v13 = vadd.f32 %v3472_v28, %v3471_v44  ;;  %v2466_v36 = vsel %vm2343_vm3, %v2254_v9, -inf  ;;  %v4332_v50 = vmul.f32 %v4045_v0, %v6567_v40 }
 0x322   :  { %v2467_v3 = vmax.f32 %v2465_v11, %v2466_v36  ;;  %5986 = vset.pattern.permute.xlu2 %v6546_v24 }
 0x323   :  { %v3475_v46 = vadd.f32 %v3474_v63, %v3473_v13  ;;  %v4506_v54 = vsel %vm629_vm2, %v4332_v50, 0.0 }
 0x324   :  { %v2468_v60 = vrot.slane %v2467_v3, 4  ;;  %v8623_v27 = vadd.f32 %v4506_v54, %v4505_v43  ;;  %5990 = vset.pattern.permute.xlu1 %v6546_v24  ;;  %v2083_v44 = vpop.permute.xlu2 %2082 }
 0x325   :  { %v3476_v57 = vrot.slane %v3475_v46, 4  ;;  %v8626_v28 = vadd.f32 %v2083_v44, %v1349_v1 }
 0x326   :  { %10252 = vst [vmem:[#allocation56_spill] sm:$0xff] %v8623_v27  ;;  %v2469_v45 = vmax.f32 %v2467_v3, %v2468_v60  ;;  %v8628_v0 = vpop.permute.xlu1 %207 }
 0x327   :  { %v3477_v56 = vadd.f32 %v3476_v57, %v3475_v46  ;;  %v365_v11 = vadd.f32 %v8628_v0, %v6522_v6  ;;  %v8632_v13 = vpop.f32.mrf.mxu1  ;;  %v2685_v36 = vsel %vm2343_vm3, %v8626_v28, -inf  ;;  %v366_v3 = vadd.f32 %v8628_v0, %v6541_v22 }
 0x328   :  { %v2470_v34 = vrot.slane %v2469_v45, 2  ;;  %v2686_v63 = vmax.f32 %v2684_v12, %v2685_v36  ;;  %v1352_v57 = vpop.f32.mrf.mxu3 }
 0x329   :  { %v3478_v50 = vrot.slane %v3477_v56, 2  ;;  %v493_v43 = vmul.f32 0.2, %v365_v11 }
 0x32a   :  { %v2471_v54 = vmax.f32 %v2469_v45, %v2470_v34  ;;  %2126 = vperm.xlu2 %5986, %v7936_v35   ;;  %v494_v45 = vmul.f32 0.2, %v366_v3 }
 0x32b   :  { %v3479_v19 = vadd.f32 %v3478_v50, %v3477_v56  ;;  %v621_v46 = vmax.f32 %v365_v11, %v493_v43 }
 0x32c   :  { %v2472_v1 = vrot.slane %v2471_v54, 1  ;;  %1726 = vperm.xlu1 %5990, %v8014_v23   ;;  %5795 = vmatmul.msk.bf16.gmra.mxu0 %vm2343_vm3, %v3737_v47 }
 0x32d   :  { %v3480_v60 = vrot.slane %v3479_v19, 1  ;;  %5774 = vmatmul.msk.f32.gmra.mxu3 %vm629_vm2, %v621_v46 }
 0x32e   :  { %v2473_v44 = vmax.f32 %v2471_v54, %v2472_v1  ;;  %v2089_v12 = vpop.permute.xlu1 %2088 }
 0x32f   :  { %v3481_v36 = vadd.f32 %v3480_v60, %v3479_v19  ;;  %v8642_v56 = vadd.f32 %v2089_v12, %v1352_v57  ;;  %v8644_v34 = vpop.f32.mrf.mxu1  ;;  %v367_v57 = vadd.f32 %v8628_v0, %v6567_v40 }
 0x330   :  { %v2796_v35 = vsub.f32 %v8569_v25, %v2473_v44  ;;  %v2797_v11 = vsub.f32 %v8564_v37, %v2473_v44  ;;  %v2798_v50 = vsub.f32 %v8588_v61, %v2473_v44  ;;  %v2799_v43 = vsub.f32 %v2254_v9, %v2473_v44  ;;  %v8654_v37 = vpop.f32.mrf.mxu0 }
 0x331   :  { %6200 = vrcp.f32 %v3481_v36  ;;  %v2687_v47 = vsel %vm2343_vm3, %v8642_v56, -inf  ;;  %v622_v25 = vmax.f32 %v366_v3, %v494_v45  ;;  %10253 = vst [vmem:[#allocation57_spill] sm:$0xff] %v8654_v37  ;;  %v8755_v37 = vperm.slane %v8283_v53, 7 }
 0x332   :  { %v2960_v46 = vmul.f32 1.442695, %v2796_v35  ;;  %v2962_v54 = vmul.f32 1.442695, %v2797_v11  ;;  %v2964_v1 = vmul.f32 1.442695, %v2798_v50  ;;  %v2688_v19 = vmax.f32 %v2686_v63, %v2687_v47  ;;  %5989 = vset.pattern.permute.xlu2 %v6538_v21 }
 0x333   :  { %v2966_v60 = vmul.f32 1.442695, %v2799_v43  ;;  %v495_v63 = vmul.f32 0.2, %v367_v57  ;;  %v8661_v35 = vperm.slane %v8283_v53, 5  ;;  %2213 = vperm.xlu0 %6012, %v8755_v37  }
 0x334   :  { %6202 = vpow2.f32 %v2960_v46  ;;  %v2689_v61 = vrot.slane %v2688_v19, 4  ;;  %5993 = vset.pattern.permute.xlu1 %v6538_v21  ;;  %v1671_v46 = vpop.permute.xlu2 %1670 }
 0x335   :  { %6204 = vpow2.f32 %v2962_v54  ;;  %5775 = vmatmul.msk.f32.gmra.mxu3 %vm629_vm2, %v622_v25 }
 0x336   :  { %6206 = vpow2.f32 %v2964_v1  ;;  %v2690_v9 = vmax.f32 %v2688_v19, %v2689_v61 }
 0x337   :  { %v6201_v44 = vpop.eup %6200  ;;  %6208 = vpow2.f32 %v2966_v60  ;;  %v8658_v12 = vpop.f32.mrf.mxu1 }
 0x338   :  { %v2691_v36 = vrot.slane %v2690_v9, 2  ;;  %v8664_v3 = vmul.f32 %v6201_v44, %v8592_v38  ;;  %v8667_v45 = vmul.f32 %v6201_v44, %v8596_v4  ;;  %v8670_v11 = vmul.f32 %v6201_v44, %v8602_v49  ;;  %v1677_v38 = vpop.permute.xlu0 %1676 }
 0x339   :  { %v8673_v50 = vmul.f32 %v6201_v44, %v8606_v51  ;;  %v368_v49 = vadd.f32 %v8628_v0, %v6672_v29  ;;  %v623_v51 = vmax.f32 %v367_v57, %v495_v63  ;;  %v8696_v0 = vadd.f32 %v1671_v46, %v8262_v2  ;;  %v1355_v46 = vpop.f32.mrf.mxu3 }
 0x33a   :  { %10254 = vst [vmem:[#allocation58_spill] sm:$0xff] %v8664_v3  ;;  %v8675_v43 = vpop.eup %6202  ;;  %v2692_v47 = vmax.f32 %v2690_v9, %v2691_v36  ;;  %1720 = vperm.xlu2 %5989, %v8014_v23   ;;  %v8700_v57 = vadd.f32 %v1677_v38, %v8293_v10 }
 0x33b   :  { %10255 = vst [vmem:[#allocation59_spill] sm:$0xff] %v8667_v45  ;;  %v8679_v1 = vpop.eup %6204  ;;  %v3261_v4 = vsel %vm2343_vm3, %v8675_v43, 0.0  ;;  %v4050_v9 = vpop.f32.mrf.mxu0  ;;  %v496_v3 = vmul.f32 0.2, %v368_v49  ;;  %6013 = vset.pattern.permute.xlu0 %v6538_v21 }
 0x33c   :  { %10256 = vst [vmem:[#allocation60_spill] sm:$0xff] %v8670_v11  ;;  %v8688_v60 = vpop.eup %6206  ;;  %v3262_v25 = vsel %vm2343_vm3, %v8679_v1, 0.0  ;;  %v2693_v61 = vrot.slane %v2692_v47, 1  ;;  %2145 = vperm.xlu1 %5993, %v8661_v35  }
 0x33d   :  { %10257 = vst [vmem:[#allocation61_spill] sm:$0xff] %v8673_v50  ;;  %v8693_v44 = vpop.eup %6208  ;;  %v3263_v36 = vadd.f32 %v3262_v25, %v3261_v4  ;;  %5776 = vmatmul.msk.f32.gmra.mxu3 %vm629_vm2, %v623_v51  ;;  %v3264_v63 = vsel %vm2343_vm3, %v8688_v60, 0.0  ;;  %v624_v27 = vmax.f32 %v368_v49, %v496_v3 }
 0x33e   :  { %v2694_v19 = vmax.f32 %v2692_v47, %v2693_v61  ;;  %v1683_v54 = vpop.permute.xlu1 %1682  ;;  %v3266_v50 = vsel %vm2343_vm3, %v8693_v44, 0.0  ;;  %v2474_v61 = vsel %vm2343_vm3, %v8696_v0, -inf }
 0x33f   :  { %v3265_v11 = vadd.f32 %v3264_v63, %v3263_v36  ;;  %v8707_v4 = vadd.f32 %v1683_v54, %v8330_v30  ;;  %v8709_v2 = vpop.f32.mrf.mxu1 }
 0x340   :  { %v2864_v51 = vsub.f32 %v8566_v5, %v2694_v19  ;;  %v2865_v10 = vsub.f32 %v8560_v31, %v2694_v19  ;;  %v2866_v38 = vsub.f32 %v8626_v28, %v2694_v19  ;;  %v2867_v47 = vsub.f32 %v8642_v56, %v2694_v19 }
 0x341   :  { %v3267_v25 = vadd.f32 %v3266_v50, %v3265_v11  ;;  %v2475_v5 = vsel %vm2343_vm3, %v8700_v57, -inf  ;;  %v2477_v31 = vsel %vm2343_vm3, %v8707_v4, -inf }
 0x342   :  { %v3096_v36 = vmul.f32 1.442695, %v2864_v51  ;;  %v3098_v63 = vmul.f32 1.442695, %v2865_v10  ;;  %v3100_v45 = vmul.f32 1.442695, %v2866_v38  ;;  %5991 = vset.pattern.permute.xlu2 %v6590_v55  ;;  %v2476_v11 = vmax.f32 %v2474_v61, %v2475_v5 }
 0x343   :  { %v3268_v30 = vrot.slane %v3267_v25, 4  ;;  %v3102_v54 = vmul.f32 1.442695, %v2867_v47  ;;  %v4052_v28 = vpop.f32.mrf.mxu0 }
 0x344   :  { %6210 = vpow2.f32 %v3096_v36  ;;  %5995 = vset.pattern.permute.xlu1 %v6590_v55  ;;  %v1689_v50 = vpop.permute.xlu2 %1688  ;;  %v2478_v49 = vmax.f32 %v2476_v11, %v2477_v31  ;;  %v4335_v51 = vmul.f32 %v4052_v28, %v6541_v22 }
 0x345   :  { %v3269_v56 = vadd.f32 %v3268_v30, %v3267_v25  ;;  %6212 = vpow2.f32 %v3098_v63  ;;  %5777 = vmatmul.msk.f32.gmra.mxu3 %vm629_vm2, %v624_v27  ;;  %v8725_v19 = vadd.f32 %v1689_v50, %v8366_v17  ;;  %v4334_v25 = vmul.f32 %v4050_v9, %v6522_v6  ;;  %v2096_v17 = vpop.permute.xlu0 %2095 }
 0x346   :  { %6214 = vpow2.f32 %v3100_v45  ;;  %v1358_v45 = vpop.f32.mrf.mxu3  ;;  %v8743_v28 = vadd.f32 %v2096_v17, %v1355_v46 }
 0x347   :  { %v3270_v3 = vrot.slane %v3269_v56, 2  ;;  %6216 = vpow2.f32 %v3102_v54  ;;  %v8728_v10 = vpop.f32.mrf.mxu1  ;;  %v2479_v38 = vsel %vm2343_vm3, %v8725_v19, -inf  ;;  %v4517_v54 = vsel %vm629_vm2, %v4335_v51, 0.0 }
 0x348   :  { %10258 = vst [vmem:[#allocation62_spill] sm:$0xff] %v8728_v10  ;;  %v2480_v61 = vmax.f32 %v2478_v49, %v2479_v38  ;;  %v4516_v49 = vsel %vm629_vm2, %v4334_v25, 0.0  ;;  %v2695_v25 = vsel %vm2343_vm3, %v8743_v28, -inf }
 0x349   :  { %v3271_v47 = vadd.f32 %v3270_v3, %v3269_v56  ;;  %v4518_v38 = vadd.f32 %v4517_v54, %v4516_v49 }
 0x34a   :  { %v8733_v27 = vpop.eup %6210  ;;  %v2481_v5 = vrot.slane %v2480_v61, 4  ;;  %1732 = vperm.xlu2 %5991, %v8014_v23  }
 0x34b   :  { %v8735_v36 = vpop.eup %6212  ;;  %v3272_v63 = vrot.slane %v3271_v47, 1  ;;  %v3482_v30 = vsel %vm2343_vm3, %v8733_v27, 0.0  ;;  %v4055_v56 = vpop.f32.mrf.mxu0 }
 0x34c   :  { %v8741_v31 = vpop.eup %6214  ;;  %v3483_v9 = vsel %vm2343_vm3, %v8735_v36, 0.0  ;;  %2157 = vperm.xlu1 %5995, %v8661_v35   ;;  %v2482_v51 = vmax.f32 %v2480_v61, %v2481_v5  ;;  %v4336_v46 = vmul.f32 %v4055_v56, %v6567_v40 }
 0x34d   :  { %v8748_v11 = vpop.eup %6216  ;;  %v3273_v50 = vadd.f32 %v3272_v63, %v3271_v47  ;;  %v3484_v3 = vadd.f32 %v3483_v9, %v3482_v30  ;;  %v3485_v23 = vsel %vm2343_vm3, %v8741_v31, 0.0 }
 0x34e   :  { %v2102_v17 = vpop.permute.xlu1 %2101  ;;  %v2483_v15 = vrot.slane %v2482_v51, 2  ;;  %v3487_v61 = vsel %vm2343_vm3, %v8748_v11, 0.0  ;;  %v4519_v63 = vsel %vm629_vm2, %v4336_v46, 0.0 }
 0x34f   :  { %6218 = vrcp.f32 %v3273_v50  ;;  %v3486_v41 = vadd.f32 %v3485_v23, %v3484_v3  ;;  %v8757_v10 = vadd.f32 %v2102_v17, %v1358_v45  ;;  %v8759_v47 = vpop.f32.mrf.mxu1  ;;  %v8767_v54 = vadd.f32 %v4519_v63, %v4518_v38  ;;  %v1361_v50 = vpop.f32.mrf.mxu3 }
 0x350   :  { %v2484_v53 = vmax.f32 %v2482_v51, %v2483_v15 }
 0x351   :  { %v3488_v30 = vadd.f32 %v3487_v61, %v3486_v41  ;;  %10259 = vst [vmem:[#allocation63_spill] sm:$0xff] %v8767_v54  ;;  %v2696_v45 = vsel %vm2343_vm3, %v8757_v10, -inf }
 0x352   :  { %v2697_v5 = vmax.f32 %v2695_v25, %v2696_v45  ;;  %v2485_v56 = vrot.slane %v2484_v53, 1  ;;  %5994 = vset.pattern.permute.xlu2 %v6546_v24 }
 0x353   :  { %v3489_v9 = vrot.slane %v3488_v30, 4 }
 0x354   :  { %5998 = vset.pattern.permute.xlu1 %v6546_v24  ;;  %v2486_v23 = vmax.f32 %v2484_v53, %v2485_v56  ;;  %v2108_v46 = vpop.permute.xlu2 %2107 }
 0x355   :  { %v6219_v3 = vpop.eup %6218  ;;  %v3490_v49 = vadd.f32 %v3489_v9, %v3488_v30  ;;  %v8773_v17 = vadd.f32 %v2108_v46, %v1361_v50 }
 0x356   :  { %v3628_v15 = vmul.f32 %v6219_v3, %v8675_v43  ;;  %v3629_v41 = vmul.f32 %v6219_v3, %v8679_v1  ;;  %v2800_v38 = vsub.f32 %v8696_v0, %v2486_v23  ;;  %v2801_v25 = vsub.f32 %v8700_v57, %v2486_v23 }
 0x357   :  { %v3491_v51 = vrot.slane %v3490_v49, 2  ;;  %v2802_v61 = vsub.f32 %v8707_v4, %v2486_v23  ;;  %v8780_v63 = vpop.f32.mrf.mxu1  ;;  %v2803_v45 = vsub.f32 %v8725_v19, %v2486_v23  ;;  %v2698_v30 = vsel %vm2343_vm3, %v8773_v17, -inf  ;;  %v1364_v19 = vpop.f32.mrf.mxu3 }
 0x358   :  { %10260 = vst [vmem:[#allocation64_spill] sm:$0xff] %v8780_v63  ;;  %v3738_v53 = vpack.c.bf16 %v3629_v41, %v3628_v15  ;;  %v2968_v9 = vmul.f32 1.442695, %v2800_v38  ;;  %v2970_v1 = vmul.f32 1.442695, %v2801_v25  ;;  %v2699_v0 = vmax.f32 %v2697_v5, %v2698_v30  ;;  %v8791_v15 = vpop.f32.mrf.mxu0 }
 0x359   :  { %v3492_v43 = vadd.f32 %v3491_v51, %v3490_v49  ;;  %v2972_v56 = vmul.f32 1.442695, %v2802_v61  ;;  %v2974_v50 = vmul.f32 1.442695, %v2803_v45  ;;  %10261 = vst [vmem:[#allocation65_spill] sm:$0xff] %v8791_v15 }
 0x35a   :  { %5796 = vmatmul.msk.bf16.gmra.mxu0 %vm2343_vm3, %v3738_v53  ;;  %6220 = vpow2.f32 %v2968_v9  ;;  %2151 = vperm.xlu2 %5994, %v8661_v35   ;;  %v3630_v9 = vmul.f32 %v6219_v3, %v8688_v60 }
 0x35b   :  { %v3493_v57 = vrot.slane %v3492_v43, 1  ;;  %6222 = vpow2.f32 %v2970_v1  ;;  %v3631_v1 = vmul.f32 %v6219_v3, %v8693_v44 }
 0x35c   :  { %1751 = vperm.xlu1 %5998, %v8104_v26   ;;  %6224 = vpow2.f32 %v2972_v56 }
 0x35d   :  { %v3494_v4 = vadd.f32 %v3493_v57, %v3492_v43  ;;  %6226 = vpow2.f32 %v2974_v50 }
 0x35e   :  { %v2114_v23 = vpop.permute.xlu1 %2113 }
 0x35f   :  { %6228 = vrcp.f32 %v3494_v4  ;;  %v8789_v49 = vadd.f32 %v2114_v23, %v1364_v19  ;;  %v1211_v46 = vpop.f32.mrf.mxu1 }
 0x360   :  { %v8793_v5 = vpop.eup %6220 }
 0x361   :  { %v2700_v41 = vsel %vm2343_vm3, %v8789_v49, -inf  ;;  %v8797_v51 = vpop.eup %6222  ;;  %v3274_v38 = vsel %vm2343_vm3, %v8793_v5, 0.0 }
 0x362   :  { %v2701_v25 = vmax.f32 %v2699_v0, %v2700_v41  ;;  %v8801_v61 = vpop.eup %6224  ;;  %v3275_v45 = vsel %vm2343_vm3, %v8797_v51, 0.0  ;;  %5996 = vset.pattern.permute.xlu2 %v10206_v62 }
 0x363   :  { %v8806_v30 = vpop.eup %6226  ;;  %v3276_v53 = vadd.f32 %v3275_v45, %v3274_v38  ;;  %v3277_v50 = vsel %vm2343_vm3, %v8801_v61, 0.0 }
 0x364   :  { %v2702_v43 = vrot.slane %v2701_v25, 4  ;;  %6000 = vset.pattern.permute.xlu1 %v10206_v62  ;;  %v3279_v57 = vsel %vm2343_vm3, %v8806_v30, 0.0 }
 0x365   :  { %v6229_v56 = vpop.eup %6228  ;;  %v3278_v0 = vadd.f32 %v3277_v50, %v3276_v53  ;;  %v3739_v53 = vpack.c.bf16 %v3631_v1, %v3630_v9 }
 0x366   :  { %v2703_v4 = vmax.f32 %v2701_v25, %v2702_v43  ;;  %v8816_v23 = vmul.f32 %v6229_v56, %v8733_v27  ;;  %v8819_v41 = vmul.f32 %v6229_v56, %v8735_v36  ;;  %v8822_v60 = vmul.f32 %v6229_v56, %v8741_v31  ;;  %v1696_v36 = vpop.permute.xlu2 %1695  ;;  %v1702_v31 = vpop.permute.xlu0 %1701 }
 0x367   :  { %v1214_v19 = vpop.f32.mrf.mxu1  ;;  %v8825_v44 = vmul.f32 %v6229_v56, %v8748_v11  ;;  %v3280_v3 = vadd.f32 %v3279_v57, %v3278_v0  ;;  %v4060_v45 = vpop.f32.mrf.mxu0  ;;  %v8835_v9 = vadd.f32 %v1696_v36, %v8395_v18  ;;  %v8838_v27 = vadd.f32 %v1702_v31, %v8417_v58  ;;  %v10267_v31 = vld [vmem:[#allocation15_spill] sm:$0xff] }
 0x368   :  { %10262 = vst [vmem:[#allocation66_spill] sm:$0xff] %v8816_v23  ;;  %v2704_v38 = vrot.slane %v2703_v4, 2 }
 0x369   :  { %10263 = vst [vmem:[#allocation67_spill] sm:$0xff] %v8819_v41  ;;  %v3281_v43 = vrot.slane %v3280_v3, 4 }
 0x36a   :  { %10264 = vst [vmem:[#allocation68_spill] sm:$0xff] %v8822_v60  ;;  %v2705_v50 = vmax.f32 %v2703_v4, %v2704_v38  ;;  %5797 = vmatmul.msk.bf16.gmra.mxu0 %vm2343_vm3, %v3739_v53  ;;  %2163 = vperm.xlu2 %5996, %v8661_v35   ;;  %v8840_v4 = vpop.f32.mrf.mxu3  ;;  %v10266_v38 = vld [vmem:[#allocation20_spill] sm:$0xff] }
 0x36b   :  { %10265 = vst [vmem:[#allocation69_spill] sm:$0xff] %v8825_v44  ;;  %v3282_v11 = vadd.f32 %v3281_v43, %v3280_v3  ;;  %v8843_v53 = vadd.f32 %v10266_v38, %v1214_v19  ;;  %v2487_v19 = vsel %vm2343_vm3, %v8835_v9, -inf  ;;  %v10268_v60 = vld [vmem:[#allocation16_spill] sm:$0xff] }
 0x36c   :  { %v2706_v56 = vrot.slane %v2705_v50, 1  ;;  %1763 = vperm.xlu1 %6000, %v8104_v26  }
 0x36d   :  { %v3283_v1 = vrot.slane %v3282_v11, 2 }
 0x36e   :  { %v2707_v0 = vmax.f32 %v2705_v50, %v2706_v56  ;;  %v1708_v57 = vpop.permute.xlu1 %1707  ;;  %v8853_v56 = vadd.f32 %v10267_v31, %v1211_v46 }
 0x36f   :  { %v8846_v35 = vadd.f32 %v1708_v57, %v8456_v20  ;;  %v1217_v3 = vpop.f32.mrf.mxu1  ;;  %v3284_v43 = vadd.f32 %v3283_v1, %v3282_v11  ;;  %v4062_v36 = vpop.f32.mrf.mxu0 }
 0x370   :  { %v2868_v25 = vsub.f32 %v8743_v28, %v2707_v0  ;;  %v2869_v18 = vsub.f32 %v8757_v10, %v2707_v0  ;;  %v2870_v50 = vsub.f32 %v8773_v17, %v2707_v0  ;;  %v2871_v58 = vsub.f32 %v8789_v49, %v2707_v0 }
 0x371   :  { %v3285_v38 = vrot.slane %v3284_v43, 1  ;;  %v8858_v11 = vadd.f32 %v10268_v60, %v1217_v3  ;;  %v2488_v10 = vsel %vm2343_vm3, %v8838_v27, -inf  ;;  %v2540_v17 = vsel %vm2343_vm3, %v8843_v53, -inf }
 0x372   :  { %v3104_v20 = vmul.f32 1.442695, %v2868_v25  ;;  %v3106_v57 = vmul.f32 1.442695, %v2869_v18  ;;  %v3108_v28 = vmul.f32 1.442695, %v2870_v50  ;;  %v4339_v49 = vmul.f32 %v4062_v36, %v6541_v22  ;;  %5999 = vset.pattern.permute.xlu2 %v6590_v55 }
 0x373   :  { %v3286_v46 = vadd.f32 %v3285_v38, %v3284_v43  ;;  %v3110_v1 = vmul.f32 1.442695, %v2871_v58  ;;  %v2490_v25 = vsel %vm2343_vm3, %v8846_v35, -inf  ;;  %v2489_v60 = vmax.f32 %v2487_v19, %v2488_v10  ;;  %v1370_v10 = vpop.f32.mrf.mxu3 }
 0x374   :  { %6230 = vpow2.f32 %v3104_v20  ;;  %6003 = vset.pattern.permute.xlu1 %v6590_v55  ;;  %v4338_v0 = vmul.f32 %v4060_v45, %v6522_v6  ;;  %v1714_v3 = vpop.permute.xlu2 %1713  ;;  %v2539_v18 = vsel %vm2343_vm3, %v8853_v56, -inf  ;;  %v2542_v50 = vsel %vm2343_vm3, %v8858_v11, -inf  ;;  %v10269_v20 = vld [vmem:[#allocation17_spill] sm:$0xff] }
 0x375   :  { %6232 = vpow2.f32 %v3106_v57  ;;  %v8875_v43 = vadd.f32 %v1714_v3, %v8483_v48  ;;  %v2541_v36 = vmax.f32 %v2539_v18, %v2540_v17  ;;  %v2491_v58 = vmax.f32 %v2489_v60, %v2490_v25 }
 0x376   :  { %6234 = vrcp.f32 %v3286_v46  ;;  %v4530_v31 = vsel %vm629_vm2, %v4339_v49, 0.0  ;;  %v4529_v46 = vsel %vm629_vm2, %v4338_v0, 0.0 }
 0x377   :  { %6236 = vpow2.f32 %v3108_v28  ;;  %v1220_v38 = vpop.f32.mrf.mxu1  ;;  %v2492_v45 = vsel %vm2343_vm3, %v8875_v43, -inf  ;;  %v4065_v19 = vpop.f32.mrf.mxu0  ;;  %v2543_v44 = vmax.f32 %v2541_v36, %v2542_v50  ;;  %v4531_v25 = vadd.f32 %v4530_v31, %v4529_v46 }
 0x378   :  { %6238 = vpow2.f32 %v3110_v1  ;;  %v8881_v57 = vadd.f32 %v10269_v20, %v1220_v38  ;;  %v2493_v48 = vmax.f32 %v2491_v58, %v2492_v45  ;;  %v4340_v28 = vmul.f32 %v4065_v19, %v6567_v40 }
 0x37a   :  { %v8885_v17 = vpop.eup %6230  ;;  %v2544_v49 = vsel %vm2343_vm3, %v8881_v57, -inf  ;;  %v2494_v3 = vrot.slane %v2493_v48, 4  ;;  %v4532_v18 = vsel %vm629_vm2, %v4340_v28, 0.0  ;;  %1757 = vperm.xlu2 %5999, %v8104_v26  }
 0x37b   :  { %v8889_v1 = vpop.eup %6232  ;;  %v3495_v60 = vsel %vm2343_vm3, %v8885_v17, 0.0  ;;  %v2545_v38 = vmax.f32 %v2543_v44, %v2544_v49  ;;  %v8897_v36 = vadd.f32 %v4532_v18, %v4531_v25 }
 0x37c   :  { %v6235_v0 = vpop.eup %6234  ;;  %v3496_v50 = vsel %vm2343_vm3, %v8889_v1, 0.0  ;;  %2182 = vperm.xlu1 %6003, %v8286_v42   ;;  %v2495_v45 = vmax.f32 %v2493_v48, %v2494_v3 }
 0x37d   :  { %10270 = vst [vmem:[#allocation20_spill] sm:$0xff] %v8897_v36  ;;  %v8900_v58 = vpop.eup %6236  ;;  %v3497_v31 = vadd.f32 %v3496_v50, %v3495_v60  ;;  %v2546_v19 = vrot.slane %v2545_v38, 4  ;;  %v3632_v20 = vmul.f32 %v6235_v0, %v8793_v5  ;;  %v3633_v44 = vmul.f32 %v6235_v0, %v8797_v51  ;;  %v1373_v5 = vpop.f32.mrf.mxu3 }
 0x37e   :  { %v8903_v46 = vpop.eup %6238  ;;  %v3498_v26 = vsel %vm2343_vm3, %v8900_v58, 0.0  ;;  %v2496_v49 = vrot.slane %v2495_v45, 2  ;;  %v2133_v51 = vpop.permute.xlu0 %2132 }
 0x37f   :  { %v3499_v28 = vadd.f32 %v3498_v26, %v3497_v31  ;;  %v2547_v25 = vmax.f32 %v2545_v38, %v2546_v19  ;;  %v1223_v18 = vpop.f32.mrf.mxu1  ;;  %v3500_v23 = vsel %vm2343_vm3, %v8903_v46, 0.0  ;;  %v3740_v41 = vpack.c.bf16 %v3633_v44, %v3632_v20  ;;  %v10271_v38 = vld [vmem:[#allocation27_spill] sm:$0xff]  ;;  %v10272_v31 = vld [vmem:[#allocation24_spill] sm:$0xff] }
 0x380   :  { %v2497_v48 = vmax.f32 %v2495_v45, %v2496_v49  ;;  %v8915_v19 = vadd.f32 %v10272_v31, %v10271_v38  ;;  %v2121_v45 = vpop.permute.xlu1 %2120  ;;  %v3634_v49 = vmul.f32 %v6235_v0, %v8801_v61 }
 0x381   :  { %v3501_v60 = vadd.f32 %v3500_v23, %v3499_v28  ;;  %v2548_v3 = vrot.slane %v2547_v25, 2  ;;  %5798 = vmatmul.msk.bf16.gmra.mxu0 %vm2343_vm3, %v3740_v41  ;;  %v8917_v28 = vadd.f32 %v2133_v51, %v1373_v5  ;;  %v8928_v5 = vadd.f32 %v2121_v45, %v8840_v4 }
 0x382   :  { %v2498_v36 = vrot.slane %v2497_v48, 1  ;;  %6001 = vset.pattern.permute.xlu2 %v6538_v21 }
 0x383   :  { %v3502_v50 = vrot.slane %v3501_v60, 4  ;;  %v2549_v54 = vmax.f32 %v2547_v25, %v2548_v3  ;;  %v3635_v25 = vmul.f32 %v6235_v0, %v8806_v30 }
 0x384   :  { %6005 = vset.pattern.permute.xlu1 %v6538_v21  ;;  %v2499_v20 = vmax.f32 %v2497_v48, %v2498_v36  ;;  %v2127_v44 = vpop.permute.xlu2 %2126 }
 0x385   :  { %v3503_v26 = vadd.f32 %v3502_v50, %v3501_v60  ;;  %v2550_v23 = vrot.slane %v2549_v54, 1  ;;  %v8919_v41 = vadd.f32 %v2127_v44, %v1370_v10  ;;  %v10273_v10 = vld [vmem:[#allocation18_spill] sm:$0xff] }
 0x386   :  { %v2804_v15 = vsub.f32 %v8835_v9, %v2499_v20  ;;  %v2805_v63 = vsub.f32 %v8838_v27, %v2499_v20  ;;  %v2806_v38 = vsub.f32 %v8846_v35, %v2499_v20  ;;  %v2807_v36 = vsub.f32 %v8875_v43, %v2499_v20  ;;  %v10274_v20 = vld [vmem:[#allocation22_spill] sm:$0xff] }
 0x387   :  { %v3504_v3 = vrot.slane %v3503_v26, 2  ;;  %v1226_v60 = vpop.f32.mrf.mxu1  ;;  %v2551_v48 = vmax.f32 %v2549_v54, %v2550_v23  ;;  %v8931_v50 = vadd.f32 %v10273_v10, %v1223_v18  ;;  %v2709_v4 = vsel %vm2343_vm3, %v8919_v41, -inf  ;;  %v10275_v10 = vld [vmem:[#allocation19_spill] sm:$0xff] }
 0x388   :  { %v2976_v51 = vmul.f32 1.442695, %v2804_v15  ;;  %v2978_v30 = vmul.f32 1.442695, %v2805_v63  ;;  %v2980_v0 = vmul.f32 1.442695, %v2806_v38  ;;  %v8946_v23 = vadd.f32 %v10274_v20, %v1226_v60 }
 0x389   :  { %v3505_v61 = vadd.f32 %v3504_v3, %v3503_v26  ;;  %v2982_v31 = vmul.f32 1.442695, %v2807_v36  ;;  %v2820_v9 = vsub.f32 %v8853_v56, %v2551_v48  ;;  %v2821_v27 = vsub.f32 %v8843_v53, %v2551_v48 }
 0x38a   :  { %v2822_v35 = vsub.f32 %v8858_v11, %v2551_v48  ;;  %6240 = vpow2.f32 %v2976_v51  ;;  %v2823_v54 = vsub.f32 %v8881_v57, %v2551_v48  ;;  %2170 = vperm.xlu2 %6001, %v8286_v42   ;;  %v2711_v63 = vsel %vm2343_vm3, %v8917_v28, -inf  ;;  %v1376_v57 = vpop.f32.mrf.mxu3 }
 0x38b   :  { %v3506_v44 = vrot.slane %v3505_v61, 1  ;;  %6242 = vpow2.f32 %v2978_v30  ;;  %v3008_v15 = vmul.f32 1.442695, %v2820_v9  ;;  %v3741_v56 = vpack.c.bf16 %v3635_v25, %v3634_v49  ;;  %v8965_v9 = vpop.f32.mrf.mxu0 }
 0x38c   :  { %1770 = vperm.xlu1 %6005, %v8359_v32   ;;  %6244 = vpow2.f32 %v2980_v0  ;;  %v3010_v11 = vmul.f32 1.442695, %v2821_v27  ;;  %v2708_v43 = vsel %vm2343_vm3, %v8928_v5, -inf  ;;  %v3012_v18 = vmul.f32 1.442695, %v2822_v35 }
 0x38d   :  { %v3507_v53 = vadd.f32 %v3506_v44, %v3505_v61  ;;  %6246 = vpow2.f32 %v2982_v31  ;;  %v2710_v26 = vmax.f32 %v2708_v43, %v2709_v4  ;;  %v3014_v3 = vmul.f32 1.442695, %v2823_v54 }
 0x38e   :  { %v2139_v45 = vpop.permute.xlu1 %2138  ;;  %v2552_v38 = vsel %vm2343_vm3, %v8931_v50, -inf  ;;  %v2553_v36 = vsel %vm2343_vm3, %v8946_v23, -inf }
 0x38f   :  { %6248 = vrcp.f32 %v3507_v53  ;;  %v8950_v49 = vadd.f32 %v2139_v45, %v1376_v57  ;;  %v1229_v25 = vpop.f32.mrf.mxu1  ;;  %v2712_v48 = vmax.f32 %v2710_v26, %v2711_v63  ;;  %v2554_v60 = vmax.f32 %v2552_v38, %v2553_v36 }
 0x390   :  { %6250 = vpow2.f32 %v3008_v15  ;;  %v8955_v61 = vadd.f32 %v10275_v10, %v1229_v25  ;;  %v8957_v51 = vpop.eup %6240  ;;  %v2557_v15 = vsel %vm2343_vm3, %v8915_v19, -inf }
 0x391   :  { %6252 = vpow2.f32 %v3010_v11  ;;  %v2713_v30 = vsel %vm2343_vm3, %v8950_v49, -inf  ;;  %v8961_v0 = vpop.eup %6242  ;;  %v3287_v31 = vsel %vm2343_vm3, %v8957_v51, 0.0  ;;  %5799 = vmatmul.msk.bf16.gmra.mxu0 %vm2343_vm3, %v3741_v56 }
 0x392   :  { %6254 = vpow2.f32 %v3012_v18  ;;  %v2714_v27 = vmax.f32 %v2712_v48, %v2713_v30  ;;  %v2555_v35 = vsel %vm2343_vm3, %v8955_v61, -inf  ;;  %v8970_v44 = vpop.eup %6244  ;;  %v3288_v54 = vsel %vm2343_vm3, %v8961_v0, 0.0  ;;  %6004 = vset.pattern.permute.xlu2 %v10206_v62 }
 0x393   :  { %6256 = vpow2.f32 %v3014_v3  ;;  %v2556_v4 = vmax.f32 %v2554_v60, %v2555_v35  ;;  %v8975_v63 = vpop.eup %6246  ;;  %v3289_v53 = vadd.f32 %v3288_v54, %v3287_v31  ;;  %v3290_v56 = vsel %vm2343_vm3, %v8970_v44, 0.0 }
 0x394   :  { %v2715_v11 = vrot.slane %v2714_v27, 4  ;;  %6008 = vset.pattern.permute.xlu1 %v10206_v62  ;;  %v3292_v20 = vsel %vm2343_vm3, %v8975_v63, 0.0 }
 0x395   :  { %v6249_v43 = vpop.eup %6248  ;;  %v2558_v57 = vmax.f32 %v2556_v4, %v2557_v15  ;;  %v3291_v26 = vadd.f32 %v3290_v56, %v3289_v53 }
 0x396   :  { %v8982_v18 = vpop.eup %6250  ;;  %v2716_v45 = vmax.f32 %v2714_v27, %v2715_v11  ;;  %v8987_v3 = vmul.f32 %v6249_v43, %v8885_v17  ;;  %v8994_v48 = vmul.f32 %v6249_v43, %v8889_v1  ;;  %v8997_v10 = vmul.f32 %v6249_v43, %v8900_v58 }
 0x397   :  { %v8989_v38 = vpop.eup %6252  ;;  %v3339_v25 = vsel %vm2343_vm3, %v8982_v18, 0.0  ;;  %v2559_v36 = vrot.slane %v2558_v57, 4  ;;  %v3293_v30 = vadd.f32 %v3292_v20, %v3291_v26  ;;  %v9010_v11 = vmul.f32 %v6249_v43, %v8903_v46  ;;  %v1739_v20 = vpop.permute.xlu0 %1738 }
 0x398   :  { %10276 = vst [vmem:[#allocation15_spill] sm:$0xff] %v8987_v3  ;;  %v8999_v60 = vpop.eup %6254  ;;  %v3340_v31 = vsel %vm2343_vm3, %v8989_v38, 0.0  ;;  %v2717_v17 = vrot.slane %v2716_v45, 2 }
 0x399   :  { %10277 = vst [vmem:[#allocation16_spill] sm:$0xff] %v8994_v48  ;;  %v9003_v27 = vpop.eup %6256  ;;  %v3341_v35 = vadd.f32 %v3340_v31, %v3339_v25  ;;  %v2560_v54 = vmax.f32 %v2558_v57, %v2559_v36  ;;  %v3294_v15 = vrot.slane %v3293_v30, 4  ;;  %v3342_v1 = vsel %vm2343_vm3, %v8999_v60, 0.0  ;;  %v4070_v53 = vpop.f32.mrf.mxu0 }
 0x39a   :  { %v2718_v58 = vmax.f32 %v2716_v45, %v2717_v17  ;;  %2188 = vperm.xlu2 %6004, %v8286_v42   ;;  %v3344_v57 = vsel %vm2343_vm3, %v9003_v27, 0.0  ;;  %v1721_v17 = vpop.permute.xlu2 %1720 }
 0x39b   :  { %v3343_v56 = vadd.f32 %v3342_v1, %v3341_v35  ;;  %v2561_v26 = vrot.slane %v2560_v54, 2  ;;  %v3295_v62 = vadd.f32 %v3294_v15, %v3293_v30  ;;  %v9019_v1 = vadd.f32 %v1739_v20, %v8571_v16 }
 0x39c   :  { %v2719_v25 = vrot.slane %v2718_v58, 1  ;;  %1788 = vperm.xlu1 %6008, %v8359_v32  }
 0x39d   :  { %v3345_v45 = vadd.f32 %v3344_v57, %v3343_v56  ;;  %v2562_v31 = vmax.f32 %v2560_v54, %v2561_v26  ;;  %v3296_v46 = vrot.slane %v3295_v62, 2  ;;  %v9029_v57 = vadd.f32 %v1721_v17, %v8514_v52 }
 0x39e   :  { %v2720_v43 = vmax.f32 %v2718_v58, %v2719_v25  ;;  %v1727_v35 = vpop.permute.xlu1 %1726 }
 0x39f   :  { %v3346_v42 = vrot.slane %v3345_v45, 4  ;;  %v2563_v30 = vrot.slane %v2562_v31, 1  ;;  %v9022_v15 = vadd.f32 %v1727_v35, %v8531_v8  ;;  %v3297_v4 = vadd.f32 %v3296_v46, %v3295_v62 }
 0x3a0   :  { %v2872_v3 = vsub.f32 %v8928_v5, %v2720_v43  ;;  %v2873_v48 = vsub.f32 %v8919_v41, %v2720_v43  ;;  %v2874_v56 = vsub.f32 %v8917_v28, %v2720_v43  ;;  %v2875_v26 = vsub.f32 %v8950_v49, %v2720_v43  ;;  %v9042_v43 = vpop.f32.mrf.mxu3 }
 0x3a1   :  { %v3347_v54 = vadd.f32 %v3346_v42, %v3345_v45  ;;  %v2564_v58 = vmax.f32 %v2562_v31, %v2563_v30  ;;  %v3298_v16 = vrot.slane %v3297_v4, 1  ;;  %v2501_v8 = vsel %vm2343_vm3, %v9022_v15, -inf  ;;  %v4072_v62 = vpop.f32.mrf.mxu0 }
 0x3a2   :  { %v3112_v20 = vmul.f32 1.442695, %v2872_v3  ;;  %v3114_v25 = vmul.f32 1.442695, %v2873_v48  ;;  %v3116_v5 = vmul.f32 1.442695, %v2874_v56  ;;  %6006 = vset.pattern.permute.xlu2 %v6546_v24 }
 0x3a3   :  { %v3348_v46 = vrot.slane %v3347_v54, 2  ;;  %v3118_v35 = vmul.f32 1.442695, %v2875_v26  ;;  %v2824_v41 = vsub.f32 %v8931_v50, %v2564_v58  ;;  %v3299_v28 = vadd.f32 %v3298_v16, %v3297_v4 }
 0x3a4   :  { %6258 = vpow2.f32 %v3112_v20  ;;  %v2825_v49 = vsub.f32 %v8946_v23, %v2564_v58  ;;  %v2826_v52 = vsub.f32 %v8955_v61, %v2564_v58  ;;  %6010 = vset.pattern.permute.xlu1 %v6546_v24  ;;  %v2827_v48 = vsub.f32 %v8915_v19, %v2564_v58  ;;  %v1733_v31 = vpop.permute.xlu2 %1732 }
 0x3a5   :  { %v3349_v3 = vadd.f32 %v3348_v46, %v3347_v54  ;;  %6260 = vpow2.f32 %v3114_v25  ;;  %v3016_v45 = vmul.f32 1.442695, %v2824_v41  ;;  %v2500_v50 = vsel %vm2343_vm3, %v9029_v57, -inf }
 0x3a6   :  { %6262 = vrcp.f32 %v3299_v28  ;;  %v3018_v17 = vmul.f32 1.442695, %v2825_v49  ;;  %v4343_v4 = vmul.f32 %v4072_v62, %v6541_v22  ;;  %v4342_v61 = vmul.f32 %v4070_v53, %v6522_v6 }
 0x3a7   :  { %v3350_v23 = vrot.slane %v3349_v3, 1  ;;  %6264 = vpow2.f32 %v3116_v5  ;;  %v9046_v24 = vadd.f32 %v1733_v31, %v8553_v39  ;;  %v3020_v19 = vmul.f32 1.442695, %v2826_v52 }
 0x3a8   :  { %6266 = vpow2.f32 %v3118_v35  ;;  %v3022_v42 = vmul.f32 1.442695, %v2827_v48  ;;  %v2502_v30 = vmax.f32 %v2500_v50, %v2501_v8  ;;  %v4543_v54 = vsel %vm629_vm2, %v4343_v4, 0.0 }
 0x3a9   :  { %v3351_v56 = vadd.f32 %v3350_v23, %v3349_v3  ;;  %6268 = vpow2.f32 %v3016_v45  ;;  %v2503_v26 = vsel %vm2343_vm3, %v9046_v24, -inf  ;;  %v2505_v16 = vsel %vm2343_vm3, %v9019_v1, -inf  ;;  %v4075_v39 = vpop.f32.mrf.mxu0 }
 0x3aa   :  { %v9051_v58 = vpop.eup %6258  ;;  %6270 = vpow2.f32 %v3018_v17  ;;  %v2504_v53 = vmax.f32 %v2502_v30, %v2503_v26  ;;  %v4542_v8 = vsel %vm629_vm2, %v4342_v61, 0.0  ;;  %v4344_v62 = vmul.f32 %v4075_v39, %v6567_v40  ;;  %1776 = vperm.xlu2 %6006, %v8359_v32  }
 0x3ab   :  { %v9055_v20 = vpop.eup %6260  ;;  %6272 = vrcp.f32 %v3351_v56  ;;  %v3508_v25 = vsel %vm2343_vm3, %v9051_v58, 0.0  ;;  %v4544_v35 = vadd.f32 %v4543_v54, %v4542_v8  ;;  %v1382_v56 = vpop.f32.mrf.mxu3 }
 0x3ac   :  { %v9062_v46 = vpop.eup %6262  ;;  %v3509_v5 = vsel %vm2343_vm3, %v9055_v20, 0.0  ;;  %6274 = vpow2.f32 %v3020_v19  ;;  %v2506_v41 = vmax.f32 %v2504_v53, %v2505_v16  ;;  %2201 = vperm.xlu1 %6010, %v8755_v37   ;;  %v4545_v52 = vsel %vm629_vm2, %v4344_v62, 0.0 }
 0x3ad   :  { %v9067_v28 = vpop.eup %6264  ;;  %v3510_v49 = vadd.f32 %v3509_v5, %v3508_v25  ;;  %6276 = vpow2.f32 %v3022_v42  ;;  %v3636_v3 = vmul.f32 %v9062_v46, %v8957_v51  ;;  %v9076_v31 = vadd.f32 %v4545_v52, %v4544_v35 }
 0x3ae   :  { %v9072_v32 = vpop.eup %6266  ;;  %v3511_v48 = vsel %vm2343_vm3, %v9067_v28, 0.0  ;;  %v2507_v45 = vrot.slane %v2506_v41, 4  ;;  %v3637_v17 = vmul.f32 %v9062_v46, %v8961_v0  ;;  %v2146_v0 = vpop.permute.xlu1 %2145 }
 0x3af   :  { %v9080_v50 = vpop.eup %6268  ;;  %v3512_v4 = vadd.f32 %v3511_v48, %v3510_v49  ;;  %v3513_v61 = vsel %vm2343_vm3, %v9072_v32, 0.0  ;;  %v9101_v52 = vadd.f32 %v2146_v0, %v9042_v43 }
 0x3b0   :  { %v9082_v23 = vpop.eup %6270  ;;  %v3352_v51 = vsel %vm2343_vm3, %v9080_v50, 0.0  ;;  %v2508_v19 = vmax.f32 %v2506_v41, %v2507_v45  ;;  %v3742_v42 = vpack.c.bf16 %v3637_v17, %v3636_v3 }
 0x3b1   :  { %v6273_v30 = vpop.eup %6272  ;;  %v3514_v54 = vadd.f32 %v3513_v61, %v3512_v4  ;;  %v3353_v26 = vsel %vm2343_vm3, %v9082_v23, 0.0 }
 0x3b2   :  { %v9090_v16 = vpop.eup %6274  ;;  %v3354_v53 = vadd.f32 %v3353_v26, %v3352_v51  ;;  %v2509_v39 = vrot.slane %v2508_v19, 2  ;;  %5800 = vmatmul.msk.bf16.gmra.mxu0 %vm2343_vm3, %v3742_v42  ;;  %v3652_v25 = vmul.f32 %v6273_v30, %v8982_v18  ;;  %v3653_v8 = vmul.f32 %v6273_v30, %v8989_v38  ;;  %6009 = vset.pattern.permute.xlu2 %v6538_v21  ;;  %v6428_v18 = vld [vmem:[%s10100_s6] ss:$0 sm:$0xff] }
 0x3b3   :  { %v9095_v62 = vpop.eup %6276  ;;  %v3515_v5 = vrot.slane %v3514_v54, 4  ;;  %v3355_v35 = vsel %vm2343_vm3, %v9090_v16, 0.0  ;;  %v2721_v42 = vsel %vm2343_vm3, %v9101_v52, -inf }
 0x3b4   :  { %v3356_v41 = vadd.f32 %v3355_v35, %v3354_v53  ;;  %v2510_v49 = vmax.f32 %v2508_v19, %v2509_v39  ;;  %v3750_v3 = vpack.c.bf16 %v3653_v8, %v3652_v25  ;;  %4854 = vrot.lane.b32.xlu1 %v6428_v18, %s6458_s0  ;;  %v3357_v48 = vsel %vm2343_vm3, %v9095_v62, 0.0  ;;  %v2152_v45 = vpop.permute.xlu2 %2151 }
 0x3b5   :  { %v3516_v38 = vadd.f32 %v3515_v5, %v3514_v54  ;;  %v9109_v61 = vadd.f32 %v2152_v45, %v1382_v56  ;;  %v1385_v56 = vpop.f32.mrf.mxu3 }
 0x3b6   :  { %v3358_v17 = vadd.f32 %v3357_v48, %v3356_v41  ;;  %v2511_v4 = vrot.slane %v2510_v49, 1  ;;  %5808 = vmatmul.msk.bf16.vlgmr.msra.gmra.mxu2 %vm2343_vm3, %v3750_v3  ;;  %v3638_v41 = vmul.f32 %v9062_v46, %v8970_v44  ;;  %v3654_v44 = vmul.f32 %v6273_v30, %v8999_v60 }
 0x3b7   :  { %v3517_v43 = vrot.slane %v3516_v38, 2  ;;  %v2722_v26 = vsel %vm2343_vm3, %v9109_v61, -inf }
 0x3b8   :  { %v3359_v51 = vrot.slane %v3358_v17, 4  ;;  %v2512_v19 = vmax.f32 %v2510_v49, %v2511_v4  ;;  %v2723_v0 = vmax.f32 %v2721_v42, %v2722_v26  ;;  %v3639_v49 = vmul.f32 %v9062_v46, %v8975_v63 }
 0x3b9   :  { %v3518_v54 = vadd.f32 %v3517_v43, %v3516_v38  ;;  %v3655_v63 = vmul.f32 %v6273_v30, %v9003_v27 }
 0x3ba   :  { %v3360_v53 = vadd.f32 %v3359_v51, %v3358_v17  ;;  %v2808_v39 = vsub.f32 %v9029_v57, %v2512_v19  ;;  %v2809_v25 = vsub.f32 %v9022_v15, %v2512_v19  ;;  %v2810_v8 = vsub.f32 %v9046_v24, %v2512_v19  ;;  %2195 = vperm.xlu2 %6009, %v8755_v37   ;;  %v10278_v57 = vld [vmem:[#allocation7_spill] sm:$0xff] }
 0x3bb   :  { %v3519_v5 = vrot.slane %v3518_v54, 1  ;;  %v2811_v35 = vsub.f32 %v9019_v1, %v2512_v19  ;;  %v3743_v4 = vpack.c.bf16 %v3639_v49, %v3638_v41  ;;  %v3751_v26 = vpack.c.bf16 %v3655_v63, %v3654_v44 }
 0x3bc   :  { %v3361_v3 = vrot.slane %v3360_v53, 2  ;;  %v2984_v18 = vmul.f32 1.442695, %v2808_v39  ;;  %v2986_v38 = vmul.f32 1.442695, %v2809_v25  ;;  %5336 = vperm.xlu1 %6010, %v10278_v57  }
 0x3bd   :  { %v3520_v15 = vadd.f32 %v3519_v5, %v3518_v54  ;;  %v2988_v48 = vmul.f32 1.442695, %v2810_v8  ;;  %v2990_v45 = vmul.f32 1.442695, %v2811_v35  ;;  %v10279_v54 = vld [vmem:[#allocation6_spill] sm:$0xff]  ;;  %v1388_v60 = vpop.f32.mrf.mxu3 }
 0x3be   :  { %v3362_v24 = vadd.f32 %v3361_v3, %v3360_v53  ;;  %6278 = vpow2.f32 %v2984_v18  ;;  %v2158_v17 = vpop.permute.xlu1 %2157 }
 0x3bf   :  { %6280 = vrcp.f32 %v3520_v15  ;;  %v9125_v1 = vadd.f32 %v2158_v17, %v1385_v56 }
 0x3c0   :  { %v3363_v43 = vrot.slane %v3362_v24, 1  ;;  %6282 = vpow2.f32 %v2986_v38 }
 0x3c1   :  { %6284 = vpow2.f32 %v2988_v48  ;;  %v2724_v46 = vsel %vm2343_vm3, %v9125_v1, -inf }
 0x3c2   :  { %6286 = vpow2.f32 %v2990_v45  ;;  %v2725_v51 = vmax.f32 %v2723_v0, %v2724_v46  ;;  %5801 = vmatmul.msk.bf16.gmra.mxu0 %vm2343_vm3, %v3743_v4  ;;  %v3364_v19 = vadd.f32 %v3363_v43, %v3362_v24  ;;  %6011 = vset.pattern.permute.xlu2 %v6590_v55  ;;  %v9169_v43 = vpop.f32.mrf.mxu0 }
 0x3c4   :  { %v9133_v42 = vpop.eup %6278  ;;  %5361 = vperm.xlu1 %6010, %v10279_v54   ;;  %v2164_v30 = vpop.permute.xlu2 %2163  ;;  %6288 = vrcp.f32 %v3364_v19 }
 0x3c5   :  { %v6281_v53 = vpop.eup %6280  ;;  %v3300_v27 = vsel %vm2343_vm3, %v9133_v42, 0.0  ;;  %v2334_v0 = vadd.f32 %v2164_v30, %v1388_v60  ;;  %v1746_v30 = vpop.permute.xlu0 %1745 }
 0x3c6   :  { %v9138_v39 = vpop.eup %6282  ;;  %5809 = vmatmul.msk.bf16.gmra.mxu2 %vm2343_vm3, %v3751_v26  ;;  %v9142_v25 = vmul.f32 %v6281_v53, %v9051_v58  ;;  %v9145_v8 = vmul.f32 %v6281_v53, %v9055_v20  ;;  %v9148_v56 = vmul.f32 %v6281_v53, %v9067_v28  ;;  %v9155_v41 = vmul.f32 %v6281_v53, %v9072_v32 }
 0x3c7   :  { %v9150_v5 = vpop.eup %6284  ;;  %v3301_v35 = vsel %vm2343_vm3, %v9138_v39, 0.0  ;;  %v2726_v58 = vsel %vm2343_vm3, %v2334_v0, -inf }
 0x3c8   :  { %v9157_v49 = vpop.eup %6286  ;;  %v3302_v3 = vadd.f32 %v3301_v35, %v3300_v27  ;;  %v3303_v28 = vsel %vm2343_vm3, %v9150_v5, 0.0  ;;  %v2727_v18 = vmax.f32 %v2725_v51, %v2726_v58 }
 0x3c9   :  { %v3305_v32 = vsel %vm2343_vm3, %v9157_v49, 0.0 }
 0x3ca   :  { %v3304_v15 = vadd.f32 %v3303_v28, %v3302_v3  ;;  %v2728_v48 = vrot.slane %v2727_v18, 4  ;;  %2207 = vperm.xlu2 %6011, %v8755_v37   ;;  %v6289_v45 = vpop.eup %6288  ;;  %v1391_v3 = vpop.f32.mrf.mxu3 }
 0x3cb   :  { %v3656_v46 = vmul.f32 %v6289_v45, %v9080_v50  ;;  %v3657_v51 = vmul.f32 %v6289_v45, %v9082_v23  ;;  %v5888_v23 = vld [vmem:[%s10099_s5 + $0x8] sm:$0xff] }
 0x3cc   :  { %v3306_v24 = vadd.f32 %v3305_v32, %v3304_v15  ;;  %v2729_v17 = vmax.f32 %v2727_v18, %v2728_v48  ;;  %5241 = vmatpush.bf16.msrb.mxu3 %v5888_v23 }
 0x3cd   :  { %v3752_v37 = vpack.c.bf16 %v3657_v51, %v3656_v46 }
 0x3ce   :  { %v3307_v4 = vrot.slane %v3306_v24, 4  ;;  %v2730_v44 = vrot.slane %v2729_v17, 2  ;;  %v1752_v60 = vpop.permute.xlu1 %1751 }
 0x3cf   :  { %v9175_v28 = vadd.f32 %v1752_v60, %v8632_v13  ;;  %v3658_v60 = vmul.f32 %v6289_v45, %v9090_v16 }
 0x3d0   :  { %v3308_v63 = vadd.f32 %v3307_v4, %v3306_v24  ;;  %v2731_v19 = vmax.f32 %v2729_v17, %v2730_v44  ;;  %v9185_v24 = vadd.f32 %v1746_v30, %v8612_v7 }
 0x3d2   :  { %v3309_v26 = vrot.slane %v3308_v63, 2  ;;  %v2732_v53 = vrot.slane %v2731_v19, 1  ;;  %6014 = vset.pattern.permute.xlu2 %v6538_v21 }
 0x3d4   :  { %v3310_v27 = vadd.f32 %v3309_v26, %v3308_v63  ;;  %v2733_v35 = vmax.f32 %v2731_v19, %v2732_v53  ;;  %v1758_v50 = vpop.permute.xlu2 %1757  ;;  %v1394_v26 = vpop.f32.mrf.mxu3 }
 0x3d5   :  { %v9188_v63 = vadd.f32 %v1758_v50, %v8644_v34 }
 0x3d6   :  { %v3311_v58 = vrot.slane %v3310_v27, 1  ;;  %5810 = vmatmul.msk.bf16.gmra.mxu2 %vm2343_vm3, %v3752_v37  ;;  %v2876_v18 = vsub.f32 %v9101_v52, %v2733_v35  ;;  %v2877_v21 = vsub.f32 %v9109_v61, %v2733_v35  ;;  %v2878_v15 = vsub.f32 %v9125_v1, %v2733_v35 }
 0x3d7   :  { %v2879_v32 = vsub.f32 %v2334_v0, %v2733_v35  ;;  %v4080_v48 = vpop.f32.mrf.mxu0  ;;  %v2514_v52 = vsel %vm2343_vm3, %v9175_v28, -inf  ;;  %v2513_v61 = vsel %vm2343_vm3, %v9185_v24, -inf  ;;  %v2516_v7 = vsel %vm2343_vm3, %v9188_v63, -inf }
 0x3d8   :  { %v3312_v13 = vadd.f32 %v3311_v58, %v3310_v27  ;;  %v3120_v17 = vmul.f32 1.442695, %v2876_v18  ;;  %v3122_v4 = vmul.f32 1.442695, %v2877_v21  ;;  %v3124_v44 = vmul.f32 1.442695, %v2878_v15 }
 0x3d9   :  { %v3126_v46 = vmul.f32 1.442695, %v2879_v32  ;;  %v2515_v1 = vmax.f32 %v2513_v61, %v2514_v52  ;;  %v3659_v27 = vmul.f32 %v6289_v45, %v9095_v62 }
 0x3da   :  { %6290 = vrcp.f32 %v3312_v13 }
 0x3db   :  { %6292 = vpow2.f32 %v3120_v17  ;;  %v2517_v53 = vmax.f32 %v2515_v1, %v2516_v7  ;;  %v3753_v17 = vpack.c.bf16 %v3659_v27, %v3658_v60 }
 0x3dc   :  { %6294 = vpow2.f32 %v3122_v4 }
 0x3dd   :  { %6296 = vpow2.f32 %v3124_v44 }
 0x3de   :  { %6298 = vpow2.f32 %v3126_v46  ;;  %v1764_v0 = vpop.permute.xlu1 %1763 }
 0x3df   :  { %v9197_v34 = vadd.f32 %v1764_v0, %v8658_v12  ;;  %v4082_v51 = vpop.f32.mrf.mxu0  ;;  %v2177_v12 = vpop.permute.xlu0 %2176 }
 0x3e0   :  { %v6291_v19 = vpop.eup %6290  ;;  %v4347_v16 = vmul.f32 %v4082_v51, %v6541_v22  ;;  %v9214_v62 = vadd.f32 %v2177_v12, %v1394_v26 }
 0x3e1   :  { %v9201_v37 = vpop.eup %6292  ;;  %v2518_v30 = vsel %vm2343_vm3, %v9197_v34, -inf  ;;  %v3640_v35 = vmul.f32 %v6291_v19, %v9133_v42  ;;  %v3641_v58 = vmul.f32 %v6291_v19, %v9138_v39  ;;  %v4346_v42 = vmul.f32 %v4080_v48, %v6522_v6 }
 0x3e2   :  { %v9207_v50 = vpop.eup %6294  ;;  %v3521_v23 = vsel %vm2343_vm3, %v9201_v37, 0.0  ;;  %v2519_v18 = vmax.f32 %v2517_v53, %v2518_v30  ;;  %v4556_v61 = vsel %vm629_vm2, %v4347_v16, 0.0  ;;  %v2735_v48 = vsel %vm2343_vm3, %v9214_v62, -inf }
 0x3e3   :  { %v9212_v21 = vpop.eup %6296  ;;  %v3522_v45 = vsel %vm2343_vm3, %v9207_v50, 0.0  ;;  %v3744_v15 = vpack.c.bf16 %v3641_v58, %v3640_v35  ;;  %v4555_v0 = vsel %vm629_vm2, %v4346_v42, 0.0 }
 0x3e4   :  { %v9219_v39 = vpop.eup %6298  ;;  %v3523_v32 = vadd.f32 %v3522_v45, %v3521_v23  ;;  %v2520_v13 = vrot.slane %v2519_v18, 4  ;;  %v3524_v4 = vsel %vm2343_vm3, %v9212_v21, 0.0  ;;  %v2171_v44 = vpop.permute.xlu2 %2170  ;;  %v4557_v30 = vadd.f32 %v4556_v61, %v4555_v0 }
 0x3e5   :  { %5802 = vmatmul.msk.bf16.gmra.mxu0 %vm2343_vm3, %v3744_v15  ;;  %v9226_v7 = vadd.f32 %v2171_v44, %v1391_v3  ;;  %v3526_v1 = vsel %vm2343_vm3, %v9219_v39, 0.0  ;;  %v1397_v23 = vpop.f32.mrf.mxu3  ;;  %v3643_v44 = vmul.f32 %v6291_v19, %v9157_v49 }
 0x3e6   :  { %v3525_v46 = vadd.f32 %v3524_v4, %v3523_v32  ;;  %v2521_v52 = vmax.f32 %v2519_v18, %v2520_v13  ;;  %5811 = vmatmul.msk.bf16.gmra.mxu2 %vm2343_vm3, %v3753_v17  ;;  %v3642_v4 = vmul.f32 %v6291_v19, %v9150_v5 }
 0x3e7   :  { %v4085_v51 = vpop.f32.mrf.mxu0  ;;  %v2734_v60 = vsel %vm2343_vm3, %v9226_v7, -inf }
 0x3e8   :  { %v3527_v26 = vadd.f32 %v3526_v1, %v3525_v46  ;;  %v2522_v53 = vrot.slane %v2521_v52, 2  ;;  %v4348_v27 = vmul.f32 %v4085_v51, %v6567_v40  ;;  %v2736_v35 = vmax.f32 %v2734_v60, %v2735_v48 }
 0x3e9   :  { %v3745_v19 = vpack.c.bf16 %v3643_v44, %v3642_v4  ;;  %v10283_v4 = vld [vmem:[#allocation8_spill] sm:$0xff] }
 0x3ea   :  { %v3528_v3 = vrot.slane %v3527_v26, 4  ;;  %v2523_v58 = vmax.f32 %v2521_v52, %v2522_v53  ;;  %v4558_v12 = vsel %vm629_vm2, %v4348_v27, 0.0 }
 0x3eb   :  { %v4559_v18 = vadd.f32 %v4558_v12, %v4557_v30 }
 0x3ec   :  { %v3529_v16 = vadd.f32 %v3528_v3, %v3527_v26  ;;  %v2524_v45 = vrot.slane %v2523_v58, 1 }
 0x3ee   :  { %v3530_v15 = vrot.slane %v3529_v16, 2  ;;  %v2525_v42 = vmax.f32 %v2523_v58, %v2524_v45  ;;  %v2183_v32 = vpop.permute.xlu1 %2182  ;;  %v10280_v58 = vld [vmem:[#allocation29_spill] sm:$0xff] }
 0x3ef   :  { %v9237_v13 = vadd.f32 %v2183_v32, %v1397_v23  ;;  %v4087_v17 = vpop.f32.mrf.mxu0 }
 0x3f0   :  { %v3531_v46 = vadd.f32 %v3530_v15, %v3529_v16  ;;  %v2812_v61 = vsub.f32 %v9185_v24, %v2525_v42  ;;  %v2813_v52 = vsub.f32 %v9175_v28, %v2525_v42  ;;  %v2814_v48 = vsub.f32 %v9188_v63, %v2525_v42 }
 0x3f1   :  { %v2815_v1 = vsub.f32 %v9197_v34, %v2525_v42  ;;  %v2737_v0 = vsel %vm2343_vm3, %v9237_v13, -inf  ;;  %v4349_v51 = vmul.f32 %v4087_v17, %v6672_v29  ;;  %v4313_v63 = vmul.f32 %v7818_v14, %v6672_v29  ;;  %v1400_v34 = vpop.f32.mrf.mxu3 }
 0x3f2   :  { %v3532_v26 = vrot.slane %v3531_v46, 1  ;;  %v2992_v53 = vmul.f32 1.442695, %v2812_v61  ;;  %v2994_v60 = vmul.f32 1.442695, %v2813_v52  ;;  %v2738_v5 = vmax.f32 %v2736_v35, %v2737_v0  ;;  %v10281_v35 = vld [vmem:[#allocation28_spill] sm:$0xff] }
 0x3f3   :  { %v2996_v27 = vmul.f32 1.442695, %v2814_v48  ;;  %v4560_v49 = vsel %vm629_vm2, %v4349_v51, 0.0  ;;  %v2998_v28 = vmul.f32 1.442695, %v2815_v1  ;;  %v10282_v12 = vpack.c.bf16 %v10280_v58, %v10281_v35 }
 0x3f4   :  { %v3533_v24 = vadd.f32 %v3532_v26, %v3531_v46  ;;  %6300 = vpow2.f32 %v2992_v53  ;;  %v9249_v30 = vadd.f32 %v4560_v49, %v4559_v18  ;;  %v2189_v3 = vpop.permute.xlu2 %2188  ;;  %v4443_v14 = vsel %vm629_vm2, %v4313_v63, 0.0 }
 0x3f5   :  { %6302 = vpow2.f32 %v2994_v60  ;;  %5803 = vmatmul.msk.bf16.gmra.mxu0 %vm2343_vm3, %v3745_v19  ;;  %v9258_v23 = vadd.f32 %v2189_v3, %v1400_v34  ;;  %v4444_v44 = vadd.f32 %v4443_v14, %v10283_v4  ;;  %v4317_v26 = vmul.f32 %v8001_v59, %v6672_v29 }
 0x3f6   :  { %6304 = vrcp.f32 %v3533_v24  ;;  %5812 = vmatmul.msk.bf16.gmra.mxu2 %vm2343_vm3, %v10282_v12  ;;  %v10285_v12 = vld [vmem:[#allocation13_spill] sm:$0xff]  ;;  %v4321_v14 = vmul.f32 %v8168_v33, %v6672_v29 }
 0x3f7   :  { %6306 = vpow2.f32 %v2996_v27  ;;  %v2739_v18 = vsel %vm2343_vm3, %v9258_v23, -inf  ;;  %v4445_v19 = vrot.slane %v4444_v44, 4  ;;  %v10299_v24 = vld [vmem:[#allocation21_spill] sm:$0xff] }
 0x3f8   :  { %6308 = vpow2.f32 %v2998_v28  ;;  %v2740_v16 = vmax.f32 %v2738_v5, %v2739_v18 }
 0x3f9   :  { %v9301_v35 = vadd.f32 %v4445_v19, %v4444_v44  ;;  %v10287_v44 = vld [vmem:[#allocation30_spill] sm:$0xff] }
 0x3fa   :  { %v9263_v45 = vpop.eup %6300  ;;  %v2741_v32 = vrot.slane %v2740_v16, 4 }
 0x3fb   :  { %v9265_v15 = vpop.eup %6302  ;;  %v3313_v42 = vsel %vm2343_vm3, %v9263_v45, 0.0 }
 0x3fc   :  { %v6305_v17 = vpop.eup %6304  ;;  %v3314_v46 = vsel %vm2343_vm3, %v9265_v15, 0.0  ;;  %v2742_v48 = vmax.f32 %v2740_v16, %v2741_v32  ;;  %v1783_v16 = vpop.permute.xlu0 %1782 }
 0x3fd   :  { %v9272_v61 = vpop.eup %6306  ;;  %v3315_v52 = vadd.f32 %v3314_v46, %v3313_v42  ;;  %v9275_v1 = vmul.f32 %v6305_v17, %v9201_v37  ;;  %v9278_v0 = vmul.f32 %v6305_v17, %v9207_v50  ;;  %v9287_v60 = vmul.f32 %v6305_v17, %v9212_v21 }
 0x3fe   :  { %v9280_v51 = vpop.eup %6308  ;;  %v3316_v53 = vsel %vm2343_vm3, %v9272_v61, 0.0  ;;  %v9290_v5 = vmul.f32 %v6305_v17, %v9219_v39  ;;  %v2743_v37 = vrot.slane %v2742_v48, 2  ;;  %v4090_v49 = vpop.f32.mrf.mxu0  ;;  %v4456_v21 = vsel %vm629_vm2, %v4317_v26, 0.0  ;;  %v10289_v26 = vld [vmem:[#allocation62_spill] sm:$0xff] }
 0x3ff   :  { %10284 = vst [vmem:[#allocation17_spill] sm:$0xff] %v9287_v60  ;;  %v3317_v27 = vadd.f32 %v3316_v53, %v3315_v52  ;;  %v3318_v50 = vsel %vm2343_vm3, %v9280_v51, 0.0  ;;  %v4345_v39 = vmul.f32 %v9169_v43, %v6672_v29  ;;  %v1771_v58 = vpop.permute.xlu1 %1770  ;;  %v9304_v18 = vadd.f32 %v4456_v21, %v10285_v12  ;;  %v10286_v52 = vld [vmem:[#allocation31_spill] sm:$0xff] }
 0x400   :  { %v2744_v63 = vmax.f32 %v2742_v48, %v2743_v37  ;;  %v9310_v46 = vadd.f32 %v1771_v58, %v8709_v2  ;;  %v4350_v43 = vmul.f32 %v4090_v49, %v6522_v6  ;;  %v10288_v48 = vpack.c.bf16 %v10286_v52, %v10287_v44 }
 0x401   :  { %v3319_v28 = vadd.f32 %v3318_v50, %v3317_v27  ;;  %v4547_v4 = vsel %vm629_vm2, %v4345_v39, 0.0  ;;  %v9324_v2 = vadd.f32 %v1783_v16, %v8759_v47  ;;  %v4469_v16 = vsel %vm629_vm2, %v4321_v14, 0.0 }
 0x402   :  { %v2745_v3 = vrot.slane %v2744_v63, 1  ;;  %v4458_v44 = vrot.slane %v9304_v18, 4  ;;  %v10303_v60 = vrot.slane %v9301_v35, 2 }
 0x403   :  { %v3320_v34 = vrot.slane %v3319_v28, 4 }
 0x404   :  { %v2746_v32 = vmax.f32 %v2744_v63, %v2745_v3  ;;  %v1777_v17 = vpop.permute.xlu2 %1776 }
 0x405   :  { %v3321_v42 = vadd.f32 %v3320_v34, %v3319_v28  ;;  %v9318_v53 = vadd.f32 %v1777_v17, %v10289_v26  ;;  %v2529_v26 = vsel %vm2343_vm3, %v9324_v2, -inf }
 0x406   :  { %5813 = vmatmul.msk.bf16.gmra.mxu2 %vm2343_vm3, %v10288_v48  ;;  %v2880_v27 = vsub.f32 %v9226_v7, %v2746_v32  ;;  %v2881_v37 = vsub.f32 %v9214_v62, %v2746_v32  ;;  %v2882_v19 = vsub.f32 %v9237_v13, %v2746_v32  ;;  %v4092_v50 = vpop.f32.mrf.mxu0  ;;  %v2883_v49 = vsub.f32 %v9258_v23, %v2746_v32  ;;  %v10290_v32 = vld [vmem:[#allocation14_spill] sm:$0xff] }
 0x407   :  { %v3322_v33 = vrot.slane %v3321_v42, 2  ;;  %v2527_v28 = vsel %vm2343_vm3, %v9318_v53, -inf  ;;  %v4351_v63 = vmul.f32 %v4092_v50, %v6541_v22  ;;  %v4548_v7 = vadd.f32 %v4547_v4, %v9076_v31  ;;  %v10291_v31 = vld [vmem:[#allocation55_spill] sm:$0xff] }
 0x408   :  { %v3128_v39 = vmul.f32 1.442695, %v2880_v27  ;;  %v3130_v34 = vmul.f32 1.442695, %v2881_v37  ;;  %v3132_v3 = vmul.f32 1.442695, %v2882_v19  ;;  %v4325_v17 = vmul.f32 %v10290_v32, %v6672_v29 }
 0x409   :  { %v3323_v21 = vadd.f32 %v3322_v33, %v3321_v42  ;;  %v3134_v62 = vmul.f32 1.442695, %v2883_v49  ;;  %v4568_v13 = vsel %vm629_vm2, %v4350_v43, 0.0  ;;  %v4569_v58 = vsel %vm629_vm2, %v4351_v63, 0.0  ;;  %v10292_v33 = vld [vmem:[#allocation64_spill] sm:$0xff]  ;;  %v10293_v19 = vld [vmem:[#allocation10_spill] sm:$0xff] }
 0x40a   :  { %6310 = vpow2.f32 %v3128_v39  ;;  %v2526_v23 = vsel %vm2343_vm3, %v9310_v46, -inf  ;;  %v4570_v12 = vadd.f32 %v4569_v58, %v4568_v13  ;;  %v4329_v4 = vmul.f32 %v10291_v31, %v6672_v29 }
 0x40b   :  { %v3324_v47 = vrot.slane %v3323_v21, 1  ;;  %6312 = vpow2.f32 %v3130_v34  ;;  %v2528_v42 = vmax.f32 %v2526_v23, %v2527_v28  ;;  %v4549_v14 = vrot.slane %v4548_v7, 4 }
 0x40c   :  { %6314 = vpow2.f32 %v3132_v3  ;;  %v4470_v50 = vadd.f32 %v4469_v16, %v10293_v19  ;;  %v4562_v49 = vrot.slane %v9249_v30, 4  ;;  %v4482_v39 = vsel %vm629_vm2, %v4325_v17, 0.0  ;;  %v10294_v3 = vld [vmem:[#allocation57_spill] sm:$0xff] }
 0x40d   :  { %v3325_v52 = vadd.f32 %v3324_v47, %v3323_v21  ;;  %6316 = vpow2.f32 %v3134_v62  ;;  %v2530_v28 = vmax.f32 %v2528_v42, %v2529_v26  ;;  %v4495_v34 = vsel %vm629_vm2, %v4329_v4, 0.0  ;;  %v10295_v47 = vld [vmem:[#allocation65_spill] sm:$0xff] }
 0x40e   :  { %v1789_v48 = vpop.permute.xlu1 %1788  ;;  %v4095_v37 = vpop.f32.mrf.mxu0  ;;  %v4333_v62 = vmul.f32 %v10294_v3, %v6672_v29  ;;  %v4337_v23 = vmul.f32 %v10295_v47, %v6672_v29  ;;  %v4459_v31 = vadd.f32 %v4458_v44, %v9304_v18  ;;  %v4550_v4 = vadd.f32 %v4549_v14, %v4548_v7 }
 0x40f   :  { %6318 = vrcp.f32 %v3325_v52  ;;  %v9345_v27 = vadd.f32 %v1789_v48, %v10292_v33  ;;  %v4352_v63 = vmul.f32 %v4095_v37, %v6567_v40  ;;  %v4471_v33 = vrot.slane %v4470_v50, 4 }
 0x410   :  { %v9350_v21 = vpop.eup %6310  ;;  %v4563_v37 = vadd.f32 %v4562_v49, %v9249_v30  ;;  %v4508_v18 = vsel %vm629_vm2, %v4333_v62, 0.0 }
 0x411   :  { %v2531_v13 = vsel %vm2343_vm3, %v9345_v27, -inf  ;;  %v9358_v58 = vpop.eup %6312  ;;  %v3534_v16 = vsel %vm2343_vm3, %v9350_v21, 0.0  ;;  %v4571_v32 = vsel %vm629_vm2, %v4352_v63, 0.0 }
 0x412   :  { %v2532_v42 = vmax.f32 %v2530_v28, %v2531_v13  ;;  %v9365_v17 = vpop.eup %6314  ;;  %v3535_v52 = vsel %vm2343_vm3, %v9358_v58, 0.0  ;;  %v4572_v48 = vadd.f32 %v4571_v32, %v4570_v12  ;;  %v10296_v28 = vld [vmem:[#allocation11_spill] sm:$0xff]  ;;  %v10297_v13 = vld [vmem:[#allocation36_spill] sm:$0xff]  ;;  %v4521_v12 = vsel %vm629_vm2, %v4337_v23, 0.0 }
 0x413   :  { %v9370_v26 = vpop.eup %6316  ;;  %v3536_v19 = vadd.f32 %v3535_v52, %v3534_v16  ;;  %v4483_v63 = vadd.f32 %v4482_v39, %v10296_v28  ;;  %v4496_v59 = vadd.f32 %v4495_v34, %v10297_v13  ;;  %v3537_v7 = vsel %vm2343_vm3, %v9365_v17, 0.0  ;;  %v10298_v32 = vld [vmem:[#allocation32_spill] sm:$0xff] }
 0x414   :  { %v2533_v3 = vrot.slane %v2532_v42, 4  ;;  %v10300_v30 = vpack.c.bf16 %v10298_v32, %v10299_v24  ;;  %v4341_v39 = vmul.f32 %v8965_v9, %v6672_v29  ;;  %v4551_v34 = vrot.slane %v4550_v4, 2  ;;  %v10302_v32 = vld [vmem:[#allocation63_spill] sm:$0xff] }
 0x415   :  { %v9373_v47 = vpop.eup %6318  ;;  %v3538_v44 = vadd.f32 %v3537_v7, %v3536_v19  ;;  %v3539_v62 = vsel %vm2343_vm3, %v9370_v26, 0.0  ;;  %v4484_v28 = vrot.slane %v4483_v63, 4  ;;  %v4472_v9 = vadd.f32 %v4471_v33, %v4470_v50 }
 0x416   :  { %v2534_v14 = vmax.f32 %v2532_v42, %v2533_v3  ;;  %5814 = vmatmul.msk.bf16.gmra.mxu2 %vm2343_vm3, %v10300_v30  ;;  %v3644_v49 = vmul.f32 %v9373_v47, %v9263_v45  ;;  %v4097_v16 = vpop.f32.mrf.mxu0  ;;  %v3645_v23 = vmul.f32 %v9373_v47, %v9265_v15  ;;  %v4564_v42 = vrot.slane %v4563_v37, 2  ;;  %v10301_v45 = vld [vmem:[#allocation56_spill] sm:$0xff] }
 0x417   :  { %v9393_v52 = vadd.f32 %v3539_v62, %v3538_v44  ;;  %v4353_v19 = vmul.f32 %v4097_v16, %v6672_v29  ;;  %v4460_v3 = vrot.slane %v4459_v31, 2  ;;  %v4509_v13 = vadd.f32 %v4508_v18, %v10301_v45 }
 0x418   :  { %v2535_v24 = vrot.slane %v2534_v14, 2  ;;  %v3746_v7 = vpack.c.bf16 %v3645_v23, %v3644_v49  ;;  %v4522_v30 = vadd.f32 %v4521_v12, %v10302_v32  ;;  %v4497_v36 = vrot.slane %v4496_v59, 4  ;;  %v10304_v23 = vld [vmem:[#allocation20_spill] sm:$0xff] }
 0x419   :  { %v4573_v20 = vsel %vm629_vm2, %v4353_v19, 0.0  ;;  %v4534_v15 = vsel %vm629_vm2, %v4341_v39, 0.0  ;;  %v4552_v43 = vadd.f32 %v4551_v34, %v4550_v4  ;;  %v4565_v62 = vadd.f32 %v4564_v42, %v4563_v37 }
 0x41a   :  { %v2536_v38 = vmax.f32 %v2534_v14, %v2535_v24  ;;  %v4574_v44 = vadd.f32 %v4573_v20, %v4572_v48  ;;  %5804 = vmatmul.msk.bf16.gmra.mxu0 %vm2343_vm3, %v3746_v7  ;;  %v9404_v18 = vadd.f32 %v10303_v60, %v9301_v35  ;;  %v4485_v50 = vadd.f32 %v4484_v28, %v4483_v63 }
 0x41b   :  { %v4510_v33 = vrot.slane %v4509_v13, 4  ;;  %v4461_v14 = vadd.f32 %v4460_v3, %v4459_v31  ;;  %v4523_v49 = vrot.slane %v4522_v30, 4  ;;  %v4535_v24 = vadd.f32 %v4534_v15, %v10304_v23  ;;  %v10306_v23 = vld [vmem:[#allocation33_spill] sm:$0xff] }
 0x41c   :  { %v2537_v16 = vrot.slane %v2536_v38, 1  ;;  %v4575_v12 = vrot.slane %v4574_v44, 4  ;;  %v4473_v20 = vrot.slane %v4472_v9, 2  ;;  %v4498_v4 = vadd.f32 %v4497_v36, %v4496_v59 }
 0x41d   :  { %v4553_v48 = vrot.slane %v4552_v43, 1  ;;  %v4566_v34 = vrot.slane %v4565_v62, 1  ;;  %v4486_v63 = vrot.slane %v4485_v50, 2  ;;  %v4511_v28 = vadd.f32 %v4510_v33, %v4509_v13 }
 0x41e   :  { %v2538_v19 = vmax.f32 %v2536_v38, %v2537_v16  ;;  %v9407_v39 = vpop.permute.xlu1 %2201  ;;  %v4576_v37 = vadd.f32 %v4575_v12, %v4574_v44  ;;  %v4524_v45 = vadd.f32 %v4523_v49, %v4522_v30  ;;  %v4536_v38 = vrot.slane %v4535_v24, 4 }
 0x41f   :  { %v4499_v15 = vrot.slane %v4498_v4, 2  ;;  %v4554_v36 = vadd.f32 %v4553_v48, %v4552_v43  ;;  %v4567_v16 = vadd.f32 %v4566_v34, %v4565_v62  ;;  %v3646_v13 = vmul.f32 %v9373_v47, %v9272_v61  ;;  %v10305_v43 = vld [vmem:[#allocation34_spill] sm:$0xff] }
 0x420   :  { %v2816_v42 = vsub.f32 %v9310_v46, %v2538_v19  ;;  %v2817_v60 = vsub.f32 %v9318_v53, %v2538_v19  ;;  %v2818_v35 = vsub.f32 %v9324_v2, %v2538_v19  ;;  %v2819_v31 = vsub.f32 %v9345_v27, %v2538_v19 }
 0x421   :  { %v4577_v3 = vrot.slane %v4576_v37, 2  ;;  %v3541_v46 = vrot.slane %v9393_v52, 4  ;;  %v3647_v27 = vmul.f32 %v9373_v47, %v9280_v51  ;;  %v4462_v30 = vrot.slane %v4461_v14, 1 }
 0x422   :  { %v3000_v7 = vmul.f32 1.442695, %v2816_v42  ;;  %v3002_v32 = vmul.f32 1.442695, %v2817_v60  ;;  %v3004_v59 = vmul.f32 1.442695, %v2818_v35  ;;  %v4537_v49 = vadd.f32 %v4536_v38, %v4535_v24 }
 0x423   :  { %v4578_v44 = vadd.f32 %v4577_v3, %v4576_v37  ;;  %v3006_v53 = vmul.f32 1.442695, %v2819_v31  ;;  %v4512_v33 = vrot.slane %v4511_v28, 2  ;;  %v4525_v12 = vrot.slane %v4524_v45, 2 }
 0x424   :  { %6320 = vpow2.f32 %v3000_v7  ;;  %v10307_v19 = vpack.c.bf16 %v10305_v43, %v10306_v23  ;;  %v4449_v51 = vrot.slane %v9404_v18, 1  ;;  %v4474_v47 = vadd.f32 %v4473_v20, %v4472_v9 }
 0x425   :  { %6322 = vpow2.f32 %v3002_v32  ;;  %v4579_v2 = vrot.slane %v4578_v44, 1  ;;  %v3542_v24 = vadd.f32 %v3541_v46, %v9393_v52  ;;  %v4487_v34 = vadd.f32 %v4486_v63, %v4485_v50 }
 0x426   :  { %5815 = vmatmul.msk.bf16.gmra.mxu2 %vm2343_vm3, %v10307_v19  ;;  %v9422_v62 = vpop.permute.xlu1 %4854  ;;  %6324 = vpow2.f32 %v3004_v59  ;;  %v4500_v42 = vadd.f32 %v4499_v15, %v4498_v4  ;;  %v3747_v60 = vpack.c.bf16 %v3647_v27, %v3646_v13  ;;  %v4513_v3 = vadd.f32 %v4512_v33, %v4511_v28 }
 0x427   :  { %v4580_v48 = vadd.f32 %v4579_v2, %v4578_v44  ;;  %v9425_v37 = vadd.f32 %v9422_v62, %v4554_v36  ;;  %v9428_v61 = vadd.f32 %v9422_v62, %v4567_v16  ;;  %6326 = vpow2.f32 %v3006_v53 }
 0x428   :  { %v4526_v38 = vadd.f32 %v4525_v12, %v4524_v45  ;;  %v4463_v9 = vadd.f32 %v4462_v30, %v4461_v14  ;;  %v4538_v20 = vrot.slane %v4537_v49, 2  ;;  %v4475_v4 = vrot.slane %v4474_v47, 1 }
 0x429   :  { %v9433_v35 = vadd.f32 %v9422_v62, %v4580_v48  ;;  %v4937_v7 = vmul.f32 1.442695, %v9425_v37  ;;  %v4939_v32 = vmul.f32 1.442695, %v9428_v61  ;;  %v3543_v63 = vrot.slane %v3542_v24, 2 }
 0x42a   :  { %v9435_v31 = vpop.eup %6320  ;;  %5805 = vmatmul.msk.bf16.gmra.mxu0 %vm2343_vm3, %v3747_v60  ;;  %v4488_v15 = vrot.slane %v4487_v34, 1  ;;  %v4501_v59 = vrot.slane %v4500_v42, 1  ;;  %v4514_v16 = vrot.slane %v4513_v3, 1  ;;  %v4527_v46 = vrot.slane %v4526_v38, 1 }
 0x42b   :  { %v9439_v36 = vpop.eup %6322  ;;  %v3326_v52 = vsel %vm2343_vm3, %v9435_v31, 0.0  ;;  %v4941_v50 = vmul.f32 1.442695, %v9433_v35  ;;  %6328 = vpow2.f32 %v4937_v7  ;;  %v4539_v2 = vadd.f32 %v4538_v20, %v4537_v49 }
 0x42c   :  { %v3327_v28 = vsel %vm2343_vm3, %v9439_v36, 0.0  ;;  %v9447_v45 = vpop.eup %6324  ;;  %6330 = vpow2.f32 %v4939_v32  ;;  %v4476_v30 = vadd.f32 %v4475_v4, %v4474_v47  ;;  %v3544_v33 = vadd.f32 %v3543_v63, %v3542_v24 }
 0x42d   :  { %v3328_v44 = vadd.f32 %v3327_v28, %v3326_v52  ;;  %v9449_v14 = vpop.eup %6326  ;;  %v3329_v53 = vsel %vm2343_vm3, %v9447_v45, 0.0  ;;  %6332 = vpow2.f32 %v4941_v50  ;;  %v9456_v43 = vadd.f32 %v9422_v62, %v4463_v9  ;;  %v10309_v28 = vld [vmem:[#allocation23_spill] sm:$0xff] }
 0x42e   :  { %v3331_v12 = vsel %vm2343_vm3, %v9449_v14, 0.0  ;;  %v4450_v23 = vadd.f32 %v4449_v51, %v9404_v18  ;;  %v4489_v19 = vadd.f32 %v4488_v15, %v4487_v34  ;;  %v4502_v7 = vadd.f32 %v4501_v59, %v4500_v42 }
 0x42f   :  { %v3330_v13 = vadd.f32 %v3329_v53, %v3328_v44  ;;  %v4100_v27 = vpop.f32.mrf.mxu0  ;;  %v4515_v32 = vadd.f32 %v4514_v16, %v4513_v3  ;;  %v4528_v52 = vadd.f32 %v4527_v46, %v4526_v38  ;;  %v9460_v49 = vadd.f32 %v9422_v62, %v4476_v30  ;;  %v10308_v38 = vld [vmem:[#allocation9_spill] sm:$0xff] }
 0x430   :  { %v4540_v47 = vrot.slane %v4539_v2, 1  ;;  %v9463_v4 = vadd.f32 %v9422_v62, %v4450_v23  ;;  %v3545_v63 = vrot.slane %v3544_v33, 1  ;;  %vm4897_vm5 = vcmp.gt.f32.partialorder %v9425_v37, 0.0 }
 0x431   :  { %v3332_v48 = vadd.f32 %v3331_v12, %v3330_v13  ;;  %v6329_v60 = vpop.eup %6328  ;;  %v4923_v51 = vmul.f32 1.442695, %v9456_v43  ;;  %vm4898_vm6 = vcmp.gt.f32.partialorder %v9428_v61, 0.0  ;;  %vm4899_vm7 = vcmp.gt.f32.partialorder %v9433_v35, 0.0 }
 0x432   :  { %v6331_v20 = vpop.eup %6330  ;;  %v5850_v50 = vadd.f32 -1.0, %v6329_v60  ;;  %v4354_v3 = vmul.f32 %v4100_v27, %v6522_v6  ;;  %v10310_v15 = vpack.c.bf16 %v10308_v38, %v10309_v28  ;;  %v4925_v16 = vmul.f32 1.442695, %v9460_v49 }
 0x433   :  { %v3333_v24 = vrot.slane %v3332_v48, 4  ;;  %v6333_v9 = vpop.eup %6332  ;;  %v5851_v18 = vadd.f32 -1.0, %v6331_v20  ;;  %v4921_v12 = vmul.f32 1.442695, %v9463_v4  ;;  %v4541_v23 = vadd.f32 %v4540_v47, %v4539_v2 }
 0x434   :  { %v5852_v42 = vadd.f32 -1.0, %v6333_v9  ;;  %v5025_v59 = vsel %vm4897_vm5, %v9425_v37, %v5850_v50  ;;  %6334 = vpow2.f32 %v4923_v51  ;;  %v3546_v60 = vadd.f32 %v3545_v63, %v3544_v33 }
 0x435   :  { %v3334_v34 = vadd.f32 %v3333_v24, %v3332_v48  ;;  %v5026_v44 = vsel %vm4898_vm6, %v9428_v61, %v5851_v18  ;;  %v5057_v37 = vpack.c.bf16 %v5025_v59, %v5025_v59  ;;  %v9481_v61 = vadd.f32 %v9422_v62, %v4489_v19 }
 0x436   :  { %5816 = vmatmul.msk.bf16.gmra.mxu2 %vm2343_vm3, %v10310_v15  ;;  %v5027_v13 = vsel %vm4899_vm7, %v9433_v35, %v5852_v42  ;;  %v5058_v30 = vpack.c.bf16 %v5026_v44, %v5026_v44  ;;  %v4581_v50 = vsel %vm629_vm2, %v4354_v3, 0.0  ;;  %6336 = vpow2.f32 %v4925_v16 }
 0x437   :  { %v3335_v46 = vrot.slane %v3334_v34, 2  ;;  %v4102_v53 = vpop.f32.mrf.mxu0  ;;  %v5059_v48 = vpack.c.bf16 %v5027_v13, %v5027_v13  ;;  %v9486_v2 = vadd.f32 %v9422_v62, %v4502_v7  ;;  %6338 = vpow2.f32 %v4921_v12 }
 0x438   :  { %v4355_v27 = vmul.f32 %v4102_v53, %v6541_v22  ;;  %v5126_v35 = vunpack.c.l.b16 %v5058_v30  ;;  %v9489_v33 = vadd.f32 %v9422_v62, %v4515_v32  ;;  %v9492_v19 = vadd.f32 %v9422_v62, %v4528_v52 }
 0x439   :  { %v3336_v20 = vadd.f32 %v3335_v46, %v3334_v34  ;;  %v4140_v24 = vpop.f32.mrf.mxu2  ;;  %v5127_v47 = vunpack.c.l.b16 %v5059_v48  ;;  %v5125_v51 = vunpack.c.l.b16 %v5057_v37  ;;  %v4927_v28 = vmul.f32 1.442695, %v9481_v61 }
 0x43a   :  { %v4582_v9 = vsel %vm629_vm2, %v4355_v27, 0.0  ;;  %v5170_v34 = vrot.slane %v5126_v35, 7  ;;  %v6335_v3 = vpop.eup %6334  ;;  %v9497_v59 = vadd.f32 %v9422_v62, %v4541_v23  ;;  %v4929_v32 = vmul.f32 1.442695, %v9486_v2 }
 0x43b   :  { %v3337_v18 = vrot.slane %v3336_v20, 1  ;;  %v4583_v42 = vadd.f32 %v4582_v9, %v4581_v50  ;;  %v5172_v38 = vrot.slane %v5127_v47, 6  ;;  %v4370_v52 = vmul.f32 %v4140_v24, %v6522_v6 }
 0x43c   :  { %v5171_v15 = vsel %vm5150_vm8, %v5170_v34, %v5125_v51  ;;  %v6337_v44 = vpop.eup %6336  ;;  %v4931_v53 = vmul.f32 1.442695, %v9489_v33  ;;  %v4933_v12 = vmul.f32 1.442695, %v9492_v19  ;;  %v5843_v27 = vadd.f32 -1.0, %v6335_v3  ;;  %v10312_v51 = vld [vmem:[#allocation35_spill] sm:$0xff] }
 0x43d   :  { %v3338_v63 = vadd.f32 %v3337_v18, %v3336_v20  ;;  %v9503_v46 = vsel %vm5153_vm9, %v5172_v38, %v5171_v15  ;;  %v6339_v13 = vpop.eup %6338  ;;  %vm4890_vm10 = vcmp.gt.f32.partialorder %v9456_v43, 0.0  ;;  %v4935_v24 = vmul.f32 1.442695, %v9497_v59 }
 0x43e   :  { %v5844_v37 = vadd.f32 -1.0, %v6337_v44  ;;  %v4633_v50 = vsel %vm629_vm2, %v4370_v52, 0.0  ;;  %v5842_v9 = vadd.f32 -1.0, %v6339_v13  ;;  %v5018_v47 = vsel %vm4890_vm10, %v9456_v43, %v5843_v27 }
 0x43f   :  { %6340 = vrcp.f32 %v3338_v63  ;;  %v4105_v7 = vpop.f32.mrf.mxu0  ;;  %v10311_v63 = vld [vmem:[#allocation37_spill] sm:$0xff]  ;;  %vm4889_vm11 = vcmp.gt.f32.partialorder %v9463_v4, 0.0  ;;  %vm4891_vm12 = vcmp.gt.f32.partialorder %v9460_v49, 0.0  ;;  %vm4892_vm13 = vcmp.gt.f32.partialorder %v9481_v61, 0.0 }
 0x440   :  { %v4356_v16 = vmul.f32 %v4105_v7, %v6567_v40  ;;  %6342 = vrcp.f32 %v3546_v60  ;;  %v10313_v34 = vpack.c.bf16 %v10311_v63, %v10312_v51  ;;  %vm4893_vm14 = vcmp.gt.f32.partialorder %v9486_v2, 0.0 }
 0x441   :  { %v4142_v30 = vpop.f32.mrf.mxu2  ;;  %6344 = vpow2.f32 %v4927_v28  ;;  %v5019_v43 = vsel %vm4891_vm12, %v9460_v49, %v5844_v37  ;;  %vm4894_vm15 = vcmp.gt.f32.partialorder %v9489_v33, 0.0  ;;  %vm4895_vm0 = vcmp.gt.f32.partialorder %v9492_v19, 0.0 }
 0x442   :  { %v4584_v23 = vsel %vm629_vm2, %v4356_v16, 0.0  ;;  %v4371_v48 = vmul.f32 %v4142_v30, %v6541_v22  ;;  %6346 = vpow2.f32 %v4929_v32  ;;  %v5050_v32 = vpack.c.bf16 %v5018_v47, %v5018_v47 }
 0x443   :  { %v4585_v20 = vadd.f32 %v4584_v23, %v4583_v42  ;;  %6348 = vpow2.f32 %v4931_v53  ;;  %vm4896_vm4 = vcmp.gt.f32.partialorder %v9497_v59, 0.0  ;;  %vm5156_vm5 = vcmask 1043459  }
 0x444   :  { %v4634_v60 = vsel %vm629_vm2, %v4371_v48, 0.0  ;;  %6350 = vpow2.f32 %v4933_v12  ;;  %vm5159_vm6 = vcmask 1044484   ;;  %vm5162_vm7 = vcmask 1045509  }
 0x445   :  { %v9513_v35 = vpop.eup %6340  ;;  %v4635_v18 = vadd.f32 %v4634_v60, %v4633_v50  ;;  %6352 = vpow2.f32 %v4935_v24  ;;  %vm5165_vm10 = vcmask 1046534  }
 0x446   :  { %5817 = vmatmul.msk.bf16.gmra.mxu2 %vm2343_vm3, %v10313_v34  ;;  %v3648_v42 = vmul.f32 %v9513_v35, %v9435_v31  ;;  %v3649_v3 = vmul.f32 %v9513_v35, %v9439_v36  ;;  %v9526_v38 = vpop.eup %6342  ;;  %v5017_v36 = vsel %vm4889_vm11, %v9463_v4, %v5842_v9  ;;  %v5051_v4 = vpack.c.bf16 %v5019_v43, %v5019_v43 }
 0x447   :  { %v4107_v28 = vpop.f32.mrf.mxu0  ;;  %v6345_v7 = vpop.eup %6344  ;;  %v5049_v24 = vpack.c.bf16 %v5017_v36, %v5017_v36  ;;  %v5118_v9 = vunpack.c.l.b16 %v5050_v32  ;;  %vm5168_vm11 = vcmask 1047559  }
 0x448   :  { %v4357_v31 = vmul.f32 %v4107_v28, %v6672_v29  ;;  %v3748_v15 = vpack.c.bf16 %v3649_v3, %v3648_v42  ;;  %v6347_v44 = vpop.eup %6346  ;;  %v5845_v16 = vadd.f32 -1.0, %v6345_v7  ;;  %v5119_v28 = vunpack.c.l.b16 %v5051_v4 }
 0x449   :  { %v4145_v52 = vpop.f32.mrf.mxu2  ;;  %v6349_v53 = vpop.eup %6348  ;;  %v5846_v30 = vadd.f32 -1.0, %v6347_v44  ;;  %v5149_v32 = vrot.slane %v5118_v9, 7  ;;  %v10314_v9 = vld [vmem:[#allocation38_spill] sm:$0xff] }
 0x44a   :  { %v4586_v13 = vsel %vm629_vm2, %v4357_v31, 0.0  ;;  %v4372_v49 = vmul.f32 %v4145_v52, %v6567_v40  ;;  %5806 = vmatmul.msk.bf16.gmra.mxu0 %vm2343_vm3, %v3748_v15  ;;  %v6351_v12 = vpop.eup %6350  ;;  %v5847_v23 = vadd.f32 -1.0, %v6349_v53  ;;  %v5020_v48 = vsel %vm4892_vm13, %v9481_v61, %v5845_v16 }
 0x44b   :  { %v4587_v27 = vadd.f32 %v4586_v13, %v4585_v20  ;;  %v5848_v50 = vadd.f32 -1.0, %v6351_v12  ;;  %v5021_v60 = vsel %vm4893_vm14, %v9486_v2, %v5846_v30  ;;  %v6353_v47 = vpop.eup %6352  ;;  %v5052_v34 = vpack.c.bf16 %v5020_v48, %v5020_v48 }
 0x44c   :  { %v4636_v37 = vsel %vm629_vm2, %v4372_v49, 0.0  ;;  %v5022_v20 = vsel %vm4894_vm15, %v9489_v33, %v5847_v23  ;;  %v5849_v42 = vadd.f32 -1.0, %v6353_v47  ;;  %v5053_v3 = vpack.c.bf16 %v5021_v60, %v5021_v60  ;;  %v10315_v47 = vld [vmem:[#allocation26_spill] sm:$0xff] }
 0x44d   :  { %v4588_v63 = vrot.slane %v4587_v27, 4  ;;  %v4637_v51 = vadd.f32 %v4636_v37, %v4635_v18  ;;  %v5023_v61 = vsel %vm4895_vm0, %v9492_v19, %v5848_v50  ;;  %v5054_v7 = vpack.c.bf16 %v5022_v20, %v5022_v20 }
 0x44e   :  { %v5055_v31 = vpack.c.bf16 %v5023_v61, %v5023_v61  ;;  %v5120_v2 = vunpack.c.l.b16 %v5052_v34  ;;  %v5024_v18 = vsel %vm4896_vm4, %v9497_v59, %v5849_v42  ;;  %v5117_v15 = vunpack.c.l.b16 %v5049_v24 }
 0x44f   :  { %v4589_v43 = vadd.f32 %v4588_v63, %v4587_v27  ;;  %v5121_v36 = vunpack.c.l.b16 %v5053_v3  ;;  %v3650_v52 = vmul.f32 %v9513_v35, %v9447_v45  ;;  %v5056_v16 = vpack.c.bf16 %v5024_v18, %v5024_v18 }
 0x450   :  { %v5122_v19 = vunpack.c.l.b16 %v5054_v7  ;;  %v5123_v13 = vunpack.c.l.b16 %v5055_v31  ;;  %v5151_v49 = vsel %vm5150_vm8, %v5149_v32, %v5117_v15  ;;  %v5152_v30 = vrot.slane %v5119_v28, 6 }
 0x451   :  { %v4590_v33 = vrot.slane %v4589_v43, 2  ;;  %v4147_v44 = vpop.f32.mrf.mxu2  ;;  %v3651_v59 = vmul.f32 %v9513_v35, %v9449_v14  ;;  %v5124_v12 = vunpack.c.l.b16 %v5056_v16  ;;  %v5155_v27 = vrot.slane %v5120_v2, 5 }
 0x452   :  { %v4373_v53 = vmul.f32 %v4147_v44, %v6672_v29  ;;  %v5154_v48 = vsel %vm5153_vm9, %v5152_v30, %v5151_v49  ;;  %v5158_v24 = vrot.slane %v5121_v36, 4  ;;  %v5161_v45 = vrot.slane %v5122_v19, 3 }
 0x453   :  { %v4591_v4 = vadd.f32 %v4590_v33, %v4589_v43  ;;  %v5157_v60 = vsel %vm5156_vm5, %v5155_v27, %v5154_v48  ;;  %v10316_v63 = vpack.c.bf16 %v10314_v9, %v10315_v47  ;;  %v5164_v35 = vrot.slane %v5123_v13, 2  ;;  %v10318_v13 = vld [vmem:[#allocation39_spill] sm:$0xff] }
 0x454   :  { %v4638_v23 = vsel %vm629_vm2, %v4373_v53, 0.0  ;;  %v5160_v14 = vsel %vm5159_vm6, %v5158_v24, %v5157_v60  ;;  %v5167_v42 = vrot.slane %v5124_v12, 1  ;;  %v3749_v61 = vpack.c.bf16 %v3651_v59, %v3650_v52  ;;  %v10317_v53 = vld [vmem:[#allocation40_spill] sm:$0xff] }
 0x455   :  { %v4592_v37 = vrot.slane %v4591_v4, 1  ;;  %v9563_v50 = vadd.f32 %v4638_v23, %v4637_v51  ;;  %v5163_v34 = vsel %vm5162_vm7, %v5161_v45, %v5160_v14  ;;  %v9575_v3 = vmul.f32 %v9526_v38, %v9350_v21 }
 0x456   :  { %5818 = vmatmul.msk.bf16.gmra.mxu2 %vm2343_vm3, %v10316_v63  ;;  %v5166_v51 = vsel %vm5165_vm10, %v5164_v35, %v5163_v34  ;;  %v9583_v31 = vmul.f32 %v9526_v38, %v9358_v58  ;;  %v9588_v2 = vmul.f32 %v9526_v38, %v9365_v17  ;;  %v9592_v21 = vmul.f32 %v9526_v38, %v9370_v26 }
 0x457   :  { %v4593_v20 = vadd.f32 %v4592_v37, %v4591_v4  ;;  %v9579_v7 = vsel %vm5168_vm11, %v5167_v42, %v5166_v51  ;;  %v10319_v49 = vpack.c.bf16 %v10317_v53, %v10318_v13 }
 0x458   :  { %v3780_v15 = vpack.c.bf16 %v9583_v31, %v9575_v3  ;;  %v3781_v36 = vpack.c.bf16 %v9592_v21, %v9588_v2 }
 0x459   :  { %v4868_v28 = vadd.f32 %v9422_v62, %v4593_v20  ;;  %v4150_v43 = vpop.f32.mrf.mxu2 }
 0x45a   :  { %5807 = vmatmul.msk.bf16.gmra.mxu0 %vm2343_vm3, %v3749_v61  ;;  %v4374_v58 = vmul.f32 %v4150_v43, %v6522_v6  ;;  %v10321_v43 = vld [vmem:[#allocation41_spill] sm:$0xff] }
 0x45b   :  { %v4943_v18 = vmul.f32 1.442695, %v4868_v28  ;;  %vm4900_vm12 = vcmp.gt.f32.partialorder %v4868_v28, 0.0 }
 0x45c   :  { %v4646_v16 = vsel %vm629_vm2, %v4374_v58, 0.0 }
 0x45d   :  { %6354 = vpow2.f32 %v4943_v18 }
 0x461   :  { %v4152_v32 = vpop.f32.mrf.mxu2 }
 0x462   :  { %v4375_v33 = vmul.f32 %v4152_v32, %v6541_v22  ;;  %v4110_v44 = vpop.f32.mrf.mxu0 }
 0x463   :  { %v6355_v17 = vpop.eup %6354  ;;  %v4358_v59 = vmul.f32 %v4110_v44, %v6522_v6 }
 0x464   :  { %v5853_v52 = vadd.f32 -1.0, %v6355_v17  ;;  %v4647_v26 = vsel %vm629_vm2, %v4375_v33, 0.0 }
 0x465   :  { %v4648_v38 = vadd.f32 %v4647_v26, %v4646_v16  ;;  %v4594_v60 = vsel %vm629_vm2, %v4358_v59, 0.0  ;;  %v10323_v59 = vld [vmem:[#allocation44_spill] sm:$0xff] }
 0x466   :  { %v5028_v19 = vsel %vm4900_vm12, %v4868_v28, %v5853_v52  ;;  %5819 = vmatmul.msk.bf16.gmra.mxu2 %vm2343_vm3, %v10319_v49 }
 0x467   :  { %v5060_v30 = vpack.c.bf16 %v5028_v19, %v5028_v19 }
 0x469   :  { %v5128_v4 = vunpack.c.l.b16 %v5060_v30  ;;  %v4155_v12 = vpop.f32.mrf.mxu2 }
 0x46a   :  { %v4376_v27 = vmul.f32 %v4155_v12, %v6567_v40  ;;  %v4112_v23 = vpop.f32.mrf.mxu0  ;;  %v10324_v12 = vld [vmem:[#allocation43_spill] sm:$0xff] }
 0x46b   :  { %v5174_v48 = vrot.slane %v5128_v4, 5  ;;  %v4359_v24 = vmul.f32 %v4112_v23, %v6541_v22 }
 0x46c   :  { %v4649_v45 = vsel %vm629_vm2, %v4376_v27, 0.0  ;;  %v10325_v27 = vpack.c.bf16 %v10323_v59, %v10324_v12 }
 0x46d   :  { %v9612_v37 = vsel %vm5156_vm5, %v5174_v48, %v9503_v46  ;;  %v4650_v9 = vadd.f32 %v4649_v45, %v4648_v38  ;;  %v4595_v47 = vsel %vm629_vm2, %v4359_v24, 0.0  ;;  %v10320_v46 = vld [vmem:[#allocation42_spill] sm:$0xff] }
 0x46e   :  { %v4596_v63 = vadd.f32 %v4595_v47, %v4594_v60  ;;  %v10322_v18 = vpack.c.bf16 %v10320_v46, %v10321_v43  ;;  %v10326_v43 = vld [vmem:[#allocation46_spill] sm:$0xff] }
 0x471   :  { %v4157_v14 = vpop.f32.mrf.mxu2 }
 0x472   :  { %v4377_v35 = vmul.f32 %v4157_v14, %v6672_v29  ;;  %v4115_v20 = vpop.f32.mrf.mxu0 }
 0x473   :  { %v4360_v34 = vmul.f32 %v4115_v20, %v6567_v40 }
 0x474   :  { %v4651_v42 = vsel %vm629_vm2, %v4377_v35, 0.0 }
 0x475   :  { %v4652_v61 = vadd.f32 %v4651_v42, %v4650_v9  ;;  %v4597_v51 = vsel %vm629_vm2, %v4360_v34, 0.0 }
 0x476   :  { %v4598_v28 = vadd.f32 %v4597_v51, %v4596_v63  ;;  %5820 = vmatmul.msk.bf16.gmra.mxu2 %vm2343_vm3, %v10322_v18  ;;  %v10327_v18 = vld [vmem:[#allocation45_spill] sm:$0xff] }
 0x477   :  { %v4653_v60 = vrot.slane %v4652_v61, 4 }
 0x479   :  { %v4160_v58 = vpop.f32.mrf.mxu2  ;;  %v4654_v35 = vadd.f32 %v4653_v60, %v4652_v61 }
 0x47a   :  { %v4117_v32 = vpop.f32.mrf.mxu0  ;;  %v4378_v52 = vmul.f32 %v4160_v58, %v6522_v6  ;;  %v10328_v58 = vpack.c.bf16 %v10326_v43, %v10327_v18 }
 0x47b   :  { %v4361_v33 = vmul.f32 %v4117_v32, %v6672_v29  ;;  %v4655_v42 = vrot.slane %v4654_v35, 2 }
 0x47c   :  { %v4659_v53 = vsel %vm629_vm2, %v4378_v52, 0.0 }
 0x47d   :  { %v4599_v44 = vsel %vm629_vm2, %v4361_v33, 0.0  ;;  %v4656_v32 = vadd.f32 %v4655_v42, %v4654_v35  ;;  %v10329_v35 = vld [vmem:[#allocation48_spill] sm:$0xff] }
 0x47e   :  { %v4600_v17 = vadd.f32 %v4599_v44, %v4598_v28 }
 0x480   :  { %v4601_v16 = vrot.slane %v4600_v17, 4 }
 0x481   :  { %v4162_v26 = vpop.f32.mrf.mxu2 }
 0x482   :  { %v4602_v38 = vadd.f32 %v4601_v16, %v4600_v17  ;;  %v4379_v19 = vmul.f32 %v4162_v26, %v6541_v22  ;;  %v4657_v26 = vrot.slane %v4656_v32, 1 }
 0x484   :  { %v4603_v13 = vrot.slane %v4602_v38, 2  ;;  %v4660_v49 = vsel %vm629_vm2, %v4379_v19, 0.0 }
 0x485   :  { %v4661_v30 = vadd.f32 %v4660_v49, %v4659_v53 }
 0x486   :  { %v4604_v4 = vadd.f32 %v4603_v13, %v4602_v38  ;;  %5821 = vmatmul.msk.bf16.gmra.mxu2 %vm2343_vm3, %v10325_v27 }
 0x488   :  { %v4605_v23 = vrot.slane %v4604_v4, 1 }
 0x489   :  { %v4165_v48 = vpop.f32.mrf.mxu2 }
 0x48a   :  { %v4606_v24 = vadd.f32 %v4605_v23, %v4604_v4  ;;  %v4380_v45 = vmul.f32 %v4165_v48, %v6567_v40 }
 0x48c   :  { %v4869_v9 = vadd.f32 %v9422_v62, %v4606_v24  ;;  %v4662_v47 = vsel %vm629_vm2, %v4380_v45, 0.0 }
 0x48d   :  { %v4663_v63 = vadd.f32 %v4662_v47, %v4661_v30  ;;  %v4658_v30 = vadd.f32 %v4657_v26, %v4656_v32 }
 0x48e   :  { %v4945_v14 = vmul.f32 1.442695, %v4869_v9  ;;  %vm4901_vm13 = vcmp.gt.f32.partialorder %v4869_v9, 0.0 }
 0x48f   :  { %v4873_v24 = vadd.f32 %v9422_v62, %v4658_v30 }
 0x490   :  { %6356 = vpow2.f32 %v4945_v14 }
 0x491   :  { %v4167_v20 = vpop.f32.mrf.mxu2  ;;  %vm4905_vm15 = vcmp.gt.f32.partialorder %v4873_v24, 0.0 }
 0x492   :  { %v4381_v34 = vmul.f32 %v4167_v20, %v6672_v29  ;;  %v10330_v20 = vld [vmem:[#allocation47_spill] sm:$0xff] }
 0x494   :  { %v4664_v51 = vsel %vm629_vm2, %v4381_v34, 0.0  ;;  %v10331_v34 = vpack.c.bf16 %v10329_v35, %v10330_v20 }
 0x495   :  { %v4665_v28 = vadd.f32 %v4664_v51, %v4663_v63 }
 0x496   :  { %v6357_v46 = vpop.eup %6356  ;;  %5822 = vmatmul.msk.bf16.gmra.mxu2 %vm2343_vm3, %v10328_v58 }
 0x497   :  { %v5854_v33 = vadd.f32 -1.0, %v6357_v46  ;;  %v4666_v44 = vrot.slane %v4665_v28, 4  ;;  %v4120_v53 = vpop.f32.mrf.mxu0 }
 0x499   :  { %v5029_v17 = vsel %vm4901_vm13, %v4869_v9, %v5854_v33  ;;  %v4667_v61 = vadd.f32 %v4666_v44, %v4665_v28  ;;  %v4170_v52 = vpop.f32.mrf.mxu2 }
 0x49a   :  { %v5061_v16 = vpack.c.bf16 %v5029_v17, %v5029_v17  ;;  %v4382_v59 = vmul.f32 %v4170_v52, %v6522_v6 }
 0x49b   :  { %v4668_v38 = vrot.slane %v4667_v61, 2 }
 0x49c   :  { %v5129_v19 = vunpack.c.l.b16 %v5061_v16  ;;  %v4672_v60 = vsel %vm629_vm2, %v4382_v59, 0.0 }
 0x49d   :  { %v4669_v13 = vadd.f32 %v4668_v38, %v4667_v61  ;;  %v5887_v38 = vld [vmem:[%s10099_s5] sm:$0xff] }
 0x49e   :  { %v5176_v49 = vrot.slane %v5129_v19, 4  ;;  %v10332_v19 = vld [vmem:[#allocation50_spill] sm:$0xff]  ;;  %5242 = vmatpush.bf16.msrb.mxu3 %v5887_v38  ;;  %v10335_v38 = vld [vmem:[#allocation52_spill] sm:$0xff] }
 0x49f   :  { %v4670_v4 = vrot.slane %v4669_v13, 1  ;;  %v4122_v14 = vpop.f32.mrf.mxu0 }
 0x4a0   :  { %v9646_v12 = vsel %vm5159_vm6, %v5176_v49, %v9612_v37  ;;  %v4953_v37 = vmul.f32 1.442695, %v4873_v24 }
 0x4a1   :  { %v4671_v27 = vadd.f32 %v4670_v4, %v4669_v13  ;;  %v4172_v23 = vpop.f32.mrf.mxu2  ;;  %v10333_v13 = vld [vmem:[#allocation49_spill] sm:$0xff] }
 0x4a2   :  { %v4383_v48 = vmul.f32 %v4172_v23, %v6541_v22  ;;  %v10334_v49 = vpack.c.bf16 %v10332_v19, %v10333_v13  ;;  %v10336_v19 = vld [vmem:[#allocation51_spill] sm:$0xff] }
 0x4a3   :  { %v4874_v45 = vadd.f32 %v9422_v62, %v4671_v27  ;;  %v4363_v27 = vmul.f32 %v4122_v14, %v6541_v22  ;;  %v10337_v13 = vpack.c.bf16 %v10335_v38, %v10336_v19 }
 0x4a4   :  { %v4673_v9 = vsel %vm629_vm2, %v4383_v48, 0.0 }
 0x4a5   :  { %v4955_v47 = vmul.f32 1.442695, %v4874_v45  ;;  %v4674_v63 = vadd.f32 %v4673_v9, %v4672_v60  ;;  %vm4906_vm14 = vcmp.gt.f32.partialorder %v4874_v45, 0.0  ;;  %v4362_v9 = vmul.f32 %v4120_v53, %v6522_v6 }
 0x4a6   :  { %5823 = vmatmul.msk.bf16.gmra.mxu2 %vm2343_vm3, %v10331_v34  ;;  %v4608_v20 = vsel %vm629_vm2, %v4363_v27, 0.0  ;;  %v4640_v27 = vrot.slane %v9563_v50, 4 }
 0x4a7   :  { %6358 = vpow2.f32 %v4955_v47  ;;  %v4125_v58 = vpop.f32.mrf.mxu0 }
 0x4a8   :  { %6360 = vpow2.f32 %v4953_v37  ;;  %v4364_v47 = vmul.f32 %v4125_v58, %v6567_v40 }
 0x4a9   :  { %v4175_v42 = vpop.f32.mrf.mxu2 }
 0x4aa   :  { %v4384_v51 = vmul.f32 %v4175_v42, %v6567_v40  ;;  %v4610_v14 = vsel %vm629_vm2, %v4364_v47, 0.0  ;;  %v4641_v47 = vadd.f32 %v4640_v27, %v9563_v50 }
 0x4ac   :  { %v4675_v28 = vsel %vm629_vm2, %v4384_v51, 0.0 }
 0x4ad   :  { %v6359_v46 = vpop.eup %6358  ;;  %v4676_v43 = vadd.f32 %v4675_v28, %v4674_v63 }
 0x4ae   :  { %v5859_v18 = vadd.f32 -1.0, %v6359_v46  ;;  %v6361_v32 = vpop.eup %6360 }
 0x4af   :  { %v5858_v61 = vadd.f32 -1.0, %v6361_v32 }
 0x4b0   :  { %v5034_v44 = vsel %vm4906_vm14, %v4874_v45, %v5859_v18  ;;  %v4127_v45 = vpop.f32.mrf.mxu0 }
 0x4b1   :  { %v4177_v33 = vpop.f32.mrf.mxu2  ;;  %v5066_v16 = vpack.c.bf16 %v5034_v44, %v5034_v44  ;;  %v5033_v4 = vsel %vm4905_vm15, %v4873_v24, %v5858_v61  ;;  %v4365_v34 = vmul.f32 %v4127_v45, %v6672_v29  ;;  %v4607_v24 = vsel %vm629_vm2, %v4362_v9, 0.0 }
 0x4b2   :  { %v4385_v17 = vmul.f32 %v4177_v33, %v6672_v29  ;;  %v5065_v60 = vpack.c.bf16 %v5033_v4, %v5033_v4  ;;  %v4609_v28 = vadd.f32 %v4608_v20, %v4607_v24  ;;  %v4642_v24 = vrot.slane %v4641_v47, 2 }
 0x4b3   :  { %v5134_v59 = vunpack.c.l.b16 %v5066_v16  ;;  %v4612_v53 = vsel %vm629_vm2, %v4365_v34, 0.0 }
 0x4b4   :  { %v4677_v52 = vsel %vm629_vm2, %v4385_v17, 0.0  ;;  %v5133_v42 = vunpack.c.l.b16 %v5065_v60  ;;  %v4611_v32 = vadd.f32 %v4610_v14, %v4609_v28 }
 0x4b5   :  { %v4678_v26 = vadd.f32 %v4677_v52, %v4676_v43  ;;  %v5184_v35 = vrot.slane %v5134_v59, 7 }
 0x4b6   :  { %5824 = vmatmul.msk.bf16.gmra.mxu2 %vm2343_vm3, %v10334_v49  ;;  %v4613_v17 = vadd.f32 %v4612_v53, %v4611_v32  ;;  %v10339_v53 = vld [vmem:[#allocation12_spill] sm:$0xff] }
 0x4b7   :  { %v4679_v30 = vrot.slane %v4678_v26, 4  ;;  %v9678_v58 = vsel %vm5150_vm8, %v5184_v35, %v5133_v42  ;;  %v9695_v35 = vld [vmem:[%s10100_s6] ss:$0 sm:$0xff] }
 0x4b8   :  { %5226 = vrot.lane.b32.xlu2 %v9695_v35, %s6459_s14  ;;  %5288 = vrot.lane.b32.xlu0 %v9695_v35, %s6460_s15 }
 0x4b9   :  { %v4680_v23 = vadd.f32 %v4679_v30, %v4678_v26  ;;  %v4180_v48 = vpop.f32.mrf.mxu2  ;;  %v4614_v30 = vrot.slane %v4613_v17, 4 }
 0x4ba   :  { %v4386_v46 = vmul.f32 %v4180_v48, %v6522_v6 }
 0x4bb   :  { %v4681_v63 = vrot.slane %v4680_v23, 2 }
 0x4bc   :  { %v4685_v61 = vsel %vm629_vm2, %v4386_v46, 0.0  ;;  %v10338_v46 = vld [vmem:[#allocation25_spill] sm:$0xff] }
 0x4bd   :  { %v4682_v37 = vadd.f32 %v4681_v63, %v4680_v23  ;;  %v4615_v23 = vadd.f32 %v4614_v30, %v4613_v17 }
 0x4bf   :  { %v4683_v51 = vrot.slane %v4682_v37, 1  ;;  %v4616_v20 = vrot.slane %v4615_v23, 2 }
 0x4c0   :  { %5355 = vperm.xlu2 %6014, %v10279_v54   ;;  %5330 = vperm.xlu0 %6013, %v10278_v57  }
 0x4c1   :  { %v4684_v43 = vadd.f32 %v4683_v51, %v4682_v37  ;;  %v4182_v18 = vpop.f32.mrf.mxu2  ;;  %v4617_v14 = vadd.f32 %v4616_v20, %v4615_v23 }
 0x4c2   :  { %v4387_v33 = vmul.f32 %v4182_v18, %v6541_v22  ;;  %v4643_v18 = vadd.f32 %v4642_v24, %v4641_v47 }
 0x4c3   :  { %v4875_v44 = vadd.f32 %v9422_v62, %v4684_v43  ;;  %v10340_v43 = vpack.c.bf16 %v10338_v46, %v10339_v53  ;;  %v4618_v17 = vrot.slane %v4617_v14, 1 }
 0x4c4   :  { %v4686_v52 = vsel %vm629_vm2, %v4387_v33, 0.0  ;;  %v4644_v19 = vrot.slane %v4643_v18, 1 }
 0x4c5   :  { %v4957_v16 = vmul.f32 1.442695, %v4875_v44  ;;  %v4687_v26 = vadd.f32 %v4686_v52, %v4685_v61  ;;  %vm4907_vm0 = vcmp.gt.f32.partialorder %v4875_v44, 0.0  ;;  %v4619_v30 = vadd.f32 %v4618_v17, %v4617_v14 }
 0x4c6   :  { %5825 = vmatmul.msk.bf16.gmra.mxu2 %vm2343_vm3, %v10337_v13 }
 0x4c7   :  { %6362 = vpow2.f32 %v4957_v16  ;;  %v4130_v49 = vpop.f32.mrf.mxu0 }
 0x4c8   :  { %6015 = vset.pattern.permute.xlu0 %v6590_v55 }
 0x4c9   :  { %v4185_v4 = vpop.f32.mrf.mxu2 }
 0x4ca   :  { %v4388_v59 = vmul.f32 %v4185_v4, %v6567_v40 }
 0x4cc   :  { %v4688_v48 = vsel %vm629_vm2, %v4388_v59, 0.0 }
 0x4cd   :  { %v6363_v45 = vpop.eup %6362  ;;  %v4689_v60 = vadd.f32 %v4688_v48, %v4687_v26  ;;  %v4366_v26 = vmul.f32 %v4130_v49, %v6522_v6  ;;  %v4870_v49 = vadd.f32 %v9422_v62, %v4619_v30 }
 0x4ce   :  { %v5860_v9 = vadd.f32 -1.0, %v6363_v45  ;;  %v4645_v45 = vadd.f32 %v4644_v19, %v4643_v18 }
 0x4cf   :  { %v4132_v63 = vpop.f32.mrf.mxu0  ;;  %v4620_v23 = vsel %vm629_vm2, %v4366_v26, 0.0  ;;  %vm4902_vm12 = vcmp.gt.f32.partialorder %v4870_v49, 0.0 }
 0x4d0   :  { %v5035_v37 = vsel %vm4907_vm0, %v4875_v44, %v5860_v9  ;;  %v4367_v44 = vmul.f32 %v4132_v63, %v6541_v22  ;;  %v10341_v63 = vld [vmem:[#allocation5_spill] sm:$0xff]  ;;  %5342 = vperm.xlu0 %6015, %v10278_v57  }
 0x4d1   :  { %v4187_v34 = vpop.f32.mrf.mxu2  ;;  %v5067_v50 = vpack.c.bf16 %v5035_v37, %v5035_v37  ;;  %6017 = vset.pattern.permute.xlu2 %v10341_v63 }
 0x4d2   :  { %v4389_v42 = vmul.f32 %v4187_v34, %v6672_v29  ;;  %v4621_v4 = vsel %vm629_vm2, %v4367_v44, 0.0 }
 0x4d3   :  { %v5135_v61 = vunpack.c.l.b16 %v5067_v50 }
 0x4d4   :  { %v4690_v51 = vsel %vm629_vm2, %v4389_v42, 0.0 }
 0x4d5   :  { %v4691_v28 = vadd.f32 %v4690_v51, %v4689_v60  ;;  %v5186_v59 = vrot.slane %v5135_v61, 6  ;;  %v4622_v60 = vadd.f32 %v4621_v4, %v4620_v23  ;;  %v10342_v61 = vld [vmem:[#allocation54_spill] sm:$0xff] }
 0x4d6   :  { %5826 = vmatmul.msk.bf16.gmra.mxu2 %vm2343_vm3, %v10340_v43  ;;  %v4947_v43 = vmul.f32 1.442695, %v4870_v49 }
 0x4d7   :  { %v4692_v32 = vrot.slane %v4691_v28, 4  ;;  %v4135_v33 = vpop.f32.mrf.mxu0  ;;  %v9717_v14 = vsel %vm5153_vm9, %v5186_v59, %v9678_v58  ;;  %v10343_v58 = vld [vmem:[#allocation53_spill] sm:$0xff] }
 0x4d8   :  { %v4368_v38 = vmul.f32 %v4135_v33, %v6567_v40  ;;  %5367 = vperm.xlu0 %6015, %v10279_v54  }
 0x4d9   :  { %v4693_v52 = vadd.f32 %v4692_v32, %v4691_v28  ;;  %v4190_v16 = vpop.f32.mrf.mxu2  ;;  %v4872_v28 = vadd.f32 %v9422_v62, %v4645_v45 }
 0x4da   :  { %v4623_v48 = vsel %vm629_vm2, %v4368_v38, 0.0  ;;  %v4390_v20 = vmul.f32 %v4190_v16, %v6522_v6 }
 0x4db   :  { %v4694_v13 = vrot.slane %v4693_v52, 2  ;;  %v4624_v42 = vadd.f32 %v4623_v48, %v4622_v60  ;;  %v4951_v16 = vmul.f32 1.442695, %v4872_v28  ;;  %vm4904_vm13 = vcmp.gt.f32.partialorder %v4872_v28, 0.0 }
 0x4dc   :  { %v4698_v18 = vsel %vm629_vm2, %v4390_v20, 0.0 }
 0x4dd   :  { %v4695_v27 = vadd.f32 %v4694_v13, %v4693_v52  ;;  %v10344_v52 = vpack.c.bf16 %v10342_v61, %v10343_v58 }
 0x4df   :  { %v4696_v9 = vrot.slane %v4695_v27, 1  ;;  %v4137_v47 = vpop.f32.mrf.mxu0 }
 0x4e0   :  { %v4369_v34 = vmul.f32 %v4137_v47, %v6672_v29  ;;  %6016 = vset.pattern.permute.xlu0 %v10341_v63  ;;  %v10362_v63 = vpack.c.bf16 %v9155_v41, %v9148_v56 }
 0x4e1   :  { %v4697_v37 = vadd.f32 %v4696_v9, %v4695_v27  ;;  %v4192_v24 = vpop.f32.mrf.mxu2 }
 0x4e2   :  { %v4625_v51 = vsel %vm629_vm2, %v4369_v34, 0.0  ;;  %v4391_v50 = vmul.f32 %v4192_v24, %v6541_v22 }
 0x4e3   :  { %v4876_v46 = vadd.f32 %v9422_v62, %v4697_v37  ;;  %v4626_v53 = vadd.f32 %v4625_v51, %v4624_v42 }
 0x4e4   :  { %v4699_v32 = vsel %vm629_vm2, %v4391_v50, 0.0 }
 0x4e5   :  { %v4959_v33 = vmul.f32 1.442695, %v4876_v46  ;;  %v4627_v17 = vrot.slane %v4626_v53, 4  ;;  %v4700_v44 = vadd.f32 %v4699_v32, %v4698_v18  ;;  %vm4908_vm4 = vcmp.gt.f32.partialorder %v4876_v46, 0.0  ;;  %v10345_v32 = vld [vmem:[#allocation59_spill] sm:$0xff] }
 0x4e6   :  { %5827 = vmatmul.msk.bf16.gmra.mxu2 %vm2343_vm3, %v10344_v52 }
 0x4e7   :  { %6364 = vpow2.f32 %v4959_v33  ;;  %v4628_v26 = vadd.f32 %v4627_v17, %v4626_v53  ;;  %v10346_v33 = vld [vmem:[#allocation58_spill] sm:$0xff] }
 0x4e8   :  { %6366 = vpow2.f32 %v4947_v43  ;;  %v10347_v17 = vpack.c.bf16 %v10345_v32, %v10346_v33  ;;  %v10348_v33 = vld [vmem:[#allocation61_spill] sm:$0xff]  ;;  %5348 = vperm.xlu0 %6016, %v10278_v57  }
 0x4e9   :  { %v4629_v38 = vrot.slane %v4628_v26, 2  ;;  %v4195_v19 = vpop.f32.mrf.mxu2  ;;  %6368 = vpow2.f32 %v4951_v16 }
 0x4ea   :  { %v4392_v13 = vmul.f32 %v4195_v19, %v6567_v40 }
 0x4eb   :  { %v4630_v30 = vadd.f32 %v4629_v38, %v4628_v26 }
 0x4ec   :  { %v4701_v4 = vsel %vm629_vm2, %v4392_v13, 0.0 }
 0x4ed   :  { %v6365_v59 = vpop.eup %6364  ;;  %v4631_v27 = vrot.slane %v4630_v30, 1  ;;  %v4702_v23 = vadd.f32 %v4701_v4, %v4700_v44 }
 0x4ee   :  { %v6367_v48 = vpop.eup %6366  ;;  %v5861_v45 = vadd.f32 -1.0, %v6365_v59 }
 0x4ef   :  { %v4632_v60 = vadd.f32 %v4631_v27, %v4630_v30  ;;  %v6369_v9 = vpop.eup %6368  ;;  %v5855_v47 = vadd.f32 -1.0, %v6367_v48 }
 0x4f0   :  { %v5036_v37 = vsel %vm4908_vm4, %v4876_v46, %v5861_v45  ;;  %v5857_v51 = vadd.f32 -1.0, %v6369_v9 }
 0x4f1   :  { %v4871_v20 = vadd.f32 %v9422_v62, %v4632_v60  ;;  %v4197_v34 = vpop.f32.mrf.mxu2  ;;  %v5030_v53 = vsel %vm4902_vm12, %v4870_v49, %v5855_v47  ;;  %v5068_v43 = vpack.c.bf16 %v5036_v37, %v5036_v37 }
 0x4f2   :  { %v4393_v42 = vmul.f32 %v4197_v34, %v6672_v29  ;;  %v5062_v61 = vpack.c.bf16 %v5030_v53, %v5030_v53  ;;  %v5032_v46 = vsel %vm4904_vm13, %v4872_v28, %v5857_v51 }
 0x4f3   :  { %v4949_v24 = vmul.f32 1.442695, %v4871_v20  ;;  %v5136_v58 = vunpack.c.l.b16 %v5068_v43  ;;  %v5064_v19 = vpack.c.bf16 %v5032_v46, %v5032_v46  ;;  %vm4903_vm14 = vcmp.gt.f32.partialorder %v4871_v20, 0.0 }
 0x4f4   :  { %v4703_v50 = vsel %vm629_vm2, %v4393_v42, 0.0  ;;  %v5130_v13 = vunpack.c.l.b16 %v5062_v61 }
 0x4f5   :  { %6370 = vpow2.f32 %v4949_v24  ;;  %v4704_v18 = vadd.f32 %v4703_v50, %v4702_v23  ;;  %v5188_v30 = vrot.slane %v5136_v58, 5  ;;  %v5132_v60 = vunpack.c.l.b16 %v5064_v19 }
 0x4f6   :  { %5828 = vmatmul.msk.bf16.gmra.mxu2 %vm2343_vm3, %v10347_v17  ;;  %v5178_v48 = vrot.slane %v5130_v13, 3  ;;  %v10349_v17 = vld [vmem:[#allocation60_spill] sm:$0xff] }
 0x4f7   :  { %v4705_v44 = vrot.slane %v4704_v18, 4  ;;  %v5189_v34 = vsel %vm5156_vm5, %v5188_v30, %v9717_v14  ;;  %v5182_v53 = vrot.slane %v5132_v60, 1  ;;  %v10350_v14 = vpack.c.bf16 %v10348_v33, %v10349_v17  ;;  %v10354_v17 = vld [vmem:[#allocation69_spill] sm:$0xff] }
 0x4f8   :  { %v5179_v50 = vsel %vm5162_vm7, %v5178_v48, %v9646_v12 }
 0x4f9   :  { %v4706_v52 = vadd.f32 %v4705_v44, %v4704_v18  ;;  %v4200_v16 = vpop.f32.mrf.mxu2 }
 0x4fa   :  { %v4394_v45 = vmul.f32 %v4200_v16, %v6522_v6 }
 0x4fb   :  { %v6371_v26 = vpop.eup %6370  ;;  %v4707_v38 = vrot.slane %v4706_v52, 2 }
 0x4fc   :  { %v5856_v49 = vadd.f32 -1.0, %v6371_v26  ;;  %v4711_v51 = vsel %vm629_vm2, %v4394_v45, 0.0 }
 0x4fd   :  { %v4708_v4 = vadd.f32 %v4707_v38, %v4706_v52 }
 0x4fe   :  { %v5031_v59 = vsel %vm4903_vm14, %v4871_v20, %v5856_v49 }
 0x4ff   :  { %v5063_v27 = vpack.c.bf16 %v5031_v59, %v5031_v59  ;;  %v4709_v23 = vrot.slane %v4708_v4, 1  ;;  %v10352_v59 = vld [vmem:[#allocation66_spill] sm:$0xff] }
 0x501   :  { %v5131_v9 = vunpack.c.l.b16 %v5063_v27  ;;  %v4710_v28 = vadd.f32 %v4709_v23, %v4708_v4  ;;  %v4202_v47 = vpop.f32.mrf.mxu2 }
 0x502   :  { %v4395_v37 = vmul.f32 %v4202_v47, %v6541_v22 }
 0x503   :  { %v5180_v42 = vrot.slane %v5131_v9, 2  ;;  %v4877_v24 = vadd.f32 %v9422_v62, %v4710_v28 }
 0x504   :  { %v4712_v20 = vsel %vm629_vm2, %v4395_v37, 0.0 }
 0x505   :  { %v4961_v43 = vmul.f32 1.442695, %v4877_v24  ;;  %v4713_v18 = vadd.f32 %v4712_v20, %v4711_v51  ;;  %v5181_v32 = vsel %vm5165_vm10, %v5180_v42, %v5179_v50  ;;  %vm4909_vm15 = vcmp.gt.f32.partialorder %v4877_v24, 0.0 }
 0x506   :  { %5829 = vmatmul.msk.bf16.gmra.mxu2 %vm2343_vm3, %v10350_v14  ;;  %v5183_v44 = vsel %vm5168_vm11, %v5182_v53, %v5181_v32  ;;  %v10355_v14 = vld [vmem:[#allocation68_spill] sm:$0xff] }
 0x507   :  { %6372 = vpow2.f32 %v4961_v43  ;;  %v5212_v61 = vpack.c.b16 %v5183_v44, %v9579_v7  ;;  %v10351_v7 = vld [vmem:[#allocation67_spill] sm:$0xff]  ;;  %v10356_v44 = vpack.c.bf16 %v10354_v17, %v10355_v14 }
 0x508   :  { %v10353_v27 = vpack.c.bf16 %v10351_v7, %v10352_v59  ;;  %v10358_v7 = vld [vmem:[#allocation15_spill] sm:$0xff] }
 0x509   :  { %v4205_v46 = vpop.f32.mrf.mxu2  ;;  %5882 = vmatmul.msk.bf16.vlgmr.msrb.gmra.mxu3 %vm629_vm2, %v5212_v61 }
 0x50a   :  { %v4396_v12 = vmul.f32 %v4205_v46, %v6567_v40 }
 0x50c   :  { %v4714_v58 = vsel %vm629_vm2, %v4396_v12, 0.0 }
 0x50d   :  { %v6373_v52 = vpop.eup %6372  ;;  %v4715_v16 = vadd.f32 %v4714_v58, %v4713_v18 }
 0x50e   :  { %v5862_v26 = vadd.f32 -1.0, %v6373_v52 }
 0x510   :  { %v5037_v19 = vsel %vm4909_vm15, %v4877_v24, %v5862_v26 }
 0x511   :  { %v4207_v38 = vpop.f32.mrf.mxu2  ;;  %v5069_v30 = vpack.c.bf16 %v5037_v19, %v5037_v19 }
 0x512   :  { %v4397_v13 = vmul.f32 %v4207_v38, %v6672_v29 }
 0x513   :  { %v5137_v48 = vunpack.c.l.b16 %v5069_v30 }
 0x514   :  { %v4716_v49 = vsel %vm629_vm2, %v4397_v13, 0.0 }
 0x515   :  { %v4717_v4 = vadd.f32 %v4716_v49, %v4715_v16  ;;  %v5190_v28 = vrot.slane %v5137_v48, 4 }
 0x516   :  { %5830 = vmatmul.msk.bf16.gmra.mxu2 %vm2343_vm3, %v10353_v27 }
 0x517   :  { %v4718_v23 = vrot.slane %v4717_v4, 4  ;;  %v5191_v20 = vsel %vm5159_vm6, %v5190_v28, %v5189_v34  ;;  %v1403_v34 = vpop.f32.mrf.mxu3 }
 0x519   :  { %v4719_v45 = vadd.f32 %v4718_v23, %v4717_v4  ;;  %v4210_v60 = vpop.f32.mrf.mxu2  ;;  %v10357_v4 = vld [vmem:[#allocation16_spill] sm:$0xff] }
 0x51a   :  { %v4398_v42 = vmul.f32 %v4210_v60, %v6522_v6  ;;  %v10359_v59 = vpack.c.bf16 %v10357_v4, %v10358_v7  ;;  %v2196_v60 = vpop.permute.xlu2 %2195 }
 0x51b   :  { %v4720_v9 = vrot.slane %v4719_v45, 2 }
 0x51c   :  { %v4724_v43 = vsel %vm629_vm2, %v4398_v42, 0.0 }
 0x51d   :  { %v4721_v47 = vadd.f32 %v4720_v9, %v4719_v45 }
 0x51f   :  { %v4722_v37 = vrot.slane %v4721_v47, 1  ;;  %v1406_v13 = vpop.f32.mrf.mxu3 }
 0x521   :  { %v4723_v24 = vadd.f32 %v4722_v37, %v4721_v47  ;;  %v4212_v51 = vpop.f32.mrf.mxu2 }
 0x522   :  { %v4399_v50 = vmul.f32 %v4212_v51, %v6541_v22 }
 0x523   :  { %v4878_v53 = vadd.f32 %v9422_v62, %v4723_v24 }
 0x524   :  { %v4725_v18 = vsel %vm629_vm2, %v4399_v50, 0.0 }
 0x525   :  { %v4963_v32 = vmul.f32 1.442695, %v4878_v53  ;;  %v4726_v33 = vadd.f32 %v4725_v18, %v4724_v43  ;;  %vm4910_vm0 = vcmp.gt.f32.partialorder %v4878_v53, 0.0  ;;  %v2208_v18 = vpop.permute.xlu2 %2207 }
 0x526   :  { %5831 = vmatmul.msk.bf16.gmra.mxu2 %vm2343_vm3, %v10356_v44 }
 0x527   :  { %6374 = vpow2.f32 %v4963_v32  ;;  %v1409_v37 = vpop.f32.mrf.mxu3  ;;  %v9787_v32 = vadd.f32 %v9407_v39, %v1406_v13  ;;  %v2214_v39 = vpop.permute.xlu0 %2213 }
 0x529   :  { %v4215_v61 = vpop.f32.mrf.mxu2 }
 0x52a   :  { %v4400_v46 = vmul.f32 %v4215_v61, %v6567_v40  ;;  %v9792_v61 = vadd.f32 %v2196_v60, %v1403_v34  ;;  %v10361_v60 = vpack.c.bf16 %v9145_v8, %v9142_v25 }
 0x52c   :  { %v4727_v12 = vsel %vm629_vm2, %v4400_v46, 0.0  ;;  %v9794_v46 = vadd.f32 %v2208_v18, %v1409_v37  ;;  %v2747_v34 = vsel %vm2343_vm3, %v9792_v61, -inf }
 0x52d   :  { %v4728_v58 = vadd.f32 %v4727_v12, %v4726_v33  ;;  %v6375_v52 = vpop.eup %6374  ;;  %v2748_v12 = vsel %vm2343_vm3, %v9787_v32, -inf }
 0x52e   :  { %v5863_v26 = vadd.f32 -1.0, %v6375_v52 }
 0x530   :  { %v5038_v30 = vsel %vm4910_vm0, %v4878_v53, %v5863_v26  ;;  %v2750_v26 = vsel %vm2343_vm3, %v9794_v46, -inf  ;;  %vm5447_vm0 = vcmask 254976  }
 0x531   :  { %v4217_v16 = vpop.f32.mrf.mxu2  ;;  %v5070_v23 = vpack.c.bf16 %v5038_v30, %v5038_v30 }
 0x532   :  { %v4401_v38 = vmul.f32 %v4217_v16, %v6672_v29 }
 0x533   :  { %v5138_v47 = vunpack.c.l.b16 %v5070_v23 }
 0x534   :  { %v4729_v19 = vsel %vm629_vm2, %v4401_v38, 0.0 }
 0x535   :  { %v4730_v49 = vadd.f32 %v4729_v19, %v4728_v58  ;;  %v5192_v24 = vrot.slane %v5138_v47, 3  ;;  %v1412_v58 = vpop.f32.mrf.mxu3 }
 0x536   :  { %5832 = vmatmul.msk.bf16.gmra.mxu2 %vm2343_vm3, %v10359_v59 }
 0x537   :  { %v4731_v27 = vrot.slane %v4730_v49, 4  ;;  %v5193_v43 = vsel %vm5162_vm7, %v5192_v24, %v5191_v20  ;;  %v10360_v20 = vpack.c.bf16 %v9010_v11, %v8997_v10  ;;  %v2749_v10 = vmax.f32 %v2747_v34, %v2748_v12 }
 0x538   :  { %v9808_v11 = vadd.f32 %v2214_v39, %v1412_v58 }
 0x539   :  { %v4732_v48 = vadd.f32 %v4731_v27, %v4730_v49  ;;  %v4220_v45 = vpop.f32.mrf.mxu2  ;;  %v2751_v19 = vmax.f32 %v2749_v10, %v2750_v26 }
 0x53a   :  { %v4402_v51 = vmul.f32 %v4220_v45, %v6522_v6  ;;  %v2752_v49 = vsel %vm2343_vm3, %v9808_v11, -inf }
 0x53b   :  { %v4733_v9 = vrot.slane %v4732_v48, 2  ;;  %v2753_v30 = vmax.f32 %v2751_v19, %v2752_v49 }
 0x53c   :  { %v4737_v33 = vsel %vm629_vm2, %v4402_v51, 0.0 }
 0x53d   :  { %v4734_v28 = vadd.f32 %v4733_v9, %v4732_v48  ;;  %v2754_v23 = vrot.slane %v2753_v30, 4 }
 0x53f   :  { %v4735_v42 = vrot.slane %v4734_v28, 1 }
 0x541   :  { %v4736_v50 = vadd.f32 %v4735_v42, %v4734_v28  ;;  %v4222_v53 = vpop.f32.mrf.mxu2  ;;  %v2755_v28 = vmax.f32 %v2753_v30, %v2754_v23 }
 0x542   :  { %v4403_v35 = vmul.f32 %v4222_v53, %v6541_v22 }
 0x543   :  { %v4879_v14 = vadd.f32 %v9422_v62, %v4736_v50  ;;  %v2756_v50 = vrot.slane %v2755_v28, 2 }
 0x544   :  { %v4738_v17 = vsel %vm629_vm2, %v4403_v35, 0.0 }
 0x545   :  { %v4739_v44 = vadd.f32 %v4738_v17, %v4737_v33  ;;  %v4965_v52 = vmul.f32 1.442695, %v4879_v14  ;;  %vm4911_vm4 = vcmp.gt.f32.partialorder %v4879_v14, 0.0  ;;  %v2757_v8 = vmax.f32 %v2755_v28, %v2756_v50 }
 0x546   :  { %5833 = vmatmul.msk.bf16.gmra.mxu2 %vm2343_vm3, %v10360_v20 }
 0x547   :  { %6376 = vpow2.f32 %v4965_v52  ;;  %v2758_v58 = vrot.slane %v2757_v8, 1 }
 0x549   :  { %v4225_v16 = vpop.f32.mrf.mxu2  ;;  %v2759_v34 = vmax.f32 %v2757_v8, %v2758_v58 }
 0x54a   :  { %v4404_v38 = vmul.f32 %v4225_v16, %v6567_v40 }
 0x54b   :  { %v2886_v30 = vsub.f32 %v9794_v46, %v2759_v34 }
 0x54c   :  { %v4740_v55 = vsel %vm629_vm2, %v4404_v38, 0.0 }
 0x54d   :  { %v4741_v13 = vadd.f32 %v4740_v55, %v4739_v44  ;;  %v6377_v59 = vpop.eup %6376  ;;  %v2884_v55 = vsub.f32 %v9792_v61, %v2759_v34  ;;  %v10363_v61 = vpack.c.bf16 %v9278_v0, %v9275_v1 }
 0x54e   :  { %v5864_v45 = vadd.f32 -1.0, %v6377_v59 }
 0x54f   :  { %v3136_v56 = vmul.f32 1.442695, %v2884_v55 }
 0x550   :  { %v5039_v42 = vsel %vm4911_vm4, %v4879_v14, %v5864_v45  ;;  %vm5622_vm4 = vcmask 58368  }
 0x551   :  { %v4227_v4 = vpop.f32.mrf.mxu2  ;;  %v5071_v51 = vpack.c.bf16 %v5039_v42, %v5039_v42 }
 0x552   :  { %v4405_v7 = vmul.f32 %v4227_v4, %v6672_v29 }
 0x553   :  { %v5139_v35 = vunpack.c.l.b16 %v5071_v51 }
 0x554   :  { %v4742_v27 = vsel %vm629_vm2, %v4405_v7, 0.0 }
 0x555   :  { %v4743_v48 = vadd.f32 %v4742_v27, %v4741_v13  ;;  %v5194_v33 = vrot.slane %v5139_v35, 2  ;;  %v2885_v13 = vsub.f32 %v9787_v32, %v2759_v34  ;;  %v2887_v32 = vsub.f32 %v9808_v11, %v2759_v34 }
 0x556   :  { %5834 = vmatmul.msk.bf16.gmra.mxu2 %vm2343_vm3, %v10361_v60  ;;  %v3140_v27 = vmul.f32 1.442695, %v2886_v30 }
 0x557   :  { %v4744_v9 = vrot.slane %v4743_v48, 4  ;;  %v5195_v44 = vsel %vm5165_vm10, %v5194_v33, %v5193_v43  ;;  %v3138_v49 = vmul.f32 1.442695, %v2885_v13  ;;  %v3142_v28 = vmul.f32 1.442695, %v2887_v32 }
 0x559   :  { %v4745_v47 = vadd.f32 %v4744_v9, %v4743_v48  ;;  %v4230_v37 = vpop.f32.mrf.mxu2 }
 0x55a   :  { %v4406_v25 = vmul.f32 %v4230_v37, %v6522_v6 }
 0x55b   :  { %v4746_v24 = vrot.slane %v4745_v47, 2 }
 0x55c   :  { %v4750_v14 = vsel %vm629_vm2, %v4406_v25, 0.0 }
 0x55d   :  { %v4747_v53 = vadd.f32 %v4746_v24, %v4745_v47 }
 0x55f   :  { %v4748_v18 = vrot.slane %v4747_v53, 1 }
 0x561   :  { %v4232_v17 = vpop.f32.mrf.mxu2  ;;  %v4749_v39 = vadd.f32 %v4748_v18, %v4747_v53 }
 0x562   :  { %v4407_v20 = vmul.f32 %v4232_v17, %v6541_v22 }
 0x563   :  { %v4880_v16 = vadd.f32 %v9422_v62, %v4749_v39 }
 0x564   :  { %v4751_v12 = vsel %vm629_vm2, %v4407_v20, 0.0  ;;  %v10364_v20 = vld [vmem:[#allocation17_spill] sm:$0xff] }
 0x565   :  { %v4752_v52 = vadd.f32 %v4751_v12, %v4750_v14  ;;  %v4967_v38 = vmul.f32 1.442695, %v4880_v16  ;;  %vm4912_vm12 = vcmp.gt.f32.partialorder %v4880_v16, 0.0 }
 0x566   :  { %5835 = vmatmul.msk.bf16.gmra.mxu2 %vm2343_vm3, %v10362_v63 }
 0x567   :  { %6378 = vpow2.f32 %v4967_v38 }
 0x568   :  { %6380 = vpow2.f32 %v3136_v56 }
 0x569   :  { %v4235_v43 = vpop.f32.mrf.mxu2  ;;  %6382 = vpow2.f32 %v3138_v49 }
 0x56a   :  { %v4408_v26 = vmul.f32 %v4235_v43, %v6567_v40  ;;  %6384 = vpow2.f32 %v3140_v27 }
 0x56b   :  { %6386 = vpow2.f32 %v3142_v28 }
 0x56c   :  { %v4753_v10 = vsel %vm629_vm2, %v4408_v26, 0.0 }
 0x56d   :  { %v4754_v19 = vadd.f32 %v4753_v10, %v4752_v52  ;;  %v6379_v7 = vpop.eup %6378  ;;  %v9873_v52 = vpop.permute.xlu2 %5226 }
 0x56e   :  { %v5865_v23 = vadd.f32 -1.0, %v6379_v7  ;;  %v9845_v60 = vpop.eup %6380 }
 0x56f   :  { %v9847_v9 = vpop.eup %6382  ;;  %v3547_v1 = vsel %vm2343_vm3, %v9845_v60, 0.0 }
 0x570   :  { %v5040_v45 = vsel %vm4912_vm12, %v4880_v16, %v5865_v23  ;;  %v3548_v0 = vsel %vm2343_vm3, %v9847_v9, 0.0  ;;  %v9857_v51 = vpop.eup %6384 }
 0x571   :  { %v4237_v41 = vpop.f32.mrf.mxu2  ;;  %v5072_v46 = vpack.c.bf16 %v5040_v45, %v5040_v45  ;;  %v3549_v50 = vadd.f32 %v3548_v0, %v3547_v1  ;;  %v3550_v33 = vsel %vm2343_vm3, %v9857_v51, 0.0  ;;  %v9864_v8 = vpop.eup %6386 }
 0x572   :  { %v4409_v57 = vmul.f32 %v4237_v41, %v6672_v29  ;;  %v3552_v39 = vsel %vm2343_vm3, %v9864_v8, 0.0 }
 0x573   :  { %v5140_v47 = vunpack.c.l.b16 %v5072_v46  ;;  %v3551_v17 = vadd.f32 %v3550_v33, %v3549_v50 }
 0x574   :  { %v4755_v4 = vsel %vm629_vm2, %v4409_v57, 0.0 }
 0x575   :  { %v4756_v59 = vadd.f32 %v4755_v4, %v4754_v19  ;;  %v5196_v11 = vrot.slane %v5140_v47, 1  ;;  %v3553_v12 = vadd.f32 %v3552_v39, %v3551_v17 }
 0x576   :  { %5836 = vmatmul.msk.bf16.gmra.mxu2 %vm2343_vm3, %v10363_v61 }
 0x577   :  { %v9855_v24 = vsel %vm5168_vm11, %v5196_v11, %v5195_v44  ;;  %v10365_v44 = vpack.c.bf16 %v9290_v5, %v10364_v20  ;;  %v4757_v63 = vrot.slane %v4756_v59, 4  ;;  %v3554_v5 = vrot.slane %v3553_v12, 4 }
 0x579   :  { %v4240_v48 = vpop.f32.mrf.mxu2  ;;  %v4758_v38 = vadd.f32 %v4757_v63, %v4756_v59  ;;  %v3555_v19 = vadd.f32 %v3554_v5, %v3553_v12 }
 0x57a   :  { %v4410_v37 = vmul.f32 %v4240_v48, %v6522_v6 }
 0x57b   :  { %v4759_v56 = vrot.slane %v4758_v38, 2  ;;  %v3556_v57 = vrot.slane %v3555_v19, 2 }
 0x57c   :  { %v4763_v35 = vsel %vm629_vm2, %v4410_v37, 0.0 }
 0x57d   :  { %v4760_v30 = vadd.f32 %v4759_v56, %v4758_v38  ;;  %v3557_v61 = vadd.f32 %v3556_v57, %v3555_v19 }
 0x57f   :  { %v4761_v32 = vrot.slane %v4760_v30, 1  ;;  %v3558_v48 = vrot.slane %v3557_v61, 1 }
 0x581   :  { %v4242_v42 = vpop.f32.mrf.mxu2  ;;  %v4762_v45 = vadd.f32 %v4761_v32, %v4760_v30  ;;  %v3559_v0 = vadd.f32 %v3558_v48, %v3557_v61 }
 0x582   :  { %v4411_v53 = vmul.f32 %v4242_v42, %v6541_v22 }
 0x583   :  { %v4881_v31 = vadd.f32 %v9422_v62, %v4762_v45  ;;  %6388 = vrcp.f32 %v3559_v0 }
 0x584   :  { %v4764_v18 = vsel %vm629_vm2, %v4411_v53, 0.0 }
 0x585   :  { %v4765_v25 = vadd.f32 %v4764_v18, %v4763_v35  ;;  %v4969_v53 = vmul.f32 1.442695, %v4881_v31  ;;  %vm4913_vm14 = vcmp.gt.f32.partialorder %v4881_v31, 0.0 }
 0x586   :  { %5837 = vmatmul.msk.bf16.gmra.mxu2 %vm2343_vm3, %v10365_v44 }
 0x589   :  { %v4245_v14 = vpop.f32.mrf.mxu2  ;;  %v6389_v33 = vpop.eup %6388 }
 0x58a   :  { %v4412_v58 = vmul.f32 %v4245_v14, %v6567_v40  ;;  %v3716_v39 = vmul.f32 %v6389_v33, %v9845_v60  ;;  %v3717_v14 = vmul.f32 %v6389_v33, %v9847_v9  ;;  %v3718_v30 = vmul.f32 %v6389_v33, %v9857_v51 }
 0x58c   :  { %v4766_v16 = vsel %vm629_vm2, %v4412_v58, 0.0  ;;  %v5244_v34 = vpop.f32.mrf.mxu3 }
 0x58d   :  { %v4767_v43 = vadd.f32 %v4766_v16, %v4765_v25  ;;  %v9877_v26 = vadd.f32 %v5244_v34, %v9873_v52  ;;  %v3782_v16 = vpack.c.bf16 %v3717_v14, %v3716_v39 }
 0x58f   :  { %v5254_v10 = vperm.slane %v9877_v26, 0 }
 0x591   :  { %v4247_v55 = vpop.f32.mrf.mxu2  ;;  %5258 = vrot.lane.b32.xlu1 %v5254_v10, %s6461_s16 }
 0x592   :  { %v4413_v13 = vmul.f32 %v4247_v55, %v6672_v29 }
 0x594   :  { %v4768_v41 = vsel %vm629_vm2, %v4413_v13, 0.0 }
 0x595   :  { %v4769_v49 = vadd.f32 %v4768_v41, %v4767_v43 }
 0x596   :  { %5838 = vmatmul.msk.bf16.gmra.mxu2 %vm2343_vm3, %v3780_v15 }
 0x597   :  { %v4770_v4 = vrot.slane %v4769_v49, 4 }
 0x599   :  { %v4771_v7 = vadd.f32 %v4770_v4, %v4769_v49  ;;  %v4250_v59 = vpop.f32.mrf.mxu2  ;;  %v3719_v4 = vmul.f32 %v6389_v33, %v9864_v8 }
 0x59a   :  { %v4414_v28 = vmul.f32 %v4250_v59, %v6522_v6 }
 0x59b   :  { %v4772_v27 = vrot.slane %v4771_v7, 2  ;;  %v3783_v45 = vpack.c.bf16 %v3719_v4, %v3718_v30 }
 0x59c   :  { %v4776_v11 = vsel %vm629_vm2, %v4414_v28, 0.0 }
 0x59d   :  { %v4773_v23 = vadd.f32 %v4772_v27, %v4771_v7 }
 0x59f   :  { %v4774_v46 = vrot.slane %v4773_v23, 1 }
 0x5a1   :  { %v4775_v47 = vadd.f32 %v4774_v46, %v4773_v23  ;;  %v4252_v1 = vpop.f32.mrf.mxu2 }
 0x5a2   :  { %v4415_v3 = vmul.f32 %v4252_v1, %v6541_v22 }
 0x5a3   :  { %v4882_v15 = vadd.f32 %v9422_v62, %v4775_v47 }
 0x5a4   :  { %v4777_v37 = vsel %vm629_vm2, %v4415_v3, 0.0 }
 0x5a5   :  { %v4971_v42 = vmul.f32 1.442695, %v4882_v15  ;;  %v4778_v50 = vadd.f32 %v4777_v37, %v4776_v11  ;;  %vm4914_vm13 = vcmp.gt.f32.partialorder %v4882_v15, 0.0 }
 0x5a6   :  { %5839 = vmatmul.msk.bf16.gmra.mxu2 %vm2343_vm3, %v3781_v36 }
 0x5a7   :  { %6390 = vpow2.f32 %v4971_v42 }
 0x5a8   :  { %6392 = vpow2.f32 %v4969_v53 }
 0x5a9   :  { %v4255_v35 = vpop.f32.mrf.mxu2 }
 0x5aa   :  { %v4416_v18 = vmul.f32 %v4255_v35, %v6567_v40 }
 0x5ac   :  { %v4779_v25 = vsel %vm629_vm2, %v4416_v18, 0.0 }
 0x5ad   :  { %v6391_v17 = vpop.eup %6390  ;;  %v4780_v20 = vadd.f32 %v4779_v25, %v4778_v50 }
 0x5ae   :  { %v5867_v44 = vadd.f32 -1.0, %v6391_v17  ;;  %v6393_v12 = vpop.eup %6392 }
 0x5af   :  { %v5866_v58 = vadd.f32 -1.0, %v6393_v12 }
 0x5b0   :  { %v5042_v21 = vsel %vm4914_vm13, %v4882_v15, %v5867_v44 }
 0x5b1   :  { %v4257_v2 = vpop.f32.mrf.mxu2  ;;  %v5074_v34 = vpack.c.bf16 %v5042_v21, %v5042_v21  ;;  %v5041_v38 = vsel %vm4913_vm14, %v4881_v31, %v5866_v58 }
 0x5b2   :  { %v4417_v36 = vmul.f32 %v4257_v2, %v6672_v29  ;;  %v5073_v55 = vpack.c.bf16 %v5041_v38, %v5041_v38 }
 0x5b3   :  { %v5142_v60 = vunpack.c.l.b16 %v5074_v34 }
 0x5b4   :  { %v4781_v63 = vsel %vm629_vm2, %v4417_v36, 0.0  ;;  %v5141_v41 = vunpack.c.l.b16 %v5073_v55  ;;  %v9925_v55 = vpop.permute.xlu1 %5336 }
 0x5b5   :  { %v4782_v43 = vadd.f32 %v4781_v63, %v4780_v20  ;;  %v5198_v13 = vrot.slane %v5142_v60, 7 }
 0x5b6   :  { %5840 = vmatmul.msk.bf16.gmra.mxu2 %vm2343_vm3, %v3782_v16 }
 0x5b7   :  { %v4783_v5 = vrot.slane %v4782_v43, 4  ;;  %v5199_v61 = vsel %vm5150_vm8, %v5198_v13, %v5141_v41 }
 0x5b9   :  { %v4784_v10 = vadd.f32 %v4783_v5, %v4782_v43  ;;  %v4260_v9 = vpop.f32.mrf.mxu2 }
 0x5ba   :  { %v4418_v57 = vmul.f32 %v4260_v9, %v6522_v6 }
 0x5bb   :  { %v4785_v19 = vrot.slane %v4784_v10, 2 }
 0x5bc   :  { %v4789_v23 = vsel %vm629_vm2, %v4418_v57, 0.0 }
 0x5bd   :  { %v4786_v56 = vadd.f32 %v4785_v19, %v4784_v10 }
 0x5bf   :  { %v4787_v49 = vrot.slane %v4786_v56, 1 }
 0x5c1   :  { %v4788_v7 = vadd.f32 %v4787_v49, %v4786_v56  ;;  %v4262_v59 = vpop.f32.mrf.mxu2 }
 0x5c2   :  { %v4419_v32 = vmul.f32 %v4262_v59, %v6541_v22 }
 0x5c3   :  { %v4883_v27 = vadd.f32 %v9422_v62, %v4788_v7 }
 0x5c4   :  { %v4790_v48 = vsel %vm629_vm2, %v4419_v32, 0.0 }
 0x5c5   :  { %v4973_v46 = vmul.f32 1.442695, %v4883_v27  ;;  %v4791_v28 = vadd.f32 %v4790_v48, %v4789_v23  ;;  %vm4915_vm15 = vcmp.gt.f32.partialorder %v4883_v27, 0.0  ;;  %v5246_v48 = vpop.f32.mrf.mxu3 }
 0x5c6   :  { %5841 = vmatmul.msk.bf16.gmra.mxu2 %vm2343_vm3, %v3783_v45 }
 0x5c7   :  { %6394 = vpow2.f32 %v4973_v46 }
 0x5c9   :  { %v4265_v51 = vpop.f32.mrf.mxu2 }
 0x5ca   :  { %v4420_v8 = vmul.f32 %v4265_v51, %v6567_v40 }
 0x5cc   :  { %v4792_v47 = vsel %vm629_vm2, %v4420_v8, 0.0 }
 0x5cd   :  { %v6395_v1 = vpop.eup %6394  ;;  %v4793_v0 = vadd.f32 %v4792_v47, %v4791_v28  ;;  %v9934_v47 = vadd.f32 %v5246_v48, %v9873_v52 }
 0x5ce   :  { %v5868_v3 = vadd.f32 -1.0, %v6395_v1 }
 0x5d0   :  { %v5043_v15 = vsel %vm4915_vm15, %v4883_v27, %v5868_v3 }
 0x5d1   :  { %v4267_v31 = vpop.f32.mrf.mxu2  ;;  %v5075_v42 = vpack.c.bf16 %v5043_v15, %v5043_v15 }
 0x5d2   :  { %v4421_v11 = vmul.f32 %v4267_v31, %v6672_v29 }
 0x5d3   :  { %v5143_v35 = vunpack.c.l.b16 %v5075_v42 }
 0x5d4   :  { %v4794_v37 = vsel %vm629_vm2, %v4421_v11, 0.0 }
 0x5d5   :  { %v4795_v50 = vadd.f32 %v4794_v37, %v4793_v0  ;;  %v5200_v17 = vrot.slane %v5143_v35, 6 }
 0x5d7   :  { %v4796_v53 = vrot.slane %v4795_v50, 4  ;;  %v5201_v2 = vsel %vm5153_vm9, %v5200_v17, %v5199_v61  ;;  %v9929_v61 = vpop.permute.xlu1 %5361 }
 0x5d9   :  { %v4797_v18 = vadd.f32 %v4796_v53, %v4795_v50  ;;  %v4270_v33 = vpop.f32.mrf.mxu2 }
 0x5da   :  { %v4422_v39 = vmul.f32 %v4270_v33, %v6522_v6 }
 0x5db   :  { %v4798_v25 = vrot.slane %v4797_v18, 2 }
 0x5dc   :  { %v4802_v58 = vsel %vm629_vm2, %v4422_v39, 0.0 }
 0x5dd   :  { %v4799_v20 = vadd.f32 %v4798_v25, %v4797_v18  ;;  %v9946_v18 = vpop.permute.xlu0 %5288 }
 0x5df   :  { %v4800_v44 = vrot.slane %v4799_v20, 1 }
 0x5e1   :  { %v4801_v14 = vadd.f32 %v4800_v44, %v4799_v20  ;;  %v4272_v12 = vpop.f32.mrf.mxu2 }
 0x5e2   :  { %v4423_v21 = vmul.f32 %v4272_v12, %v6541_v22 }
 0x5e3   :  { %v4884_v36 = vadd.f32 %v9422_v62, %v4801_v14 }
 0x5e4   :  { %v4803_v63 = vsel %vm629_vm2, %v4423_v21, 0.0 }
 0x5e5   :  { %v4975_v16 = vmul.f32 1.442695, %v4884_v36  ;;  %v4804_v34 = vadd.f32 %v4803_v63, %v4802_v58  ;;  %vm4916_vm3 = vcmp.gt.f32.partialorder %v4884_v36, 0.0 }
 0x5e7   :  { %6396 = vpow2.f32 %v4975_v16 }
 0x5e9   :  { %v4275_v43 = vpop.f32.mrf.mxu2 }
 0x5ea   :  { %v4424_v5 = vmul.f32 %v4275_v43, %v6567_v40 }
 0x5ec   :  { %v4805_v38 = vsel %vm629_vm2, %v4424_v5, 0.0 }
 0x5ed   :  { %v6397_v60 = vpop.eup %6396  ;;  %v4806_v10 = vadd.f32 %v4805_v38, %v4804_v34 }
 0x5ee   :  { %v5869_v9 = vadd.f32 -1.0, %v6397_v60 }
 0x5f0   :  { %v5044_v13 = vsel %vm4916_vm3, %v4884_v36, %v5869_v9 }
 0x5f1   :  { %v4277_v19 = vpop.f32.mrf.mxu2  ;;  %v5076_v49 = vpack.c.bf16 %v5044_v13, %v5044_v13 }
 0x5f2   :  { %v4425_v56 = vmul.f32 %v4277_v19, %v6672_v29 }
 0x5f3   :  { %v5144_v4 = vunpack.c.l.b16 %v5076_v49 }
 0x5f4   :  { %v4807_v41 = vsel %vm629_vm2, %v4425_v56, 0.0 }
 0x5f5   :  { %v4808_v57 = vadd.f32 %v4807_v41, %v4806_v10  ;;  %v5202_v27 = vrot.slane %v5144_v4, 5 }
 0x5f7   :  { %v4809_v30 = vrot.slane %v4808_v57, 4  ;;  %v5203_v8 = vsel %vm5156_vm5, %v5202_v27, %v5201_v2 }
 0x5f9   :  { %v4810_v7 = vadd.f32 %v4809_v30, %v4808_v57  ;;  %v4280_v59 = vpop.f32.mrf.mxu2 }
 0x5fa   :  { %v4426_v46 = vmul.f32 %v4280_v59, %v6522_v6 }
 0x5fb   :  { %v4811_v32 = vrot.slane %v4810_v7, 2 }
 0x5fc   :  { %v4815_v31 = vsel %vm629_vm2, %v4426_v46, 0.0 }
 0x5fd   :  { %v4812_v23 = vadd.f32 %v4811_v32, %v4810_v7 }
 0x5ff   :  { %v4813_v45 = vrot.slane %v4812_v23, 1 }
 0x601   :  { %v4814_v28 = vadd.f32 %v4813_v45, %v4812_v23  ;;  %v4282_v51 = vpop.f32.mrf.mxu2 }
 0x602   :  { %v4427_v1 = vmul.f32 %v4282_v51, %v6541_v22 }
 0x603   :  { %v4885_v0 = vadd.f32 %v9422_v62, %v4814_v28  ;;  %v9938_v3 = vpop.permute.xlu1 %5258 }
 0x604   :  { %v4816_v15 = vsel %vm629_vm2, %v4427_v1, 0.0  ;;  %v5264_v11 = vadd.f32 %v9938_v3, %v9877_v26  ;;  %v5265_v37 = vadd.f32 %v9938_v3, %v9934_v47 }
 0x605   :  { %v4977_v42 = vmul.f32 1.442695, %v4885_v0  ;;  %v4817_v50 = vadd.f32 %v4816_v15, %v4815_v31  ;;  %vm4917_vm9 = vcmp.gt.f32.partialorder %v4885_v0, 0.0 }
 0x606   :  { %v5273_v53 = vmul.f32 0.2, %v5265_v37  ;;  %v5272_v35 = vmul.f32 0.2, %v5264_v11 }
 0x607   :  { %6398 = vpow2.f32 %v4977_v42 }
 0x608   :  { %v5281_v33 = vmax.f32 %v5265_v37, %v5273_v53  ;;  %v5280_v25 = vmax.f32 %v5264_v11, %v5272_v35 }
 0x609   :  { %v4285_v17 = vpop.f32.mrf.mxu2 }
 0x60a   :  { %v4428_v20 = vmul.f32 %v4285_v17, %v6567_v40  ;;  %v5292_v44 = vmul.f32 %v9946_v18, %v5281_v33  ;;  %v5291_v39 = vmul.f32 %v9946_v18, %v5280_v25 }
 0x60c   :  { %v4818_v14 = vsel %vm629_vm2, %v4428_v20, 0.0  ;;  %v5302_v12 = vsel %vm51_vm1, %v5292_v44, 0.0  ;;  %v5299_v2 = vsel %vm51_vm1, %v5291_v39, 0.0 }
 0x60d   :  { %v6399_v21 = vpop.eup %6398  ;;  %v4819_v36 = vadd.f32 %v4818_v14, %v4817_v50  ;;  %5303 = vadd.xlane.f32.xlu2 %v5302_v12  ;;  %5300 = vadd.xlane.f32.xlu1 %v5299_v2 }
 0x60e   :  { %v5870_v58 = vadd.f32 -1.0, %v6399_v21 }
 0x610   :  { %v5045_v16 = vsel %vm4917_vm9, %v4885_v0, %v5870_v58 }
 0x611   :  { %v4287_v63 = vpop.f32.mrf.mxu2  ;;  %v5077_v5 = vpack.c.bf16 %v5045_v16, %v5045_v16 }
 0x612   :  { %v4429_v34 = vmul.f32 %v4287_v63, %v6672_v29 }
 0x613   :  { %v5145_v10 = vunpack.c.l.b16 %v5077_v5 }
 0x614   :  { %v4820_v43 = vsel %vm629_vm2, %v4429_v34, 0.0 }
 0x615   :  { %v4821_v38 = vadd.f32 %v4820_v43, %v4819_v36  ;;  %v5204_v56 = vrot.slane %v5145_v10, 4 }
 0x617   :  { %v4822_v60 = vrot.slane %v4821_v38, 4  ;;  %v5205_v4 = vsel %vm5159_vm6, %v5204_v56, %v5203_v8 }
 0x619   :  { %v4823_v9 = vadd.f32 %v4822_v60, %v4821_v38  ;;  %v4290_v19 = vpop.f32.mrf.mxu2 }
 0x61a   :  { %v4430_v48 = vmul.f32 %v4290_v19, %v6522_v6 }
 0x61b   :  { %v4824_v13 = vrot.slane %v4823_v9, 2 }
 0x61c   :  { %v4828_v51 = vsel %vm629_vm2, %v4430_v48, 0.0 }
 0x61d   :  { %v4825_v41 = vadd.f32 %v4824_v13, %v4823_v9 }
 0x61f   :  { %v4826_v49 = vrot.slane %v4825_v41, 1 }
 0x621   :  { %v4827_v57 = vadd.f32 %v4826_v49, %v4825_v41  ;;  %v4292_v30 = vpop.f32.mrf.mxu2 }
 0x622   :  { %v4431_v27 = vmul.f32 %v4292_v30, %v6541_v22 }
 0x623   :  { %v4886_v7 = vadd.f32 %v9422_v62, %v4827_v57 }
 0x624   :  { %v4829_v28 = vsel %vm629_vm2, %v4431_v27, 0.0 }
 0x625   :  { %v4979_v59 = vmul.f32 1.442695, %v4886_v7  ;;  %vm4918_vm5 = vcmp.gt.f32.partialorder %v4886_v7, 0.0  ;;  %v4830_v31 = vadd.f32 %v4829_v28, %v4828_v51 }
 0x627   :  { %6400 = vpow2.f32 %v4979_v59 }
 0x629   :  { %v4295_v32 = vpop.f32.mrf.mxu2 }
 0x62a   :  { %v4432_v45 = vmul.f32 %v4295_v32, %v6567_v40 }
 0x62c   :  { %v4831_v8 = vsel %vm629_vm2, %v4432_v45, 0.0 }
 0x62d   :  { %v6401_v23 = vpop.eup %6400  ;;  %v4832_v11 = vadd.f32 %v4831_v8, %v4830_v31 }
 0x62e   :  { %v5871_v46 = vadd.f32 -1.0, %v6401_v23 }
 0x630   :  { %v5046_v0 = vsel %vm4918_vm5, %v4886_v7, %v5871_v46 }
 0x631   :  { %v4297_v1 = vpop.f32.mrf.mxu2  ;;  %v5078_v42 = vpack.c.bf16 %v5046_v0, %v5046_v0  ;;  %v9977_v0 = vpop.permute.xlu2 %5355 }
 0x632   :  { %v4433_v15 = vmul.f32 %v4297_v1, %v6672_v29 }
 0x633   :  { %v5146_v53 = vunpack.c.l.b16 %v5078_v42 }
 0x634   :  { %v4833_v37 = vsel %vm629_vm2, %v4433_v15, 0.0 }
 0x635   :  { %v4834_v50 = vadd.f32 %v4833_v37, %v4832_v11  ;;  %v5206_v25 = vrot.slane %v5146_v53, 3  ;;  %v5331_v11 = vpop.permute.xlu0 %5330 }
 0x637   :  { %v4835_v33 = vrot.slane %v4834_v50, 4  ;;  %v5207_v44 = vsel %vm5162_vm7, %v5206_v25, %v5205_v4  ;;  %v6462_v4 = vmov 0  }
 0x638   :  { %6018 = vset.pattern.permute.xlu1 %v6462_v4  ;;  %6019 = vset.pattern.permute.xlu0 %v6462_v4 }
 0x639   :  { %v4300_v35 = vpop.f32.mrf.mxu2  ;;  %v4836_v17 = vadd.f32 %v4835_v33, %v4834_v50 }
 0x63a   :  { %v4434_v36 = vmul.f32 %v4300_v35, %v6522_v6 }
 0x63b   :  { %v4837_v39 = vrot.slane %v4836_v17, 2 }
 0x63c   :  { %v4841_v34 = vsel %vm629_vm2, %v4434_v36, 0.0 }
 0x63d   :  { %v4838_v14 = vadd.f32 %v4837_v39, %v4836_v17 }
 0x63f   :  { %v4839_v2 = vrot.slane %v4838_v14, 1 }
 0x641   :  { %v4302_v20 = vpop.f32.mrf.mxu2  ;;  %v4840_v63 = vadd.f32 %v4839_v2, %v4838_v14  ;;  %v5549_v2 = vpack.c.bf16 %v9934_v47, %v9877_v26 }
 0x642   :  { %v4435_v21 = vmul.f32 %v4302_v20, %v6541_v22 }
 0x643   :  { %v4887_v60 = vadd.f32 %v9422_v62, %v4840_v63 }
 0x644   :  { %v4842_v16 = vsel %vm629_vm2, %v4435_v21, 0.0 }
 0x645   :  { %v4843_v5 = vadd.f32 %v4842_v16, %v4841_v34  ;;  %v4981_v6 = vmul.f32 1.442695, %v4887_v60  ;;  %vm4919_vm6 = vcmp.gt.f32.partialorder %v4887_v60, 0.0 }
 0x647   :  { %6402 = vpow2.f32 %v4981_v6 }
 0x649   :  { %v4305_v12 = vpop.f32.mrf.mxu2 }
 0x64a   :  { %v4436_v58 = vmul.f32 %v4305_v12, %v6567_v40 }
 0x64c   :  { %v4844_v43 = vsel %vm629_vm2, %v4436_v58, 0.0 }
 0x64d   :  { %v4845_v9 = vadd.f32 %v4844_v43, %v4843_v5  ;;  %v6403_v57 = vpop.eup %6402 }
 0x64e   :  { %v5872_v7 = vadd.f32 -1.0, %v6403_v57 }
 0x650   :  { %v5047_v32 = vsel %vm4919_vm6, %v4887_v60, %v5872_v7 }
 0x651   :  { %v4307_v38 = vpop.f32.mrf.mxu2  ;;  %v5079_v27 = vpack.c.bf16 %v5047_v32, %v5047_v32 }
 0x652   :  { %v4437_v10 = vmul.f32 %v4307_v38, %v6672_v29 }
 0x653   :  { %v5147_v45 = vunpack.c.l.b16 %v5079_v27 }
 0x654   :  { %v4846_v22 = vsel %vm629_vm2, %v4437_v10, 0.0 }
 0x655   :  { %v4847_v19 = vadd.f32 %v4846_v22, %v4845_v9  ;;  %v5208_v51 = vrot.slane %v5147_v45, 2 }
 0x657   :  { %v4848_v13 = vrot.slane %v4847_v19, 4  ;;  %v5209_v31 = vsel %vm5165_vm10, %v5208_v51, %v5207_v44  ;;  %vm5432_vm10 = vcmask 195712  }
 0x659   :  { %v4849_v40 = vadd.f32 %v4848_v13, %v4847_v19 }
 0x65b   :  { %v4850_v56 = vrot.slane %v4849_v40, 2 }
 0x65d   :  { %v4851_v41 = vadd.f32 %v4850_v56, %v4849_v40 }
 0x65f   :  { %v4852_v49 = vrot.slane %v4851_v41, 1 }
 0x661   :  { %v4853_v30 = vadd.f32 %v4852_v49, %v4851_v41 }
 0x663   :  { %v4888_v59 = vadd.f32 %v9422_v62, %v4853_v30 }
 0x665   :  { %v4983_v29 = vmul.f32 1.442695, %v4888_v59  ;;  %vm4920_vm7 = vcmp.gt.f32.partialorder %v4888_v59, 0.0 }
 0x667   :  { %6404 = vpow2.f32 %v4983_v29 }
 0x66d   :  { %v6405_v23 = vpop.eup %6404 }
 0x66e   :  { %v5873_v48 = vadd.f32 -1.0, %v6405_v23 }
 0x670   :  { %v5048_v46 = vsel %vm4920_vm7, %v4888_v59, %v5873_v48 }
 0x671   :  { %v5080_v28 = vpack.c.bf16 %v5048_v46, %v5048_v46 }
 0x673   :  { %v5148_v8 = vunpack.c.l.b16 %v5080_v28 }
 0x675   :  { %v5210_v1 = vrot.slane %v5148_v8, 1 }
 0x677   :  { %v5211_v62 = vsel %vm5168_vm11, %v5210_v1, %v5209_v31  ;;  %vm5436_vm11 = vcmask 261312  }
 0x678   :  { %v5213_v15 = vpack.c.b16 %v5211_v62, %v9855_v24 }
 0x67a   :  { %5883 = vmatmul.msk.bf16.gmra.mxu3 %vm629_vm2, %v5213_v15 }
 0x680   :  { %v5304_v37 = vpop.xlane.xlu2 %5303  ;;  %v5301_v42 = vpop.xlane.xlu1 %5300 }
 0x681   :  { %v9984_v50 = vadd.f32 %v9925_v55, %v5304_v37  ;;  %v9986_v53 = vadd.f32 %v5331_v11, %v5301_v42  ;;  %v10366_v11 = vlaneseq }
 0x683   :  { %5403 = vperm.xlu0 %6019, %v9984_v50   ;;  %5400 = vperm.xlu1 %6018, %v9986_v53   ;;  %v10024_v37 = vand.u32 127, %v10366_v11 }
 0x6f5   :  { %v5401_v30 = vpop.permute.xlu1 %5400 }
 0x6fd   :  { %v5249_v35 = vpop.f32.mrf.mxu3 }
 0x6fe   :  { %v5250_v33 = vadd.f32 %v5249_v35, %v9873_v52  ;;  %v10030_v35 = vadd.s32 4294967280, %v10024_v37 }
 0x700   :  { %v5255_v25 = vperm.slane %v5250_v33, 0  ;;  %v5266_v24 = vadd.f32 %v9938_v3, %v5250_v33 }
 0x702   :  { %5260 = vrot.lane.b32.xlu2 %v5255_v25, %s6461_s16  ;;  %v5274_v17 = vmul.f32 0.2, %v5266_v24 }
 0x704   :  { %v5282_v20 = vmax.f32 %v5266_v24, %v5274_v17  ;;  %v5425_v24 = vperm.slane %v5401_v30, %v10024_v37 }
 0x705   :  { %v5251_v44 = vpop.f32.mrf.mxu3 }
 0x706   :  { %v5252_v55 = vadd.f32 %v5251_v44, %v9873_v52  ;;  %v5293_v39 = vmul.f32 %v9946_v18, %v5282_v20 }
 0x708   :  { %v5550_v14 = vpack.c.bf16 %v5252_v55, %v5250_v33  ;;  %v5305_v12 = vsel %vm51_vm1, %v5293_v39, 0.0  ;;  %v5267_v21 = vadd.f32 %v9938_v3, %v5252_v55 }
 0x709   :  { %5306 = vadd.xlane.f32.xlu1 %v5305_v12 }
 0x70a   :  { %5615 = vmatpush.bf16.msra.mxu0 %v5550_v14  ;;  %5373 = vperm.xlu2 %6017, %v10279_v54   ;;  %v5275_v36 = vmul.f32 0.2, %v5267_v21 }
 0x70c   :  { %v5283_v58 = vmax.f32 %v5267_v21, %v5275_v36 }
 0x70e   :  { %5616 = vmatpush.bf16.msra.mxu0 %v5549_v2  ;;  %v5294_v52 = vmul.f32 %v9946_v18, %v5283_v58 }
 0x710   :  { %v5308_v63 = vsel %vm51_vm1, %v5294_v52, 0.0 }
 0x712   :  { %6020 = vset.pattern.permute.xlu2 %v6462_v4  ;;  %v5343_v4 = vpop.permute.xlu0 %5342 }
 0x71a   :  { %v5368_v29 = vpop.permute.xlu0 %5367 }
 0x722   :  { %v5349_v32 = vpop.permute.xlu0 %5348 }
 0x72a   :  { %v5404_v23 = vpop.permute.xlu0 %5403 }
 0x733   :  { %5309 = vadd.xlane.f32.xlu2 %v5308_v63 }
 0x75c   :  { %v5261_v16 = vpop.permute.xlu2 %5260 }
 0x75d   :  { %v5268_v34 = vadd.f32 %v5261_v16, %v9877_v26  ;;  %v5269_v43 = vadd.f32 %v5261_v16, %v9934_v47  ;;  %v5270_v54 = vadd.f32 %v5261_v16, %v5250_v33  ;;  %v5271_v5 = vadd.f32 %v5261_v16, %v5252_v55 }
 0x75e   :  { %v10033_v33 = vadd.s32 4294967272, %v10024_v37 }
 0x75f   :  { %v5277_v38 = vmul.f32 0.2, %v5269_v43  ;;  %v5276_v60 = vmul.f32 0.2, %v5268_v34  ;;  %v5279_v10 = vmul.f32 0.2, %v5271_v5 }
 0x760   :  { %v5278_v19 = vmul.f32 0.2, %v5270_v54 }
 0x761   :  { %v5285_v9 = vmax.f32 %v5269_v43, %v5277_v38  ;;  %v5284_v22 = vmax.f32 %v5268_v34, %v5276_v60  ;;  %v5287_v3 = vmax.f32 %v5271_v5, %v5279_v10 }
 0x762   :  { %v5286_v41 = vmax.f32 %v5270_v54, %v5278_v19 }
 0x763   :  { %v5296_v6 = vmul.f32 %v9946_v18, %v5285_v9  ;;  %v5295_v13 = vmul.f32 %v9946_v18, %v5284_v22  ;;  %v5298_v40 = vmul.f32 %v9946_v18, %v5287_v3 }
 0x764   :  { %v5297_v49 = vmul.f32 %v9946_v18, %v5286_v41  ;;  %v5374_v27 = vpop.permute.xlu2 %5373 }
 0x765   :  { %v5314_v56 = vsel %vm51_vm1, %v5296_v6, 0.0  ;;  %v5311_v26 = vsel %vm51_vm1, %v5295_v13, 0.0  ;;  %v5320_v47 = vsel %vm51_vm1, %v5298_v40, 0.0 }
 0x766   :  { %5315 = vadd.xlane.f32.xlu2 %v5314_v56  ;;  %5312 = vadd.xlane.f32.xlu0 %v5311_v26  ;;  %v5317_v57 = vsel %vm51_vm1, %v5297_v49, 0.0  ;;  %vm5428_vm1 = vcmask 130112  }
 0x767   :  { %5321 = vadd.xlane.f32.xlu1 %v5320_v47 }
 0x76e   :  { %5318 = vadd.xlane.f32.xlu2 %v5317_v57 }
 0x77c   :  { %v5307_v7 = vpop.xlane.xlu1 %5306 }
 0x77d   :  { %v10012_v59 = vadd.f32 %v5343_v4, %v5307_v7 }
 0x780   :  { %5406 = vperm.xlu1 %6018, %v10012_v59  }
 0x7a6   :  { %v5310_v48 = vpop.xlane.xlu2 %5309 }
 0x7a7   :  { %v10020_v31 = vadd.f32 %v5349_v32, %v5310_v48 }
 0x7d9   :  { %v5316_v45 = vpop.xlane.xlu2 %5315  ;;  %v5313_v46 = vpop.xlane.xlu0 %5312 }
 0x7da   :  { %v5388_v28 = vadd.f32 %v9929_v61, %v5316_v45  ;;  %v5322_v18 = vpop.xlane.xlu1 %5321  ;;  %v5387_v51 = vadd.f32 %v9977_v0, %v5313_v46  ;;  %v10027_v0 = vadd.s32 4294967288, %v10024_v37 }
 0x7db   :  { %v10017_v8 = vadd.f32 %v5374_v27, %v5322_v18 }
 0x7dc   :  { %5415 = vperm.xlu2 %6020, %v5388_v28   ;;  %5412 = vperm.xlu0 %6019, %v5387_v51   ;;  %v5427_v17 = vperm.slane %v5404_v23, %v10027_v0 }
 0x7dd   :  { %5421 = vperm.xlu1 %6018, %v10017_v8  }
 0x7de   :  { %v5429_v21 = vsel %vm5428_vm1, %v5427_v17, %v5425_v24 }
 0x7e1   :  { %v5319_v1 = vpop.xlane.xlu2 %5318 }
 0x7e2   :  { %v5389_v62 = vadd.f32 %v5368_v29, %v5319_v1 }
 0x7e4   :  { %5409 = vperm.xlu2 %6020, %v10020_v31   ;;  %5418 = vperm.xlu0 %6019, %v5389_v62  }
 0x7f2   :  { %v5407_v61 = vpop.permute.xlu1 %5406 }
 0x7f3   :  { %v5431_v44 = vperm.slane %v5407_v61, %v10030_v35 }
 0x7f5   :  { %v5433_v52 = vsel %vm5432_vm10, %v5431_v44, %v5429_v21 }
 0x836   :  { %v5416_v15 = vpop.permute.xlu2 %5415 }
 0x837   :  { %v5439_v39 = vperm.slane %v5416_v15, %v10027_v0 }
 0x83e   :  { %v5410_v25 = vpop.permute.xlu2 %5409 }
 0x83f   :  { %v5435_v14 = vperm.slane %v5410_v25, %v10033_v33 }
 0x841   :  { %v5437_v16 = vsel %vm5436_vm11, %v5435_v14, %v5433_v52 }
 0x84e   :  { %v5413_v42 = vpop.permute.xlu0 %5412 }
 0x84f   :  { %v5438_v20 = vperm.slane %v5413_v42, %v10024_v37  ;;  %v5422_v55 = vpop.permute.xlu1 %5421 }
 0x850   :  { %v5443_v36 = vperm.slane %v5422_v55, %v10033_v33 }
 0x851   :  { %v5440_v58 = vsel %vm5428_vm1, %v5439_v39, %v5438_v20 }
 0x856   :  { %v5419_v12 = vpop.permute.xlu0 %5418 }
 0x857   :  { %v5441_v2 = vperm.slane %v5419_v12, %v10030_v35 }
 0x859   :  { %v5442_v63 = vsel %vm5432_vm10, %v5441_v2, %v5440_v58 }
 0x85a   :  { %v5444_v34 = vsel %vm5436_vm11, %v5443_v36, %v5442_v63 }
 0x85b   :  { %v5445_v43 = vsel %vm5150_vm8, %v5444_v34, %v5437_v16 }
 0x85c   :  { %v5448_v54 = vsel %vm5447_vm0, %v5445_v43, -inf }
 0x85d   :  { %5449 = vmax.xlane.f32.xlu0 %v5448_v54 }
 0x8d0   :  { %v5450_v5 = vpop.xlane.xlu0 %5449 }
 0x8d1   :  { %v5452_v38 = vperm.slane %v5450_v5, 0  ;;  %v5453_v60 = vperm.slane %v5450_v5, 1 }
 0x8d3   :  { %v5456_v10 = vsub.f32 %v9986_v53, %v5452_v38  ;;  %v5457_v9 = vsub.f32 %v9984_v50, %v5452_v38  ;;  %v5460_v19 = vsub.f32 %v5387_v51, %v5453_v60  ;;  %v5461_v6 = vsub.f32 %v5388_v28, %v5453_v60 }
 0x8d4   :  { %v5458_v47 = vsub.f32 %v10012_v59, %v5452_v38  ;;  %v5462_v41 = vsub.f32 %v5389_v62, %v5453_v60  ;;  %v5459_v30 = vsub.f32 %v10020_v31, %v5452_v38  ;;  %v5463_v4 = vsub.f32 %v10017_v8, %v5453_v60 }
 0x8d5   :  { %v5464_v22 = vmul.f32 1.442695, %v5456_v10  ;;  %v5466_v3 = vmul.f32 1.442695, %v5457_v9  ;;  %v5472_v13 = vmul.f32 1.442695, %v5460_v19 }
 0x8d6   :  { %v5474_v40 = vmul.f32 1.442695, %v5461_v6  ;;  %v5468_v53 = vmul.f32 1.442695, %v5458_v47  ;;  %v5476_v49 = vmul.f32 1.442695, %v5462_v41 }
 0x8d7   :  { %6406 = vpow2.f32 %v5464_v22  ;;  %v5470_v7 = vmul.f32 1.442695, %v5459_v30  ;;  %v5478_v29 = vmul.f32 1.442695, %v5463_v4  ;;  %v6430_v41 = vld [vmem:[%s10100_s6] ss:$0 sm:$0xff] }
 0x8d8   :  { %6408 = vpow2.f32 %v5466_v3  ;;  %s6464_s6 = smov [#allocation2]  }
 0x8d9   :  { %6410 = vpow2.f32 %v5472_v13  ;;  %s5629_s20 = sshll.u32 %s6464_s6, 4  ;;  %s5630_s20 = int_to_ptr.vmem [resolvable:$true] %s5629_s20 }
 0x8da   :  { %6412 = vpow2.f32 %v5474_v40 }
 0x8db   :  { %6414 = vpow2.f32 %v5468_v53 }
 0x8dc   :  { %6416 = vpow2.f32 %v5476_v49 }
 0x8dd   :  { %v6407_v56 = vpop.eup %6406  ;;  %6418 = vpow2.f32 %v5470_v7 }
 0x8de   :  { %v6409_v26 = vpop.eup %6408  ;;  %5489 = vperm.xlu2 %6020, %v6407_v56   ;;  %6420 = vpow2.f32 %v5478_v29 }
 0x8df   :  { %5492 = vperm.xlu1 %6018, %v6409_v26   ;;  %v6411_v50 = vpop.eup %6410 }
 0x8e0   :  { %v6413_v57 = vpop.eup %6412 }
 0x8e1   :  { %v6415_v32 = vpop.eup %6414 }
 0x8e2   :  { %v6417_v59 = vpop.eup %6416 }
 0x8e3   :  { %v6419_v27 = vpop.eup %6418 }
 0x8e4   :  { %v6421_v23 = vpop.eup %6420 }
 0x8e6   :  { %5501 = vperm.xlu2 %6020, %v6411_v50  }
 0x8e7   :  { %5504 = vperm.xlu1 %6018, %v6413_v57  }
 0x8ee   :  { %5495 = vperm.xlu2 %6020, %v6415_v32  }
 0x8ef   :  { %5507 = vperm.xlu1 %6018, %v6417_v59  }
 0x8f6   :  { %5498 = vperm.xlu2 %6020, %v6419_v27  }
 0x8f7   :  { %5510 = vperm.xlu1 %6018, %v6421_v23  }
 0x938   :  { %v5490_v48 = vpop.permute.xlu2 %5489 }
 0x939   :  { %v5512_v1 = vperm.slane %v5490_v48, %v10024_v37 }
 0x940   :  { %v5502_v46 = vpop.permute.xlu2 %5501 }
 0x941   :  { %v5519_v42 = vperm.slane %v5502_v46, %v10024_v37 }
 0x948   :  { %v5496_v18 = vpop.permute.xlu2 %5495 }
 0x949   :  { %v5515_v15 = vperm.slane %v5496_v18, %v10030_v35 }
 0x950   :  { %v5499_v11 = vpop.permute.xlu2 %5498 }
 0x951   :  { %v5493_v45 = vpop.permute.xlu1 %5492  ;;  %v5517_v17 = vperm.slane %v5499_v11, %v10033_v33 }
 0x952   :  { %v5513_v8 = vperm.slane %v5493_v45, %v10027_v0 }
 0x954   :  { %v5514_v31 = vsel %vm5428_vm1, %v5513_v8, %v5512_v1 }
 0x955   :  { %v5516_v24 = vsel %vm5432_vm10, %v5515_v15, %v5514_v31 }
 0x956   :  { %v5518_v39 = vsel %vm5436_vm11, %v5517_v17, %v5516_v24 }
 0x959   :  { %v5505_v28 = vpop.permute.xlu1 %5504 }
 0x95a   :  { %v5520_v62 = vperm.slane %v5505_v28, %v10027_v0 }
 0x95c   :  { %v5521_v20 = vsel %vm5428_vm1, %v5520_v62, %v5519_v42 }
 0x961   :  { %v5508_v51 = vpop.permute.xlu1 %5507 }
 0x962   :  { %v5522_v61 = vperm.slane %v5508_v51, %v10030_v35 }
 0x964   :  { %v5523_v55 = vsel %vm5432_vm10, %v5522_v61, %v5521_v20 }
 0x969   :  { %v5511_v25 = vpop.permute.xlu1 %5510 }
 0x96a   :  { %v5524_v44 = vperm.slane %v5511_v25, %v10033_v33 }
 0x96c   :  { %v5525_v14 = vsel %vm5436_vm11, %v5524_v44, %v5523_v55 }
 0x96d   :  { %v5526_v12 = vsel %vm5150_vm8, %v5525_v14, %v5518_v39 }
 0x96e   :  { %v5528_v2 = vsel %vm5447_vm0, %v5526_v12, 0.0 }
 0x96f   :  { %5529 = vadd.xlane.f32.xlu2 %v5528_v2 }
 0x987   :  { %5603 = vrot.lane.b32.xlu2 %v6430_v41, %s6463_s19 }
 0x9e2   :  { %v5530_v21 = vpop.xlane.xlu2 %5529 }
 0x9e3   :  { %6422 = vrcp.f32 %v5530_v21 }
 0x9e9   :  { %v6423_v36 = vpop.eup %6422 }
 0x9ea   :  { %v5533_v58 = vperm.slane %v6423_v36, 0  ;;  %v5534_v52 = vperm.slane %v6423_v36, 1 }
 0x9ec   :  { %v5537_v63 = vmul.f32 %v6407_v56, %v5533_v58  ;;  %v5538_v16 = vmul.f32 %v6409_v26, %v5533_v58  ;;  %v5543_v43 = vmul.f32 %v6417_v59, %v5534_v52  ;;  %v5544_v54 = vmul.f32 %v6421_v23, %v5534_v52 }
 0x9ed   :  { %v5541_v60 = vmul.f32 %v6411_v50, %v5534_v52  ;;  %v5542_v10 = vmul.f32 %v6413_v57, %v5534_v52  ;;  %v5539_v40 = vmul.f32 %v6415_v32, %v5533_v58  ;;  %v5540_v56 = vmul.f32 %v6419_v27, %v5533_v58 }
 0x9ee   :  { %v5545_v34 = vpack.c.bf16 %v5538_v16, %v5537_v63  ;;  %v5548_v9 = vpack.c.bf16 %v5544_v54, %v5543_v43 }
 0x9ef   :  { %v5547_v22 = vpack.c.bf16 %v5542_v10, %v5541_v60  ;;  %v5546_v26 = vpack.c.bf16 %v5540_v56, %v5539_v40 }
 0x9f0   :  { %v5556_v5 = vunpack.c.h.b16 %v5545_v34  ;;  %v5555_v38 = vunpack.c.l.b16 %v5545_v34  ;;  %v5561_v3 = vunpack.c.l.b16 %v5548_v9  ;;  %v5562_v6 = vunpack.c.h.b16 %v5548_v9 }
 0x9f1   :  { %v5559_v19 = vunpack.c.l.b16 %v5547_v22  ;;  %v5560_v13 = vunpack.c.h.b16 %v5547_v22  ;;  %v5557_v47 = vunpack.c.l.b16 %v5546_v26  ;;  %v5558_v53 = vunpack.c.h.b16 %v5546_v26 }
 0x9f2   :  { %5567 = vperm.xlu0 %6019, %v5556_v5   ;;  %5564 = vperm.xlu1 %6018, %v5555_v38  }
 0x9fa   :  { %5582 = vperm.xlu0 %6019, %v5561_v3   ;;  %5576 = vperm.xlu1 %6018, %v5559_v19  }
 0xa02   :  { %5585 = vperm.xlu0 %6019, %v5562_v6   ;;  %5579 = vperm.xlu1 %6018, %v5560_v13  }
 0xa0a   :  { %5570 = vperm.xlu1 %6018, %v5557_v47  }
 0xa12   :  { %5573 = vperm.xlu1 %6018, %v5558_v53  }
 0xa64   :  { %v5565_v49 = vpop.permute.xlu1 %5564  ;;  %v5568_v57 = vpop.permute.xlu0 %5567 }
 0xa65   :  { %v5588_v59 = vperm.slane %v5568_v57, %v10027_v0  ;;  %v5587_v27 = vperm.slane %v5565_v49, %v10024_v37 }
 0xa67   :  { %v5589_v51 = vsel %vm5428_vm1, %v5588_v59, %v5587_v27 }
 0xa6c   :  { %v5577_v50 = vpop.permute.xlu1 %5576  ;;  %v5583_v4 = vpop.permute.xlu0 %5582 }
 0xa6d   :  { %v5594_v32 = vperm.slane %v5577_v50, %v10024_v37  ;;  %v5597_v48 = vperm.slane %v5583_v4, %v10030_v35 }
 0xa74   :  { %v5580_v30 = vpop.permute.xlu1 %5579  ;;  %v5586_v45 = vpop.permute.xlu0 %5585 }
 0xa75   :  { %v5595_v29 = vperm.slane %v5580_v30, %v10027_v0  ;;  %v5599_v8 = vperm.slane %v5586_v45, %v10033_v33 }
 0xa77   :  { %v5596_v23 = vsel %vm5428_vm1, %v5595_v29, %v5594_v32 }
 0xa78   :  { %v5598_v28 = vsel %vm5432_vm10, %v5597_v48, %v5596_v23 }
 0xa79   :  { %v5600_v37 = vsel %vm5436_vm11, %v5599_v8, %v5598_v28 }
 0xa7c   :  { %v5571_v7 = vpop.permute.xlu1 %5570 }
 0xa7d   :  { %v5590_v46 = vperm.slane %v5571_v7, %v10030_v35  ;;  %v5604_v35 = vpop.permute.xlu2 %5603 }
 0xa7f   :  { %v5591_v0 = vsel %vm5432_vm10, %v5590_v46, %v5589_v51 }
 0xa84   :  { %v5574_v18 = vpop.permute.xlu1 %5573 }
 0xa85   :  { %v5592_v1 = vperm.slane %v5574_v18, %v10033_v33 }
 0xa87   :  { %v5593_v31 = vsel %vm5436_vm11, %v5592_v1, %v5591_v0 }
 0xa88   :  { %v5601_v62 = vsel %vm5150_vm8, %v5600_v37, %v5593_v31 }
 0xa89   :  { %v5602_v15 = vpack.c.b16 %v5601_v62, %v5601_v62 }
 0xa8b   :  { %5884 = vmatmul.msk.bf16.vlgmr.msra.gmra.mxu0 %vm629_vm2, %v5602_v15 }
 0xb08   :  { %v5618_v11 = vpop.f32.mrf.mxu0 }
 0xb09   :  { %v5619_v33 = vadd.f32 %v5618_v11, %v5604_v35 }
 0xb0b   :  { %5623 = vst.msk [vmem:[#allocation2] sm:$0x3] %vm5622_vm4, %v5619_v33 }
 0xb0c   :  { %5634 = dma.vmem_to_hbm [thread:$0]  %s5630_s20, 32, %s5632_s22, [#allocation3]  }
 0xb10   :  { %v5620_v61 = vpop.f32.mrf.mxu0 }
 0xb11   :  { %6455 = dma.done.wait [#allocation3], 32  }
 0xb12   :  { %6456 = vsyncadd [#allocation3], 4294967264 }
 0xb13   :  { %5639 = vsyncpa [#allocation3], 1 }

</bundles_post_ra>
